<compile_context>
chip_gen: v7x
topology: tpu7x:2x2x1
jax: 0.10.0
libtpu: 0.0.40
codegen_flags: <defaults>
</compile_context>

<pallas_src>
import functools

import jax
import jax.numpy as jnp
from jax import lax
from jax.experimental import pallas as pl
from jax.experimental.pallas import tpu as pltpu

EPS = 1e-5
EXPANSION = 4
LANE = 128   # pad channel dims to a multiple of the lane width


# ----------------------- generation-aware sizing --------------------------- #

def _vmem_budget_and_caps():
    phys = 64 * 1024 * 1024            # conservative default (v7x per-TC)
    try:
        info = pltpu.get_tpu_info()
        phys = int(getattr(info, "vmem_capacity_bytes", phys))
    except Exception:
        pass
    vmem_limit = min((phys * 5) // 8, 96 * 1024 * 1024)   # 64MiB->40MiB, 128MiB->80MiB
    row_cap = 512 if phys <= 64 * 1024 * 1024 else 1024
    return vmem_limit, row_cap


VMEM_LIMIT, ROW_TILE_CAP = _vmem_budget_and_caps()
# The fused projection kernel carries two matmuls + two activation outputs per tile.
ROW_TILE_CAP_PROJ = min(ROW_TILE_CAP, 512)

_ACC_PARAMS = pltpu.CompilerParams(            # kernels with resident stat accumulators
    dimension_semantics=("arbitrary",), vmem_limit_bytes=VMEM_LIMIT)
_PAR_PARAMS = pltpu.CompilerParams(            # purely elementwise kernels
    dimension_semantics=("parallel",), vmem_limit_bytes=VMEM_LIMIT)


# ------------------------------- helpers ----------------------------------- #

def _round_up(x, m):
    return (x + m - 1) // m * m


def _pick_tile(m, cap):
    """Largest divisor of m that is a multiple of 8 and <= cap (exact tiling, so no
    M-padding and no per-tile row masking).  Falls back to one full block."""
    for t in range(min(cap, m), 7, -1):
        if m % t == 0 and t % 8 == 0:
            return t
    return m


def _pad2d(x, rows, cols):
    r, c = x.shape
    if r == rows and c == cols:
        return x
    return jnp.pad(x, ((0, rows - r), (0, cols - c)))


def _pad_cols(x, cols):
    c = x.shape[1]
    if c == cols:
        return x
    return jnp.pad(x, ((0, 0), (0, cols - c)))


def _pad_vec(v, n):
    if v.shape[0] == n:
        return v
    return jnp.pad(v, (0, n - v.shape[0]))


def _fold_bn(gamma, beta, ssum, sqsum, count):
    """Fold train-mode batch-norm into y = x*scale + bias (per channel, f32).
    ssum/sqsum have shape (1, C)."""
    # TODO(synk): E[x^2]-E[x]^2 in f32 can cancel when |mean| >> std; a two-pass /
    # Welford formulation is more robust but costs an extra pass over the activation.
    mean = ssum / count
    var = jnp.maximum(sqsum / count - mean * mean, 0.0)
    scale = gamma.reshape(1, -1) * lax.rsqrt(var + EPS)
    bias = beta.reshape(1, -1) - mean * scale
    return scale.astype(jnp.float32), bias.astype(jnp.float32)


# ----------------------------- Pallas kernels ------------------------------ #

def _mm_stats_kernel(x_ref, w_ref, d_ref, s_ref, q_ref):
    """d = x @ w (bf16 operands, f32 accumulate) + resident per-channel sum/sumsq."""
    x = x_ref[...].astype(jnp.bfloat16)
    acc = jnp.dot(x, w_ref[...], preferred_element_type=jnp.float32)
    d_ref[...] = acc.astype(d_ref.dtype)

    @pl.when(pl.program_id(0) == 0)
    def _():
        s_ref[...] = jnp.zeros_like(s_ref)
        q_ref[...] = jnp.zeros_like(q_ref)

    s_ref[...] += jnp.sum(acc, axis=0, keepdims=True)
    q_ref[...] += jnp.sum(acc * acc, axis=0, keepdims=True)


def _bnrelu_mm_stats_kernel(d_ref, sc_ref, bi_ref, w_ref, o_ref, s_ref, q_ref):
    """h = relu(d*scale+bias) (fused BN of the producer, f32); o = h @ w + stats."""
    h = jnp.maximum(d_ref[...].astype(jnp.float32) * sc_ref[...] + bi_ref[...], 0.0)
    acc = jnp.dot(h.astype(jnp.bfloat16), w_ref[...],
                  preferred_element_type=jnp.float32)
    o_ref[...] = acc.astype(o_ref.dtype)

    @pl.when(pl.program_id(0) == 0)
    def _():
        s_ref[...] = jnp.zeros_like(s_ref)
        q_ref[...] = jnp.zeros_like(q_ref)

    s_ref[...] += jnp.sum(acc, axis=0, keepdims=True)
    q_ref[...] += jnp.sum(acc * acc, axis=0, keepdims=True)


def _bnrelu_mm_proj_stats_kernel(d_ref, sc_ref, bi_ref, w_ref, xs_ref, ws_ref,
                                 o_ref, s_ref, q_ref, op_ref, sp_ref, qp_ref):
    """Stage-3 dot fused with the projection-shortcut dot on the same M tile."""
    h = jnp.maximum(d_ref[...].astype(jnp.float32) * sc_ref[...] + bi_ref[...], 0.0)
    acc = jnp.dot(h.astype(jnp.bfloat16), w_ref[...],
                  preferred_element_type=jnp.float32)
    o_ref[...] = acc.astype(o_ref.dtype)
    accp = jnp.dot(xs_ref[...].astype(jnp.bfloat16), ws_ref[...],
                   preferred_element_type=jnp.float32)
    op_ref[...] = accp.astype(op_ref.dtype)

    @pl.when(pl.program_id(0) == 0)
    def _():
        s_ref[...] = jnp.zeros_like(s_ref)
        q_ref[...] = jnp.zeros_like(q_ref)
        sp_ref[...] = jnp.zeros_like(sp_ref)
        qp_ref[...] = jnp.zeros_like(qp_ref)

    s_ref[...] += jnp.sum(acc, axis=0, keepdims=True)
    q_ref[...] += jnp.sum(acc * acc, axis=0, keepdims=True)
    sp_ref[...] += jnp.sum(accp, axis=0, keepdims=True)
    qp_ref[...] += jnp.sum(accp * accp, axis=0, keepdims=True)


def _conv_bnrelu_stats_kernel(x_ref, sc_ref, bi_ref, w_ref, o_ref, s_ref, q_ref,
                              *, kh, kw, pad_t, pad_l):
    """Per-image KxK 'same-size' conv:
       h = relu(x*scale + bias)                      (fused BN1 of the producer)
       out[y, x] = sum_{i,j} h[y+i-pad_t, x+j-pad_l] @ W[i,j]   (zero OOB)
    Column(W) shifts are hoisted (one per distinct j), row(H) shifts are flat
    tile-aligned shifts, and the taps are value-chained into one f32 accumulator."""
    hin, win, cin = x_ref.shape[1], x_ref.shape[2], x_ref.shape[3]
    cout = o_ref.shape[3]

    h = jnp.maximum(x_ref[0].astype(jnp.float32) * sc_ref[...] + bi_ref[...], 0.0)
    h = h.astype(jnp.bfloat16)

    def col_shift(dc):                                 # operand[:, x] = h[:, x+dc]
        if dc == 0:
            return h
        z = jnp.zeros((hin, abs(dc), cin), jnp.bfloat16)
        if dc > 0:
            return jnp.concatenate([h[:, dc:, :], z], axis=1)
        return jnp.concatenate([z, h[:, :dc, :]], axis=1)

    cols = {j: col_shift(j - pad_l).reshape(hin * win, cin) for j in range(kw)}

    def row_shift(g, dr):                              # image-row shift == flat shift
        if dr == 0:
            return g
        z = jnp.zeros((abs(dr) * win, cin), jnp.bfloat16)
        if dr > 0:
            return jnp.concatenate([g[dr * win:, :], z], axis=0)
        return jnp.concatenate([z, g[:dr * win, :]], axis=0)

    acc = None                                         # value-chained accumulation
    for i in range(kh):
        for j in range(kw):
            tap = row_shift(cols[j], i - pad_t)
            part = jnp.dot(tap, w_ref[i * kw + j], preferred_element_type=jnp.float32)
            acc = part if acc is None else acc + part

    o_ref[...] = acc.reshape(1, hin, win, cout).astype(o_ref.dtype)

    @pl.when(pl.program_id(0) == 0)
    def _():
        s_ref[...] = jnp.zeros_like(s_ref)
        q_ref[...] = jnp.zeros_like(q_ref)

    s_ref[...] += jnp.sum(acc, axis=0, keepdims=True)
    q_ref[...] += jnp.sum(acc * acc, axis=0, keepdims=True)


def _bn_add_relu_kernel(d_ref, sc_ref, bi_ref, r_ref, sr_ref, br_ref, o_ref,
                        *, bn_resid):
    """out = relu(d*scale+bias + BN_r(resid)); identity path skips the resid FMA."""
    y = d_ref[...].astype(jnp.float32) * sc_ref[...] + bi_ref[...]
    r = r_ref[...].astype(jnp.float32)
    if bn_resid:
        r = r * sr_ref[...] + br_ref[...]
    o_ref[...] = jnp.maximum(y + r, 0.0).astype(o_ref.dtype)


# ------------------------------ kernel wrappers ---------------------------- #

def matmul_stats(x, w, *, tile_m):
    m, k = x.shape
    n = w.shape[1]
    nt = m // tile_m
    return pl.pallas_call(
        _mm_stats_kernel, grid=(nt,),
        in_specs=[pl.BlockSpec((tile_m, k), lambda i: (i, 0)),
                  pl.BlockSpec((k, n), lambda i: (0, 0))],
        out_specs=[pl.BlockSpec((tile_m, n), lambda i: (i, 0)),
                   pl.BlockSpec((1, n), lambda i: (0, 0)),
                   pl.BlockSpec((1, n), lambda i: (0, 0))],
        out_shape=[jax.ShapeDtypeStruct((m, n), jnp.bfloat16),
                   jax.ShapeDtypeStruct((1, n), jnp.float32),
                   jax.ShapeDtypeStruct((1, n), jnp.float32)],
        compiler_params=_ACC_PARAMS,
    )(x, w)


def bnrelu_matmul_stats(d, scale, bias, w, *, tile_m):
    m, k = d.shape
    n = w.shape[1]
    nt = m // tile_m
    return pl.pallas_call(
        _bnrelu_mm_stats_kernel, grid=(nt,),
        in_specs=[pl.BlockSpec((tile_m, k), lambda i: (i, 0)),
                  pl.BlockSpec((1, k), lambda i: (0, 0)),
                  pl.BlockSpec((1, k), lambda i: (0, 0)),
                  pl.BlockSpec((k, n), lambda i: (0, 0))],
        out_specs=[pl.BlockSpec((tile_m, n), lambda i: (i, 0)),
                   pl.BlockSpec((1, n), lambda i: (0, 0)),
                   pl.BlockSpec((1, n), lambda i: (0, 0))],
        out_shape=[jax.ShapeDtypeStruct((m, n), jnp.bfloat16),
                   jax.ShapeDtypeStruct((1, n), jnp.float32),
                   jax.ShapeDtypeStruct((1, n), jnp.float32)],
        compiler_params=_ACC_PARAMS,
    )(d, scale, bias, w)


def bnrelu_matmul_proj_stats(d, scale, bias, w, xs, ws, *, tile_m):
    m, k = d.shape
    n = w.shape[1]
    kin = xs.shape[1]
    nt = m // tile_m
    return pl.pallas_call(
        _bnrelu_mm_proj_stats_kernel, grid=(nt,),
        in_specs=[pl.BlockSpec((tile_m, k), lambda i: (i, 0)),
                  pl.BlockSpec((1, k), lambda i: (0, 0)),
                  pl.BlockSpec((1, k), lambda i: (0, 0)),
                  pl.BlockSpec((k, n), lambda i: (0, 0)),
                  pl.BlockSpec((tile_m, kin), lambda i: (i, 0)),
                  pl.BlockSpec((kin, n), lambda i: (0, 0))],
        out_specs=[pl.BlockSpec((tile_m, n), lambda i: (i, 0)),
                   pl.BlockSpec((1, n), lambda i: (0, 0)),
                   pl.BlockSpec((1, n), lambda i: (0, 0)),
                   pl.BlockSpec((tile_m, n), lambda i: (i, 0)),
                   pl.BlockSpec((1, n), lambda i: (0, 0)),
                   pl.BlockSpec((1, n), lambda i: (0, 0))],
        out_shape=[jax.ShapeDtypeStruct((m, n), jnp.bfloat16),
                   jax.ShapeDtypeStruct((1, n), jnp.float32),
                   jax.ShapeDtypeStruct((1, n), jnp.float32),
                   jax.ShapeDtypeStruct((m, n), jnp.bfloat16),
                   jax.ShapeDtypeStruct((1, n), jnp.float32),
                   jax.ShapeDtypeStruct((1, n), jnp.float32)],
        compiler_params=_ACC_PARAMS,
    )(d, scale, bias, w, xs, ws)


def conv_bnrelu_stats(x_img, scale, bias, w, *, ksize, pad):
    # TODO(synk): add a second grid axis over output-row strips (with a kh-1 halo in
    # the input BlockSpec) so small-batch early layers pipeline/shard better.
    nb, hin, win, cin = x_img.shape
    kk, _, cout = w.shape
    kh, kw = ksize
    pad_t, pad_l = pad
    kern = functools.partial(_conv_bnrelu_stats_kernel, kh=kh, kw=kw,
                             pad_t=pad_t, pad_l=pad_l)
    return pl.pallas_call(
        kern, grid=(nb,),
        in_specs=[pl.BlockSpec((1, hin, win, cin), lambda b: (b, 0, 0, 0)),
                  pl.BlockSpec((1, cin), lambda b: (0, 0)),
                  pl.BlockSpec((1, cin), lambda b: (0, 0)),
                  pl.BlockSpec((kk, cin, cout), lambda b: (0, 0, 0))],
        out_specs=[pl.BlockSpec((1, hin, win, cout), lambda b: (b, 0, 0, 0)),
                   pl.BlockSpec((1, cout), lambda b: (0, 0)),
                   pl.BlockSpec((1, cout), lambda b: (0, 0))],
        out_shape=[jax.ShapeDtypeStruct((nb, hin, win, cout), jnp.bfloat16),
                   jax.ShapeDtypeStruct((1, cout), jnp.float32),
                   jax.ShapeDtypeStruct((1, cout), jnp.float32)],
        compiler_params=_ACC_PARAMS,
    )(x_img, scale, bias, w)


def bn_add_relu(d, scale, bias, r, rscale, rbias, *, tile_m, bn_resid):
    m, n = d.shape
    nt = m // tile_m
    kern = functools.partial(_bn_add_relu_kernel, bn_resid=bn_resid)
    return pl.pallas_call(
        kern, grid=(nt,),
        in_specs=[pl.BlockSpec((tile_m, n), lambda i: (i, 0)),
                  pl.BlockSpec((1, n), lambda i: (0, 0)),
                  pl.BlockSpec((1, n), lambda i: (0, 0)),
                  pl.BlockSpec((tile_m, n), lambda i: (i, 0)),
                  pl.BlockSpec((1, n), lambda i: (0, 0)),
                  pl.BlockSpec((1, n), lambda i: (0, 0))],
        out_specs=pl.BlockSpec((tile_m, n), lambda i: (i, 0)),
        out_shape=jax.ShapeDtypeStruct((m, n), jnp.float32),
        compiler_params=_PAR_PARAMS,
    )(d, scale, bias, r, rscale, rbias)


# --------------------------- conv-weight plumbing --------------------------- #

def _conv3x3_weight_s1(w2, c_in_p, c_out_p):
    """(cout, cin, 3, 3) torch weight -> (9, cin_p, cout_p) tap weights."""
    cout, cin = w2.shape[0], w2.shape[1]
    weq = jnp.zeros((9, c_in_p, c_out_p), jnp.float32)
    for r in range(3):
        for c in range(3):
            weq = weq.at[r * 3 + c, :cin, :cout].set(w2[:, :, r, c].T)
    return weq.astype(jnp.bfloat16)


def _conv3x3_weight_s2(w2, c_in_p, c_out_p):
    """Stride-2 3x3 conv expressed as a 2x2 stride-1 conv over the space-to-depth
    input (channel order of the s2d input is (dr, dc, cin))."""
    cout, cin = w2.shape[0], w2.shape[1]
    weq = jnp.zeros((2, 2, 2, 2, c_in_p, c_out_p), jnp.float32)
    for bh in range(2):
        for dr in range(2):
            r = 2 * bh + dr - 1
            if not 0 <= r < 3:
                continue
            for bw in range(2):
                for dc in range(2):
                    c = 2 * bw + dc - 1
                    if not 0 <= c < 3:
                        continue
                    weq = weq.at[bh, bw, dr, dc, :cin, :cout].set(w2[:, :, r, c].T)
    return weq.reshape(4, 4 * c_in_p, c_out_p).astype(jnp.bfloat16)


# ------------------------------ forward pass -------------------------------- #

@functools.partial(jax.jit, static_argnames=("stride",))
def bottleneck_forward(x_nchw, params, *, stride):
    """Forward pass of the Bottleneck block.  Input/output are NCHW float32."""
    x = jnp.transpose(x_nchw, (0, 2, 3, 1)).astype(jnp.float32)   # NHWC
    n, h, w, c_in = x.shape
    c1 = params["conv1"].shape[0]
    c3 = EXPANSION * c1
    cin_p = _round_up(c_in, LANE)
    c1_p = _round_up(c1, LANE)
    c3_p = _round_up(c3, LANE)

    # ---- stage 1: 1x1 conv (tiled matmul, bf16 out) + resident BN statistics ---
    m1 = n * h * w
    tm1 = _pick_tile(m1, ROW_TILE_CAP)
    x_flat = x.reshape(m1, c_in)
    x1 = _pad_cols(x_flat, cin_p)                     # channel pad only; stays f32
    w1 = _pad2d(params["conv1"][:, :, 0, 0].T, cin_p, c1_p).astype(jnp.bfloat16)
    d1, s1, q1 = matmul_stats(x1, w1, tile_m=tm1)
    scale1, bias1 = _fold_bn(_pad_vec(params["bn1_g"], c1_p),
                             _pad_vec(params["bn1_b"], c1_p), s1, q1, m1)

    # ---- stage 2: 3x3 conv (stride) with fused BN1+ReLU inside the kernel ------
    d1_img = d1.reshape(n, h, w, c1_p)
    if stride == 1:
        h_out, w_out = h, w
        conv_in, sc_in, bi_in = d1_img, scale1, bias1
        w2 = _conv3x3_weight_s1(params["conv2"], c1_p, c1_p)
        ksize, pad = (3, 3), (1, 1)
    elif stride == 2:
        assert h % 2 == 0 and w % 2 == 0
        h_out, w_out = h // 2, w // 2
        # TODO(synk): do this space-to-depth permute inside the conv kernel (VMEM/XLU)
        # to save one bf16 HBM round-trip over the stage-1 activation.
        conv_in = (d1_img.reshape(n, h_out, 2, w_out, 2, c1_p)
                   .transpose(0, 1, 3, 2, 4, 5)
                   .reshape(n, h_out, w_out, 4 * c1_p))
        sc_in = jnp.tile(scale1, (1, 4))
        bi_in = jnp.tile(bias1, (1, 4))
        w2 = _conv3x3_weight_s2(params["conv2"], c1_p, c1_p)
        ksize, pad = (2, 2), (1, 1)
    else:
        raise NotImplementedError("stride must be 1 or 2")
    d2_img, s2, q2 = conv_bnrelu_stats(conv_in, sc_in, bi_in, w2,
                                       ksize=ksize, pad=pad)
    m2 = n * h_out * w_out
    scale2, bias2 = _fold_bn(_pad_vec(params["bn2_g"], c1_p),
                             _pad_vec(params["bn2_b"], c1_p), s2, q2, m2)

    # ---- stage 3: fused BN2+ReLU + 1x1 conv (+ fused projection shortcut) ------
    has_proj = "convs" in params
    tm2 = _pick_tile(m2, ROW_TILE_CAP_PROJ if has_proj else ROW_TILE_CAP)
    d2 = d2_img.reshape(m2, c1_p)
    w3 = _pad2d(params["conv3"][:, :, 0, 0].T, c1_p, c3_p).astype(jnp.bfloat16)

    if has_proj:            # projection shortcut (stride != 1 or cin != 4*planes)
        xs = _pad_cols(x[:, ::stride, ::stride, :].reshape(m2, c_in), cin_p)
        ws = _pad2d(params["convs"][:, :, 0, 0].T, cin_p, c3_p).astype(jnp.bfloat16)
        d3, s3, q3, dsc, ssc, qsc = bnrelu_matmul_proj_stats(
            d2, scale2, bias2, w3, xs, ws, tile_m=tm2)
        scale_r, bias_r = _fold_bn(_pad_vec(params["bns_g"], c3_p),
                                   _pad_vec(params["bns_b"], c3_p), ssc, qsc, m2)
        resid, bn_resid = dsc, True                    # bf16 residual
    else:                   # identity shortcut (stride 1, cin == 4*planes)
        d3, s3, q3 = bnrelu_matmul_stats(d2, scale2, bias2, w3, tile_m=tm2)
        resid = _pad_cols(x_flat, c3_p)                # original f32 input, no BN
        scale_r = jnp.ones((1, c3_p), jnp.float32)
        bias_r = jnp.zeros((1, c3_p), jnp.float32)
        bn_resid = False
    scale3, bias3 = _fold_bn(_pad_vec(params["bn3_g"], c3_p),
                             _pad_vec(params["bn3_b"], c3_p), s3, q3, m2)

    # ---- final: BN3 + shortcut add + ReLU (single fused elementwise kernel) ----
    out = bn_add_relu(d3, scale3, bias3, resid, scale_r, bias_r,
                      tile_m=tm2, bn_resid=bn_resid)
    out = out[:, :c3].reshape(n, h_out, w_out, c3)
    return jnp.transpose(out, (0, 3, 1, 2))   # -> NCHW


# --------------------------- pure-JAX reference ----------------------------- #

def _bn_ref(x, g, b):
    mean = x.mean(axis=(0, 1, 2))
    var = x.var(axis=(0, 1, 2))
    return (x - mean) * lax.rsqrt(var + EPS) * g + b


def bottleneck_ref(x_nchw, params, *, stride):
    x = jnp.transpose(x_nchw, (0, 2, 3, 1)).astype(jnp.float32)

    def conv(inp, w, s=1, p=0):
        return lax.conv_general_dilated(
            inp, jnp.transpose(w, (2, 3, 1, 0)), (s, s), [(p, p), (p, p)],
            dimension_numbers=("NHWC", "HWIO", "NHWC"))

    out = jax.nn.relu(_bn_ref(conv(x, params["conv1"]),
                              params["bn1_g"], params["bn1_b"]))
    out = jax.nn.relu(_bn_ref(conv(out, params["conv2"], stride, 1),
                              params["bn2_g"], params["bn2_b"]))
    out = _bn_ref(conv(out, params["conv3"]), params["bn3_g"], params["bn3_b"])
    if "convs" in params:
        sc = _bn_ref(conv(x, params["convs"], stride),
                     params["bns_g"], params["bns_b"])
    else:
        sc = x
    out = jax.nn.relu(out + sc)
    return jnp.transpose(out, (0, 3, 1, 2))


# --------------------------- synthetic parameters --------------------------- #

def init_bottleneck_params(key, in_planes, planes, stride):
    """Deterministic synthetic parameters in PyTorch-native shapes."""
    out_planes = EXPANSION * planes
    ks = jax.random.split(key, 12)

    def conv_w(k, cout, cin, kh, kw):
        fan_in = cin * kh * kw
        return (jax.random.normal(k, (cout, cin, kh, kw), jnp.float32)
                / jnp.sqrt(fan_in))

    p = {
        "conv1": conv_w(ks[0], planes, in_planes, 1, 1),
        "bn1_g": 1.0 + 0.1 * jax.random.normal(ks[1], (planes,), jnp.float32),
        "bn1_b": 0.1 * jax.random.normal(ks[2], (planes,), jnp.float32),
        "conv2": conv_w(ks[3], planes, planes, 3, 3),
        "bn2_g": 1.0 + 0.1 * jax.random.normal(ks[4], (planes,), jnp.float32),
        "bn2_b": 0.1 * jax.random.normal(ks[5], (planes,), jnp.float32),
        "conv3": conv_w(ks[6], out_planes, planes, 1, 1),
        "bn3_g": 1.0 + 0.1 * jax.random.normal(ks[7], (out_planes,), jnp.float32),
        "bn3_b": 0.1 * jax.random.normal(ks[8], (out_planes,), jnp.float32),
    }
    if stride != 1 or in_planes != out_planes:
        p["convs"] = conv_w(ks[9], out_planes, in_planes, 1, 1)
        p["bns_g"] = 1.0 + 0.1 * jax.random.normal(ks[10], (out_planes,), jnp.float32)
        p["bns_b"] = 0.1 * jax.random.normal(ks[11], (out_planes,), jnp.float32)
    return p


# --------------------------------- main ------------------------------------ #

if __name__ == "__main__":
    key = jax.random.PRNGKey(0)
    kx1, kx2, kp1, kp2 = jax.random.split(key, 4)

    # Case 1: projection shortcut (stride=2, in_planes != 4*planes).
    in_planes, planes, stride = 8, 4, 2
    x1 = jax.random.normal(kx1, (2, in_planes, 32, 32), jnp.float32)
    params1 = init_bottleneck_params(kp1, in_planes, planes, stride)
    y1 = bottleneck_forward(x1, params1, stride=stride)
    jax.block_until_ready(y1)
    assert y1.shape == (2, EXPANSION * planes, 16, 16), y1.shape
    assert bool(jnp.all(jnp.isfinite(y1)))
    r1 = bottleneck_ref(x1, params1, stride=stride)
    err1 = float(jnp.max(jnp.abs(y1 - r1)))
    assert err1 < 0.3, f"case1 max abs err {err1}"

    # Case 2: identity shortcut (stride=1, in_planes == 4*planes).
    in_planes, planes, stride = 16, 4, 1
    x2 = jax.random.normal(kx2, (2, in_planes, 16, 16), jnp.float32)
    params2 = init_bottleneck_params(kp2, in_planes, planes, stride)
    y2 = bottleneck_forward(x2, params2, stride=stride)
    jax.block_until_ready(y2)
    assert y2.shape == (2, EXPANSION * planes, 16, 16), y2.shape
    assert bool(jnp.all(jnp.isfinite(y2)))
    r2 = bottleneck_ref(x2, params2, stride=stride)
    err2 = float(jnp.max(jnp.abs(y2 - r2)))
    assert err2 < 0.3, f"case2 max abs err {err2}"

    print("KERNEL_OK")
</pallas_src>

<mosaic_0001>
module attributes {stable_mosaic.version = 11 : i64} {
  func.func @_mm_stats_kernel(%arg0: i32, %arg1: memref<512x128xf32, #tpu.memory_space<vmem>>, %arg2: memref<128x128xbf16, #tpu.memory_space<vmem>>, %arg3: memref<512x128xbf16, #tpu.memory_space<vmem>>, %arg4: memref<1x128xf32, #tpu.memory_space<vmem>>, %arg5: memref<1x128xf32, #tpu.memory_space<vmem>>) attributes {dimension_semantics = [#tpu.dimension_semantics<arbitrary>], iteration_bounds = array<i64: 4>, scalar_prefetch = 0 : i64, scratch_operands = 0 : i64, tpu.core_type = #tpu.core_type<tc>, window_params = [{transform_indices = @transform_0, window_bounds = array<i64: 512, 128>}, {pipeline_mode = #tpu.pipeline_mode<synchronous>, transform_indices = @transform_1, window_bounds = array<i64: 128, 128>}, {transform_indices = @transform_2, window_bounds = array<i64: 512, 128>}, {pipeline_mode = #tpu.pipeline_mode<synchronous>, transform_indices = @transform_3, window_bounds = array<i64: 1, 128>}, {pipeline_mode = #tpu.pipeline_mode<synchronous>, transform_indices = @transform_4, window_bounds = array<i64: 1, 128>}]} {
    %c0 = arith.constant 0 : index
    %c0_0 = arith.constant 0 : index
    %0 = vector.load %arg1[%c0, %c0_0] : memref<512x128xf32, #tpu.memory_space<vmem>>, vector<512x128xf32>
    %1 = arith.truncf %0 : vector<512x128xf32> to vector<512x128xbf16>
    %c0_1 = arith.constant 0 : index
    %c0_2 = arith.constant 0 : index
    %2 = vector.load %arg2[%c0_1, %c0_2] : memref<128x128xbf16, #tpu.memory_space<vmem>>, vector<128x128xbf16>
    %cst = arith.constant dense<0.000000e+00> : vector<512x128xf32>
    %3 = tpu.matmul %1, %2, %cst {dimension_numbers = #tpu.dot_dimension_numbers<[1], [0], [0], [1], [0, 0, 1, 1], [], []>} : vector<512x128xbf16>, vector<128x128xbf16>, vector<512x128xf32> -> vector<512x128xf32>
    %4 = arith.truncf %3 : vector<512x128xf32> to vector<512x128xbf16>
    %c0_3 = arith.constant 0 : index
    %c0_4 = arith.constant 0 : index
    %5 = vector.load %arg3[%c0_3, %c0_4] : memref<512x128xbf16, #tpu.memory_space<vmem>>, vector<512x128xbf16>
    tpu.vector_store %arg3[%c0_3, %c0_4], %4 {strides = array<i32>} : memref<512x128xbf16, #tpu.memory_space<vmem>>, vector<512x128xbf16>,
    %c0_i32 = arith.constant 0 : i32
    %6 = arith.cmpi eq, %arg0, %c0_i32 : i32
    %7 = arith.extui %6 : i1 to i32
    %c0_i32_5 = arith.constant 0 : i32
    %8 = arith.cmpi ne, %7, %c0_i32_5 : i32
    scf.if %8 {
      %cst_16 = arith.constant 0.000000e+00 : f32
      %20 = vector.broadcast %cst_16 : f32 to vector<1x128xf32>
      %c0_17 = arith.constant 0 : index
      %c0_18 = arith.constant 0 : index
      %21 = vector.load %arg4[%c0_17, %c0_18] : memref<1x128xf32, #tpu.memory_space<vmem>>, vector<1x128xf32>
      tpu.vector_store %arg4[%c0_17, %c0_18], %20 {strides = array<i32>} : memref<1x128xf32, #tpu.memory_space<vmem>>, vector<1x128xf32>,
      %cst_19 = arith.constant 0.000000e+00 : f32
      %22 = vector.broadcast %cst_19 : f32 to vector<1x128xf32>
      %c0_20 = arith.constant 0 : index
      %c0_21 = arith.constant 0 : index
      %23 = vector.load %arg5[%c0_20, %c0_21] : memref<1x128xf32, #tpu.memory_space<vmem>>, vector<1x128xf32>
      tpu.vector_store %arg5[%c0_20, %c0_21], %22 {strides = array<i32>} : memref<1x128xf32, #tpu.memory_space<vmem>>, vector<1x128xf32>,
    } else {
    }
    %c0_6 = arith.constant 0 : index
    %c0_7 = arith.constant 0 : index
    %9 = vector.load %arg4[%c0_6, %c0_7] : memref<1x128xf32, #tpu.memory_space<vmem>>, vector<1x128xf32>
    %cst_8 = arith.constant dense<0.000000e+00> : vector<128xf32>
    %10 = vector.multi_reduction <add>, %3, %cst_8 [0] : vector<512x128xf32> to vector<128xf32>
    %11 = vector.shape_cast %10 : vector<128xf32> to vector<1x128xf32>
    %12 = arith.addf %9, %11 : vector<1x128xf32>
    %c0_9 = arith.constant 0 : index
    %c0_10 = arith.constant 0 : index
    %13 = vector.load %arg4[%c0_9, %c0_10] : memref<1x128xf32, #tpu.memory_space<vmem>>, vector<1x128xf32>
    tpu.vector_store %arg4[%c0_9, %c0_10], %12 {strides = array<i32>} : memref<1x128xf32, #tpu.memory_space<vmem>>, vector<1x128xf32>,
    %c0_11 = arith.constant 0 : index
    %c0_12 = arith.constant 0 : index
    %14 = vector.load %arg5[%c0_11, %c0_12] : memref<1x128xf32, #tpu.memory_space<vmem>>, vector<1x128xf32>
    %15 = arith.mulf %3, %3 : vector<512x128xf32>
    %cst_13 = arith.constant dense<0.000000e+00> : vector<128xf32>
    %16 = vector.multi_reduction <add>, %15, %cst_13 [0] : vector<512x128xf32> to vector<128xf32>
    %17 = vector.shape_cast %16 : vector<128xf32> to vector<1x128xf32>
    %18 = arith.addf %14, %17 : vector<1x128xf32>
    %c0_14 = arith.constant 0 : index
    %c0_15 = arith.constant 0 : index
    %19 = vector.load %arg5[%c0_14, %c0_15] : memref<1x128xf32, #tpu.memory_space<vmem>>, vector<1x128xf32>
    tpu.vector_store %arg5[%c0_14, %c0_15], %18 {strides = array<i32>} : memref<1x128xf32, #tpu.memory_space<vmem>>, vector<1x128xf32>,
    return
  }
  func.func @transform_0(%arg0: i32) -> (i32, i32) {
    %c0_i32 = arith.constant 0 : i32
    %c0_i32_0 = arith.constant 0 : i32
    return %arg0, %c0_i32 : i32, i32
  }
  func.func @transform_1(%arg0: i32) -> (i32, i32) {
    %c0_i32 = arith.constant 0 : i32
    %c0_i32_0 = arith.constant 0 : i32
    %c0_i32_1 = arith.constant 0 : i32
    return %c0_i32, %c0_i32_0 : i32, i32
  }
  func.func @transform_2(%arg0: i32) -> (i32, i32) {
    %c0_i32 = arith.constant 0 : i32
    %c0_i32_0 = arith.constant 0 : i32
    return %arg0, %c0_i32 : i32, i32
  }
  func.func @transform_3(%arg0: i32) -> (i32, i32) {
    %c0_i32 = arith.constant 0 : i32
    %c0_i32_0 = arith.constant 0 : i32
    %c0_i32_1 = arith.constant 0 : i32
    return %c0_i32, %c0_i32_0 : i32, i32
  }
  func.func @transform_4(%arg0: i32) -> (i32, i32) {
    %c0_i32 = arith.constant 0 : i32
    %c0_i32_0 = arith.constant 0 : i32
    %c0_i32_1 = arith.constant 0 : i32
    return %c0_i32, %c0_i32_0 : i32, i32
  }
}

module attributes {stable_mosaic.version = 11 : i64} {
  func.func @_conv_bnrelu_stats_kernel(%arg0: i32, %arg1: memref<1x16x16x512xbf16, #tpu.memory_space<vmem>>, %arg2: memref<1x512xf32, #tpu.memory_space<vmem>>, %arg3: memref<1x512xf32, #tpu.memory_space<vmem>>, %arg4: memref<4x512x128xbf16, #tpu.memory_space<vmem>>, %arg5: memref<1x16x16x128xbf16, #tpu.memory_space<vmem>>, %arg6: memref<1x128xf32, #tpu.memory_space<vmem>>, %arg7: memref<1x128xf32, #tpu.memory_space<vmem>>) attributes {dimension_semantics = [#tpu.dimension_semantics<arbitrary>], iteration_bounds = array<i64: 2>, scalar_prefetch = 0 : i64, scratch_operands = 0 : i64, tpu.core_type = #tpu.core_type<tc>, window_params = [{transform_indices = @transform_0, window_bounds = array<i64: 1, 16, 16, 512>}, {pipeline_mode = #tpu.pipeline_mode<synchronous>, transform_indices = @transform_1, window_bounds = array<i64: 1, 512>}, {pipeline_mode = #tpu.pipeline_mode<synchronous>, transform_indices = @transform_2, window_bounds = array<i64: 1, 512>}, {pipeline_mode = #tpu.pipeline_mode<synchronous>, transform_indices = @transform_3, window_bounds = array<i64: 4, 512, 128>}, {transform_indices = @transform_4, window_bounds = array<i64: 1, 16, 16, 128>}, {pipeline_mode = #tpu.pipeline_mode<synchronous>, transform_indices = @transform_5, window_bounds = array<i64: 1, 128>}, {pipeline_mode = #tpu.pipeline_mode<synchronous>, transform_indices = @transform_6, window_bounds = array<i64: 1, 128>}]} {
    %c0 = arith.constant 0 : index
    %c0_0 = arith.constant 0 : index
    %c0_1 = arith.constant 0 : index
    %c0_2 = arith.constant 0 : index
    %0 = vector.load %arg1[%c0, %c0_0, %c0_1, %c0_2] : memref<1x16x16x512xbf16, #tpu.memory_space<vmem>>, vector<1x16x16x512xbf16>
    %1 = vector.shape_cast %0 : vector<1x16x16x512xbf16> to vector<16x16x512xbf16>
    %2 = arith.extf %1 : vector<16x16x512xbf16> to vector<16x16x512xf32>
    %c0_3 = arith.constant 0 : index
    %c0_4 = arith.constant 0 : index
    %3 = vector.load %arg2[%c0_3, %c0_4] : memref<1x512xf32, #tpu.memory_space<vmem>>, vector<1x512xf32>
    %4 = vector.shape_cast %3 : vector<1x512xf32> to vector<1x1x512xf32>
    %5 = vector.broadcast %4 : vector<1x1x512xf32> to vector<16x16x512xf32>
    %6 = arith.mulf %2, %5 : vector<16x16x512xf32>
    %c0_5 = arith.constant 0 : index
    %c0_6 = arith.constant 0 : index
    %7 = vector.load %arg3[%c0_5, %c0_6] : memref<1x512xf32, #tpu.memory_space<vmem>>, vector<1x512xf32>
    %8 = vector.shape_cast %7 : vector<1x512xf32> to vector<1x1x512xf32>
    %9 = vector.broadcast %8 : vector<1x1x512xf32> to vector<16x16x512xf32>
    %10 = arith.addf %6, %9 : vector<16x16x512xf32>
    %cst = arith.constant 0.000000e+00 : f32
    %11 = vector.broadcast %cst : f32 to vector<16x16x512xf32>
    %12 = arith.maximumf %10, %11 : vector<16x16x512xf32>
    %13 = arith.truncf %12 : vector<16x16x512xf32> to vector<16x16x512xbf16>
    %cst_7 = arith.constant 0.000000e+00 : bf16
    %14 = vector.broadcast %cst_7 : bf16 to vector<16x1x512xbf16>
    %15 = vector.extract_strided_slice %13 {offsets = [0, 0, 0], sizes = [16, 15, 512], strides = [1, 1, 1]} : vector<16x16x512xbf16> to vector<16x15x512xbf16>
    %16 = tpu.concatenate %14, %15 in 1 : vector<16x1x512xbf16>, vector<16x15x512xbf16> -> vector<16x16x512xbf16>
    %17 = vector.shape_cast %16 : vector<16x16x512xbf16> to vector<256x512xbf16>
    %18 = vector.shape_cast %13 : vector<16x16x512xbf16> to vector<256x512xbf16>
    %cst_8 = arith.constant 0.000000e+00 : bf16
    %19 = vector.broadcast %cst_8 : bf16 to vector<16x512xbf16>
    %20 = vector.extract_strided_slice %17 {offsets = [0, 0], sizes = [240, 512], strides = [1, 1]} : vector<256x512xbf16> to vector<240x512xbf16>
    %21 = tpu.concatenate %19, %20 in 0 : vector<16x512xbf16>, vector<240x512xbf16> -> vector<256x512xbf16>
    %c0_9 = arith.constant 0 : index
    %c0_10 = arith.constant 0 : index
    %c0_11 = arith.constant 0 : index
    %22 = vector.load %arg4[%c0_9, %c0_10, %c0_11] : memref<4x512x128xbf16, #tpu.memory_space<vmem>>, vector<1x512x128xbf16>
    %23 = vector.shape_cast %22 : vector<1x512x128xbf16> to vector<512x128xbf16>
    %cst_12 = arith.constant dense<0.000000e+00> : vector<256x128xf32>
    %24 = tpu.matmul %21, %23, %cst_12 {dimension_numbers = #tpu.dot_dimension_numbers<[1], [0], [0], [1], [0, 0, 1, 1], [], []>} : vector<256x512xbf16>, vector<512x128xbf16>, vector<256x128xf32> -> vector<256x128xf32>
    %cst_13 = arith.constant 0.000000e+00 : bf16
    %25 = vector.broadcast %cst_13 : bf16 to vector<16x512xbf16>
    %26 = vector.extract_strided_slice %18 {offsets = [0, 0], sizes = [240, 512], strides = [1, 1]} : vector<256x512xbf16> to vector<240x512xbf16>
    %27 = tpu.concatenate %25, %26 in 0 : vector<16x512xbf16>, vector<240x512xbf16> -> vector<256x512xbf16>
    %c1 = arith.constant 1 : index
    %c0_14 = arith.constant 0 : index
    %c0_15 = arith.constant 0 : index
    %28 = vector.load %arg4[%c1, %c0_14, %c0_15] : memref<4x512x128xbf16, #tpu.memory_space<vmem>>, vector<1x512x128xbf16>
    %29 = vector.shape_cast %28 : vector<1x512x128xbf16> to vector<512x128xbf16>
    %cst_16 = arith.constant dense<0.000000e+00> : vector<256x128xf32>
    %30 = tpu.matmul %27, %29, %cst_16 {dimension_numbers = #tpu.dot_dimension_numbers<[1], [0], [0], [1], [0, 0, 1, 1], [], []>} : vector<256x512xbf16>, vector<512x128xbf16>, vector<256x128xf32> -> vector<256x128xf32>
    %31 = arith.addf %24, %30 : vector<256x128xf32>
    %c2 = arith.constant 2 : index
    %c0_17 = arith.constant 0 : index
    %c0_18 = arith.constant 0 : index
    %32 = vector.load %arg4[%c2, %c0_17, %c0_18] : memref<4x512x128xbf16, #tpu.memory_space<vmem>>, vector<1x512x128xbf16>
    %33 = vector.shape_cast %32 : vector<1x512x128xbf16> to vector<512x128xbf16>
    %cst_19 = arith.constant dense<0.000000e+00> : vector<256x128xf32>
    %34 = tpu.matmul %17, %33, %cst_19 {dimension_numbers = #tpu.dot_dimension_numbers<[1], [0], [0], [1], [0, 0, 1, 1], [], []>} : vector<256x512xbf16>, vector<512x128xbf16>, vector<256x128xf32> -> vector<256x128xf32>
    %35 = arith.addf %31, %34 : vector<256x128xf32>
    %c3 = arith.constant 3 : index
    %c0_20 = arith.constant 0 : index
    %c0_21 = arith.constant 0 : index
    %36 = vector.load %arg4[%c3, %c0_20, %c0_21] : memref<4x512x128xbf16, #tpu.memory_space<vmem>>, vector<1x512x128xbf16>
    %37 = vector.shape_cast %36 : vector<1x512x128xbf16> to vector<512x128xbf16>
    %cst_22 = arith.constant dense<0.000000e+00> : vector<256x128xf32>
    %38 = tpu.matmul %18, %37, %cst_22 {dimension_numbers = #tpu.dot_dimension_numbers<[1], [0], [0], [1], [0, 0, 1, 1], [], []>} : vector<256x512xbf16>, vector<512x128xbf16>, vector<256x128xf32> -> vector<256x128xf32>
    %39 = arith.addf %35, %38 : vector<256x128xf32>
    %40 = vector.shape_cast %39 : vector<256x128xf32> to vector<1x16x16x128xf32>
    %41 = arith.truncf %40 : vector<1x16x16x128xf32> to vector<1x16x16x128xbf16>
    %c0_23 = arith.constant 0 : index
    %c0_24 = arith.constant 0 : index
    %c0_25 = arith.constant 0 : index
    %c0_26 = arith.constant 0 : index
    %42 = vector.load %arg5[%c0_23, %c0_24, %c0_25, %c0_26] : memref<1x16x16x128xbf16, #tpu.memory_space<vmem>>, vector<1x16x16x128xbf16>
    tpu.vector_store %arg5[%c0_23, %c0_24, %c0_25, %c0_26], %41 {strides = array<i32>} : memref<1x16x16x128xbf16, #tpu.memory_space<vmem>>, vector<1x16x16x128xbf16>,
    %c0_i32 = arith.constant 0 : i32
    %43 = arith.cmpi eq, %arg0, %c0_i32 : i32
    %44 = arith.extui %43 : i1 to i32
    %c0_i32_27 = arith.constant 0 : i32
    %45 = arith.cmpi ne, %44, %c0_i32_27 : i32
    scf.if %45 {
      %cst_38 = arith.constant 0.000000e+00 : f32
      %57 = vector.broadcast %cst_38 : f32 to vector<1x128xf32>
      %c0_39 = arith.constant 0 : index
      %c0_40 = arith.constant 0 : index
      %58 = vector.load %arg6[%c0_39, %c0_40] : memref<1x128xf32, #tpu.memory_space<vmem>>, vector<1x128xf32>
      tpu.vector_store %arg6[%c0_39, %c0_40], %57 {strides = array<i32>} : memref<1x128xf32, #tpu.memory_space<vmem>>, vector<1x128xf32>,
      %cst_41 = arith.constant 0.000000e+00 : f32
      %59 = vector.broadcast %cst_41 : f32 to vector<1x128xf32>
      %c0_42 = arith.constant 0 : index
      %c0_43 = arith.constant 0 : index
      %60 = vector.load %arg7[%c0_42, %c0_43] : memref<1x128xf32, #tpu.memory_space<vmem>>, vector<1x128xf32>
      tpu.vector_store %arg7[%c0_42, %c0_43], %59 {strides = array<i32>} : memref<1x128xf32, #tpu.memory_space<vmem>>, vector<1x128xf32>,
    } else {
    }
    %c0_28 = arith.constant 0 : index
    %c0_29 = arith.constant 0 : index
    %46 = vector.load %arg6[%c0_28, %c0_29] : memref<1x128xf32, #tpu.memory_space<vmem>>, vector<1x128xf32>
    %cst_30 = arith.constant dense<0.000000e+00> : vector<128xf32>
    %47 = vector.multi_reduction <add>, %39, %cst_30 [0] : vector<256x128xf32> to vector<128xf32>
    %48 = vector.shape_cast %47 : vector<128xf32> to vector<1x128xf32>
    %49 = arith.addf %46, %48 : vector<1x128xf32>
    %c0_31 = arith.constant 0 : index
    %c0_32 = arith.constant 0 : index
    %50 = vector.load %arg6[%c0_31, %c0_32] : memref<1x128xf32, #tpu.memory_space<vmem>>, vector<1x128xf32>
    tpu.vector_store %arg6[%c0_31, %c0_32], %49 {strides = array<i32>} : memref<1x128xf32, #tpu.memory_space<vmem>>, vector<1x128xf32>,
    %c0_33 = arith.constant 0 : index
    %c0_34 = arith.constant 0 : index
    %51 = vector.load %arg7[%c0_33, %c0_34] : memref<1x128xf32, #tpu.memory_space<vmem>>, vector<1x128xf32>
    %52 = arith.mulf %39, %39 : vector<256x128xf32>
    %cst_35 = arith.constant dense<0.000000e+00> : vector<128xf32>
    %53 = vector.multi_reduction <add>, %52, %cst_35 [0] : vector<256x128xf32> to vector<128xf32>
    %54 = vector.shape_cast %53 : vector<128xf32> to vector<1x128xf32>
    %55 = arith.addf %51, %54 : vector<1x128xf32>
    %c0_36 = arith.constant 0 : index
    %c0_37 = arith.constant 0 : index
    %56 = vector.load %arg7[%c0_36, %c0_37] : memref<1x128xf32, #tpu.memory_space<vmem>>, vector<1x128xf32>
    tpu.vector_store %arg7[%c0_36, %c0_37], %55 {strides = array<i32>} : memref<1x128xf32, #tpu.memory_space<vmem>>, vector<1x128xf32>,
    return
  }
  func.func @transform_0(%arg0: i32) -> (i32, i32, i32, i32) {
    %c0_i32 = arith.constant 0 : i32
    %c0_i32_0 = arith.constant 0 : i32
    %c0_i32_1 = arith.constant 0 : i32
    %c0_i32_2 = arith.constant 0 : i32
    return %arg0, %c0_i32, %c0_i32_0, %c0_i32_1 : i32, i32, i32, i32
  }
  func.func @transform_1(%arg0: i32) -> (i32, i32) {
    %c0_i32 = arith.constant 0 : i32
    %c0_i32_0 = arith.constant 0 : i32
    %c0_i32_1 = arith.constant 0 : i32
    return %c0_i32, %c0_i32_0 : i32, i32
  }
  func.func @transform_2(%arg0: i32) -> (i32, i32) {
    %c0_i32 = arith.constant 0 : i32
    %c0_i32_0 = arith.constant 0 : i32
    %c0_i32_1 = arith.constant 0 : i32
    return %c0_i32, %c0_i32_0 : i32, i32
  }
  func.func @transform_3(%arg0: i32) -> (i32, i32, i32) {
    %c0_i32 = arith.constant 0 : i32
    %c0_i32_0 = arith.constant 0 : i32
    %c0_i32_1 = arith.constant 0 : i32
    %c0_i32_2 = arith.constant 0 : i32
    return %c0_i32, %c0_i32_0, %c0_i32_1 : i32, i32, i32
  }
  func.func @transform_4(%arg0: i32) -> (i32, i32, i32, i32) {
    %c0_i32 = arith.constant 0 : i32
    %c0_i32_0 = arith.constant 0 : i32
    %c0_i32_1 = arith.constant 0 : i32
    %c0_i32_2 = arith.constant 0 : i32
    return %arg0, %c0_i32, %c0_i32_0, %c0_i32_1 : i32, i32, i32, i32
  }
  func.func @transform_5(%arg0: i32) -> (i32, i32) {
    %c0_i32 = arith.constant 0 : i32
    %c0_i32_0 = arith.constant 0 : i32
    %c0_i32_1 = arith.constant 0 : i32
    return %c0_i32, %c0_i32_0 : i32, i32
  }
  func.func @transform_6(%arg0: i32) -> (i32, i32) {
    %c0_i32 = arith.constant 0 : i32
    %c0_i32_0 = arith.constant 0 : i32
    %c0_i32_1 = arith.constant 0 : i32
    return %c0_i32, %c0_i32_0 : i32, i32
  }
}

module attributes {stable_mosaic.version = 11 : i64} {
  func.func @_bnrelu_mm_proj_stats_kernel(%arg0: i32, %arg1: memref<512x128xbf16, #tpu.memory_space<vmem>>, %arg2: memref<1x128xf32, #tpu.memory_space<vmem>>, %arg3: memref<1x128xf32, #tpu.memory_space<vmem>>, %arg4: memref<128x128xbf16, #tpu.memory_space<vmem>>, %arg5: memref<512x128xf32, #tpu.memory_space<vmem>>, %arg6: memref<128x128xbf16, #tpu.memory_space<vmem>>, %arg7: memref<512x128xbf16, #tpu.memory_space<vmem>>, %arg8: memref<1x128xf32, #tpu.memory_space<vmem>>, %arg9: memref<1x128xf32, #tpu.memory_space<vmem>>, %arg10: memref<512x128xbf16, #tpu.memory_space<vmem>>, %arg11: memref<1x128xf32, #tpu.memory_space<vmem>>, %arg12: memref<1x128xf32, #tpu.memory_space<vmem>>) attributes {dimension_semantics = [#tpu.dimension_semantics<arbitrary>], iteration_bounds = array<i64: 1>, scalar_prefetch = 0 : i64, scratch_operands = 0 : i64, tpu.core_type = #tpu.core_type<tc>, window_params = [{transform_indices = @transform_0, window_bounds = array<i64: 512, 128>}, {pipeline_mode = #tpu.pipeline_mode<synchronous>, transform_indices = @transform_1, window_bounds = array<i64: 1, 128>}, {pipeline_mode = #tpu.pipeline_mode<synchronous>, transform_indices = @transform_2, window_bounds = array<i64: 1, 128>}, {pipeline_mode = #tpu.pipeline_mode<synchronous>, transform_indices = @transform_3, window_bounds = array<i64: 128, 128>}, {transform_indices = @transform_4, window_bounds = array<i64: 512, 128>}, {pipeline_mode = #tpu.pipeline_mode<synchronous>, transform_indices = @transform_5, window_bounds = array<i64: 128, 128>}, {transform_indices = @transform_6, window_bounds = array<i64: 512, 128>}, {pipeline_mode = #tpu.pipeline_mode<synchronous>, transform_indices = @transform_7, window_bounds = array<i64: 1, 128>}, {pipeline_mode = #tpu.pipeline_mode<synchronous>, transform_indices = @transform_8, window_bounds = array<i64: 1, 128>}, {transform_indices = @transform_9, window_bounds = array<i64: 512, 128>}, {pipeline_mode = #tpu.pipeline_mode<synchronous>, transform_indices = @transform_10, window_bounds = array<i64: 1, 128>}, {pipeline_mode = #tpu.pipeline_mode<synchronous>, transform_indices = @transform_11, window_bounds = array<i64: 1, 128>}]} {
    %c0 = arith.constant 0 : index
    %c0_0 = arith.constant 0 : index
    %0 = vector.load %arg1[%c0, %c0_0] : memref<512x128xbf16, #tpu.memory_space<vmem>>, vector<512x128xbf16>
    %1 = arith.extf %0 : vector<512x128xbf16> to vector<512x128xf32>
    %c0_1 = arith.constant 0 : index
    %c0_2 = arith.constant 0 : index
    %2 = vector.load %arg2[%c0_1, %c0_2] : memref<1x128xf32, #tpu.memory_space<vmem>>, vector<1x128xf32>
    %3 = vector.broadcast %2 : vector<1x128xf32> to vector<512x128xf32>
    %4 = arith.mulf %1, %3 : vector<512x128xf32>
    %c0_3 = arith.constant 0 : index
    %c0_4 = arith.constant 0 : index
    %5 = vector.load %arg3[%c0_3, %c0_4] : memref<1x128xf32, #tpu.memory_space<vmem>>, vector<1x128xf32>
    %6 = vector.broadcast %5 : vector<1x128xf32> to vector<512x128xf32>
    %7 = arith.addf %4, %6 : vector<512x128xf32>
    %cst = arith.constant 0.000000e+00 : f32
    %8 = vector.broadcast %cst : f32 to vector<512x128xf32>
    %9 = arith.maximumf %7, %8 : vector<512x128xf32>
    %10 = arith.truncf %9 : vector<512x128xf32> to vector<512x128xbf16>
    %c0_5 = arith.constant 0 : index
    %c0_6 = arith.constant 0 : index
    %11 = vector.load %arg4[%c0_5, %c0_6] : memref<128x128xbf16, #tpu.memory_space<vmem>>, vector<128x128xbf16>
    %cst_7 = arith.constant dense<0.000000e+00> : vector<512x128xf32>
    %12 = tpu.matmul %10, %11, %cst_7 {dimension_numbers = #tpu.dot_dimension_numbers<[1], [0], [0], [1], [0, 0, 1, 1], [], []>} : vector<512x128xbf16>, vector<128x128xbf16>, vector<512x128xf32> -> vector<512x128xf32>
    %13 = arith.truncf %12 : vector<512x128xf32> to vector<512x128xbf16>
    %c0_8 = arith.constant 0 : index
    %c0_9 = arith.constant 0 : index
    %14 = vector.load %arg7[%c0_8, %c0_9] : memref<512x128xbf16, #tpu.memory_space<vmem>>, vector<512x128xbf16>
    tpu.vector_store %arg7[%c0_8, %c0_9], %13 {strides = array<i32>} : memref<512x128xbf16, #tpu.memory_space<vmem>>, vector<512x128xbf16>,
    %c0_10 = arith.constant 0 : index
    %c0_11 = arith.constant 0 : index
    %15 = vector.load %arg5[%c0_10, %c0_11] : memref<512x128xf32, #tpu.memory_space<vmem>>, vector<512x128xf32>
    %16 = arith.truncf %15 : vector<512x128xf32> to vector<512x128xbf16>
    %c0_12 = arith.constant 0 : index
    %c0_13 = arith.constant 0 : index
    %17 = vector.load %arg6[%c0_12, %c0_13] : memref<128x128xbf16, #tpu.memory_space<vmem>>, vector<128x128xbf16>
    %cst_14 = arith.constant dense<0.000000e+00> : vector<512x128xf32>
    %18 = tpu.matmul %16, %17, %cst_14 {dimension_numbers = #tpu.dot_dimension_numbers<[1], [0], [0], [1], [0, 0, 1, 1], [], []>} : vector<512x128xbf16>, vector<128x128xbf16>, vector<512x128xf32> -> vector<512x128xf32>
    %19 = arith.truncf %18 : vector<512x128xf32> to vector<512x128xbf16>
    %c0_15 = arith.constant 0 : index
    %c0_16 = arith.constant 0 : index
    %20 = vector.load %arg10[%c0_15, %c0_16] : memref<512x128xbf16, #tpu.memory_space<vmem>>, vector<512x128xbf16>
    tpu.vector_store %arg10[%c0_15, %c0_16], %19 {strides = array<i32>} : memref<512x128xbf16, #tpu.memory_space<vmem>>, vector<512x128xbf16>,
    %c0_i32 = arith.constant 0 : i32
    %21 = arith.cmpi eq, %arg0, %c0_i32 : i32
    %22 = arith.extui %21 : i1 to i32
    %c0_i32_17 = arith.constant 0 : i32
    %23 = arith.cmpi ne, %22, %c0_i32_17 : i32
    scf.if %23 {
      %cst_38 = arith.constant 0.000000e+00 : f32
      %46 = vector.broadcast %cst_38 : f32 to vector<1x128xf32>
      %c0_39 = arith.constant 0 : index
      %c0_40 = arith.constant 0 : index
      %47 = vector.load %arg8[%c0_39, %c0_40] : memref<1x128xf32, #tpu.memory_space<vmem>>, vector<1x128xf32>
      tpu.vector_store %arg8[%c0_39, %c0_40], %46 {strides = array<i32>} : memref<1x128xf32, #tpu.memory_space<vmem>>, vector<1x128xf32>,
      %cst_41 = arith.constant 0.000000e+00 : f32
      %48 = vector.broadcast %cst_41 : f32 to vector<1x128xf32>
      %c0_42 = arith.constant 0 : index
      %c0_43 = arith.constant 0 : index
      %49 = vector.load %arg9[%c0_42, %c0_43] : memref<1x128xf32, #tpu.memory_space<vmem>>, vector<1x128xf32>
      tpu.vector_store %arg9[%c0_42, %c0_43], %48 {strides = array<i32>} : memref<1x128xf32, #tpu.memory_space<vmem>>, vector<1x128xf32>,
      %cst_44 = arith.constant 0.000000e+00 : f32
      %50 = vector.broadcast %cst_44 : f32 to vector<1x128xf32>
      %c0_45 = arith.constant 0 : index
      %c0_46 = arith.constant 0 : index
      %51 = vector.load %arg11[%c0_45, %c0_46] : memref<1x128xf32, #tpu.memory_space<vmem>>, vector<1x128xf32>
      tpu.vector_store %arg11[%c0_45, %c0_46], %50 {strides = array<i32>} : memref<1x128xf32, #tpu.memory_space<vmem>>, vector<1x128xf32>,
      %cst_47 = arith.constant 0.000000e+00 : f32
      %52 = vector.broadcast %cst_47 : f32 to vector<1x128xf32>
      %c0_48 = arith.constant 0 : index
      %c0_49 = arith.constant 0 : index
      %53 = vector.load %arg12[%c0_48, %c0_49] : memref<1x128xf32, #tpu.memory_space<vmem>>, vector<1x128xf32>
      tpu.vector_store %arg12[%c0_48, %c0_49], %52 {strides = array<i32>} : memref<1x128xf32, #tpu.memory_space<vmem>>, vector<1x128xf32>,
    } else {
    }
    %c0_18 = arith.constant 0 : index
    %c0_19 = arith.constant 0 : index
    %24 = vector.load %arg8[%c0_18, %c0_19] : memref<1x128xf32, #tpu.memory_space<vmem>>, vector<1x128xf32>
    %cst_20 = arith.constant dense<0.000000e+00> : vector<128xf32>
    %25 = vector.multi_reduction <add>, %12, %cst_20 [0] : vector<512x128xf32> to vector<128xf32>
    %26 = vector.shape_cast %25 : vector<128xf32> to vector<1x128xf32>
    %27 = arith.addf %24, %26 : vector<1x128xf32>
    %c0_21 = arith.constant 0 : index
    %c0_22 = arith.constant 0 : index
    %28 = vector.load %arg8[%c0_21, %c0_22] : memref<1x128xf32, #tpu.memory_space<vmem>>, vector<1x128xf32>
    tpu.vector_store %arg8[%c0_21, %c0_22], %27 {strides = array<i32>} : memref<1x128xf32, #tpu.memory_space<vmem>>, vector<1x128xf32>,
    %c0_23 = arith.constant 0 : index
    %c0_24 = arith.constant 0 : index
    %29 = vector.load %arg9[%c0_23, %c0_24] : memref<1x128xf32, #tpu.memory_space<vmem>>, vector<1x128xf32>
    %30 = arith.mulf %12, %12 : vector<512x128xf32>
    %cst_25 = arith.constant dense<0.000000e+00> : vector<128xf32>
    %31 = vector.multi_reduction <add>, %30, %cst_25 [0] : vector<512x128xf32> to vector<128xf32>
    %32 = vector.shape_cast %31 : vector<128xf32> to vector<1x128xf32>
    %33 = arith.addf %29, %32 : vector<1x128xf32>
    %c0_26 = arith.constant 0 : index
    %c0_27 = arith.constant 0 : index
    %34 = vector.load %arg9[%c0_26, %c0_27] : memref<1x128xf32, #tpu.memory_space<vmem>>, vector<1x128xf32>
    tpu.vector_store %arg9[%c0_26, %c0_27], %33 {strides = array<i32>} : memref<1x128xf32, #tpu.memory_space<vmem>>, vector<1x128xf32>,
    %c0_28 = arith.constant 0 : index
    %c0_29 = arith.constant 0 : index
    %35 = vector.load %arg11[%c0_28, %c0_29] : memref<1x128xf32, #tpu.memory_space<vmem>>, vector<1x128xf32>
    %cst_30 = arith.constant dense<0.000000e+00> : vector<128xf32>
    %36 = vector.multi_reduction <add>, %18, %cst_30 [0] : vector<512x128xf32> to vector<128xf32>
    %37 = vector.shape_cast %36 : vector<128xf32> to vector<1x128xf32>
    %38 = arith.addf %35, %37 : vector<1x128xf32>
    %c0_31 = arith.constant 0 : index
    %c0_32 = arith.constant 0 : index
    %39 = vector.load %arg11[%c0_31, %c0_32] : memref<1x128xf32, #tpu.memory_space<vmem>>, vector<1x128xf32>
    tpu.vector_store %arg11[%c0_31, %c0_32], %38 {strides = array<i32>} : memref<1x128xf32, #tpu.memory_space<vmem>>, vector<1x128xf32>,
    %c0_33 = arith.constant 0 : index
    %c0_34 = arith.constant 0 : index
    %40 = vector.load %arg12[%c0_33, %c0_34] : memref<1x128xf32, #tpu.memory_space<vmem>>, vector<1x128xf32>
    %41 = arith.mulf %18, %18 : vector<512x128xf32>
    %cst_35 = arith.constant dense<0.000000e+00> : vector<128xf32>
    %42 = vector.multi_reduction <add>, %41, %cst_35 [0] : vector<512x128xf32> to vector<128xf32>
    %43 = vector.shape_cast %42 : vector<128xf32> to vector<1x128xf32>
    %44 = arith.addf %40, %43 : vector<1x128xf32>
    %c0_36 = arith.constant 0 : index
    %c0_37 = arith.constant 0 : index
    %45 = vector.load %arg12[%c0_36, %c0_37] : memref<1x128xf32, #tpu.memory_space<vmem>>, vector<1x128xf32>
    tpu.vector_store %arg12[%c0_36, %c0_37], %44 {strides = array<i32>} : memref<1x128xf32, #tpu.memory_space<vmem>>, vector<1x128xf32>,
    return
  }
  func.func @transform_0(%arg0: i32) -> (i32, i32) {
    %c0_i32 = arith.constant 0 : i32
    %c0_i32_0 = arith.constant 0 : i32
    return %arg0, %c0_i32 : i32, i32
  }
  func.func @transform_1(%arg0: i32) -> (i32, i32) {
    %c0_i32 = arith.constant 0 : i32
    %c0_i32_0 = arith.constant 0 : i32
    %c0_i32_1 = arith.constant 0 : i32
    return %c0_i32, %c0_i32_0 : i32, i32
  }
  func.func @transform_2(%arg0: i32) -> (i32, i32) {
    %c0_i32 = arith.constant 0 : i32
    %c0_i32_0 = arith.constant 0 : i32
    %c0_i32_1 = arith.constant 0 : i32
    return %c0_i32, %c0_i32_0 : i32, i32
  }
  func.func @transform_3(%arg0: i32) -> (i32, i32) {
    %c0_i32 = arith.constant 0 : i32
    %c0_i32_0 = arith.constant 0 : i32
    %c0_i32_1 = arith.constant 0 : i32
    return %c0_i32, %c0_i32_0 : i32, i32
  }
  func.func @transform_4(%arg0: i32) -> (i32, i32) {
    %c0_i32 = arith.constant 0 : i32
    %c0_i32_0 = arith.constant 0 : i32
    return %arg0, %c0_i32 : i32, i32
  }
  func.func @transform_5(%arg0: i32) -> (i32, i32) {
    %c0_i32 = arith.constant 0 : i32
    %c0_i32_0 = arith.constant 0 : i32
    %c0_i32_1 = arith.constant 0 : i32
    return %c0_i32, %c0_i32_0 : i32, i32
  }
  func.func @transform_6(%arg0: i32) -> (i32, i32) {
    %c0_i32 = arith.constant 0 : i32
    %c0_i32_0 = arith.constant 0 : i32
    return %arg0, %c0_i32 : i32, i32
  }
  func.func @transform_7(%arg0: i32) -> (i32, i32) {
    %c0_i32 = arith.constant 0 : i32
    %c0_i32_0 = arith.constant 0 : i32
    %c0_i32_1 = arith.constant 0 : i32
    return %c0_i32, %c0_i32_0 : i32, i32
  }
  func.func @transform_8(%arg0: i32) -> (i32, i32) {
    %c0_i32 = arith.constant 0 : i32
    %c0_i32_0 = arith.constant 0 : i32
    %c0_i32_1 = arith.constant 0 : i32
    return %c0_i32, %c0_i32_0 : i32, i32
  }
  func.func @transform_9(%arg0: i32) -> (i32, i32) {
    %c0_i32 = arith.constant 0 : i32
    %c0_i32_0 = arith.constant 0 : i32
    return %arg0, %c0_i32 : i32, i32
  }
  func.func @transform_10(%arg0: i32) -> (i32, i32) {
    %c0_i32 = arith.constant 0 : i32
    %c0_i32_0 = arith.constant 0 : i32
    %c0_i32_1 = arith.constant 0 : i32
    return %c0_i32, %c0_i32_0 : i32, i32
  }
  func.func @transform_11(%arg0: i32) -> (i32, i32) {
    %c0_i32 = arith.constant 0 : i32
    %c0_i32_0 = arith.constant 0 : i32
    %c0_i32_1 = arith.constant 0 : i32
    return %c0_i32, %c0_i32_0 : i32, i32
  }
}

module attributes {stable_mosaic.version = 11 : i64} {
  func.func @_bn_add_relu_kernel(%arg0: i32, %arg1: memref<512x128xbf16, #tpu.memory_space<vmem>>, %arg2: memref<1x128xf32, #tpu.memory_space<vmem>>, %arg3: memref<1x128xf32, #tpu.memory_space<vmem>>, %arg4: memref<512x128xbf16, #tpu.memory_space<vmem>>, %arg5: memref<1x128xf32, #tpu.memory_space<vmem>>, %arg6: memref<1x128xf32, #tpu.memory_space<vmem>>, %arg7: memref<512x128xf32, #tpu.memory_space<vmem>>) attributes {dimension_semantics = [#tpu.dimension_semantics<parallel>], iteration_bounds = array<i64: 1>, scalar_prefetch = 0 : i64, scratch_operands = 0 : i64, tpu.core_type = #tpu.core_type<tc>, window_params = [{transform_indices = @transform_0, window_bounds = array<i64: 512, 128>}, {pipeline_mode = #tpu.pipeline_mode<synchronous>, transform_indices = @transform_1, window_bounds = array<i64: 1, 128>}, {pipeline_mode = #tpu.pipeline_mode<synchronous>, transform_indices = @transform_2, window_bounds = array<i64: 1, 128>}, {transform_indices = @transform_3, window_bounds = array<i64: 512, 128>}, {pipeline_mode = #tpu.pipeline_mode<synchronous>, transform_indices = @transform_4, window_bounds = array<i64: 1, 128>}, {pipeline_mode = #tpu.pipeline_mode<synchronous>, transform_indices = @transform_5, window_bounds = array<i64: 1, 128>}, {transform_indices = @transform_6, window_bounds = array<i64: 512, 128>}]} {
    %c0 = arith.constant 0 : index
    %c0_0 = arith.constant 0 : index
    %0 = vector.load %arg1[%c0, %c0_0] : memref<512x128xbf16, #tpu.memory_space<vmem>>, vector<512x128xbf16>
    %1 = arith.extf %0 : vector<512x128xbf16> to vector<512x128xf32>
    %c0_1 = arith.constant 0 : index
    %c0_2 = arith.constant 0 : index
    %2 = vector.load %arg2[%c0_1, %c0_2] : memref<1x128xf32, #tpu.memory_space<vmem>>, vector<1x128xf32>
    %3 = vector.broadcast %2 : vector<1x128xf32> to vector<512x128xf32>
    %4 = arith.mulf %1, %3 : vector<512x128xf32>
    %c0_3 = arith.constant 0 : index
    %c0_4 = arith.constant 0 : index
    %5 = vector.load %arg3[%c0_3, %c0_4] : memref<1x128xf32, #tpu.memory_space<vmem>>, vector<1x128xf32>
    %6 = vector.broadcast %5 : vector<1x128xf32> to vector<512x128xf32>
    %7 = arith.addf %4, %6 : vector<512x128xf32>
    %c0_5 = arith.constant 0 : index
    %c0_6 = arith.constant 0 : index
    %8 = vector.load %arg4[%c0_5, %c0_6] : memref<512x128xbf16, #tpu.memory_space<vmem>>, vector<512x128xbf16>
    %9 = arith.extf %8 : vector<512x128xbf16> to vector<512x128xf32>
    %c0_7 = arith.constant 0 : index
    %c0_8 = arith.constant 0 : index
    %10 = vector.load %arg5[%c0_7, %c0_8] : memref<1x128xf32, #tpu.memory_space<vmem>>, vector<1x128xf32>
    %11 = vector.broadcast %10 : vector<1x128xf32> to vector<512x128xf32>
    %12 = arith.mulf %9, %11 : vector<512x128xf32>
    %c0_9 = arith.constant 0 : index
    %c0_10 = arith.constant 0 : index
    %13 = vector.load %arg6[%c0_9, %c0_10] : memref<1x128xf32, #tpu.memory_space<vmem>>, vector<1x128xf32>
    %14 = vector.broadcast %13 : vector<1x128xf32> to vector<512x128xf32>
    %15 = arith.addf %12, %14 : vector<512x128xf32>
    %16 = arith.addf %7, %15 : vector<512x128xf32>
    %cst = arith.constant 0.000000e+00 : f32
    %17 = vector.broadcast %cst : f32 to vector<512x128xf32>
    %18 = arith.maximumf %16, %17 : vector<512x128xf32>
    %c0_11 = arith.constant 0 : index
    %c0_12 = arith.constant 0 : index
    %19 = vector.load %arg7[%c0_11, %c0_12] : memref<512x128xf32, #tpu.memory_space<vmem>>, vector<512x128xf32>
    tpu.vector_store %arg7[%c0_11, %c0_12], %18 {strides = array<i32>} : memref<512x128xf32, #tpu.memory_space<vmem>>, vector<512x128xf32>,
    return
  }
  func.func @transform_0(%arg0: i32) -> (i32, i32) {
    %c0_i32 = arith.constant 0 : i32
    %c0_i32_0 = arith.constant 0 : i32
    return %arg0, %c0_i32 : i32, i32
  }
  func.func @transform_1(%arg0: i32) -> (i32, i32) {
    %c0_i32 = arith.constant 0 : i32
    %c0_i32_0 = arith.constant 0 : i32
    %c0_i32_1 = arith.constant 0 : i32
    return %c0_i32, %c0_i32_0 : i32, i32
  }
  func.func @transform_2(%arg0: i32) -> (i32, i32) {
    %c0_i32 = arith.constant 0 : i32
    %c0_i32_0 = arith.constant 0 : i32
    %c0_i32_1 = arith.constant 0 : i32
    return %c0_i32, %c0_i32_0 : i32, i32
  }
  func.func @transform_3(%arg0: i32) -> (i32, i32) {
    %c0_i32 = arith.constant 0 : i32
    %c0_i32_0 = arith.constant 0 : i32
    return %arg0, %c0_i32 : i32, i32
  }
  func.func @transform_4(%arg0: i32) -> (i32, i32) {
    %c0_i32 = arith.constant 0 : i32
    %c0_i32_0 = arith.constant 0 : i32
    %c0_i32_1 = arith.constant 0 : i32
    return %c0_i32, %c0_i32_0 : i32, i32
  }
  func.func @transform_5(%arg0: i32) -> (i32, i32) {
    %c0_i32 = arith.constant 0 : i32
    %c0_i32_0 = arith.constant 0 : i32
    %c0_i32_1 = arith.constant 0 : i32
    return %c0_i32, %c0_i32_0 : i32, i32
  }
  func.func @transform_6(%arg0: i32) -> (i32, i32) {
    %c0_i32 = arith.constant 0 : i32
    %c0_i32_0 = arith.constant 0 : i32
    return %arg0, %c0_i32 : i32, i32
  }
}

</mosaic_0001>

<bundles_post_ra>
// kernel: bottleneck_forward.4
= control target key start
LH: loop header
LB: loop body
LE: loop exit
PB: predicated region body
PF: predicated region fallthrough
CT: control target
= control target key end

     0   :  { %s1774_s15 = smov 0   ;;  %s2325_s0 = inlined_call_operand.vmem [shape: f32[2048,128], index: 0, kind: input, shape index: {}]   ;;  %s2326_s1 = inlined_call_operand.vmem [shape: bf16[128,128], index: 1, kind: input, shape index: {}]   ;;  %s2327_s2 = inlined_call_operand.vmem [shape: bf16[2048,128], index: 2, kind: output, shape index: {0}]   ;;  %s2328_s3 = inlined_call_operand.vmem [shape: f32[1,128], index: 3, kind: output, shape index: {1}]   ;;  %s2329_s4 = inlined_call_operand.vmem [shape: f32[1,128], index: 4, kind: output, shape index: {2}]  }
   0x1 LB: > { %s1248_s16 = sadd.s32 4294967295, %s1746_s15   ;;  %p1252_p0 = scmp.ge.s32.totalorder %s1746_s15, 1  ;;  %s1746_s15 = sphi %s1774_s15, %s15_s15  }
   0x2   : > { %p158_p1 = scmp.lt.s32.totalorder %s1746_s15, 5 }
   0x4   : > { %p159_p2 = pnand %p1252_p0, %p158_p1 }
   0x6   : > { %162 = sbr.rel (%p159_p2) target bundleno = 473 (0x1d9), region = 28 }
   0xd   : > { %v1732_v0 = vld [vmem:[%s2326_s1] sm:$0xff]   ;;  %s1253_s19 = sshll.u32 %s1248_s16, 6  ;;  %v1733_v1 = vld [vmem:[%s2326_s1 + $0x8] sm:$0xff]   ;;  %v1734_v2 = vld [vmem:[%s2326_s1 + $0x10] sm:$0xff]   ;;  %p1329_p4 = scmp.ne.s32.totalorder %s1248_s16, 0 }
   0xe   : > { %p185_p3 = scmp.lt.s32.totalorder %s1253_s19, 255  ;;  %1627 = vmatprep.subr.bf16.mxu0 %v1732_v0  ;;  %1707 = vmatprep.subr.bf16.mxu1 %v1732_v0  ;;  %v1735_v3 = vld [vmem:[%s2326_s1 + $0x18] sm:$0xff]   ;;  %v1736_v10 = vld [vmem:[%s2326_s1 + $0x20] sm:$0xff]   ;;  %v1737_v11 = vld [vmem:[%s2326_s1 + $0x28] sm:$0xff]  }
   0xf   : > { %1628 = vmatpush3.bf16.msra.mxu0 %v1732_v0  ;;  %1715 = vmatpush3.bf16.msra.mxu1 %v1732_v0  ;;  %v1738_v12 = vld [vmem:[%s2326_s1 + $0x30] sm:$0xff]   ;;  %v1739_v13 = vld [vmem:[%s2326_s1 + $0x38] sm:$0xff]  }
  0x10   : > { %s2379_s19 = smov (!%p185_p3, %s1253_s19), 255  ;;  %1629 = vmatprep.subr.bf16.mxu0 %v1733_v1  ;;  %1708 = vmatprep.subr.bf16.mxu1 %v1733_v1 }
  0x11   : > { %s1254_s24 = sshll.u32 %s2379_s19, 3  ;;  %s1256_s12 = sshll.u32 %s2379_s19, 2 }
  0x12   : > { %s1799_s27 = scalar_lea.vmem %s2325_s0, %s1254_s24  ;;  %s1892_s17 = scalar_lea.vmem %s2327_s2, %s1256_s12 }
  0x13   : > { %1630 = vmatpush3.bf16.msra.mxu0 %v1733_v1  ;;  %1716 = vmatpush3.bf16.msra.mxu1 %v1733_v1  ;;  %v197_v4 = vld [vmem:[%s1799_s27] sm:$0xff]  ;;  %v198_v5 = vld [vmem:[%s1799_s27 + $0x8] sm:$0xff]  ;;  %v199_v14 = vld [vmem:[%s1799_s27 + $0x10] sm:$0xff] }
  0x14   : > { %1631 = vmatprep.subr.bf16.mxu0 %v1734_v2  ;;  %1709 = vmatprep.subr.bf16.mxu1 %v1734_v2  ;;  %v229_v6 = vld [vmem:[%s1799_s27 + $0x100] sm:$0xff]  ;;  %v261_v7 = vpack.c.bf16 %v198_v5, %v197_v4  ;;  %v230_v8 = vld [vmem:[%s1799_s27 + $0x108] sm:$0xff]  ;;  %v200_v15 = vld [vmem:[%s1799_s27 + $0x18] sm:$0xff] }
  0x15   : > { %v277_v9 = vpack.c.bf16 %v230_v8, %v229_v6  ;;  %v231_v16 = vld [vmem:[%s1799_s27 + $0x110] sm:$0xff]  ;;  %v232_v17 = vld [vmem:[%s1799_s27 + $0x118] sm:$0xff]  ;;  %v201_v18 = vld [vmem:[%s1799_s27 + $0x20] sm:$0xff]  ;;  %v262_v22 = vpack.c.bf16 %v200_v15, %v199_v14 }
  0x16   : > { %1643 = vmatprep.mubr.bf16.mxu0 %v261_v7  ;;  %v202_v19 = vld [vmem:[%s1799_s27 + $0x28] sm:$0xff]  ;;  %v233_v20 = vld [vmem:[%s1799_s27 + $0x120] sm:$0xff]  ;;  %v278_v23 = vpack.c.bf16 %v232_v17, %v231_v16  ;;  %v203_v26 = vld [vmem:[%s1799_s27 + $0x30] sm:$0xff] }
  0x17   : > { %1632 = vmatpush3.bf16.msra.mxu0 %v1734_v2  ;;  %1717 = vmatpush3.bf16.msra.mxu1 %v1734_v2  ;;  %v234_v21 = vld [vmem:[%s1799_s27 + $0x128] sm:$0xff]  ;;  %v263_v24 = vpack.c.bf16 %v202_v19, %v201_v18  ;;  %v204_v27 = vld [vmem:[%s1799_s27 + $0x38] sm:$0xff]  ;;  %v235_v28 = vld [vmem:[%s1799_s27 + $0x130] sm:$0xff] }
  0x18   : > { %1633 = vmatprep.subr.bf16.mxu0 %v1735_v3  ;;  %1710 = vmatprep.subr.bf16.mxu1 %v1735_v3  ;;  %v279_v25 = vpack.c.bf16 %v234_v21, %v233_v20  ;;  %v236_v29 = vld [vmem:[%s1799_s27 + $0x138] sm:$0xff]  ;;  %v205_v30 = vld [vmem:[%s1799_s27 + $0x40] sm:$0xff]  ;;  %v206_v31 = vld [vmem:[%s1799_s27 + $0x48] sm:$0xff]  ;;  %v264_v34 = vpack.c.bf16 %v204_v27, %v203_v26 }
  0x19   : > { %1675 = vmatprep.mubr.bf16.mxu1 %v277_v9  ;;  %v237_v32 = vld [vmem:[%s1799_s27 + $0x140] sm:$0xff]  ;;  %v238_v33 = vld [vmem:[%s1799_s27 + $0x148] sm:$0xff]  ;;  %v280_v35 = vpack.c.bf16 %v236_v29, %v235_v28  ;;  %v265_v36 = vpack.c.bf16 %v206_v31, %v205_v30  ;;  %v207_v38 = vld [vmem:[%s1799_s27 + $0x50] sm:$0xff] }
  0x1a   : > { %v281_v37 = vpack.c.bf16 %v238_v33, %v237_v32  ;;  %v208_v39 = vld [vmem:[%s1799_s27 + $0x58] sm:$0xff]  ;;  %v239_v40 = vld [vmem:[%s1799_s27 + $0x150] sm:$0xff]  ;;  %v209_v42 = vld [vmem:[%s1799_s27 + $0x60] sm:$0xff] }
  0x1b   : > { %1634 = vmatpush3.bf16.msra.mxu0 %v1735_v3  ;;  %1718 = vmatpush3.bf16.msra.mxu1 %v1735_v3  ;;  %v240_v41 = vld [vmem:[%s1799_s27 + $0x158] sm:$0xff]  ;;  %v210_v43 = vld [vmem:[%s1799_s27 + $0x68] sm:$0xff]  ;;  %v241_v44 = vld [vmem:[%s1799_s27 + $0x160] sm:$0xff]  ;;  %v266_v46 = vpack.c.bf16 %v208_v39, %v207_v38 }
  0x1c   : > { %1635 = vmatprep.subr.bf16.mxu0 %v1736_v10  ;;  %1711 = vmatprep.subr.bf16.mxu1 %v1736_v10  ;;  %v242_v45 = vld [vmem:[%s1799_s27 + $0x168] sm:$0xff]  ;;  %v282_v47 = vpack.c.bf16 %v240_v41, %v239_v40  ;;  %v267_v48 = vpack.c.bf16 %v210_v43, %v209_v42  ;;  %v211_v50 = vld [vmem:[%s1799_s27 + $0x70] sm:$0xff]  ;;  %v212_v51 = vld [vmem:[%s1799_s27 + $0x78] sm:$0xff] }
  0x1d   : > { %v283_v49 = vpack.c.bf16 %v242_v45, %v241_v44  ;;  %v243_v52 = vld [vmem:[%s1799_s27 + $0x170] sm:$0xff]  ;;  %v244_v53 = vld [vmem:[%s1799_s27 + $0x178] sm:$0xff]  ;;  %v213_v54 = vld [vmem:[%s1799_s27 + $0x80] sm:$0xff]  ;;  %v268_v58 = vpack.c.bf16 %v212_v51, %v211_v50 }
  0x1e   : > { %v214_v55 = vld [vmem:[%s1799_s27 + $0x88] sm:$0xff]  ;;  %v245_v56 = vld [vmem:[%s1799_s27 + $0x180] sm:$0xff]  ;;  %v284_v59 = vpack.c.bf16 %v244_v53, %v243_v52  ;;  %v215_v62 = vld [vmem:[%s1799_s27 + $0x90] sm:$0xff] }
  0x1f   : > { %1636 = vmatpush3.bf16.msra.mxu0 %v1736_v10  ;;  %1719 = vmatpush3.bf16.msra.mxu1 %v1736_v10  ;;  %v246_v57 = vld [vmem:[%s1799_s27 + $0x188] sm:$0xff]  ;;  %v269_v60 = vpack.c.bf16 %v214_v55, %v213_v54  ;;  %v216_v63 = vld [vmem:[%s1799_s27 + $0x98] sm:$0xff]  ;;  %v247_v0 = vld [vmem:[%s1799_s27 + $0x190] sm:$0xff] }
  0x20   : > { %1637 = vmatprep.subr.bf16.mxu0 %v1737_v11  ;;  %1712 = vmatprep.subr.bf16.mxu1 %v1737_v11  ;;  %v285_v61 = vpack.c.bf16 %v246_v57, %v245_v56  ;;  %v248_v1 = vld [vmem:[%s1799_s27 + $0x198] sm:$0xff]  ;;  %v217_v2 = vld [vmem:[%s1799_s27 + $0xa0] sm:$0xff]  ;;  %v218_v3 = vld [vmem:[%s1799_s27 + $0xa8] sm:$0xff]  ;;  %v270_v6 = vpack.c.bf16 %v216_v63, %v215_v62 }
  0x21   : > { %v249_v4 = vld [vmem:[%s1799_s27 + $0x1a0] sm:$0xff]  ;;  %v250_v5 = vld [vmem:[%s1799_s27 + $0x1a8] sm:$0xff]  ;;  %v286_v7 = vpack.c.bf16 %v248_v1, %v247_v0  ;;  %v271_v8 = vpack.c.bf16 %v218_v3, %v217_v2  ;;  %v219_v10 = vld [vmem:[%s1799_s27 + $0xb0] sm:$0xff] }
  0x22   : > { %v287_v9 = vpack.c.bf16 %v250_v5, %v249_v4  ;;  %v221_v14 = vld [vmem:[%s1799_s27 + $0xc0] sm:$0xff]  ;;  %v222_v15 = vld [vmem:[%s1799_s27 + $0xc8] sm:$0xff] }
  0x23   : > { %1638 = vmatpush3.bf16.msra.mxu0 %v1737_v11  ;;  %1720 = vmatpush3.bf16.msra.mxu1 %v1737_v11  ;;  %v220_v11 = vld [vmem:[%s1799_s27 + $0xb8] sm:$0xff]  ;;  %v253_v16 = vld [vmem:[%s1799_s27 + $0x1c0] sm:$0xff]  ;;  %v254_v17 = vld [vmem:[%s1799_s27 + $0x1c8] sm:$0xff]  ;;  %v273_v20 = vpack.c.bf16 %v222_v15, %v221_v14 }
  0x24   : > { %1639 = vmatprep.subr.bf16.mxu0 %v1738_v12  ;;  %1713 = vmatprep.subr.bf16.mxu1 %v1738_v12  ;;  %v272_v18 = vpack.c.bf16 %v220_v11, %v219_v10  ;;  %v289_v21 = vpack.c.bf16 %v254_v17, %v253_v16  ;;  %v225_v26 = vld [vmem:[%s1799_s27 + $0xe0] sm:$0xff]  ;;  %v226_v27 = vld [vmem:[%s1799_s27 + $0xe8] sm:$0xff] }
  0x25   : > { %v257_v28 = vld [vmem:[%s1799_s27 + $0x1e0] sm:$0xff]  ;;  %v258_v29 = vld [vmem:[%s1799_s27 + $0x1e8] sm:$0xff]  ;;  %v275_v32 = vpack.c.bf16 %v226_v27, %v225_v26 }
  0x26   : > { %v291_v33 = vpack.c.bf16 %v258_v29, %v257_v28 }
  0x27   : > { %1640 = vmatpush3.bf16.msra.mxu0 %v1738_v12  ;;  %1721 = vmatpush3.bf16.msra.mxu1 %v1738_v12  ;;  %v251_v12 = vld [vmem:[%s1799_s27 + $0x1b0] sm:$0xff] }
  0x28   : > { %1641 = vmatprep.subr.bf16.mxu0 %v1739_v13  ;;  %1714 = vmatprep.subr.bf16.mxu1 %v1739_v13 }
  0x2b   : > { %1642 = vmatpush3.bf16.msra.mxu0 %v1739_v13  ;;  %1722 = vmatpush3.bf16.msra.mxu1 %v1739_v13  ;;  %v252_v13 = vld [vmem:[%s1799_s27 + $0x1b8] sm:$0xff] }
  0x2c   : > { %v288_v19 = vpack.c.bf16 %v252_v13, %v251_v12 }
  0x2e   : > { %1644 = vmatmul.mubr.bf16.vlgmr.msra.gmra.mrb[0].mxu0 %v262_v22  ;;  %1676 = vmatmul.mubr.bf16.vlgmr.msra.gmra.mrb[0].mxu1 %v278_v23  ;;  %v223_v22 = vld [vmem:[%s1799_s27 + $0xd0] sm:$0xff]  ;;  %v224_v23 = vld [vmem:[%s1799_s27 + $0xd8] sm:$0xff] }
  0x2f   : > { %1647 = vmatprep.mubr.bf16.mxu0 %v263_v24  ;;  %1679 = vmatprep.mubr.bf16.mxu1 %v279_v25  ;;  %v255_v24 = vld [vmem:[%s1799_s27 + $0x1d0] sm:$0xff]  ;;  %v256_v25 = vld [vmem:[%s1799_s27 + $0x1d8] sm:$0xff]  ;;  %v274_v30 = vpack.c.bf16 %v224_v23, %v223_v22 }
  0x30   : > { %v290_v31 = vpack.c.bf16 %v256_v25, %v255_v24 }
  0x36   : > { %1648 = vmatmul.mubr.bf16.gmra.mrb[4].mxu0 %v264_v34  ;;  %1680 = vmatmul.mubr.bf16.gmra.mrb[4].mxu1 %v280_v35  ;;  %v227_v34 = vld [vmem:[%s1799_s27 + $0xf0] sm:$0xff]  ;;  %v228_v35 = vld [vmem:[%s1799_s27 + $0xf8] sm:$0xff] }
  0x37   : > { %1651 = vmatprep.mubr.bf16.mxu0 %v265_v36  ;;  %1683 = vmatprep.mubr.bf16.mxu1 %v281_v37  ;;  %v259_v36 = vld [vmem:[%s1799_s27 + $0x1f0] sm:$0xff]  ;;  %v260_v37 = vld [vmem:[%s1799_s27 + $0x1f8] sm:$0xff]  ;;  %v276_v38 = vpack.c.bf16 %v228_v35, %v227_v34 }
  0x38   : > { %v292_v39 = vpack.c.bf16 %v260_v37, %v259_v36 }
  0x3e   : > { %1652 = vmatmul.mubr.bf16.gmra.mrb[8].mxu0 %v266_v46  ;;  %1684 = vmatmul.mubr.bf16.gmra.mrb[8].mxu1 %v282_v47 }
  0x3f   : > { %1655 = vmatprep.mubr.bf16.mxu0 %v267_v48  ;;  %1687 = vmatprep.mubr.bf16.mxu1 %v283_v49 }
  0x46   : > { %1656 = vmatmul.mubr.bf16.gmra.mrb[12].mxu0 %v268_v58  ;;  %1688 = vmatmul.mubr.bf16.gmra.mrb[12].mxu1 %v284_v59 }
  0x47   : > { %1659 = vmatprep.mubr.bf16.mxu0 %v269_v60  ;;  %1691 = vmatprep.mubr.bf16.mxu1 %v285_v61 }
  0x4e   : > { %1660 = vmatmul.mubr.bf16.gmra.mrb[16].mxu0 %v270_v6  ;;  %1692 = vmatmul.mubr.bf16.gmra.mrb[16].mxu1 %v286_v7 }
  0x4f   : > { %1663 = vmatprep.mubr.bf16.mxu0 %v271_v8  ;;  %1695 = vmatprep.mubr.bf16.mxu1 %v287_v9 }
  0x56   : > { %1664 = vmatmul.mubr.bf16.gmra.mrb[20].mxu0 %v272_v18  ;;  %1696 = vmatmul.mubr.bf16.gmra.mrb[20].mxu1 %v288_v19 }
  0x57   : > { %1667 = vmatprep.mubr.bf16.mxu0 %v273_v20  ;;  %1699 = vmatprep.mubr.bf16.mxu1 %v289_v21 }
  0x5e   : > { %1668 = vmatmul.mubr.bf16.gmra.mrb[24].mxu0 %v274_v30  ;;  %1700 = vmatmul.mubr.bf16.gmra.mrb[24].mxu1 %v290_v31 }
  0x5f   : > { %1671 = vmatprep.mubr.bf16.mxu0 %v275_v32  ;;  %1703 = vmatprep.mubr.bf16.mxu1 %v291_v33 }
  0x66   : > { %1672 = vmatmul.mubr.bf16.gmra.mrb[28].mxu0 %v276_v38  ;;  %1704 = vmatmul.mubr.bf16.gmra.mrb[28].mxu1 %v292_v39 }
 0x101   : > { %v1881_v40 = vpop.f32.mrb[0].mxu0  ;;  %v1883_v41 = vpop.f32.mrb[0].mxu1 }
 0x102   : > { %v1885_v42 = vpop.f32.mrb[1].mxu0  ;;  %v1887_v43 = vpop.f32.mrb[1].mxu1 }
 0x103   : > { %v1894_v44 = vpop.f32.mrb[2].mxu0  ;;  %v1896_v45 = vpop.f32.mrb[2].mxu1 }
 0x104   : > { %v1404_v46 = vpack.c.bf16 %v1894_v44, %v1881_v40  ;;  %v1484_v47 = vpack.c.bf16 %v1896_v45, %v1883_v41  ;;  %v1902_v48 = vpop.f32.mrb[3].mxu0  ;;  %v1904_v49 = vpop.f32.mrb[3].mxu1 }
 0x105   : > { %v1399_v50 = vpack.c.bf16 %v1902_v48, %v1885_v42  ;;  %v1479_v51 = vpack.c.bf16 %v1904_v49, %v1887_v43 }
 0x106   : > { %1556 = vst [vmem:[%s1892_s17 + $0x8] sm:$0xff] %v1404_v46   ;;  %1572 = vst [vmem:[%s1892_s17 + $0x88] sm:$0xff] %v1484_v47  }
 0x107   : > { %1400 = vst [vmem:[%s1892_s17] sm:$0xff] %v1399_v50   ;;  %1571 = vst [vmem:[%s1892_s17 + $0x80] sm:$0xff] %v1479_v51  }
 0x109   : > { %v1914_v52 = vpop.f32.mrb[4].mxu0  ;;  %v1916_v53 = vpop.f32.mrb[4].mxu1 }
 0x10a   : > { %v1918_v54 = vpop.f32.mrb[5].mxu0  ;;  %v1920_v55 = vpop.f32.mrb[5].mxu1 }
 0x10b   : > { %v1922_v56 = vpop.f32.mrb[6].mxu0  ;;  %v1924_v57 = vpop.f32.mrb[6].mxu1 }
 0x10c   : > { %v1414_v58 = vpack.c.bf16 %v1922_v56, %v1914_v52  ;;  %v1494_v59 = vpack.c.bf16 %v1924_v57, %v1916_v53  ;;  %v1930_v60 = vpop.f32.mrb[7].mxu0  ;;  %v1932_v61 = vpop.f32.mrb[7].mxu1 }
 0x10d   : > { %v1409_v62 = vpack.c.bf16 %v1930_v60, %v1918_v54  ;;  %v1489_v63 = vpack.c.bf16 %v1932_v61, %v1920_v55 }
 0x10e   : > { %1558 = vst [vmem:[%s1892_s17 + $0x18] sm:$0xff] %v1414_v58   ;;  %1574 = vst [vmem:[%s1892_s17 + $0x98] sm:$0xff] %v1494_v59  }
 0x10f   : > { %1557 = vst [vmem:[%s1892_s17 + $0x10] sm:$0xff] %v1409_v62   ;;  %1573 = vst [vmem:[%s1892_s17 + $0x90] sm:$0xff] %v1489_v63  }
 0x111   : > { %v1942_v0 = vpop.f32.mrb[8].mxu0  ;;  %v1944_v1 = vpop.f32.mrb[8].mxu1 }
 0x112   : > { %v1946_v2 = vpop.f32.mrb[9].mxu0  ;;  %v1948_v3 = vpop.f32.mrb[9].mxu1 }
 0x113   : > { %v1950_v4 = vpop.f32.mrb[10].mxu0  ;;  %v1952_v5 = vpop.f32.mrb[10].mxu1 }
 0x114   : > { %v1424_v6 = vpack.c.bf16 %v1950_v4, %v1942_v0  ;;  %v1504_v7 = vpack.c.bf16 %v1952_v5, %v1944_v1  ;;  %v1958_v8 = vpop.f32.mrb[11].mxu0  ;;  %v1960_v9 = vpop.f32.mrb[11].mxu1 }
 0x115   : > { %v1419_v10 = vpack.c.bf16 %v1958_v8, %v1946_v2  ;;  %v1499_v11 = vpack.c.bf16 %v1960_v9, %v1948_v3 }
 0x116   : > { %1560 = vst [vmem:[%s1892_s17 + $0x28] sm:$0xff] %v1424_v6   ;;  %1576 = vst [vmem:[%s1892_s17 + $0xa8] sm:$0xff] %v1504_v7  }
 0x117   : > { %1559 = vst [vmem:[%s1892_s17 + $0x20] sm:$0xff] %v1419_v10   ;;  %1575 = vst [vmem:[%s1892_s17 + $0xa0] sm:$0xff] %v1499_v11  }
 0x119   : > { %v1970_v12 = vpop.f32.mrb[12].mxu0  ;;  %v1972_v13 = vpop.f32.mrb[12].mxu1 }
 0x11a   : > { %v1974_v14 = vpop.f32.mrb[13].mxu0  ;;  %v1976_v15 = vpop.f32.mrb[13].mxu1 }
 0x11b   : > { %v1978_v16 = vpop.f32.mrb[14].mxu0  ;;  %v1980_v17 = vpop.f32.mrb[14].mxu1 }
 0x11c   : > { %v1434_v18 = vpack.c.bf16 %v1978_v16, %v1970_v12  ;;  %v1514_v19 = vpack.c.bf16 %v1980_v17, %v1972_v13  ;;  %v1986_v20 = vpop.f32.mrb[15].mxu0  ;;  %v1988_v21 = vpop.f32.mrb[15].mxu1 }
 0x11d   : > { %v1429_v22 = vpack.c.bf16 %v1986_v20, %v1974_v14  ;;  %v1509_v23 = vpack.c.bf16 %v1988_v21, %v1976_v15 }
 0x11e   : > { %1562 = vst [vmem:[%s1892_s17 + $0x38] sm:$0xff] %v1434_v18   ;;  %1578 = vst [vmem:[%s1892_s17 + $0xb8] sm:$0xff] %v1514_v19  }
 0x11f   : > { %1561 = vst [vmem:[%s1892_s17 + $0x30] sm:$0xff] %v1429_v22   ;;  %1577 = vst [vmem:[%s1892_s17 + $0xb0] sm:$0xff] %v1509_v23  }
 0x121   : > { %v1998_v24 = vpop.f32.mrb[16].mxu0  ;;  %v2000_v25 = vpop.f32.mrb[16].mxu1 }
 0x122   : > { %v2002_v26 = vpop.f32.mrb[17].mxu0  ;;  %v2004_v27 = vpop.f32.mrb[17].mxu1 }
 0x123   : > { %v2006_v28 = vpop.f32.mrb[18].mxu0  ;;  %v2008_v29 = vpop.f32.mrb[18].mxu1 }
 0x124   : > { %v1444_v30 = vpack.c.bf16 %v2006_v28, %v1998_v24  ;;  %v1524_v31 = vpack.c.bf16 %v2008_v29, %v2000_v25  ;;  %v2014_v32 = vpop.f32.mrb[19].mxu0  ;;  %v2016_v33 = vpop.f32.mrb[19].mxu1 }
 0x125   : > { %v1439_v34 = vpack.c.bf16 %v2014_v32, %v2002_v26  ;;  %v1519_v35 = vpack.c.bf16 %v2016_v33, %v2004_v27 }
 0x126   : > { %1564 = vst [vmem:[%s1892_s17 + $0x48] sm:$0xff] %v1444_v30   ;;  %1580 = vst [vmem:[%s1892_s17 + $0xc8] sm:$0xff] %v1524_v31  }
 0x127   : > { %1563 = vst [vmem:[%s1892_s17 + $0x40] sm:$0xff] %v1439_v34   ;;  %1579 = vst [vmem:[%s1892_s17 + $0xc0] sm:$0xff] %v1519_v35  }
 0x129   : > { %v2026_v36 = vpop.f32.mrb[20].mxu0  ;;  %v2028_v37 = vpop.f32.mrb[20].mxu1 }
 0x12a   : > { %2354 = vst [vmem:[#allocation2_spill] sm:$0xff] %v2028_v37  ;;  %v2030_v38 = vpop.f32.mrb[21].mxu0  ;;  %v2032_v39 = vpop.f32.mrb[21].mxu1 }
 0x12b   : > { %2355 = vst [vmem:[#allocation3_spill] sm:$0xff] %v2032_v39  ;;  %v2034_v46 = vpop.f32.mrb[22].mxu0  ;;  %v2036_v47 = vpop.f32.mrb[22].mxu1 }
 0x12c   : > { %2356 = vst [vmem:[#allocation4_spill] sm:$0xff] %v2036_v47  ;;  %v1454_v50 = vpack.c.bf16 %v2034_v46, %v2026_v36  ;;  %v1534_v51 = vpack.c.bf16 %v2036_v47, %v2028_v37  ;;  %v2042_v58 = vpop.f32.mrb[23].mxu0  ;;  %v2044_v59 = vpop.f32.mrb[23].mxu1  ;;  %v1748_v47 = vmov (!%p1329_p4), 0.0  }
 0x12d   : > { %2357 = vst [vmem:[#allocation5_spill] sm:$0xff] %v2044_v59  ;;  %v1449_v62 = vpack.c.bf16 %v2042_v58, %v2030_v38  ;;  %v1529_v63 = vpack.c.bf16 %v2044_v59, %v2032_v39  ;;  %970 = vst [vmem:[%s2328_s3] sm:$0x1] (!%p1329_p4), %v1748_v47 }
 0x12e   : > { %1566 = vst [vmem:[%s1892_s17 + $0x58] sm:$0xff] %v1454_v50   ;;  %1582 = vst [vmem:[%s1892_s17 + $0xd8] sm:$0xff] %v1534_v51  }
 0x12f   : > { %1565 = vst [vmem:[%s1892_s17 + $0x50] sm:$0xff] %v1449_v62   ;;  %1581 = vst [vmem:[%s1892_s17 + $0xd0] sm:$0xff] %v1529_v63  }
 0x130   : > { %971 = vst [vmem:[%s2329_s4] sm:$0x1] (!%p1329_p4), %v1748_v47 }
 0x131   : > { %v2054_v6 = vpop.f32.mrb[24].mxu0  ;;  %v2056_v7 = vpop.f32.mrb[24].mxu1 }
 0x132   : > { %2358 = vst [vmem:[#allocation6_spill] sm:$0xff] %v2056_v7  ;;  %v2058_v10 = vpop.f32.mrb[25].mxu0  ;;  %v2060_v11 = vpop.f32.mrb[25].mxu1 }
 0x133   : > { %2359 = vst [vmem:[#allocation7_spill] sm:$0xff] %v2060_v11  ;;  %v2062_v18 = vpop.f32.mrb[26].mxu0  ;;  %v2064_v19 = vpop.f32.mrb[26].mxu1 }
 0x134   : > { %2360 = vst [vmem:[#allocation8_spill] sm:$0xff] %v2064_v19  ;;  %v1464_v22 = vpack.c.bf16 %v2062_v18, %v2054_v6  ;;  %v1544_v23 = vpack.c.bf16 %v2064_v19, %v2056_v7  ;;  %v2070_v30 = vpop.f32.mrb[27].mxu0  ;;  %v2072_v31 = vpop.f32.mrb[27].mxu1 }
 0x135   : > { %2361 = vst [vmem:[#allocation9_spill] sm:$0xff] %v2072_v31  ;;  %v1459_v34 = vpack.c.bf16 %v2070_v30, %v2058_v10  ;;  %v1539_v35 = vpack.c.bf16 %v2072_v31, %v2060_v11 }
 0x136   : > { %1568 = vst [vmem:[%s1892_s17 + $0x68] sm:$0xff] %v1464_v22   ;;  %1584 = vst [vmem:[%s1892_s17 + $0xe8] sm:$0xff] %v1544_v23  }
 0x137   : > { %1567 = vst [vmem:[%s1892_s17 + $0x60] sm:$0xff] %v1459_v34   ;;  %1583 = vst [vmem:[%s1892_s17 + $0xe0] sm:$0xff] %v1539_v35  }
 0x139   : > { %v2082_v50 = vpop.f32.mrb[28].mxu0  ;;  %v2084_v51 = vpop.f32.mrb[28].mxu1  ;;  %969 = sbr.rel (%p1329_p4) target bundleno = 320 (0x140), region = 32 }
 0x13a   : > { %2362 = vst [vmem:[#allocation10_spill] sm:$0xff] %v2084_v51  ;;  %v2086_v62 = vpop.f32.mrb[29].mxu0  ;;  %v2088_v63 = vpop.f32.mrb[29].mxu1 }
 0x13b   : > { %2363 = vst [vmem:[#allocation11_spill] sm:$0xff] %v2088_v63  ;;  %v2090_v19 = vpop.f32.mrb[30].mxu0  ;;  %v2092_v7 = vpop.f32.mrb[30].mxu1 }
 0x13c   : > { %2364 = vst [vmem:[#allocation12_spill] sm:$0xff] %v2092_v7  ;;  %v1474_v22 = vpack.c.bf16 %v2090_v19, %v2082_v50  ;;  %v1554_v23 = vpack.c.bf16 %v2092_v7, %v2084_v51  ;;  %v2098_v34 = vpop.f32.mrb[31].mxu0  ;;  %v2100_v35 = vpop.f32.mrb[31].mxu1 }
 0x13d   : > { %2365 = vst [vmem:[#allocation13_spill] sm:$0xff] %v2100_v35  ;;  %v1469_v31 = vpack.c.bf16 %v2098_v34, %v2086_v62  ;;  %v1549_v11 = vpack.c.bf16 %v2100_v35, %v2088_v63 }
 0x13e   : > { %1570 = vst [vmem:[%s1892_s17 + $0x78] sm:$0xff] %v1474_v22   ;;  %1586 = vst [vmem:[%s1892_s17 + $0xf8] sm:$0xff] %v1554_v23  }
 0x13f   : > { %1569 = vst [vmem:[%s1892_s17 + $0x70] sm:$0xff] %v1469_v31   ;;  %1585 = vst [vmem:[%s1892_s17 + $0xf0] sm:$0xff] %v1549_v11  }
 0x140 PF: > { %v973_v22 = vadd.f32 %v1902_v48, %v1885_v42  ;;  %v1045_v47 = vmul.f32 %v1885_v42, %v1885_v42  ;;  %v1046_v37 = vmul.f32 %v1902_v48, %v1902_v48  ;;  %v1050_v48 = vmul.f32 %v1930_v60, %v1930_v60 }
 0x142   : > { %v974_v31 = vadd.f32 %v1881_v40, %v973_v22 }
 0x144   : > { %v975_v11 = vadd.f32 %v1894_v44, %v974_v31  ;;  %v1047_v31 = vmul.f32 %v1881_v40, %v1881_v40 }
 0x146   : > { %v976_v23 = vadd.f32 %v975_v11, %v1918_v54 }
 0x148   : > { %v977_v7 = vadd.f32 %v976_v23, %v1930_v60  ;;  %v1109_v23 = vadd.f32 %v1046_v37, %v1045_v47  ;;  %v1052_v37 = vmul.f32 %v1922_v56, %v1922_v56 }
 0x14a   : > { %v978_v51 = vadd.f32 %v1914_v52, %v977_v7  ;;  %v1048_v7 = vmul.f32 %v1894_v44, %v1894_v44  ;;  %v1110_v42 = vadd.f32 %v1109_v23, %v1047_v31  ;;  %v1053_v31 = vmul.f32 %v1946_v2, %v1946_v2 }
 0x14b   : > { %v1055_v23 = vmul.f32 %v1942_v0, %v1942_v0 }
 0x14c   : > { %v979_v35 = vadd.f32 %v1922_v56, %v978_v51 }
 0x14e   : > { %v980_v63 = vadd.f32 %v979_v35, %v1946_v2  ;;  %v1049_v35 = vmul.f32 %v1918_v54, %v1918_v54 }
 0x150   : > { %v981_v22 = vadd.f32 %v980_v63, %v1958_v8  ;;  %v1111_v63 = vadd.f32 %v1110_v42, %v1048_v7  ;;  %v1057_v42 = vmul.f32 %v1974_v14, %v1974_v14 }
 0x152   : > { %v982_v11 = vadd.f32 %v1942_v0, %v981_v22  ;;  %v1051_v22 = vmul.f32 %v1914_v52, %v1914_v52  ;;  %v1112_v39 = vadd.f32 %v1111_v63, %v1049_v35  ;;  %v1058_v63 = vmul.f32 %v1986_v20, %v1986_v20 }
 0x154   : > { %v983_v51 = vadd.f32 %v1950_v4, %v982_v11  ;;  %v1113_v47 = vadd.f32 %v1112_v39, %v1050_v48  ;;  %v1056_v39 = vmul.f32 %v1950_v4, %v1950_v4 }
 0x156   : > { %v984_v59 = vadd.f32 %v983_v51, %v1974_v14  ;;  %v1114_v11 = vadd.f32 %v1113_v47, %v1051_v22  ;;  %v1059_v22 = vmul.f32 %v1970_v12, %v1970_v12 }
 0x158   : > { %v985_v40 = vadd.f32 %v984_v59, %v1986_v20  ;;  %v1054_v59 = vmul.f32 %v1958_v8, %v1958_v8  ;;  %v1115_v7 = vadd.f32 %v1114_v11, %v1052_v37  ;;  %v1060_v37 = vmul.f32 %v1978_v16, %v1978_v16 }
 0x159   : > { %v1062_v11 = vmul.f32 %v2014_v32, %v2014_v32 }
 0x15a   : > { %v986_v44 = vadd.f32 %v1970_v12, %v985_v40  ;;  %v1116_v51 = vadd.f32 %v1115_v7, %v1053_v31 }
 0x15c   : > { %v987_v54 = vadd.f32 %v1978_v16, %v986_v44  ;;  %v1117_v35 = vadd.f32 %v1116_v51, %v1054_v59  ;;  %v1063_v59 = vmul.f32 %v1998_v24, %v1998_v24  ;;  %v1065_v51 = vmul.f32 %v2030_v38, %v2030_v38 }
 0x15e   : > { %v988_v60 = vadd.f32 %v987_v54, %v2002_v26  ;;  %v1118_v48 = vadd.f32 %v1117_v35, %v1055_v23  ;;  %v1061_v54 = vmul.f32 %v2002_v26, %v2002_v26 }
 0x160   : > { %v989_v52 = vadd.f32 %v988_v60, %v2014_v32  ;;  %v1119_v40 = vadd.f32 %v1118_v48, %v1056_v39  ;;  %v1066_v39 = vmul.f32 %v2042_v58, %v2042_v58  ;;  %v1068_v48 = vmul.f32 %v2034_v46, %v2034_v46 }
 0x162   : > { %v990_v56 = vadd.f32 %v1998_v24, %v989_v52  ;;  %v1120_v44 = vadd.f32 %v1119_v40, %v1057_v42  ;;  %v1064_v52 = vmul.f32 %v2006_v28, %v2006_v28 }
 0x164   : > { %v991_v2 = vadd.f32 %v2006_v28, %v990_v56  ;;  %v1121_v47 = vadd.f32 %v1120_v44, %v1058_v63  ;;  %v1069_v63 = vmul.f32 %v2058_v10, %v2058_v10  ;;  %v1071_v44 = vmul.f32 %v2054_v6, %v2054_v6 }
 0x166   : > { %v992_v8 = vadd.f32 %v991_v2, %v2030_v38  ;;  %v1122_v31 = vadd.f32 %v1121_v47, %v1059_v22  ;;  %v1067_v2 = vmul.f32 %v2026_v36, %v2026_v36 }
 0x168   : > { %v993_v0 = vadd.f32 %v992_v8, %v2042_v58  ;;  %v1123_v60 = vadd.f32 %v1122_v31, %v1060_v37  ;;  %v1072_v37 = vmul.f32 %v2062_v18, %v2062_v18  ;;  %v1074_v31 = vmul.f32 %v2098_v34, %v2098_v34 }
 0x16a   : > { %v994_v4 = vadd.f32 %v2026_v36, %v993_v0  ;;  %v1124_v7 = vadd.f32 %v1123_v60, %v1061_v54  ;;  %v1070_v0 = vmul.f32 %v2070_v30, %v2070_v30 }
 0x16c   : > { %v995_v14 = vadd.f32 %v2034_v46, %v994_v4  ;;  %v1125_v23 = vadd.f32 %v1124_v7, %v1062_v11  ;;  %v1075_v11 = vmul.f32 %v2082_v50, %v2082_v50  ;;  %v1077_v7 = vmul.f32 %v1887_v43, %v1887_v43 }
 0x16e   : > { %v996_v20 = vadd.f32 %v995_v14, %v2058_v10  ;;  %v1126_v56 = vadd.f32 %v1125_v23, %v1063_v59  ;;  %v1073_v14 = vmul.f32 %v2086_v62, %v2086_v62 }
 0x170   : > { %v997_v12 = vadd.f32 %v996_v20, %v2070_v30  ;;  %v1127_v35 = vadd.f32 %v1126_v56, %v1064_v52  ;;  %v1078_v52 = vmul.f32 %v1904_v49, %v1904_v49  ;;  %v1080_v56 = vmul.f32 %v1896_v45, %v1896_v45 }
 0x172   : > { %v998_v16 = vadd.f32 %v2054_v6, %v997_v12  ;;  %v1128_v42 = vadd.f32 %v1127_v35, %v1065_v51  ;;  %v1076_v12 = vmul.f32 %v2090_v19, %v2090_v19 }
 0x174   : > { %v999_v26 = vadd.f32 %v2062_v18, %v998_v16  ;;  %v1129_v8 = vadd.f32 %v1128_v42, %v1066_v39  ;;  %v1081_v39 = vmul.f32 %v1920_v55, %v1920_v55  ;;  %v1083_v42 = vmul.f32 %v1916_v53, %v1916_v53 }
 0x176   : > { %v1000_v32 = vadd.f32 %v999_v26, %v2086_v62  ;;  %v1130_v40 = vadd.f32 %v1129_v8, %v1067_v2  ;;  %v1079_v26 = vmul.f32 %v1883_v41, %v1883_v41 }
 0x178   : > { %v1001_v24 = vadd.f32 %v1000_v32, %v2098_v34  ;;  %v1131_v22 = vadd.f32 %v1130_v40, %v1068_v48  ;;  %v1084_v48 = vmul.f32 %v1924_v57, %v1924_v57  ;;  %v1086_v40 = vmul.f32 %v1960_v9, %v1960_v9 }
 0x17a   : > { %v1002_v28 = vadd.f32 %v2082_v50, %v1001_v24  ;;  %v1132_v4 = vadd.f32 %v1131_v22, %v1069_v63  ;;  %v1082_v24 = vmul.f32 %v1932_v61, %v1932_v61 }
 0x17c   : > { %v1003_v38 = vadd.f32 %v2090_v19, %v1002_v28  ;;  %v1133_v47 = vadd.f32 %v1132_v4, %v1070_v0  ;;  %v1087_v0 = vmul.f32 %v1944_v1, %v1944_v1  ;;  %v1089_v4 = vmul.f32 %v1976_v15, %v1976_v15 }
 0x17e   : > { %v1004_v58 = vadd.f32 %v1003_v38, %v1887_v43  ;;  %v1134_v54 = vadd.f32 %v1133_v47, %v1071_v44  ;;  %v1085_v38 = vmul.f32 %v1948_v3, %v1948_v3  ;;  %v1090_v47 = vmul.f32 %v1988_v21, %v1988_v21 }
 0x180   : > { %v1005_v36 = vadd.f32 %v1004_v58, %v1904_v49  ;;  %v1135_v20 = vadd.f32 %v1134_v54, %v1072_v37  ;;  %v1091_v54 = vmul.f32 %v1972_v13, %v1972_v13 }
 0x182   : > { %v1006_v46 = vadd.f32 %v1883_v41, %v1005_v36  ;;  %v1136_v60 = vadd.f32 %v1135_v20, %v1073_v14  ;;  %v1088_v36 = vmul.f32 %v1952_v5, %v1952_v5  ;;  %v1092_v20 = vmul.f32 %v1980_v17, %v1980_v17 }
 0x184   : > { %v1007_v10 = vadd.f32 %v1896_v45, %v1006_v46  ;;  %v1137_v59 = vadd.f32 %v1136_v60, %v1074_v31  ;;  %v1093_v60 = vmul.f32 %v2004_v27, %v2004_v27 }
 0x186   : > { %v1008_v30 = vadd.f32 %v1007_v10, %v1920_v55  ;;  %v1138_v16 = vadd.f32 %v1137_v59, %v1075_v11  ;;  %v1094_v59 = vmul.f32 %v2016_v33, %v2016_v33 }
 0x188   : > { %v1009_v6 = vadd.f32 %v1008_v30, %v1932_v61  ;;  %v1139_v23 = vadd.f32 %v1138_v16, %v1076_v12  ;;  %v1095_v16 = vmul.f32 %v2000_v25, %v2000_v25 }
 0x18a   : > { %v1010_v18 = vadd.f32 %v1916_v53, %v1009_v6  ;;  %v1140_v51 = vadd.f32 %v1139_v23, %v1077_v7  ;;  %v1096_v23 = vmul.f32 %v2008_v29, %v2008_v29 }
 0x18c   : > { %v1011_v62 = vadd.f32 %v1924_v57, %v1010_v18  ;;  %v1141_v32 = vadd.f32 %v1140_v51, %v1078_v52 }
 0x18e   : > { %v1012_v34 = vadd.f32 %v1011_v62, %v1948_v3  ;;  %v1142_v35 = vadd.f32 %v1141_v32, %v1079_v26 }
 0x190   : > { %v1013_v50 = vadd.f32 %v1012_v34, %v1960_v9  ;;  %v1143_v2 = vadd.f32 %v1142_v35, %v1080_v56  ;;  %v2366_v9 = vld [vmem:[#allocation3_spill] sm:$0xff] }
 0x191   : > { %v1097_v51 = vmul.f32 %v2366_v9, %v2366_v9 }
 0x192   : > { %v1014_v19 = vadd.f32 %v1944_v1, %v1013_v50  ;;  %v1144_v28 = vadd.f32 %v1143_v2, %v1081_v39  ;;  %v2367_v1 = vld [vmem:[#allocation5_spill] sm:$0xff] }
 0x193   : > { %v1098_v32 = vmul.f32 %v2367_v1, %v2367_v1 }
 0x194   : > { %v1015_v43 = vadd.f32 %v1952_v5, %v1014_v19  ;;  %v1145_v8 = vadd.f32 %v1144_v28, %v1082_v24  ;;  %v2368_v5 = vld [vmem:[#allocation2_spill] sm:$0xff] }
 0x195   : > { %v1099_v35 = vmul.f32 %v2368_v5, %v2368_v5 }
 0x196   : > { %v1016_v49 = vadd.f32 %v1015_v43, %v1976_v15  ;;  %v1146_v63 = vadd.f32 %v1145_v8, %v1083_v42  ;;  %v2369_v15 = vld [vmem:[#allocation4_spill] sm:$0xff] }
 0x197   : > { %v1100_v2 = vmul.f32 %v2369_v15, %v2369_v15  ;;  %v2377_v42 = vld [vmem:[#allocation12_spill] sm:$0xff] }
 0x198   : > { %v1017_v41 = vadd.f32 %v1016_v49, %v1988_v21  ;;  %v1147_v58 = vadd.f32 %v1146_v63, %v1084_v48  ;;  %v2370_v21 = vld [vmem:[#allocation7_spill] sm:$0xff] }
 0x19a   : > { %v1018_v45 = vadd.f32 %v1972_v13, %v1017_v41  ;;  %v1148_v22 = vadd.f32 %v1147_v58, %v1085_v38  ;;  %v2371_v13 = vld [vmem:[#allocation9_spill] sm:$0xff] }
 0x19c   : > { %v1019_v55 = vadd.f32 %v1980_v17, %v1018_v45  ;;  %v1149_v44 = vadd.f32 %v1148_v22, %v1086_v40  ;;  %v2372_v17 = vld [vmem:[#allocation6_spill] sm:$0xff]  ;;  %v1101_v45 = vmul.f32 %v2370_v21, %v2370_v21 }
 0x19e   : > { %v1020_v61 = vadd.f32 %v1019_v55, %v2004_v27  ;;  %v1150_v46 = vadd.f32 %v1149_v44, %v1087_v0  ;;  %v2373_v27 = vld [vmem:[#allocation8_spill] sm:$0xff]  ;;  %v1102_v55 = vmul.f32 %v2371_v13, %v2371_v13 }
 0x1a0   : > { %v1021_v53 = vadd.f32 %v1020_v61, %v2016_v33  ;;  %v1151_v10 = vadd.f32 %v1150_v46, %v1088_v36  ;;  %v2374_v33 = vld [vmem:[#allocation11_spill] sm:$0xff]  ;;  %v1103_v61 = vmul.f32 %v2372_v17, %v2372_v17  ;;  %v972_v46 = vld [vmem:[%s2328_s3] sm:$0x1] }
 0x1a2   : > { %v1022_v57 = vadd.f32 %v2000_v25, %v1021_v53  ;;  %v1152_v30 = vadd.f32 %v1151_v10, %v1089_v4  ;;  %v2375_v25 = vld [vmem:[#allocation13_spill] sm:$0xff]  ;;  %v1104_v53 = vmul.f32 %v2373_v27, %v2373_v27 }
 0x1a4   : > { %v1023_v3 = vadd.f32 %v2008_v29, %v1022_v57  ;;  %v1153_v6 = vadd.f32 %v1152_v30, %v1090_v47  ;;  %v2376_v29 = vld [vmem:[#allocation10_spill] sm:$0xff]  ;;  %v1105_v57 = vmul.f32 %v2374_v33, %v2374_v33 }
 0x1a6   : > { %v1024_v37 = vadd.f32 %v1023_v3, %v2366_v9  ;;  %v1154_v18 = vadd.f32 %v1153_v6, %v1091_v54  ;;  %v1106_v3 = vmul.f32 %v2375_v25, %v2375_v25 }
 0x1a8   : > { %v1025_v14 = vadd.f32 %v1024_v37, %v2367_v1  ;;  %v1155_v62 = vadd.f32 %v1154_v18, %v1092_v20  ;;  %v1107_v37 = vmul.f32 %v2376_v29, %v2376_v29  ;;  %v1108_v1 = vmul.f32 %v2377_v42, %v2377_v42 }
 0x1aa   : > { %v1026_v31 = vadd.f32 %v2368_v5, %v1025_v14  ;;  %v1156_v34 = vadd.f32 %v1155_v62, %v1093_v60 }
 0x1ac   : > { %v1027_v11 = vadd.f32 %v2369_v15, %v1026_v31  ;;  %v1157_v50 = vadd.f32 %v1156_v34, %v1094_v59 }
 0x1ae   : > { %v1028_v12 = vadd.f32 %v1027_v11, %v2370_v21  ;;  %v1158_v19 = vadd.f32 %v1157_v50, %v1095_v16  ;;  %v1044_v11 = vld [vmem:[%s2329_s4] sm:$0x1] }
 0x1b0   : > { %v1029_v7 = vadd.f32 %v1028_v12, %v2371_v13  ;;  %v1159_v43 = vadd.f32 %v1158_v19, %v1096_v23 }
 0x1b2   : > { %v1030_v52 = vadd.f32 %v2372_v17, %v1029_v7  ;;  %v1160_v49 = vadd.f32 %v1159_v43, %v1097_v51 }
 0x1b4   : > { %v1031_v26 = vadd.f32 %v2373_v27, %v1030_v52  ;;  %v1161_v41 = vadd.f32 %v1160_v49, %v1098_v32 }
 0x1b6   : > { %v1032_v56 = vadd.f32 %v1031_v26, %v2374_v33  ;;  %v1162_v48 = vadd.f32 %v1161_v41, %v1099_v35 }
 0x1b8   : > { %v1033_v39 = vadd.f32 %v1032_v56, %v2375_v25  ;;  %v1163_v38 = vadd.f32 %v1162_v48, %v1100_v2 }
 0x1ba   : > { %v1034_v24 = vadd.f32 %v2376_v29, %v1033_v39  ;;  %v1164_v40 = vadd.f32 %v1163_v38, %v1101_v45 }
 0x1bc   : > { %v1035_v28 = vadd.f32 %v2377_v42, %v1034_v24  ;;  %v1165_v0 = vadd.f32 %v1164_v40, %v1102_v55 }
 0x1be   : > { %v1036_v8 = vrot.slane %v1035_v28, 4  ;;  %v1166_v36 = vadd.f32 %v1165_v0, %v1103_v61 }
 0x1c0   : > { %v1037_v63 = vadd.f32 %v1036_v8, %v1035_v28  ;;  %v1167_v4 = vadd.f32 %v1166_v36, %v1104_v53 }
 0x1c2   : > { %v1038_v58 = vrot.slane %v1037_v63, 2  ;;  %v1168_v47 = vadd.f32 %v1167_v4, %v1105_v57 }
 0x1c4   : > { %v1039_v22 = vadd.f32 %v1038_v58, %v1037_v63  ;;  %v1169_v14 = vadd.f32 %v1168_v47, %v1106_v3 }
 0x1c6   : > { %v1040_v44 = vrot.slane %v1039_v22, 1  ;;  %v1170_v54 = vadd.f32 %v1169_v14, %v1107_v37 }
 0x1c8   : > { %v1041_v9 = vadd.f32 %v1040_v44, %v1039_v22  ;;  %v1171_v30 = vadd.f32 %v1170_v54, %v1108_v1 }
 0x1ca   : > { %v1042_v10 = vadd.f32 %v1041_v9, %v972_v46  ;;  %v1172_v5 = vrot.slane %v1171_v30, 4 }
 0x1cc   : > { %1043 = vst [vmem:[%s2328_s3] sm:$0x1] %v1042_v10  ;;  %v1173_v31 = vadd.f32 %v1172_v5, %v1171_v30 }
 0x1ce   : > { %v1174_v20 = vrot.slane %v1173_v31, 2 }
 0x1d0   : > { %v1175_v6 = vadd.f32 %v1174_v20, %v1173_v31 }
 0x1d2   : > { %v1176_v15 = vrot.slane %v1175_v6, 1 }
 0x1d4   : > { %v1177_v60 = vadd.f32 %v1176_v15, %v1175_v6 }
 0x1d6   : > { %v1178_v18 = vadd.f32 %v1177_v60, %v1044_v11 }
 0x1d8   : > { %1179 = vst [vmem:[%s2329_s4] sm:$0x1] %v1178_v18 }
 0x1d9 PF: > { %s15_s15 = sadd.s32 1, %s1746_s15  }
 0x1da   : > { %p12_p5 = scmp.ge.s32.totalorder %s15_s15, 6  }
 0x1dc   :  { %14 = sbr.rel (!%p12_p5) target bundleno = 1 (0x1), region = 78 }

// kernel: bottleneck_forward.5
= control target key start
LH: loop header
LB: loop body
LE: loop exit
PB: predicated region body
PF: predicated region fallthrough
CT: control target
= control target key end

     0   :  { %s5807_s21 = smov 0   ;;  %s7871_s0 = inlined_call_operand.vmem [shape: bf16[2,16,16,512], index: 0, kind: input, shape index: {}]   ;;  %s7872_s1 = inlined_call_operand.vmem [shape: f32[1,512], index: 1, kind: input, shape index: {}]   ;;  %s7873_s2 = inlined_call_operand.vmem [shape: f32[1,512], index: 2, kind: input, shape index: {}]   ;;  %s7874_s3 = inlined_call_operand.vmem [shape: bf16[4,512,128], index: 3, kind: input, shape index: {}]   ;;  %s7875_s4 = inlined_call_operand.vmem [shape: bf16[2,16,16,128], index: 4, kind: output, shape index: {0}]   ;;  %s7876_s5 = inlined_call_operand.vmem [shape: f32[1,128], index: 5, kind: output, shape index: {1}]   ;;  %s7877_s6 = inlined_call_operand.vmem [shape: f32[1,128], index: 6, kind: output, shape index: {2}]  }
   0x1 LB: > { %s5813_s22 = sadd.s32 4294967295, %s5768_s21   ;;  %p4239_p0 = scmp.ge.s32.totalorder %s5768_s21, 1  ;;  %s5768_s21 = sphi %s5807_s21, %s17_s21  }
   0x2   : > { %p207_p1 = scmp.lt.s32.totalorder %s5768_s21, 3 }
   0x4   : > { %p208_p2 = pnand %p4239_p0, %p207_p1 }
   0x6   : > { %211 = sbr.rel (%p208_p2) target bundleno = 871 (0x367), region = 36 }
   0xd   : > { %v5634_v0 = vld [vmem:[%s7874_s3 + $0x140] sm:$0xff]   ;;  %v7878_v2 = vmov 0   ;;  %v5638_v5 = vld [vmem:[%s7874_s3 + $0x148] sm:$0xff]   ;;  %v5642_v9 = vld [vmem:[%s7874_s3 + $0x150] sm:$0xff]   ;;  %p237_p3 = scmp.lt.s32.totalorder %s5813_s22, 1  ;;  %v442_v26 = vlaneseq  ;;  %vm1444_vm0 = vcmask 1040384  }
   0xe   : > { %v5635_v1 = vld [vmem:[%s7874_s3 + $0x1c0] sm:$0xff]   ;;  %1864 = vmatprep.mubr.bf16.mxu0 %v7878_v2  ;;  %2025 = vmatprep.mubr.bf16.mxu1 %v7878_v2  ;;  %v5639_v6 = vld [vmem:[%s7874_s3 + $0x1c8] sm:$0xff]   ;;  %v5643_v10 = vld [vmem:[%s7874_s3 + $0x1d0] sm:$0xff]   ;;  %vm1445_vm1 = vsmask.f32 256  ;;  %p4596_p4 = scmp.ne.s32.totalorder %s5813_s22, 0 }
   0xf   : > { %4728 = vmatprep.subr.bf16.mxu0 %v5634_v0  ;;  %v5636_v3 = vld [vmem:[%s7874_s3 + $0x100] sm:$0xff]   ;;  %4840 = vmatprep.subr.bf16.mxu1 %v5635_v1  ;;  %v5640_v7 = vld [vmem:[%s7874_s3 + $0x108] sm:$0xff]   ;;  %v5644_v11 = vld [vmem:[%s7874_s3 + $0x110] sm:$0xff]   ;;  %s5902_s9 = scalar_select %p237_p3, %s5813_s22, 1  ;;  %v5910_v31 = vshrl.u32 %v442_v26, 7 }
  0x10   : > { %v5637_v4 = vld [vmem:[%s7874_s3 + $0x180] sm:$0xff]   ;;  %4729 = vmatpush3.bf16.msra.mxu0 %v5636_v3  ;;  %v5641_v8 = vld [vmem:[%s7874_s3 + $0x188] sm:$0xff]   ;;  %v5645_v12 = vld [vmem:[%s7874_s3 + $0x190] sm:$0xff]  }
  0x11   : > { %4841 = vmatpush3.bf16.msra.mxu1 %v5637_v4  ;;  %4730 = vmatprep.subr.bf16.mxu0 %v5638_v5  ;;  %v5646_v13 = vld [vmem:[%s7874_s3 + $0x158] sm:$0xff]   ;;  %v5650_v17 = vld [vmem:[%s7874_s3 + $0x160] sm:$0xff]   ;;  %v5654_v21 = vld [vmem:[%s7874_s3 + $0x168] sm:$0xff]   ;;  %s4599_s18 = sshll.u32 %s5902_s9, 9  ;;  %v448_v36 = vsub.s32 1, %v5910_v31  ;;  %v456_v38 = vsub.s32 3, %v5910_v31 }
  0x12   : > { %4842 = vmatprep.subr.bf16.mxu1 %v5639_v6  ;;  %v5647_v14 = vld [vmem:[%s7874_s3 + $0x1d8] sm:$0xff]   ;;  %v5651_v18 = vld [vmem:[%s7874_s3 + $0x1e0] sm:$0xff]   ;;  %v5655_v22 = vld [vmem:[%s7874_s3 + $0x1e8] sm:$0xff]   ;;  %s5932_s29 = scalar_lea.vmem %s7871_s0, %s4599_s18  ;;  %v444_v44 = vsub.s32 0, %v5910_v31  ;;  %v452_v45 = vsub.s32 2, %v5910_v31 }
  0x13   : > { %v5648_v15 = vld [vmem:[%s7874_s3 + $0x118] sm:$0xff]   ;;  %v5652_v19 = vld [vmem:[%s7874_s3 + $0x120] sm:$0xff]   ;;  %v5656_v23 = vld [vmem:[%s7874_s3 + $0x128] sm:$0xff]  }
  0x14   : > { %4731 = vmatpush3.bf16.msra.mxu0 %v5640_v7  ;;  %v5649_v16 = vld [vmem:[%s7874_s3 + $0x198] sm:$0xff]   ;;  %v5653_v20 = vld [vmem:[%s7874_s3 + $0x1a0] sm:$0xff]   ;;  %v5657_v24 = vld [vmem:[%s7874_s3 + $0x1a8] sm:$0xff]  }
  0x15   : > { %4843 = vmatpush3.bf16.msra.mxu1 %v5641_v8  ;;  %4732 = vmatprep.subr.bf16.mxu0 %v5642_v9  ;;  %v5658_v25 = vld [vmem:[%s7874_s3 + $0x170] sm:$0xff]   ;;  %v5662_v30 = vld [vmem:[%s7874_s3 + $0x178] sm:$0xff]   ;;  %v5666_v35 = vld [vmem:[%s7874_s3 + $0x40] sm:$0xff]  }
  0x16   : > { %4844 = vmatprep.subr.bf16.mxu1 %v5643_v10  ;;  %v5659_v27 = vld [vmem:[%s7874_s3 + $0x1f0] sm:$0xff]   ;;  %v5663_v32 = vld [vmem:[%s7874_s3 + $0x1f8] sm:$0xff]   ;;  %v5667_v37 = vld [vmem:[%s7874_s3 + $0xc0] sm:$0xff]  }
  0x17   : > { %v5660_v28 = vld [vmem:[%s7874_s3 + $0x130] sm:$0xff]   ;;  %v5664_v33 = vld [vmem:[%s7874_s3 + $0x138] sm:$0xff]   ;;  %v5668_v39 = vld [vmem:[%s7874_s3] sm:$0xff]  }
  0x18   : > { %4733 = vmatpush3.bf16.msra.mxu0 %v5644_v11  ;;  %v5661_v29 = vld [vmem:[%s7874_s3 + $0x1b0] sm:$0xff]   ;;  %v5665_v34 = vld [vmem:[%s7874_s3 + $0x1b8] sm:$0xff]   ;;  %v5669_v40 = vld [vmem:[%s7874_s3 + $0x80] sm:$0xff]  }
  0x19   : > { %4845 = vmatpush3.bf16.msra.mxu1 %v5645_v12  ;;  %4734 = vmatprep.subr.bf16.mxu0 %v5646_v13  ;;  %v248_v41 = vld [vmem:[%s5932_s29] sm:$0xff]  ;;  %v250_v42 = vld [vmem:[%s5932_s29 + $0x10] sm:$0xff]  ;;  %v249_v50 = vld [vmem:[%s5932_s29 + $0x8] sm:$0xff] }
  0x1a   : > { %4846 = vmatprep.subr.bf16.mxu1 %v5647_v14  ;;  %v440_v43 = vld [vmem:[%s7872_s1] sm:$0xf]  ;;  %v313_v46 = vunpack.c.h.bf16 %v248_v41  ;;  %v317_v47 = vunpack.c.h.bf16 %v250_v42  ;;  %v251_v51 = vld [vmem:[%s5932_s29 + $0x18] sm:$0xff]  ;;  %v315_v54 = vunpack.c.h.bf16 %v249_v50  ;;  %v312_v59 = vunpack.c.l.bf16 %v248_v41  ;;  %v5670_v3 = vld [vmem:[%s7874_s3 + $0x48] sm:$0xff]  }
  0x1b   : > { %v5950_v48 = vrot.slane %v440_v43, %v448_v36  ;;  %v590_v49 = vld [vmem:[%s7873_s2] sm:$0xf]  ;;  %v5957_v52 = vrot.slane %v440_v43, %v456_v38  ;;  %v319_v55 = vunpack.c.h.bf16 %v251_v51  ;;  %v316_v60 = vunpack.c.l.bf16 %v250_v42  ;;  %v5671_v8 = vld [vmem:[%s7874_s3 + $0xc8] sm:$0xff]   ;;  %vm6573_vm2 = vmand %vm1444_vm0, %vm1445_vm1 }
  0x1c   : > { %4735 = vmatpush3.bf16.msra.mxu0 %v5648_v15  ;;  %v5959_v53 = vrot.slane %v590_v49, %v448_v36  ;;  %v5961_v56 = vrot.slane %v590_v49, %v456_v38  ;;  %v5967_v63 = vrot.slane %v440_v43, %v444_v44  ;;  %v5969_v0 = vrot.slane %v590_v49, %v444_v44  ;;  %v252_v1 = vld [vmem:[%s5932_s29 + $0x20] sm:$0xff]  ;;  %v5672_v13 = vld [vmem:[%s7874_s3 + $0x8] sm:$0xff]   ;;  %v5674_v38 = vld [vmem:[%s7874_s3 + $0x50] sm:$0xff]  }
  0x1d   : > { %4847 = vmatpush3.bf16.msra.mxu1 %v5649_v16  ;;  %4736 = vmatprep.subr.bf16.mxu0 %v5650_v17  ;;  %8019 = vst [vmem:[#allocation2_spill] sm:$0xff] %v5950_v48  ;;  %8020 = vst [vmem:[#allocation3_spill] sm:$0xff] %v5957_v52  ;;  %v463_v57 = vmul.f32 %v5950_v48, %v313_v46  ;;  %v467_v58 = vmul.f32 %v5950_v48, %v317_v47  ;;  %v314_v6 = vunpack.c.l.bf16 %v249_v50  ;;  %v5677_v50 = vld [vmem:[%s7874_s3 + $0x90] sm:$0xff]  }
  0x1e   : > { %4848 = vmatprep.subr.bf16.mxu1 %v5651_v18  ;;  %8021 = vst [vmem:[#allocation4_spill] sm:$0xff] %v5959_v53  ;;  %8022 = vst [vmem:[#allocation5_spill] sm:$0xff] %v5961_v56  ;;  %v465_v61 = vmul.f32 %v5957_v52, %v315_v54  ;;  %v469_v62 = vmul.f32 %v5957_v52, %v319_v55  ;;  %v318_v7 = vunpack.c.l.bf16 %v251_v51  ;;  %v254_v18 = vld [vmem:[%s5932_s29 + $0x30] sm:$0xff]  ;;  %v320_v42 = vunpack.c.l.bf16 %v252_v1 }
  0x1f   : > { %8023 = vst [vmem:[#allocation6_spill] sm:$0xff] %v5967_v63  ;;  %8024 = vst [vmem:[#allocation7_spill] sm:$0xff] %v5969_v0  ;;  %v613_v4 = vadd.f32 %v5959_v53, %v463_v57  ;;  %v617_v5 = vadd.f32 %v5959_v53, %v467_v58  ;;  %v462_v11 = vmul.f32 %v5967_v63, %v312_v59  ;;  %v324_v55 = vunpack.c.l.bf16 %v254_v18  ;;  %v256_v58 = vld [vmem:[%s5932_s29 + $0x40] sm:$0xff] }
  0x20   : > { %4737 = vmatpush3.bf16.msra.mxu0 %v5652_v19  ;;  %v615_v9 = vadd.f32 %v5961_v56, %v465_v61  ;;  %v619_v10 = vadd.f32 %v5961_v56, %v469_v62  ;;  %v466_v12 = vmul.f32 %v5967_v63, %v316_v60  ;;  %v5987_v16 = vrot.slane %v440_v43, %v452_v45  ;;  %v5673_v19 = vld [vmem:[%s7874_s3 + $0x88] sm:$0xff]   ;;  %v5675_v43 = vld [vmem:[%s7874_s3 + $0xd0] sm:$0xff]  }
  0x21   : > { %4849 = vmatpush3.bf16.msra.mxu1 %v5653_v20  ;;  %4738 = vmatprep.subr.bf16.mxu0 %v5654_v21  ;;  %v741_v14 = vmax.f32 %v613_v4, 0.0  ;;  %v745_v15 = vmax.f32 %v617_v5, 0.0  ;;  %v5989_v17 = vrot.slane %v590_v49, %v452_v45  ;;  %v5676_v49 = vld [vmem:[%s7874_s3 + $0x10] sm:$0xff]   ;;  %v470_v57 = vmul.f32 %v5967_v63, %v320_v42 }
  0x22   : > { %4850 = vmatprep.subr.bf16.mxu1 %v5655_v22  ;;  %8025 = vst [vmem:[#allocation8_spill] sm:$0xff] %v5987_v16  ;;  %v743_v20 = vmax.f32 %v615_v9, 0.0  ;;  %v747_v21 = vmax.f32 %v619_v10, 0.0  ;;  %v612_v22 = vadd.f32 %v5969_v0, %v462_v11  ;;  %v464_v26 = vmul.f32 %v5987_v16, %v314_v6  ;;  %v258_v6 = vld [vmem:[%s5932_s29 + $0x50] sm:$0xff] }
  0x23   : > { %8026 = vst [vmem:[#allocation9_spill] sm:$0xff] %v5989_v17  ;;  %v474_v4 = vmul.f32 %v5967_v63, %v324_v55  ;;  %v620_v5 = vadd.f32 %v5969_v0, %v470_v57  ;;  %v6085_v55 = vld [vmem:[%s5932_s29 + $0x68] sm:$0xff]  ;;  %v5682_v57 = vld [vmem:[%s7874_s3 + $0x60] sm:$0xff]  }
  0x24   : > { %4739 = vmatpush3.bf16.msra.mxu0 %v5656_v23  ;;  %v616_v23 = vadd.f32 %v5969_v0, %v466_v12  ;;  %v740_v31 = vmax.f32 %v612_v22, 0.0  ;;  %v329_v12 = vunpack.c.h.bf16 %v256_v58  ;;  %v333_v22 = vunpack.c.h.bf16 %v258_v6 }
  0x25   : > { %4851 = vmatpush3.bf16.msra.mxu1 %v5657_v24  ;;  %4740 = vmatprep.subr.bf16.mxu0 %v5658_v25  ;;  %v253_v24 = vld [vmem:[%s5932_s29 + $0x28] sm:$0xff]  ;;  %v5998_v25 = vpack.c.bf16 %v745_v15, %v741_v14 }
  0x26   : > { %4852 = vmatprep.subr.bf16.mxu1 %v5659_v27  ;;  %v468_v27 = vmul.f32 %v5987_v16, %v318_v7  ;;  %v322_v62 = vunpack.c.l.bf16 %v253_v24  ;;  %v257_v7 = vld [vmem:[%s5932_s29 + $0x48] sm:$0xff] }
  0x27   : > { %8027 = vst [vmem:[#allocation10_spill] sm:$0xff] %v5998_v25 }
  0x28   : > { %4741 = vmatpush3.bf16.msra.mxu0 %v5660_v28  ;;  %v321_v28 = vunpack.c.h.bf16 %v252_v1  ;;  %v472_v11 = vmul.f32 %v5987_v16, %v322_v62 }
  0x29   : > { %4853 = vmatpush3.bf16.msra.mxu1 %v5661_v29  ;;  %4742 = vmatprep.subr.bf16.mxu0 %v5662_v30  ;;  %v255_v29 = vld [vmem:[%s5932_s29 + $0x38] sm:$0xff]  ;;  %v6003_v30 = vpack.c.bf16 %v747_v21, %v743_v20 }
  0x2a   : > { %4854 = vmatprep.subr.bf16.mxu1 %v5663_v32  ;;  %v744_v32 = vmax.f32 %v616_v23, 0.0  ;;  %v471_v36 = vmul.f32 %v5950_v48, %v321_v28  ;;  %v327_v41 = vunpack.c.h.bf16 %v255_v29  ;;  %v326_v10 = vunpack.c.l.bf16 %v255_v29 }
  0x2b   : > { %8028 = vst [vmem:[#allocation11_spill] sm:$0xff] %v6003_v30  ;;  %v622_v21 = vadd.f32 %v5989_v17, %v472_v11  ;;  %v479_v23 = vmul.f32 %v5950_v48, %v329_v12  ;;  %v331_v28 = vunpack.c.h.bf16 %v257_v7  ;;  %v5684_v12 = vld [vmem:[%s7874_s3 + $0x20] sm:$0xff]  }
  0x2c   : > { %4743 = vmatpush3.bf16.msra.mxu0 %v5664_v33  ;;  %v325_v33 = vunpack.c.h.bf16 %v254_v18  ;;  %v621_v46 = vadd.f32 %v5959_v53, %v471_v36  ;;  %v477_v54 = vmul.f32 %v5957_v52, %v327_v41  ;;  %v624_v18 = vadd.f32 %v5969_v0, %v474_v4  ;;  %v5681_v36 = vld [vmem:[%s7874_s3 + $0x98] sm:$0xff]  }
  0x2d   : > { %4855 = vmatpush3.bf16.msra.mxu1 %v5665_v34  ;;  %4952 = vmatprep.subr.bf16.mxu0 %v5666_v35  ;;  %v614_v34 = vadd.f32 %v5989_v17, %v464_v26  ;;  %v618_v35 = vadd.f32 %v5989_v17, %v468_v27  ;;  %v476_v20 = vmul.f32 %v5987_v16, %v326_v10  ;;  %v328_v41 = vunpack.c.l.bf16 %v256_v58 }
  0x2e   : > { %5064 = vmatprep.subr.bf16.mxu1 %v5667_v37  ;;  %v323_v37 = vunpack.c.h.bf16 %v253_v24  ;;  %v749_v60 = vmax.f32 %v621_v46, 0.0  ;;  %v5679_v24 = vld [vmem:[%s7874_s3 + $0xd8] sm:$0xff]   ;;  %v752_v27 = vmax.f32 %v624_v18, 0.0  ;;  %v260_v46 = vld [vmem:[%s5932_s29 + $0x60] sm:$0xff] }
  0x2f   : > { %1865 = vmatmul.mubr.bf16.vlgmr.msra.gmra.mrb[0].mxu0 %v7878_v2  ;;  %v742_v44 = vmax.f32 %v614_v34, 0.0  ;;  %v746_v45 = vmax.f32 %v618_v35, 0.0  ;;  %v483_v34 = vmul.f32 %v5950_v48, %v333_v22  ;;  %v629_v35 = vadd.f32 %v5959_v53, %v479_v23 }
  0x30   : > { %2026 = vmatmul.mubr.bf16.vlgmr.msra.gmra.mrb[0].mxu1 %v7878_v2  ;;  %4953 = vmatpush3.bf16.msra.mxu0 %v5668_v39  ;;  %v6013_v39 = vpack.c.bf16 %v744_v32, %v740_v31  ;;  %v473_v47 = vmul.f32 %v5957_v52, %v323_v37  ;;  %v5680_v31 = vld [vmem:[%s7874_s3 + $0x18] sm:$0xff]   ;;  %v626_v32 = vadd.f32 %v5989_v17, %v476_v20  ;;  %v337_v11 = vunpack.c.h.bf16 %v260_v46  ;;  %v5685_v20 = vld [vmem:[%s7874_s3 + $0xa0] sm:$0xff]  }
  0x31   : > { %5065 = vmatpush3.bf16.msra.mxu1 %v5669_v40  ;;  %4954 = vmatprep.subr.bf16.mxu0 %v5670_v3  ;;  %v475_v40 = vmul.f32 %v5950_v48, %v325_v33  ;;  %v6032_v59 = vpack.c.bf16 %v746_v45, %v742_v44  ;;  %v627_v3 = vadd.f32 %v5961_v56, %v477_v54  ;;  %v750_v33 = vmax.f32 %v622_v21, 0.0 }
  0x32   : > { %5066 = vmatprep.subr.bf16.mxu1 %v5671_v8  ;;  %1872 = vmatprep.mubr.bf16.mxu0 %v5998_v25  ;;  %8029 = vst [vmem:[#allocation12_spill] sm:$0xff] %v6013_v39  ;;  %v623_v61 = vadd.f32 %v5961_v56, %v473_v47  ;;  %v6041_v8 = vld [vmem:[%s5932_s29 + $0x58] sm:$0xff]  ;;  %v754_v42 = vmax.f32 %v626_v32, 0.0  ;;  %v757_v44 = vmax.f32 %v629_v35, 0.0  ;;  %v332_v45 = vunpack.c.l.bf16 %v258_v6  ;;  %v6078_v47 = vld [vmem:[%s5932_s29 + $0x70] sm:$0xff]  ;;  %v6125_v32 = vld [vmem:[%s5932_s29 + $0x80] sm:$0xff] }
  0x33   : > { %2033 = vmatprep.mubr.bf16.mxu1 %v6003_v30  ;;  %v625_v51 = vadd.f32 %v5959_v53, %v475_v40  ;;  %8030 = vst [vmem:[#allocation13_spill] sm:$0xff] %v6032_v59  ;;  %v755_v15 = vmax.f32 %v627_v3, 0.0  ;;  %v335_v29 = vunpack.c.h.bf16 %v6041_v8  ;;  %v330_v54 = vunpack.c.l.bf16 %v257_v7  ;;  %v5683_v3 = vld [vmem:[%s7874_s3 + $0xe0] sm:$0xff]  }
  0x34   : > { %4955 = vmatpush3.bf16.msra.mxu0 %v5672_v13  ;;  %v751_v9 = vmax.f32 %v623_v61, 0.0  ;;  %v5678_v13 = vld [vmem:[%s7874_s3 + $0x58] sm:$0xff]   ;;  %v6090_v58 = vpack.c.bf16 %v754_v42, %v750_v33  ;;  %v482_v61 = vmul.f32 %v5967_v63, %v332_v45  ;;  %v334_v62 = vunpack.c.l.bf16 %v6041_v8  ;;  %v5687_v45 = vld [vmem:[%s7874_s3 + $0xe8] sm:$0xff]  }
  0x35   : > { %5067 = vmatpush3.bf16.msra.mxu1 %v5673_v19  ;;  %4956 = vmatprep.subr.bf16.mxu0 %v5674_v38  ;;  %v753_v1 = vmax.f32 %v625_v51, 0.0  ;;  %v748_v19 = vmax.f32 %v620_v5, 0.0  ;;  %v481_v38 = vmul.f32 %v5957_v52, %v331_v28  ;;  %v485_v40 = vmul.f32 %v5957_v52, %v335_v29 }
  0x36   : > { %5068 = vmatprep.subr.bf16.mxu1 %v5675_v43  ;;  %v6058_v26 = vpack.c.bf16 %v755_v15, %v751_v9  ;;  %v633_v43 = vadd.f32 %v5959_v53, %v483_v34  ;;  %v478_v51 = vmul.f32 %v5967_v63, %v328_v41  ;;  %8034 = vst [vmem:[#allocation17_spill] sm:$0xff] %v6090_v58  ;;  %v340_v42 = vunpack.c.l.bf16 %v6078_v47 }
  0x37   : > { %1873 = vmatmul.mubr.bf16.gmra.mrb[4].mxu0 %v6013_v39  ;;  %v6048_v14 = vpack.c.bf16 %v753_v1, %v749_v60  ;;  %v6071_v37 = vpack.c.bf16 %v752_v27, %v748_v19  ;;  %v6095_v1 = vld [vmem:[%s5932_s29 + $0x78] sm:$0xff]  ;;  %v480_v7 = vmul.f32 %v5987_v16, %v330_v54  ;;  %v632_v10 = vadd.f32 %v5969_v0, %v482_v61 }
  0x38   : > { %4957 = vmatpush3.bf16.msra.mxu0 %v5676_v49  ;;  %2034 = vmatmul.mubr.bf16.gmra.mrb[4].mxu1 %v6032_v59  ;;  %8032 = vst [vmem:[#allocation15_spill] sm:$0xff] %v6058_v26  ;;  %v631_v49 = vadd.f32 %v5961_v56, %v481_v38  ;;  %v761_v60 = vmax.f32 %v633_v43, 0.0  ;;  %v628_v6 = vadd.f32 %v5969_v0, %v478_v51  ;;  %v341_v19 = vunpack.c.h.bf16 %v6078_v47  ;;  %v5686_v38 = vld [vmem:[%s7874_s3 + $0x68] sm:$0xff]  }
  0x39   : > { %5069 = vmatpush3.bf16.msra.mxu1 %v5677_v50  ;;  %8031 = vst [vmem:[#allocation14_spill] sm:$0xff] %v6048_v14  ;;  %4958 = vmatprep.subr.bf16.mxu0 %v5678_v13  ;;  %8033 = vst [vmem:[#allocation16_spill] sm:$0xff] %v6071_v37  ;;  %v635_v50 = vadd.f32 %v5961_v56, %v485_v40  ;;  %v484_v8 = vmul.f32 %v5987_v16, %v334_v62  ;;  %v760_v21 = vmax.f32 %v632_v10, 0.0  ;;  %v5688_v47 = vld [vmem:[%s7874_s3 + $0x28] sm:$0xff]  }
  0x3a   : > { %1880 = vmatprep.mubr.bf16.mxu0 %v6048_v14  ;;  %5070 = vmatprep.subr.bf16.mxu1 %v5679_v24  ;;  %v759_v4 = vmax.f32 %v631_v49, 0.0  ;;  %v6103_v9 = vpack.c.bf16 %v761_v60, %v757_v44  ;;  %v756_v15 = vmax.f32 %v628_v6, 0.0  ;;  %v630_v18 = vadd.f32 %v5989_v17, %v480_v7  ;;  %v6139_v44 = vld [vmem:[%s5932_s29 + $0x90] sm:$0xff]  ;;  %v5689_v62 = vld [vmem:[%s7874_s3 + $0xa8] sm:$0xff]   ;;  %v267_v7 = vld [vmem:[%s5932_s29 + $0x98] sm:$0xff] }
  0x3b   : > { %2041 = vmatprep.mubr.bf16.mxu1 %v6058_v26  ;;  %v763_v5 = vmax.f32 %v635_v50, 0.0  ;;  %v634_v22 = vadd.f32 %v5989_v17, %v484_v8  ;;  %v487_v23 = vmul.f32 %v5950_v48, %v337_v11  ;;  %v339_v24 = vunpack.c.h.bf16 %v6085_v55  ;;  %v265_v6 = vld [vmem:[%s5932_s29 + $0x88] sm:$0xff] }
  0x3c   : > { %4959 = vmatpush3.bf16.msra.mxu0 %v5680_v31  ;;  %8035 = vst [vmem:[#allocation18_spill] sm:$0xff] %v6103_v9  ;;  %v758_v27 = vmax.f32 %v630_v18, 0.0  ;;  %v491_v28 = vmul.f32 %v5950_v48, %v341_v19  ;;  %v343_v29 = vunpack.c.h.bf16 %v6095_v1  ;;  %v336_v31 = vunpack.c.l.bf16 %v260_v46 }
  0x3d   : > { %5071 = vmatpush3.bf16.msra.mxu1 %v5681_v36  ;;  %4960 = vmatprep.subr.bf16.mxu0 %v5682_v57  ;;  %v6110_v13 = vpack.c.bf16 %v763_v5, %v759_v4  ;;  %v6127_v33 = vpack.c.bf16 %v760_v21, %v756_v15  ;;  %v762_v34 = vmax.f32 %v634_v22, 0.0  ;;  %v637_v35 = vadd.f32 %v5959_v53, %v487_v23 }
  0x3e   : > { %5072 = vmatprep.subr.bf16.mxu1 %v5683_v3  ;;  %v489_v36 = vmul.f32 %v5957_v52, %v339_v24  ;;  %v641_v40 = vadd.f32 %v5959_v53, %v491_v28  ;;  %v493_v41 = vmul.f32 %v5957_v52, %v343_v29  ;;  %v486_v43 = vmul.f32 %v5967_v63, %v336_v31  ;;  %v5690_v24 = vld [vmem:[%s7874_s3 + $0x70] sm:$0xff]  }
  0x3f   : > { %1881 = vmatmul.mubr.bf16.gmra.mrb[8].mxu0 %v6071_v37  ;;  %8036 = vst [vmem:[#allocation19_spill] sm:$0xff] %v6110_v13  ;;  %8037 = vst [vmem:[#allocation20_spill] sm:$0xff] %v6127_v33  ;;  %v6145_v46 = vpack.c.bf16 %v762_v34, %v758_v27  ;;  %v765_v49 = vmax.f32 %v637_v35, 0.0  ;;  %v338_v51 = vunpack.c.l.bf16 %v6085_v55  ;;  %v490_v60 = vmul.f32 %v5967_v63, %v340_v42  ;;  %v5691_v34 = vld [vmem:[%s7874_s3 + $0xf0] sm:$0xff]  }
  0x40   : > { %2042 = vmatmul.mubr.bf16.gmra.mrb[8].mxu1 %v6090_v58  ;;  %1888 = vmatprep.mubr.bf16.mxu0 %v6103_v9  ;;  %v639_v50 = vadd.f32 %v5961_v56, %v489_v36  ;;  %v769_v54 = vmax.f32 %v641_v40, 0.0  ;;  %v643_v57 = vadd.f32 %v5961_v56, %v493_v41  ;;  %v636_v61 = vadd.f32 %v5969_v0, %v486_v43  ;;  %v5692_v41 = vld [vmem:[%s7874_s3 + $0x30] sm:$0xff]  }
  0x41   : > { %4961 = vmatpush3.bf16.msra.mxu0 %v5684_v12  ;;  %2049 = vmatprep.mubr.bf16.mxu1 %v6110_v13  ;;  %8038 = vst [vmem:[#allocation21_spill] sm:$0xff] %v6145_v46  ;;  %v342_v3 = vunpack.c.l.bf16 %v6095_v1  ;;  %v488_v4 = vmul.f32 %v5987_v16, %v338_v51  ;;  %v345_v5 = vunpack.c.h.bf16 %v6125_v32  ;;  %v640_v11 = vadd.f32 %v5969_v0, %v490_v60 }
  0x42   : > { %5073 = vmatpush3.bf16.msra.mxu1 %v5685_v20  ;;  %4962 = vmatprep.subr.bf16.mxu0 %v5686_v38  ;;  %v767_v55 = vmax.f32 %v639_v50, 0.0  ;;  %v6164_v10 = vpack.c.bf16 %v769_v54, %v765_v49  ;;  %v771_v8 = vmax.f32 %v643_v57, 0.0  ;;  %v764_v12 = vmax.f32 %v636_v61, 0.0  ;;  %v5693_v50 = vld [vmem:[%s7874_s3 + $0xb0] sm:$0xff]   ;;  %v268_v57 = vld [vmem:[%s5932_s29 + $0xa0] sm:$0xff] }
  0x43   : > { %5074 = vmatprep.subr.bf16.mxu1 %v5687_v45  ;;  %v492_v15 = vmul.f32 %v5987_v16, %v342_v3  ;;  %v638_v18 = vadd.f32 %v5989_v17, %v488_v4  ;;  %v349_v1 = vunpack.c.h.bf16 %v6139_v44  ;;  %v495_v19 = vmul.f32 %v5950_v48, %v345_v5  ;;  %v269_v3 = vld [vmem:[%s5932_s29 + $0xa8] sm:$0xff] }
  0x44   : > { %8039 = vst [vmem:[#allocation22_spill] sm:$0xff] %v6164_v10  ;;  %v6172_v20 = vpack.c.bf16 %v771_v8, %v767_v55  ;;  %v768_v21 = vmax.f32 %v640_v11, 0.0  ;;  %v347_v22 = vunpack.c.h.bf16 %v265_v6  ;;  %v351_v23 = vunpack.c.h.bf16 %v267_v7  ;;  %v270_v55 = vld [vmem:[%s5932_s29 + $0xb0] sm:$0xff] }
  0x45   : > { %4963 = vmatpush3.bf16.msra.mxu0 %v5688_v47  ;;  %v642_v27 = vadd.f32 %v5989_v17, %v492_v15  ;;  %v766_v28 = vmax.f32 %v638_v18, 0.0  ;;  %v499_v29 = vmul.f32 %v5950_v48, %v349_v1  ;;  %v645_v31 = vadd.f32 %v5959_v53, %v495_v19 }
  0x46   : > { %5075 = vmatpush3.bf16.msra.mxu1 %v5689_v62  ;;  %8040 = vst [vmem:[#allocation23_spill] sm:$0xff] %v6172_v20  ;;  %v6184_v35 = vpack.c.bf16 %v768_v21, %v764_v12  ;;  %v497_v36 = vmul.f32 %v5957_v52, %v347_v22  ;;  %v501_v38 = vmul.f32 %v5957_v52, %v351_v23  ;;  %v344_v40 = vunpack.c.l.bf16 %v6125_v32  ;;  %v6210_v12 = vld [vmem:[%s5932_s29 + $0xb8] sm:$0xff] }
  0x47   : > { %1889 = vmatmul.mubr.bf16.gmra.mrb[12].mxu0 %v6127_v33  ;;  %4964 = vmatprep.subr.bf16.mxu0 %v5690_v24  ;;  %v770_v42 = vmax.f32 %v642_v27, 0.0  ;;  %v649_v43 = vadd.f32 %v5959_v53, %v499_v29  ;;  %v773_v45 = vmax.f32 %v645_v31, 0.0  ;;  %v348_v49 = vunpack.c.l.bf16 %v6139_v44  ;;  %v5695_v24 = vld [vmem:[%s7874_s3 + $0xf8] sm:$0xff]  }
  0x48   : > { %2050 = vmatmul.mubr.bf16.gmra.mrb[12].mxu1 %v6145_v46  ;;  %1896 = vmatprep.mubr.bf16.mxu0 %v6164_v10  ;;  %8041 = vst [vmem:[#allocation24_spill] sm:$0xff] %v6184_v35  ;;  %v647_v32 = vadd.f32 %v5961_v56, %v497_v36  ;;  %v651_v51 = vadd.f32 %v5961_v56, %v501_v38  ;;  %v346_v54 = vunpack.c.l.bf16 %v265_v6  ;;  %v350_v62 = vunpack.c.l.bf16 %v267_v7  ;;  %v5694_v6 = vld [vmem:[%s7874_s3 + $0x78] sm:$0xff]  }
  0x49   : > { %2057 = vmatprep.mubr.bf16.mxu1 %v6172_v20  ;;  %5076 = vmatprep.subr.bf16.mxu1 %v5691_v34  ;;  %v494_v47 = vmul.f32 %v5967_v63, %v344_v40  ;;  %v6202_v60 = vpack.c.bf16 %v770_v42, %v766_v28  ;;  %v777_v61 = vmax.f32 %v649_v43, 0.0  ;;  %v498_v44 = vmul.f32 %v5967_v63, %v348_v49  ;;  %v5696_v34 = vld [vmem:[%s7874_s3 + $0x38] sm:$0xff]  }
  0x4a   : > { %4965 = vmatpush3.bf16.msra.mxu0 %v5692_v41  ;;  %5077 = vmatpush3.bf16.msra.mxu1 %v5693_v50  ;;  %v775_v4 = vmax.f32 %v647_v32, 0.0  ;;  %v779_v5 = vmax.f32 %v651_v51, 0.0  ;;  %v496_v11 = vmul.f32 %v5987_v16, %v346_v54  ;;  %v500_v18 = vmul.f32 %v5987_v16, %v350_v62  ;;  %v5697_v42 = vld [vmem:[%s7874_s3 + $0xb8] sm:$0xff]   ;;  %v272_v32 = vld [vmem:[%s5932_s29 + $0xc0] sm:$0xff] }
  0x4b   : > { %8042 = vst [vmem:[#allocation25_spill] sm:$0xff] %v6202_v60  ;;  %v644_v8 = vadd.f32 %v5969_v0, %v494_v47  ;;  %v6216_v15 = vpack.c.bf16 %v777_v61, %v773_v45  ;;  %v648_v7 = vadd.f32 %v5969_v0, %v498_v44  ;;  %v353_v1 = vunpack.c.h.bf16 %v268_v57  ;;  %4966 = vmatprep.subr.bf16.mxu0 %v5694_v6  ;;  %v274_v61 = vld [vmem:[%s5932_s29 + $0xd0] sm:$0xff]  ;;  %v5698_v44 = vld [vmem:[%s7874_s3 + $0x240] sm:$0xff]  }
  0x4c   : > { %v6220_v19 = vpack.c.bf16 %v779_v5, %v775_v4  ;;  %v646_v22 = vadd.f32 %v5989_v17, %v496_v11  ;;  %v357_v23 = vunpack.c.h.bf16 %v270_v55  ;;  %v650_v28 = vadd.f32 %v5989_v17, %v500_v18  ;;  %5078 = vmatprep.subr.bf16.mxu1 %v5695_v24  ;;  %v275_v24 = vld [vmem:[%s5932_s29 + $0xd8] sm:$0xff] }
  0x4d   : > { %8043 = vst [vmem:[#allocation26_spill] sm:$0xff] %v6216_v15  ;;  %v772_v21 = vmax.f32 %v644_v8, 0.0  ;;  %v776_v27 = vmax.f32 %v648_v7, 0.0  ;;  %v503_v29 = vmul.f32 %v5950_v48, %v353_v1  ;;  %v355_v31 = vunpack.c.h.bf16 %v269_v3  ;;  %v273_v1 = vld [vmem:[%s5932_s29 + $0xc8] sm:$0xff] }
  0x4e   : > { %8044 = vst [vmem:[#allocation27_spill] sm:$0xff] %v6220_v19  ;;  %v774_v36 = vmax.f32 %v646_v22, 0.0  ;;  %v507_v38 = vmul.f32 %v5950_v48, %v357_v23  ;;  %v359_v40 = vunpack.c.h.bf16 %v6210_v12  ;;  %v352_v41 = vunpack.c.l.bf16 %v268_v57  ;;  %4967 = vmatpush3.bf16.msra.mxu0 %v5696_v34  ;;  %5079 = vmatpush3.bf16.msra.mxu1 %v5697_v42 }
  0x4f   : > { %1897 = vmatmul.mubr.bf16.gmra.mrb[16].mxu0 %v6184_v35  ;;  %v6238_v43 = vpack.c.bf16 %v776_v27, %v772_v21  ;;  %v778_v45 = vmax.f32 %v650_v28, 0.0  ;;  %v653_v49 = vadd.f32 %v5959_v53, %v503_v29  ;;  %v505_v50 = vmul.f32 %v5957_v52, %v355_v31  ;;  %5176 = vmatprep.subr.bf16.mxu0 %v5698_v44 }
  0x50   : > { %2058 = vmatmul.mubr.bf16.gmra.mrb[16].mxu1 %v6202_v60  ;;  %1904 = vmatprep.mubr.bf16.mxu0 %v6216_v15  ;;  %v657_v51 = vadd.f32 %v5959_v53, %v507_v38  ;;  %v509_v47 = vmul.f32 %v5957_v52, %v359_v40  ;;  %v356_v54 = vunpack.c.l.bf16 %v270_v55  ;;  %v502_v57 = vmul.f32 %v5967_v63, %v352_v41  ;;  %v5699_v55 = vld [vmem:[%s7874_s3 + $0x2c0] sm:$0xff]  }
  0x51   : > { %2065 = vmatprep.mubr.bf16.mxu1 %v6220_v19  ;;  %8045 = vst [vmem:[#allocation28_spill] sm:$0xff] %v6238_v43  ;;  %v6251_v62 = vpack.c.bf16 %v778_v45, %v774_v36  ;;  %v781_v4 = vmax.f32 %v653_v49, 0.0  ;;  %v655_v5 = vadd.f32 %v5961_v56, %v505_v50  ;;  %v354_v8 = vunpack.c.l.bf16 %v269_v3  ;;  %5288 = vmatprep.subr.bf16.mxu1 %v5699_v55 }
  0x52   : > { %v785_v11 = vmax.f32 %v657_v51, 0.0  ;;  %v659_v6 = vadd.f32 %v5961_v56, %v509_v47  ;;  %v506_v7 = vmul.f32 %v5967_v63, %v356_v54  ;;  %v652_v18 = vadd.f32 %v5969_v0, %v502_v57 }
  0x53   : > { %8046 = vst [vmem:[#allocation29_spill] sm:$0xff] %v6251_v62  ;;  %v783_v21 = vmax.f32 %v655_v5, 0.0  ;;  %v358_v22 = vunpack.c.l.bf16 %v6210_v12  ;;  %v504_v3 = vmul.f32 %v5987_v16, %v354_v8  ;;  %v361_v23 = vunpack.c.h.bf16 %v272_v32 }
  0x54   : > { %v6265_v27 = vpack.c.bf16 %v785_v11, %v781_v4  ;;  %v787_v28 = vmax.f32 %v659_v6, 0.0  ;;  %v656_v29 = vadd.f32 %v5969_v0, %v506_v7  ;;  %v780_v31 = vmax.f32 %v652_v18, 0.0  ;;  %v276_v6 = vld [vmem:[%s5932_s29 + $0xe0] sm:$0xff]  ;;  %v278_v7 = vld [vmem:[%s5932_s29 + $0xf0] sm:$0xff] }
  0x55   : > { %v508_v34 = vmul.f32 %v5987_v16, %v358_v22  ;;  %v654_v36 = vadd.f32 %v5989_v17, %v504_v3  ;;  %v365_v38 = vunpack.c.h.bf16 %v274_v61  ;;  %v511_v40 = vmul.f32 %v5950_v48, %v361_v23  ;;  %v277_v23 = vld [vmem:[%s5932_s29 + $0xe8] sm:$0xff] }
  0x56   : > { %8047 = vst [vmem:[#allocation30_spill] sm:$0xff] %v6265_v27  ;;  %v6272_v12 = vpack.c.bf16 %v787_v28, %v783_v21  ;;  %v784_v41 = vmax.f32 %v656_v29, 0.0  ;;  %v363_v42 = vunpack.c.h.bf16 %v273_v1  ;;  %v367_v45 = vunpack.c.h.bf16 %v275_v24 }
  0x57   : > { %1905 = vmatmul.mubr.bf16.gmra.mrb[20].mxu0 %v6238_v43  ;;  %v658_v49 = vadd.f32 %v5989_v17, %v508_v34  ;;  %v782_v50 = vmax.f32 %v654_v36, 0.0  ;;  %v515_v51 = vmul.f32 %v5950_v48, %v365_v38  ;;  %v661_v47 = vadd.f32 %v5959_v53, %v511_v40  ;;  %v279_v34 = vld [vmem:[%s5932_s29 + $0xf8] sm:$0xff] }
  0x58   : > { %2066 = vmatmul.mubr.bf16.gmra.mrb[20].mxu1 %v6251_v62  ;;  %1912 = vmatprep.mubr.bf16.mxu0 %v6265_v27  ;;  %8048 = vst [vmem:[#allocation31_spill] sm:$0xff] %v6272_v12  ;;  %v6278_v54 = vpack.c.bf16 %v784_v41, %v780_v31  ;;  %v513_v57 = vmul.f32 %v5957_v52, %v363_v42  ;;  %v360_v4 = vunpack.c.l.bf16 %v272_v32  ;;  %v364_v11 = vunpack.c.l.bf16 %v274_v61 }
  0x59   : > { %2073 = vmatprep.mubr.bf16.mxu1 %v6272_v12  ;;  %v517_v44 = vmul.f32 %v5957_v52, %v367_v45  ;;  %v786_v5 = vmax.f32 %v658_v49, 0.0  ;;  %v665_v8 = vadd.f32 %v5959_v53, %v515_v51  ;;  %v789_v55 = vmax.f32 %v661_v47, 0.0 }
  0x5a   : > { %8049 = vst [vmem:[#allocation32_spill] sm:$0xff] %v6278_v54  ;;  %v663_v18 = vadd.f32 %v5961_v56, %v513_v57  ;;  %v510_v22 = vmul.f32 %v5967_v63, %v360_v4  ;;  %v362_v3 = vunpack.c.l.bf16 %v273_v1  ;;  %v514_v29 = vmul.f32 %v5967_v63, %v364_v11 }
  0x5b   : > { %v667_v21 = vadd.f32 %v5961_v56, %v517_v44  ;;  %v6290_v28 = vpack.c.bf16 %v786_v5, %v782_v50  ;;  %v793_v32 = vmax.f32 %v665_v8, 0.0  ;;  %v366_v31 = vunpack.c.l.bf16 %v275_v24 }
  0x5c   : > { %v791_v61 = vmax.f32 %v663_v18, 0.0  ;;  %v660_v38 = vadd.f32 %v5969_v0, %v510_v22  ;;  %v512_v40 = vmul.f32 %v5987_v16, %v362_v3  ;;  %v664_v1 = vadd.f32 %v5969_v0, %v514_v29 }
  0x5d   : > { %8050 = vst [vmem:[#allocation33_spill] sm:$0xff] %v6290_v28  ;;  %v795_v36 = vmax.f32 %v667_v21, 0.0  ;;  %v6297_v41 = vpack.c.bf16 %v793_v32, %v789_v55  ;;  %v516_v42 = vmul.f32 %v5987_v16, %v366_v31  ;;  %v369_v45 = vunpack.c.h.bf16 %v276_v6  ;;  %v280_v32 = vld [vmem:[%s5932_s29 + $0x100] sm:$0xff] }
  0x5e   : > { %v788_v50 = vmax.f32 %v660_v38, 0.0  ;;  %v662_v24 = vadd.f32 %v5989_v17, %v512_v40  ;;  %v373_v51 = vunpack.c.h.bf16 %v278_v7  ;;  %v792_v47 = vmax.f32 %v664_v1, 0.0 }
  0x5f   : > { %1913 = vmatmul.mubr.bf16.gmra.mrb[24].mxu0 %v6278_v54  ;;  %8051 = vst [vmem:[#allocation34_spill] sm:$0xff] %v6297_v41  ;;  %v6301_v49 = vpack.c.bf16 %v795_v36, %v791_v61  ;;  %v666_v57 = vadd.f32 %v5989_v17, %v516_v42  ;;  %v519_v44 = vmul.f32 %v5950_v48, %v369_v45  ;;  %v371_v4 = vunpack.c.h.bf16 %v277_v23 }
  0x60   : > { %2074 = vmatmul.mubr.bf16.gmra.mrb[24].mxu1 %v6290_v28  ;;  %1920 = vmatprep.mubr.bf16.mxu0 %v6297_v41  ;;  %v790_v5 = vmax.f32 %v662_v24, 0.0  ;;  %v523_v8 = vmul.f32 %v5950_v48, %v373_v51  ;;  %v375_v55 = vunpack.c.h.bf16 %v279_v34  ;;  %v368_v11 = vunpack.c.l.bf16 %v276_v6 }
  0x61   : > { %8052 = vst [vmem:[#allocation35_spill] sm:$0xff] %v6301_v49  ;;  %2081 = vmatprep.mubr.bf16.mxu1 %v6301_v49  ;;  %v6309_v18 = vpack.c.bf16 %v792_v47, %v788_v50  ;;  %v794_v21 = vmax.f32 %v666_v57, 0.0  ;;  %v669_v22 = vadd.f32 %v5959_v53, %v519_v44  ;;  %v521_v3 = vmul.f32 %v5957_v52, %v371_v4  ;;  %v281_v4 = vld [vmem:[%s5932_s29 + $0x108] sm:$0xff] }
  0x62   : > { %v673_v29 = vadd.f32 %v5959_v53, %v523_v8  ;;  %v525_v31 = vmul.f32 %v5957_v52, %v375_v55  ;;  %v372_v61 = vunpack.c.l.bf16 %v278_v7  ;;  %v518_v36 = vmul.f32 %v5967_v63, %v368_v11  ;;  %v282_v7 = vld [vmem:[%s5932_s29 + $0x110] sm:$0xff] }
  0x63   : > { %8053 = vst [vmem:[#allocation36_spill] sm:$0xff] %v6309_v18  ;;  %v6318_v6 = vpack.c.bf16 %v794_v21, %v790_v5  ;;  %v797_v38 = vmax.f32 %v669_v22, 0.0  ;;  %v671_v40 = vadd.f32 %v5961_v56, %v521_v3  ;;  %v370_v1 = vunpack.c.l.bf16 %v277_v23  ;;  %v283_v5 = vld [vmem:[%s5932_s29 + $0x118] sm:$0xff] }
  0x64   : > { %v801_v42 = vmax.f32 %v673_v29, 0.0  ;;  %v675_v45 = vadd.f32 %v5961_v56, %v525_v31  ;;  %v522_v50 = vmul.f32 %v5967_v63, %v372_v61  ;;  %v668_v24 = vadd.f32 %v5969_v0, %v518_v36 }
  0x65   : > { %8054 = vst [vmem:[#allocation37_spill] sm:$0xff] %v6318_v6  ;;  %v799_v51 = vmax.f32 %v671_v40, 0.0  ;;  %v374_v47 = vunpack.c.l.bf16 %v279_v34  ;;  %v520_v57 = vmul.f32 %v5987_v16, %v370_v1  ;;  %v377_v44 = vunpack.c.h.bf16 %v280_v32 }
  0x66   : > { %v6329_v8 = vpack.c.bf16 %v801_v42, %v797_v38  ;;  %v803_v23 = vmax.f32 %v675_v45, 0.0  ;;  %v672_v55 = vadd.f32 %v5969_v0, %v522_v50  ;;  %v796_v11 = vmax.f32 %v668_v24, 0.0 }
  0x67   : > { %1921 = vmatmul.mubr.bf16.gmra.mrb[28].mxu0 %v6309_v18  ;;  %v524_v21 = vmul.f32 %v5987_v16, %v374_v47  ;;  %v670_v22 = vadd.f32 %v5989_v17, %v520_v57  ;;  %v381_v3 = vunpack.c.h.bf16 %v282_v7  ;;  %v527_v29 = vmul.f32 %v5950_v48, %v377_v44  ;;  %v284_v47 = vld [vmem:[%s5932_s29 + $0x120] sm:$0xff] }
  0x68   : > { %2082 = vmatmul.mubr.bf16.gmra.mrb[28].mxu1 %v6318_v6  ;;  %8055 = vst [vmem:[#allocation38_spill] sm:$0xff] %v6329_v8  ;;  %1928 = vmatprep.mubr.bf16.mxu0 %v6329_v8  ;;  %v6336_v34 = vpack.c.bf16 %v803_v23, %v799_v51  ;;  %v800_v31 = vmax.f32 %v672_v55, 0.0  ;;  %v379_v61 = vunpack.c.h.bf16 %v281_v4  ;;  %v383_v36 = vunpack.c.h.bf16 %v283_v5 }
  0x69   : > { %v674_v38 = vadd.f32 %v5989_v17, %v524_v21  ;;  %v798_v40 = vmax.f32 %v670_v22, 0.0  ;;  %v531_v1 = vmul.f32 %v5950_v48, %v381_v3  ;;  %v677_v42 = vadd.f32 %v5959_v53, %v527_v29  ;;  %v286_v21 = vld [vmem:[%s5932_s29 + $0x130] sm:$0xff] }
  0x6a   : > { %8056 = vst [vmem:[#allocation39_spill] sm:$0xff] %v6336_v34  ;;  %2089 = vmatprep.mubr.bf16.mxu1 %v6336_v34  ;;  %v6342_v45 = vpack.c.bf16 %v800_v31, %v796_v11  ;;  %v529_v50 = vmul.f32 %v5957_v52, %v379_v61  ;;  %v533_v24 = vmul.f32 %v5957_v52, %v383_v36  ;;  %v376_v51 = vunpack.c.l.bf16 %v280_v32  ;;  %v285_v31 = vld [vmem:[%s5932_s29 + $0x128] sm:$0xff] }
  0x6b   : > { %v802_v57 = vmax.f32 %v674_v38, 0.0  ;;  %v681_v44 = vadd.f32 %v5959_v53, %v531_v1  ;;  %v805_v23 = vmax.f32 %v677_v42, 0.0  ;;  %v380_v55 = vunpack.c.l.bf16 %v282_v7  ;;  %v287_v1 = vld [vmem:[%s5932_s29 + $0x138] sm:$0xff] }
  0x6c   : > { %8057 = vst [vmem:[#allocation40_spill] sm:$0xff] %v6342_v45  ;;  %v679_v22 = vadd.f32 %v5961_v56, %v529_v50  ;;  %v683_v11 = vadd.f32 %v5961_v56, %v533_v24  ;;  %v526_v3 = vmul.f32 %v5967_v63, %v376_v51  ;;  %v378_v29 = vunpack.c.l.bf16 %v281_v4 }
  0x6d   : > { %v6354_v61 = vpack.c.bf16 %v802_v57, %v798_v40  ;;  %v809_v32 = vmax.f32 %v681_v44, 0.0  ;;  %v530_v36 = vmul.f32 %v5967_v63, %v380_v55  ;;  %v382_v38 = vunpack.c.l.bf16 %v283_v5 }
  0x6e   : > { %v807_v42 = vmax.f32 %v679_v22, 0.0  ;;  %v811_v7 = vmax.f32 %v683_v11, 0.0  ;;  %v676_v2 = vadd.f32 %v5969_v0, %v526_v3  ;;  %v385_v24 = vunpack.c.h.bf16 %v284_v47 }
  0x6f   : > { %1929 = vmatmul.mubr.bf16.gmra.mrb[32].mxu0 %v6342_v45  ;;  %8058 = vst [vmem:[#allocation41_spill] sm:$0xff] %v6354_v61  ;;  %v528_v45 = vmul.f32 %v5987_v16, %v378_v29  ;;  %v6361_v50 = vpack.c.bf16 %v809_v32, %v805_v23  ;;  %v680_v4 = vadd.f32 %v5969_v0, %v530_v36  ;;  %v389_v44 = vunpack.c.h.bf16 %v286_v21 }
  0x70   : > { %2090 = vmatmul.mubr.bf16.gmra.mrb[32].mxu1 %v6354_v61  ;;  %v532_v40 = vmul.f32 %v5987_v16, %v382_v38  ;;  %v6365_v51 = vpack.c.bf16 %v811_v7, %v807_v42  ;;  %v804_v57 = vmax.f32 %v676_v2, 0.0  ;;  %v535_v23 = vmul.f32 %v5950_v48, %v385_v24  ;;  %v288_v7 = vld [vmem:[%s5932_s29 + $0x140] sm:$0xff] }
  0x71   : > { %8059 = vst [vmem:[#allocation42_spill] sm:$0xff] %v6361_v50  ;;  %v678_v5 = vadd.f32 %v5989_v17, %v528_v45  ;;  %1936 = vmatprep.mubr.bf16.mxu0 %v6361_v50  ;;  %v808_v55 = vmax.f32 %v680_v4, 0.0  ;;  %v387_v11 = vunpack.c.h.bf16 %v285_v31  ;;  %v539_v29 = vmul.f32 %v5950_v48, %v389_v44 }
  0x72   : > { %8060 = vst [vmem:[#allocation43_spill] sm:$0xff] %v6365_v51  ;;  %v682_v22 = vadd.f32 %v5989_v17, %v532_v40  ;;  %2097 = vmatprep.mubr.bf16.mxu1 %v6365_v51  ;;  %v391_v32 = vunpack.c.h.bf16 %v287_v1  ;;  %v384_v2 = vunpack.c.l.bf16 %v284_v47  ;;  %v685_v38 = vadd.f32 %v5959_v53, %v535_v23 }
  0x73   : > { %v806_v3 = vmax.f32 %v678_v5, 0.0  ;;  %v6373_v36 = vpack.c.bf16 %v808_v55, %v804_v57  ;;  %v537_v42 = vmul.f32 %v5957_v52, %v387_v11  ;;  %v689_v4 = vadd.f32 %v5959_v53, %v539_v29 }
  0x74   : > { %v810_v45 = vmax.f32 %v682_v22, 0.0  ;;  %v541_v40 = vmul.f32 %v5957_v52, %v391_v32  ;;  %v388_v24 = vunpack.c.l.bf16 %v286_v21  ;;  %v534_v5 = vmul.f32 %v5967_v63, %v384_v2  ;;  %v290_v22 = vld [vmem:[%s5932_s29 + $0x150] sm:$0xff]  ;;  %v289_v21 = vld [vmem:[%s5932_s29 + $0x148] sm:$0xff] }
  0x75   : > { %8061 = vst [vmem:[#allocation44_spill] sm:$0xff] %v6373_v36  ;;  %v813_v57 = vmax.f32 %v685_v38, 0.0  ;;  %v687_v44 = vadd.f32 %v5961_v56, %v537_v42  ;;  %v386_v55 = vunpack.c.l.bf16 %v285_v31  ;;  %v817_v23 = vmax.f32 %v689_v4, 0.0  ;;  %v291_v38 = vld [vmem:[%s5932_s29 + $0x158] sm:$0xff] }
  0x76   : > { %v6382_v47 = vpack.c.bf16 %v810_v45, %v806_v3  ;;  %v691_v11 = vadd.f32 %v5961_v56, %v541_v40  ;;  %v538_v29 = vmul.f32 %v5967_v63, %v388_v24  ;;  %v684_v32 = vadd.f32 %v5969_v0, %v534_v5 }
  0x77   : > { %1937 = vmatmul.mubr.bf16.gmra.mrb[36].mxu0 %v6373_v36  ;;  %v815_v2 = vmax.f32 %v687_v44, 0.0  ;;  %v390_v36 = vunpack.c.l.bf16 %v287_v1  ;;  %v536_v3 = vmul.f32 %v5987_v16, %v386_v55  ;;  %v393_v45 = vunpack.c.h.bf16 %v288_v7 }
  0x78   : > { %8062 = vst [vmem:[#allocation45_spill] sm:$0xff] %v6382_v47  ;;  %2098 = vmatmul.mubr.bf16.gmra.mrb[36].mxu1 %v6382_v47  ;;  %v6393_v51 = vpack.c.bf16 %v817_v23, %v813_v57  ;;  %v819_v31 = vmax.f32 %v691_v11, 0.0  ;;  %v688_v42 = vadd.f32 %v5969_v0, %v538_v29  ;;  %v812_v4 = vmax.f32 %v684_v32, 0.0 }
  0x79   : > { %v540_v40 = vmul.f32 %v5987_v16, %v390_v36  ;;  %v686_v24 = vadd.f32 %v5989_v17, %v536_v3  ;;  %v397_v5 = vunpack.c.h.bf16 %v290_v22  ;;  %v543_v47 = vmul.f32 %v5950_v48, %v393_v45 }
  0x7a   : > { %8063 = vst [vmem:[#allocation46_spill] sm:$0xff] %v6393_v51  ;;  %1944 = vmatprep.mubr.bf16.mxu0 %v6393_v51  ;;  %v6400_v1 = vpack.c.bf16 %v819_v31, %v815_v2  ;;  %v816_v44 = vmax.f32 %v688_v42, 0.0  ;;  %v395_v55 = vunpack.c.h.bf16 %v289_v21  ;;  %v399_v57 = vunpack.c.h.bf16 %v291_v38  ;;  %v292_v31 = vld [vmem:[%s5932_s29 + $0x160] sm:$0xff] }
  0x7b   : > { %v690_v23 = vadd.f32 %v5989_v17, %v540_v40  ;;  %v814_v11 = vmax.f32 %v686_v24, 0.0  ;;  %v547_v29 = vmul.f32 %v5950_v48, %v397_v5  ;;  %v693_v36 = vadd.f32 %v5959_v53, %v543_v47  ;;  %v294_v5 = vld [vmem:[%s5932_s29 + $0x170] sm:$0xff] }
  0x7c   : > { %8064 = vst [vmem:[#allocation47_spill] sm:$0xff] %v6400_v1  ;;  %2105 = vmatprep.mubr.bf16.mxu1 %v6400_v1  ;;  %v6406_v32 = vpack.c.bf16 %v816_v44, %v812_v4  ;;  %v545_v3 = vmul.f32 %v5957_v52, %v395_v55  ;;  %v549_v2 = vmul.f32 %v5957_v52, %v399_v57  ;;  %v392_v45 = vunpack.c.l.bf16 %v288_v7  ;;  %v293_v1 = vld [vmem:[%s5932_s29 + $0x168] sm:$0xff] }
  0x7d   : > { %v818_v42 = vmax.f32 %v690_v23, 0.0  ;;  %v697_v40 = vadd.f32 %v5959_v53, %v547_v29  ;;  %v821_v24 = vmax.f32 %v693_v36, 0.0  ;;  %v396_v51 = vunpack.c.l.bf16 %v290_v22  ;;  %v295_v29 = vld [vmem:[%s5932_s29 + $0x178] sm:$0xff] }
  0x7e   : > { %8065 = vst [vmem:[#allocation48_spill] sm:$0xff] %v6406_v32  ;;  %v695_v47 = vadd.f32 %v5961_v56, %v545_v3  ;;  %v699_v4 = vadd.f32 %v5961_v56, %v549_v2  ;;  %v542_v44 = vmul.f32 %v5967_v63, %v392_v45  ;;  %v394_v55 = vunpack.c.l.bf16 %v289_v21 }
  0x7f   : > { %1945 = vmatmul.mubr.bf16.gmra.mrb[40].mxu0 %v6406_v32  ;;  %v6418_v57 = vpack.c.bf16 %v818_v42, %v814_v11  ;;  %v825_v7 = vmax.f32 %v697_v40, 0.0  ;;  %v546_v23 = vmul.f32 %v5967_v63, %v396_v51  ;;  %v398_v61 = vunpack.c.l.bf16 %v291_v38 }
  0x80   : > { %v823_v36 = vmax.f32 %v695_v47, 0.0  ;;  %v827_v22 = vmax.f32 %v699_v4, 0.0  ;;  %v692_v50 = vadd.f32 %v5969_v0, %v542_v44  ;;  %v544_v32 = vmul.f32 %v5987_v16, %v394_v55 }
  0x81   : > { %8066 = vst [vmem:[#allocation49_spill] sm:$0xff] %v6418_v57  ;;  %2106 = vmatmul.mubr.bf16.gmra.mrb[40].mxu1 %v6418_v57  ;;  %v6425_v3 = vpack.c.bf16 %v825_v7, %v821_v24  ;;  %v696_v21 = vadd.f32 %v5969_v0, %v546_v23  ;;  %v548_v11 = vmul.f32 %v5987_v16, %v398_v61  ;;  %v401_v2 = vunpack.c.h.bf16 %v292_v31 }
  0x82   : > { %v6429_v45 = vpack.c.bf16 %v827_v22, %v823_v36  ;;  %v820_v51 = vmax.f32 %v692_v50, 0.0  ;;  %v694_v38 = vadd.f32 %v5989_v17, %v544_v32  ;;  %v405_v42 = vunpack.c.h.bf16 %v294_v5 }
  0x83   : > { %8067 = vst [vmem:[#allocation50_spill] sm:$0xff] %v6425_v3  ;;  %1952 = vmatprep.mubr.bf16.mxu0 %v6425_v3  ;;  %v824_v40 = vmax.f32 %v696_v21, 0.0  ;;  %v698_v47 = vadd.f32 %v5989_v17, %v548_v11  ;;  %v551_v24 = vmul.f32 %v5950_v48, %v401_v2  ;;  %v403_v4 = vunpack.c.h.bf16 %v293_v1 }
  0x84   : > { %8068 = vst [vmem:[#allocation51_spill] sm:$0xff] %v6429_v45  ;;  %2113 = vmatprep.mubr.bf16.mxu1 %v6429_v45  ;;  %v822_v44 = vmax.f32 %v694_v38, 0.0  ;;  %v555_v61 = vmul.f32 %v5950_v48, %v405_v42  ;;  %v407_v55 = vunpack.c.h.bf16 %v295_v29  ;;  %v400_v50 = vunpack.c.l.bf16 %v292_v31  ;;  %v296_v38 = vld [vmem:[%s5932_s29 + $0x180] sm:$0xff] }
  0x85   : > { %v6437_v7 = vpack.c.bf16 %v824_v40, %v820_v51  ;;  %v826_v32 = vmax.f32 %v698_v47, 0.0  ;;  %v701_v23 = vadd.f32 %v5959_v53, %v551_v24  ;;  %v553_v36 = vmul.f32 %v5957_v52, %v403_v4  ;;  %v298_v47 = vld [vmem:[%s5932_s29 + $0x190] sm:$0xff] }
  0x86   : > { %v705_v22 = vadd.f32 %v5959_v53, %v555_v61  ;;  %v557_v21 = vmul.f32 %v5957_v52, %v407_v55  ;;  %v404_v11 = vunpack.c.l.bf16 %v294_v5  ;;  %v550_v2 = vmul.f32 %v5967_v63, %v400_v50  ;;  %v297_v55 = vld [vmem:[%s5932_s29 + $0x188] sm:$0xff] }
  0x87   : > { %8069 = vst [vmem:[#allocation52_spill] sm:$0xff] %v6437_v7  ;;  %1953 = vmatmul.mubr.bf16.gmra.mrb[44].mxu0 %v6437_v7  ;;  %v6446_v31 = vpack.c.bf16 %v826_v32, %v822_v44  ;;  %v829_v51 = vmax.f32 %v701_v23, 0.0  ;;  %v703_v42 = vadd.f32 %v5961_v56, %v553_v36  ;;  %v402_v40 = vunpack.c.l.bf16 %v293_v1  ;;  %v299_v23 = vld [vmem:[%s5932_s29 + $0x198] sm:$0xff] }
  0x88   : > { %v833_v24 = vmax.f32 %v705_v22, 0.0  ;;  %v707_v4 = vadd.f32 %v5961_v56, %v557_v21  ;;  %v554_v61 = vmul.f32 %v5967_v63, %v404_v11  ;;  %v700_v5 = vadd.f32 %v5969_v0, %v550_v2 }
  0x89   : > { %8070 = vst [vmem:[#allocation53_spill] sm:$0xff] %v6446_v31  ;;  %2114 = vmatmul.mubr.bf16.gmra.mrb[44].mxu1 %v6446_v31  ;;  %v831_v50 = vmax.f32 %v703_v42, 0.0  ;;  %v406_v7 = vunpack.c.l.bf16 %v295_v29  ;;  %v552_v44 = vmul.f32 %v5987_v16, %v402_v40  ;;  %v409_v32 = vunpack.c.h.bf16 %v296_v38 }
  0x8a   : > { %v6457_v45 = vpack.c.bf16 %v833_v24, %v829_v51  ;;  %v835_v1 = vmax.f32 %v707_v4, 0.0  ;;  %v704_v36 = vadd.f32 %v5969_v0, %v554_v61  ;;  %v828_v22 = vmax.f32 %v700_v5, 0.0 }
  0x8b   : > { %v556_v21 = vmul.f32 %v5987_v16, %v406_v7  ;;  %v702_v11 = vadd.f32 %v5989_v17, %v552_v44  ;;  %v413_v2 = vunpack.c.h.bf16 %v298_v47  ;;  %v559_v57 = vmul.f32 %v5950_v48, %v409_v32 }
  0x8c   : > { %8071 = vst [vmem:[#allocation54_spill] sm:$0xff] %v6457_v45  ;;  %1960 = vmatprep.mubr.bf16.mxu0 %v6457_v45  ;;  %v6464_v29 = vpack.c.bf16 %v835_v1, %v831_v50  ;;  %v832_v42 = vmax.f32 %v704_v36, 0.0  ;;  %v411_v40 = vunpack.c.h.bf16 %v297_v55  ;;  %v415_v31 = vunpack.c.h.bf16 %v299_v23 }
  0x8d   : > { %v706_v51 = vadd.f32 %v5989_v17, %v556_v21  ;;  %v830_v24 = vmax.f32 %v702_v11, 0.0  ;;  %v563_v4 = vmul.f32 %v5950_v48, %v413_v2  ;;  %v709_v7 = vadd.f32 %v5959_v53, %v559_v57 }
  0x8e   : > { %8072 = vst [vmem:[#allocation55_spill] sm:$0xff] %v6464_v29  ;;  %2121 = vmatprep.mubr.bf16.mxu1 %v6464_v29  ;;  %v6470_v61 = vpack.c.bf16 %v832_v42, %v828_v22  ;;  %v561_v5 = vmul.f32 %v5957_v52, %v411_v40  ;;  %v565_v50 = vmul.f32 %v5957_v52, %v415_v31  ;;  %v408_v44 = vunpack.c.l.bf16 %v296_v38  ;;  %v300_v42 = vld [vmem:[%s5932_s29 + $0x1a0] sm:$0xff]  ;;  %v301_v29 = vld [vmem:[%s5932_s29 + $0x1a8] sm:$0xff] }
  0x8f   : > { %v834_v32 = vmax.f32 %v706_v51, 0.0  ;;  %v713_v1 = vadd.f32 %v5959_v53, %v563_v4  ;;  %v837_v36 = vmax.f32 %v709_v7, 0.0  ;;  %v412_v21 = vunpack.c.l.bf16 %v298_v47  ;;  %v302_v4 = vld [vmem:[%s5932_s29 + $0x1b0] sm:$0xff] }
  0x90   : > { %8073 = vst [vmem:[#allocation56_spill] sm:$0xff] %v6470_v61  ;;  %1961 = vmatmul.mubr.bf16.gmra.mrb[48].mxu0 %v6470_v61  ;;  %v711_v57 = vadd.f32 %v5961_v56, %v561_v5  ;;  %v715_v11 = vadd.f32 %v5961_v56, %v565_v50  ;;  %v558_v22 = vmul.f32 %v5967_v63, %v408_v44  ;;  %v410_v2 = vunpack.c.l.bf16 %v297_v55 }
  0x91   : > { %v6480_v31 = vpack.c.bf16 %v834_v32, %v830_v24  ;;  %v841_v38 = vmax.f32 %v713_v1, 0.0  ;;  %v562_v40 = vmul.f32 %v5967_v63, %v412_v21  ;;  %v414_v51 = vunpack.c.l.bf16 %v299_v23  ;;  %v303_v32 = vld [vmem:[%s5932_s29 + $0x1b8] sm:$0xff] }
  0x92   : > { %v839_v47 = vmax.f32 %v711_v57, 0.0  ;;  %v843_v7 = vmax.f32 %v715_v11, 0.0  ;;  %v708_v61 = vadd.f32 %v5969_v0, %v558_v22  ;;  %v560_v5 = vmul.f32 %v5987_v16, %v410_v2 }
  0x93   : > { %8074 = vst [vmem:[#allocation57_spill] sm:$0xff] %v6480_v31  ;;  %2122 = vmatmul.mubr.bf16.gmra.mrb[48].mxu1 %v6480_v31  ;;  %v6488_v50 = vpack.c.bf16 %v841_v38, %v837_v36  ;;  %v712_v55 = vadd.f32 %v5969_v0, %v562_v40  ;;  %v564_v24 = vmul.f32 %v5987_v16, %v414_v51  ;;  %v417_v44 = vunpack.c.h.bf16 %v300_v42 }
  0x94   : > { %v6493_v1 = vpack.c.bf16 %v843_v7, %v839_v47  ;;  %v836_v23 = vmax.f32 %v708_v61, 0.0  ;;  %v710_v21 = vadd.f32 %v5989_v17, %v560_v5  ;;  %v421_v57 = vunpack.c.h.bf16 %v302_v4 }
  0x95   : > { %8075 = vst [vmem:[#allocation58_spill] sm:$0xff] %v6488_v50  ;;  %1968 = vmatprep.mubr.bf16.mxu0 %v6488_v50  ;;  %v840_v11 = vmax.f32 %v712_v55, 0.0  ;;  %v714_v22 = vadd.f32 %v5989_v17, %v564_v24  ;;  %v567_v36 = vmul.f32 %v5950_v48, %v417_v44  ;;  %v419_v2 = vunpack.c.h.bf16 %v301_v29 }
  0x96   : > { %8076 = vst [vmem:[#allocation59_spill] sm:$0xff] %v6493_v1  ;;  %2129 = vmatprep.mubr.bf16.mxu1 %v6493_v1  ;;  %v838_v38 = vmax.f32 %v710_v21, 0.0  ;;  %v571_v40 = vmul.f32 %v5950_v48, %v421_v57  ;;  %v423_v51 = vunpack.c.h.bf16 %v303_v32  ;;  %v416_v47 = vunpack.c.l.bf16 %v300_v42  ;;  %v304_v21 = vld [vmem:[%s5932_s29 + $0x1c0] sm:$0xff] }
  0x97   : > { %v6501_v61 = vpack.c.bf16 %v840_v11, %v836_v23  ;;  %v842_v7 = vmax.f32 %v714_v22, 0.0  ;;  %v717_v5 = vadd.f32 %v5959_v53, %v567_v36  ;;  %v569_v55 = vmul.f32 %v5957_v52, %v419_v2 }
  0x98   : > { %v721_v24 = vadd.f32 %v5959_v53, %v571_v40  ;;  %v573_v44 = vmul.f32 %v5957_v52, %v423_v51  ;;  %v420_v31 = vunpack.c.l.bf16 %v302_v4  ;;  %v566_v1 = vmul.f32 %v5967_v63, %v416_v47  ;;  %v306_v40 = vld [vmem:[%s5932_s29 + $0x1d0] sm:$0xff] }
  0x99   : > { %8077 = vst [vmem:[#allocation60_spill] sm:$0xff] %v6501_v61  ;;  %1969 = vmatmul.mubr.bf16.gmra.mrb[52].mxu0 %v6501_v61  ;;  %v6510_v42 = vpack.c.bf16 %v842_v7, %v838_v38  ;;  %v845_v23 = vmax.f32 %v717_v5, 0.0  ;;  %v719_v57 = vadd.f32 %v5961_v56, %v569_v55  ;;  %v418_v11 = vunpack.c.l.bf16 %v301_v29  ;;  %v305_v7 = vld [vmem:[%s5932_s29 + $0x1c8] sm:$0xff]  ;;  %v307_v5 = vld [vmem:[%s5932_s29 + $0x1d8] sm:$0xff] }
  0x9a   : > { %v849_v22 = vmax.f32 %v721_v24, 0.0  ;;  %v723_v36 = vadd.f32 %v5961_v56, %v573_v44  ;;  %v570_v2 = vmul.f32 %v5967_v63, %v420_v31  ;;  %v716_v4 = vadd.f32 %v5969_v0, %v566_v1 }
  0x9b   : > { %8078 = vst [vmem:[#allocation61_spill] sm:$0xff] %v6510_v42  ;;  %2130 = vmatmul.mubr.bf16.gmra.mrb[52].mxu1 %v6510_v42  ;;  %v847_v51 = vmax.f32 %v719_v57, 0.0  ;;  %v422_v47 = vunpack.c.l.bf16 %v303_v32  ;;  %v568_v61 = vmul.f32 %v5987_v16, %v418_v11  ;;  %v425_v38 = vunpack.c.h.bf16 %v304_v21 }
  0x9c   : > { %v6521_v50 = vpack.c.bf16 %v849_v22, %v845_v23  ;;  %v851_v29 = vmax.f32 %v723_v36, 0.0  ;;  %v720_v55 = vadd.f32 %v5969_v0, %v570_v2  ;;  %v844_v24 = vmax.f32 %v716_v4, 0.0 }
  0x9d   : > { %v572_v31 = vmul.f32 %v5987_v16, %v422_v47  ;;  %v718_v1 = vadd.f32 %v5989_v17, %v568_v61  ;;  %v429_v44 = vunpack.c.h.bf16 %v306_v40  ;;  %v575_v42 = vmul.f32 %v5950_v48, %v425_v38 }
  0x9e   : > { %8079 = vst [vmem:[#allocation62_spill] sm:$0xff] %v6521_v50  ;;  %1976 = vmatprep.mubr.bf16.mxu0 %v6521_v50  ;;  %v6528_v32 = vpack.c.bf16 %v851_v29, %v847_v51  ;;  %v848_v57 = vmax.f32 %v720_v55, 0.0  ;;  %v427_v11 = vunpack.c.h.bf16 %v305_v7  ;;  %v431_v45 = vunpack.c.h.bf16 %v307_v5 }
  0x9f   : > { %v722_v23 = vadd.f32 %v5989_v17, %v572_v31  ;;  %v846_v22 = vmax.f32 %v718_v1, 0.0  ;;  %v579_v36 = vmul.f32 %v5950_v48, %v429_v44  ;;  %v725_v2 = vadd.f32 %v5959_v53, %v575_v42 }
  0xa0   : > { %8080 = vst [vmem:[#allocation63_spill] sm:$0xff] %v6528_v32  ;;  %2137 = vmatprep.mubr.bf16.mxu1 %v6528_v32  ;;  %v6534_v61 = vpack.c.bf16 %v848_v57, %v844_v24  ;;  %v577_v4 = vmul.f32 %v5957_v52, %v427_v11  ;;  %v581_v47 = vmul.f32 %v5957_v52, %v431_v45  ;;  %v424_v51 = vunpack.c.l.bf16 %v304_v21 }
  0xa1   : > { %v850_v38 = vmax.f32 %v722_v23, 0.0  ;;  %v729_v29 = vadd.f32 %v5959_v53, %v579_v36  ;;  %v853_v55 = vmax.f32 %v725_v2, 0.0  ;;  %v428_v50 = vunpack.c.l.bf16 %v306_v40 }
  0xa2   : > { %8081 = vst [vmem:[#allocation64_spill] sm:$0xff] %v6534_v61  ;;  %1977 = vmatmul.mubr.bf16.gmra.mrb[56].mxu0 %v6534_v61  ;;  %v727_v31 = vadd.f32 %v5961_v56, %v577_v4  ;;  %v731_v42 = vadd.f32 %v5961_v56, %v581_v47  ;;  %v574_v1 = vmul.f32 %v5967_v63, %v424_v51  ;;  %v426_v24 = vunpack.c.l.bf16 %v305_v7 }
  0xa3   : > { %v6543_v44 = vpack.c.bf16 %v850_v38, %v846_v22  ;;  %v857_v57 = vmax.f32 %v729_v29, 0.0  ;;  %v578_v45 = vmul.f32 %v5967_v63, %v428_v50  ;;  %v430_v21 = vunpack.c.l.bf16 %v307_v5  ;;  %v8102_v63 = vld [vmem:[#allocation47_spill] sm:$0xff] }
  0xa4   : > { %v855_v11 = vmax.f32 %v727_v31, 0.0  ;;  %v859_v23 = vmax.f32 %v731_v42, 0.0  ;;  %v724_v36 = vadd.f32 %v5969_v0, %v574_v1  ;;  %v576_v40 = vmul.f32 %v5987_v16, %v426_v24 }
  0xa5   : > { %8082 = vst [vmem:[#allocation65_spill] sm:$0xff] %v6543_v44  ;;  %2138 = vmatmul.mubr.bf16.gmra.mrb[56].mxu1 %v6543_v44  ;;  %v6549_v2 = vpack.c.bf16 %v857_v57, %v853_v55  ;;  %v728_v4 = vadd.f32 %v5969_v0, %v578_v45  ;;  %v580_v7 = vmul.f32 %v5987_v16, %v430_v21  ;;  %v940_v22 = vshrl.u32 %v5998_v25, 16  ;;  %v8101_v0 = vld [vmem:[#allocation45_spill] sm:$0xff] }
  0xa6   : > { %v6554_v47 = vpack.c.bf16 %v859_v23, %v855_v11  ;;  %v852_v50 = vmax.f32 %v724_v36, 0.0  ;;  %v726_v5 = vadd.f32 %v5989_v17, %v576_v40  ;;  %v954_v55 = vshrl.u32 %v6003_v30, 16 }
  0xa7   : > { %8083 = vst [vmem:[#allocation66_spill] sm:$0xff] %v6549_v2  ;;  %1984 = vmatprep.mubr.bf16.mxu0 %v6549_v2  ;;  %v856_v51 = vmax.f32 %v728_v4, 0.0  ;;  %v730_v38 = vadd.f32 %v5989_v17, %v580_v7  ;;  %v942_v1 = vrot.slane %v940_v22, 7  ;;  %v943_v24 = vshll.u32 %v5998_v25, 16  ;;  %v8094_v25 = vld [vmem:[#allocation43_spill] sm:$0xff] }
  0xa8   : > { %8084 = vst [vmem:[#allocation67_spill] sm:$0xff] %v6554_v47  ;;  %2145 = vmatprep.mubr.bf16.mxu1 %v6554_v47  ;;  %v854_v29 = vmax.f32 %v726_v5, 0.0  ;;  %v956_v45 = vrot.slane %v954_v55, 7  ;;  %v957_v21 = vshll.u32 %v6003_v30, 16  ;;  %v8087_v11 = vmov 0   ;;  %v5700_v5 = vld [vmem:[%s7874_s3 + $0x200] sm:$0xff]  }
  0xa9   : > { %v6561_v31 = vpack.c.bf16 %v856_v51, %v852_v50  ;;  %v858_v42 = vmax.f32 %v730_v38, 0.0  ;;  %v933_v23 = vshrl.u32 %v6013_v39, 16  ;;  %v945_v36 = vor.u32 %v943_v24, %v942_v1  ;;  %v5702_v1 = vld [vmem:[%s7874_s3 + $0x248] sm:$0xff]   ;;  %v5701_v24 = vld [vmem:[%s7874_s3 + $0x280] sm:$0xff]  }
  0xaa   : > { %v968_v40 = vshrl.u32 %v6048_v14, 16  ;;  %v947_v7 = vshrl.u32 %v6032_v59, 16  ;;  %v959_v22 = vor.u32 %v957_v21, %v956_v45  ;;  %v982_v50 = vshrl.u32 %v6058_v26, 16 }
  0xab   : > { %8085 = vst [vmem:[#allocation68_spill] sm:$0xff] %v6561_v31  ;;  %1985 = vmatmul.mubr.bf16.gmra.mrb[60].mxu0 %v6561_v31  ;;  %v6565_v57 = vpack.c.bf16 %v858_v42, %v854_v29  ;;  %v935_v51 = vrot.slane %v933_v23, 7  ;;  %v936_v38 = vshll.u32 %v6013_v39, 16  ;;  %v6585_v29 = vsel %vm6573_vm2, 0, %v945_v36 }
  0xac   : > { %2378 = vmatprep.mubr.bf16.mxu0 %v8087_v11  ;;  %v970_v55 = vrot.slane %v968_v40, 7  ;;  %v971_v42 = vshll.u32 %v6048_v14, 16  ;;  %v949_v45 = vrot.slane %v947_v7, 7  ;;  %v950_v21 = vshll.u32 %v6032_v59, 16  ;;  %v5703_v14 = vld [vmem:[%s7874_s3 + $0x2c8] sm:$0xff]  }
  0xad   : > { %8086 = vst [vmem:[#allocation69_spill] sm:$0xff] %v6565_v57  ;;  %2146 = vmatmul.mubr.bf16.gmra.mrb[60].mxu1 %v6565_v57  ;;  %v6598_v23 = vsel %vm6573_vm2, 0, %v959_v22  ;;  %v984_v36 = vrot.slane %v982_v50, 7  ;;  %v985_v40 = vshll.u32 %v6058_v26, 16  ;;  %v938_v39 = vor.u32 %v936_v38, %v935_v51  ;;  %v5704_v59 = vld [vmem:[%s7874_s3 + $0x208] sm:$0xff]   ;;  %v5706_v26 = vld [vmem:[%s7874_s3 + $0x250] sm:$0xff]  }
  0xae   : > { %2539 = vmatprep.mubr.bf16.mxu1 %v8087_v11  ;;  %v961_v7 = vshrl.u32 %v6071_v37, 16  ;;  %v973_v22 = vor.u32 %v971_v42, %v970_v55  ;;  %v996_v50 = vshrl.u32 %v6103_v9, 16  ;;  %v975_v51 = vshrl.u32 %v6090_v58, 16  ;;  %v5705_v38 = vld [vmem:[%s7874_s3 + $0x288] sm:$0xff]   ;;  %v5707_v55 = vld [vmem:[%s7874_s3 + $0x2d0] sm:$0xff]  }
  0xaf   : > { %v987_v30 = vor.u32 %v985_v40, %v984_v36  ;;  %v6625_v42 = vsel %vm6573_vm2, 0, %v938_v39  ;;  %v999_v36 = vshll.u32 %v6103_v9, 16  ;;  %v5710_v39 = vld [vmem:[%s7874_s3 + $0x258] sm:$0xff]   ;;  %v1013_v9 = vshll.u32 %v6110_v13, 16 }
  0xb0   : > { %v1171_v16 = vshrl.u32 %v8101_v0, 16 }
  0xb3   : > { %2379 = vmatmul.mubr.bf16.vlgmr.msra.gmra.mrb[64].mxu0 %v8087_v11 }
  0xb4   : > { %5177 = vmatpush3.bf16.msra.mxu0 %v5700_v5  ;;  %2386 = vmatprep.mubr.bf16.mxu0 %v6585_v29  ;;  %v952_v5 = vor.u32 %v950_v21, %v949_v45  ;;  %v5708_v45 = vld [vmem:[%s7874_s3 + $0x210] sm:$0xff]   ;;  %v998_v21 = vrot.slane %v996_v50, 7 }
  0xb5   : > { %2540 = vmatmul.mubr.bf16.vlgmr.msra.gmra.mrb[64].mxu1 %v8087_v11  ;;  %5178 = vmatprep.subr.bf16.mxu0 %v5702_v1  ;;  %v1010_v11 = vshrl.u32 %v6110_v13, 16  ;;  %v963_v1 = vrot.slane %v961_v7, 7  ;;  %v978_v7 = vshll.u32 %v6090_v58, 16  ;;  %v5712_v58 = vld [vmem:[%s7874_s3 + $0x218] sm:$0xff]  }
  0xb6   : > { %5289 = vmatpush3.bf16.msra.mxu1 %v5701_v24  ;;  %2547 = vmatprep.mubr.bf16.mxu1 %v6598_v23  ;;  %v964_v24 = vshll.u32 %v6071_v37, 16  ;;  %v6641_v40 = vsel %vm6573_vm2, 0, %v952_v5  ;;  %v5711_v5 = vld [vmem:[%s7874_s3 + $0x2d8] sm:$0xff]  }
  0xb7   : > { %5290 = vmatprep.subr.bf16.mxu1 %v5703_v14  ;;  %v6633_v14 = vsel %vm6573_vm2, 0, %v973_v22  ;;  %v5709_v22 = vld [vmem:[%s7874_s3 + $0x290] sm:$0xff]   ;;  %v1012_v50 = vrot.slane %v1010_v11, 7  ;;  %v1024_v11 = vshrl.u32 %v6164_v10, 16 }
  0xb8   : > { %5179 = vmatpush3.bf16.msra.mxu0 %v5704_v59  ;;  %v977_v59 = vrot.slane %v975_v51, 7  ;;  %v966_v51 = vor.u32 %v964_v24, %v963_v1  ;;  %v1003_v24 = vshrl.u32 %v6145_v46, 16 }
  0xb9   : > { %5180 = vmatprep.subr.bf16.mxu0 %v5706_v26  ;;  %v6650_v26 = vsel %vm6573_vm2, 0, %v987_v30  ;;  %v1001_v30 = vor.u32 %v999_v36, %v998_v21  ;;  %v1015_v13 = vor.u32 %v1013_v9, %v1012_v50  ;;  %v1038_v21 = vshrl.u32 %v6172_v20, 16  ;;  %v5715_v36 = vld [vmem:[%s7874_s3 + $0x2e0] sm:$0xff]  }
  0xba   : > { %5291 = vmatpush3.bf16.msra.mxu1 %v5705_v38  ;;  %v989_v38 = vshrl.u32 %v6127_v33, 16  ;;  %v980_v1 = vor.u32 %v978_v7, %v977_v59  ;;  %v992_v7 = vshll.u32 %v6127_v33, 16  ;;  %v1026_v50 = vrot.slane %v1024_v11, 7 }
  0xbb   : > { %2387 = vmatmul.mubr.bf16.gmra.mrb[68].mxu0 %v6625_v42  ;;  %5292 = vmatprep.subr.bf16.mxu1 %v5707_v55  ;;  %v5714_v55 = vld [vmem:[%s7874_s3 + $0x260] sm:$0xff]   ;;  %v6685_v9 = vsel %vm6573_vm2, 0, %v1001_v30  ;;  %v1006_v33 = vshll.u32 %v6145_v46, 16  ;;  %v6702_v11 = vsel %vm6573_vm2, 0, %v1015_v13  ;;  %v5720_v46 = vld [vmem:[%s7874_s3 + $0x228] sm:$0xff]  }
  0xbc   : > { %2394 = vmatprep.mubr.bf16.mxu0 %v6633_v14  ;;  %5181 = vmatpush3.bf16.msra.mxu0 %v5708_v45  ;;  %v5713_v45 = vld [vmem:[%s7874_s3 + $0x298] sm:$0xff]   ;;  %v991_v59 = vrot.slane %v989_v38, 7  ;;  %v6693_v38 = vsel %vm6573_vm2, 0, %v980_v1  ;;  %v5717_v30 = vld [vmem:[%s7874_s3 + $0x2a0] sm:$0xff]   ;;  %v5719_v1 = vld [vmem:[%s7874_s3 + $0x2e8] sm:$0xff]  }
  0xbd   : > { %2548 = vmatmul.mubr.bf16.gmra.mrb[68].mxu1 %v6641_v40  ;;  %5182 = vmatprep.subr.bf16.mxu0 %v5710_v39  ;;  %v6677_v39 = vsel %vm6573_vm2, 0, %v966_v51  ;;  %v5718_v51 = vld [vmem:[%s7874_s3 + $0x268] sm:$0xff]  }
  0xbe   : > { %2555 = vmatprep.mubr.bf16.mxu1 %v6650_v26  ;;  %5293 = vmatpush3.bf16.msra.mxu1 %v5709_v22  ;;  %v5716_v22 = vld [vmem:[%s7874_s3 + $0x220] sm:$0xff]  }
  0xbf   : > { %5294 = vmatprep.subr.bf16.mxu1 %v5711_v5  ;;  %v1027_v5 = vshll.u32 %v6164_v10, 16  ;;  %v1041_v10 = vshll.u32 %v6172_v20, 16 }
  0xc0   : > { %5183 = vmatpush3.bf16.msra.mxu0 %v5712_v58  ;;  %v1005_v58 = vrot.slane %v1003_v24, 7  ;;  %v994_v24 = vor.u32 %v992_v7, %v991_v59  ;;  %v1031_v7 = vshrl.u32 %v6202_v60, 16 }
  0xc1   : > { %5184 = vmatprep.subr.bf16.mxu0 %v5714_v55  ;;  %v1040_v55 = vrot.slane %v1038_v21, 7  ;;  %v1029_v13 = vor.u32 %v1027_v5, %v1026_v50  ;;  %v1052_v21 = vshrl.u32 %v6216_v15, 16  ;;  %v1066_v50 = vshrl.u32 %v6220_v19, 16  ;;  %v5723_v5 = vld [vmem:[%s7874_s3 + $0x2f0] sm:$0xff]  }
  0xc2   : > { %5295 = vmatpush3.bf16.msra.mxu1 %v5713_v45  ;;  %v1017_v45 = vshrl.u32 %v6184_v35, 16  ;;  %v1008_v59 = vor.u32 %v1006_v33, %v1005_v58  ;;  %v1020_v58 = vshll.u32 %v6184_v35, 16  ;;  %v1034_v35 = vshll.u32 %v6202_v60, 16  ;;  %v5728_v60 = vld [vmem:[%s7874_s3 + $0x238] sm:$0xff]  }
  0xc3   : > { %2395 = vmatmul.mubr.bf16.gmra.mrb[72].mxu0 %v6677_v39  ;;  %5296 = vmatprep.subr.bf16.mxu1 %v5715_v36  ;;  %v5722_v36 = vld [vmem:[%s7874_s3 + $0x270] sm:$0xff]   ;;  %v1043_v20 = vor.u32 %v1041_v10, %v1040_v55  ;;  %v6737_v10 = vsel %vm6573_vm2, 0, %v1029_v13  ;;  %v1054_v55 = vrot.slane %v1052_v21, 7 }
  0xc4   : > { %2402 = vmatprep.mubr.bf16.mxu0 %v6685_v9  ;;  %5185 = vmatpush3.bf16.msra.mxu0 %v5716_v22  ;;  %v5721_v22 = vld [vmem:[%s7874_s3 + $0x2a8] sm:$0xff]   ;;  %v1019_v33 = vrot.slane %v1017_v45, 7  ;;  %v6745_v45 = vsel %vm6573_vm2, 0, %v1008_v59  ;;  %v5725_v13 = vld [vmem:[%s7874_s3 + $0x2b0] sm:$0xff]   ;;  %v5727_v59 = vld [vmem:[%s7874_s3 + $0x2f8] sm:$0xff]  }
  0xc5   : > { %2556 = vmatmul.mubr.bf16.gmra.mrb[72].mxu1 %v6693_v38  ;;  %5186 = vmatprep.subr.bf16.mxu0 %v5718_v51  ;;  %v6729_v51 = vsel %vm6573_vm2, 0, %v994_v24  ;;  %v5726_v24 = vld [vmem:[%s7874_s3 + $0x278] sm:$0xff]   ;;  %v6754_v21 = vsel %vm6573_vm2, 0, %v1043_v20 }
  0xc6   : > { %2563 = vmatprep.mubr.bf16.mxu1 %v6702_v11  ;;  %5297 = vmatpush3.bf16.msra.mxu1 %v5717_v30  ;;  %v5724_v30 = vld [vmem:[%s7874_s3 + $0x230] sm:$0xff]  }
  0xc7   : > { %5298 = vmatprep.subr.bf16.mxu1 %v5719_v1  ;;  %v1055_v1 = vshll.u32 %v6216_v15, 16  ;;  %v1069_v15 = vshll.u32 %v6220_v19, 16 }
  0xc8   : > { %5187 = vmatpush3.bf16.msra.mxu0 %v5720_v46  ;;  %v1033_v46 = vrot.slane %v1031_v7, 7  ;;  %v1022_v7 = vor.u32 %v1020_v58, %v1019_v33  ;;  %v1059_v58 = vshrl.u32 %v6251_v62, 16 }
  0xc9   : > { %5188 = vmatprep.subr.bf16.mxu0 %v5722_v36  ;;  %v1068_v36 = vrot.slane %v1066_v50, 7  ;;  %v1057_v20 = vor.u32 %v1055_v1, %v1054_v55  ;;  %v1080_v50 = vshrl.u32 %v6265_v27, 16  ;;  %v1094_v55 = vshrl.u32 %v6272_v12, 16  ;;  %v5731_v1 = vld [vmem:[%s7874_s3 + $0x3c0] sm:$0xff]  }
  0xca   : > { %5299 = vmatpush3.bf16.msra.mxu1 %v5721_v22  ;;  %v1045_v22 = vshrl.u32 %v6238_v43, 16  ;;  %v1036_v33 = vor.u32 %v1034_v35, %v1033_v46  ;;  %v1048_v46 = vshll.u32 %v6238_v43, 16  ;;  %v1061_v37 = vrot.slane %v1059_v58, 7 }
  0xcb   : > { %2403 = vmatmul.mubr.bf16.gmra.mrb[76].mxu0 %v6729_v51  ;;  %5300 = vmatprep.subr.bf16.mxu1 %v5723_v5  ;;  %v5730_v5 = vld [vmem:[%s7874_s3 + $0x340] sm:$0xff]   ;;  %v1071_v19 = vor.u32 %v1069_v15, %v1068_v36  ;;  %v1082_v15 = vrot.slane %v1080_v50, 7  ;;  %v1083_v36 = vshll.u32 %v6265_v27, 16  ;;  %v1108_v58 = vshrl.u32 %v6297_v41, 16  ;;  %v8093_v27 = vld [vmem:[#allocation41_spill] sm:$0xff] }
  0xcc   : > { %2410 = vmatprep.mubr.bf16.mxu0 %v6737_v10  ;;  %5189 = vmatpush3.bf16.msra.mxu0 %v5724_v30  ;;  %v5729_v30 = vld [vmem:[%s7874_s3 + $0x2b8] sm:$0xff]   ;;  %v1047_v35 = vrot.slane %v1045_v22, 7  ;;  %v1096_v22 = vrot.slane %v1094_v55, 7  ;;  %v1122_v55 = vshrl.u32 %v6301_v49, 16  ;;  %v1143_v43 = vshrl.u32 %v8093_v27, 16 }
  0xcd   : > { %2564 = vmatmul.mubr.bf16.gmra.mrb[76].mxu1 %v6745_v45  ;;  %5190 = vmatprep.subr.bf16.mxu0 %v5726_v24  ;;  %v6781_v24 = vsel %vm6573_vm2, 0, %v1022_v7  ;;  %v1062_v7 = vshll.u32 %v6251_v62, 16 }
  0xce   : > { %2571 = vmatprep.mubr.bf16.mxu1 %v6754_v21  ;;  %5301 = vmatpush3.bf16.msra.mxu1 %v5725_v13  ;;  %v6786_v13 = vsel %vm6573_vm2, 0, %v1057_v20  ;;  %v1097_v20 = vshll.u32 %v6272_v12, 16  ;;  %v1050_v50 = vor.u32 %v1048_v46, %v1047_v35  ;;  %v1076_v46 = vshll.u32 %v6278_v54, 16 }
  0xcf   : > { %5302 = vmatprep.subr.bf16.mxu1 %v5727_v59  ;;  %v6791_v59 = vsel %vm6573_vm2, 0, %v1036_v33  ;;  %v1085_v33 = vor.u32 %v1083_v36, %v1082_v15  ;;  %v1110_v36 = vrot.slane %v1108_v58, 7  ;;  %v1111_v12 = vshll.u32 %v6297_v41, 16 }
  0xd0   : > { %5191 = vmatpush3.bf16.msra.mxu0 %v5728_v60  ;;  %v6797_v60 = vsel %vm6573_vm2, 0, %v1071_v19  ;;  %v1087_v19 = vshrl.u32 %v6290_v28, 16  ;;  %v1099_v62 = vor.u32 %v1097_v20, %v1096_v22  ;;  %v1090_v22 = vshll.u32 %v6290_v28, 16 }
  0xd1   : > { %5400 = vmatprep.subr.bf16.mxu0 %v5730_v5  ;;  %v1073_v5 = vshrl.u32 %v6278_v54, 16  ;;  %v6814_v15 = vsel %vm6573_vm2, 0, %v1085_v33  ;;  %v1101_v58 = vshrl.u32 %v6309_v18, 16  ;;  %v1115_v41 = vshrl.u32 %v6318_v6, 16 }
  0xd2   : > { %5303 = vmatpush3.bf16.msra.mxu1 %v5729_v30  ;;  %v1064_v30 = vor.u32 %v1062_v7, %v1061_v37  ;;  %v1089_v7 = vrot.slane %v1087_v19, 7  ;;  %v6825_v20 = vsel %vm6573_vm2, 0, %v1099_v62  ;;  %v1136_v19 = vshrl.u32 %v6329_v8, 16 }
  0xd3   : > { %2411 = vmatmul.mubr.bf16.gmra.mrb[80].mxu0 %v6781_v24  ;;  %5512 = vmatprep.subr.bf16.mxu1 %v5731_v1  ;;  %v6809_v1 = vsel %vm6573_vm2, 0, %v1050_v50  ;;  %v1075_v35 = vrot.slane %v1073_v5, 7  ;;  %v1124_v50 = vrot.slane %v1122_v55, 7  ;;  %v1125_v5 = vshll.u32 %v6301_v49, 16 }
  0xd4   : > { %2418 = vmatprep.mubr.bf16.mxu0 %v6786_v13  ;;  %v6819_v37 = vsel %vm6573_vm2, 0, %v1064_v30  ;;  %v1113_v30 = vor.u32 %v1111_v12, %v1110_v36  ;;  %v1092_v28 = vor.u32 %v1090_v22, %v1089_v7  ;;  %v1150_v55 = vshrl.u32 %v6336_v34, 16 }
  0xd5   : > { %2572 = vmatmul.mubr.bf16.gmra.mrb[80].mxu1 %v6791_v59  ;;  %v1078_v33 = vor.u32 %v1076_v46, %v1075_v35  ;;  %v1127_v62 = vor.u32 %v1125_v5, %v1124_v50  ;;  %v1103_v35 = vrot.slane %v1101_v58, 7  ;;  %v1104_v46 = vshll.u32 %v6309_v18, 16 }
  0xd6   : > { %2579 = vmatprep.mubr.bf16.mxu1 %v6797_v60  ;;  %v6842_v12 = vsel %vm6573_vm2, 0, %v1113_v30  ;;  %v1138_v36 = vrot.slane %v1136_v19, 7  ;;  %v1139_v54 = vshll.u32 %v6329_v8, 16  ;;  %v6847_v7 = vsel %vm6573_vm2, 0, %v1092_v28  ;;  %v8091_v19 = vld [vmem:[#allocation40_spill] sm:$0xff] }
  0xd7   : > { %v6837_v49 = vsel %vm6573_vm2, 0, %v1078_v33  ;;  %v1117_v22 = vrot.slane %v1115_v41, 7  ;;  %v1118_v50 = vshll.u32 %v6318_v6, 16  ;;  %v6853_v5 = vsel %vm6573_vm2, 0, %v1127_v62  ;;  %v8092_v41 = vld [vmem:[#allocation42_spill] sm:$0xff] }
  0xd8   : > { %8090 = vst [vmem:[#allocation70_spill] sm:$0xff] %v6853_v5  ;;  %v1152_v33 = vrot.slane %v1150_v55, 7  ;;  %v1153_v58 = vshll.u32 %v6336_v34, 16  ;;  %v1106_v30 = vor.u32 %v1104_v46, %v1103_v35  ;;  %v1129_v8 = vshrl.u32 %v8091_v19, 16 }
  0xd9   : > { %v1141_v28 = vor.u32 %v1139_v54, %v1138_v36  ;;  %v1164_v18 = vshrl.u32 %v8092_v41, 16  ;;  %v1120_v6 = vor.u32 %v1118_v50, %v1117_v22  ;;  %v1178_v55 = vshrl.u32 %v8094_v25, 16 }
  0xda   : > { %v1155_v62 = vor.u32 %v1153_v58, %v1152_v33  ;;  %v6865_v34 = vsel %vm6573_vm2, 0, %v1106_v30  ;;  %v1131_v35 = vrot.slane %v1129_v8, 7  ;;  %v1132_v46 = vshll.u32 %v8091_v19, 16 }
  0xdb   : > { %2419 = vmatmul.mubr.bf16.gmra.mrb[84].mxu0 %v6809_v1  ;;  %8095 = vst [vmem:[#allocation71_spill] sm:$0xff] %v6865_v34  ;;  %v6870_v54 = vsel %vm6573_vm2, 0, %v1141_v28  ;;  %v1166_v36 = vrot.slane %v1164_v18, 7  ;;  %v1167_v17 = vshll.u32 %v8092_v41, 16  ;;  %v6875_v22 = vsel %vm6573_vm2, 0, %v1120_v6  ;;  %v8099_v28 = vld [vmem:[#allocation44_spill] sm:$0xff] }
  0xdc   : > { %2426 = vmatprep.mubr.bf16.mxu0 %v6814_v15  ;;  %8096 = vst [vmem:[#allocation72_spill] sm:$0xff] %v6870_v54  ;;  %8097 = vst [vmem:[#allocation73_spill] sm:$0xff] %v6875_v22  ;;  %v1145_v50 = vrot.slane %v1143_v43, 7  ;;  %v1146_v33 = vshll.u32 %v8093_v27, 16  ;;  %v6881_v8 = vsel %vm6573_vm2, 0, %v1155_v62  ;;  %v1180_v58 = vrot.slane %v1178_v55, 7 }
  0xdd   : > { %2580 = vmatmul.mubr.bf16.gmra.mrb[84].mxu1 %v6819_v37  ;;  %8098 = vst [vmem:[#allocation74_spill] sm:$0xff] %v6881_v8  ;;  %v1181_v30 = vshll.u32 %v8094_v25, 16  ;;  %v1134_v18 = vor.u32 %v1132_v46, %v1131_v35  ;;  %v1157_v41 = vshrl.u32 %v8099_v28, 16  ;;  %v1169_v6 = vor.u32 %v1167_v17, %v1166_v36  ;;  %v8100_v43 = vld [vmem:[#allocation46_spill] sm:$0xff] }
  0xde   : > { %2587 = vmatprep.mubr.bf16.mxu1 %v6825_v20  ;;  %v1192_v19 = vshrl.u32 %v8100_v43, 16  ;;  %v1148_v27 = vor.u32 %v1146_v33, %v1145_v50  ;;  %v1206_v55 = vshrl.u32 %v8102_v63, 16  ;;  %v1160_v46 = vshll.u32 %v8099_v28, 16 }
  0xdf   : > { %v1183_v62 = vor.u32 %v1181_v30, %v1180_v58  ;;  %v6893_v25 = vsel %vm6573_vm2, 0, %v1134_v18  ;;  %v1159_v35 = vrot.slane %v1157_v41, 7  ;;  %v6898_v17 = vsel %vm6573_vm2, 0, %v1169_v6 }
  0xe0   : > { %8103 = vst [vmem:[#allocation75_spill] sm:$0xff] %v6893_v25  ;;  %8104 = vst [vmem:[#allocation76_spill] sm:$0xff] %v6898_v17  ;;  %v1174_v36 = vshll.u32 %v8101_v0, 16  ;;  %v1194_v50 = vrot.slane %v1192_v19, 7  ;;  %v1195_v33 = vshll.u32 %v8100_v43, 16  ;;  %v6904_v53 = vsel %vm6573_vm2, 0, %v1148_v27 }
  0xe1   : > { %v1173_v18 = vrot.slane %v1171_v16, 7  ;;  %v1209_v41 = vshll.u32 %v8102_v63, 16  ;;  %v6910_v6 = vsel %vm6573_vm2, 0, %v1183_v62  ;;  %v1208_v19 = vrot.slane %v1206_v55, 7  ;;  %v8106_v0 = vld [vmem:[#allocation48_spill] sm:$0xff] }
  0xe2   : > { %8105 = vst [vmem:[#allocation77_spill] sm:$0xff] %v6910_v6  ;;  %v1185_v43 = vshrl.u32 %v8106_v0, 16  ;;  %v1162_v16 = vor.u32 %v1160_v46, %v1159_v35  ;;  %v1220_v62 = vshrl.u32 %v6425_v3, 16 }
  0xe3   : > { %2427 = vmatmul.mubr.bf16.gmra.mrb[88].mxu0 %v6837_v49  ;;  %v1176_v55 = vor.u32 %v1174_v36, %v1173_v18 }
  0xe4   : > { %2434 = vmatprep.mubr.bf16.mxu0 %v6842_v12 }
  0xe5   : > { %2588 = vmatmul.mubr.bf16.gmra.mrb[88].mxu1 %v6847_v7  ;;  %v6935_v46 = vsel %vm6573_vm2, 0, %v1176_v55 }
  0xe6   : > { %2595 = vmatprep.mubr.bf16.mxu1 %v6853_v5  ;;  %v1211_v5 = vor.u32 %v1209_v41, %v1208_v19  ;;  %8113 = vst [vmem:[#allocation82_spill] sm:$0xff] %v6935_v46  ;;  %v8115_v41 = vld [vmem:[#allocation52_spill] sm:$0xff] }
  0xe7   : > { %v1213_v19 = vshrl.u32 %v8115_v41, 16 }
  0xe8   : > { %v6941_v36 = vsel %vm6573_vm2, 0, %v1211_v5 }
  0xe9   : > { %8114 = vst [vmem:[#allocation83_spill] sm:$0xff] %v6941_v36 }
  0xeb   : > { %2435 = vmatmul.mubr.bf16.gmra.mrb[92].mxu0 %v6865_v34 }
  0xec   : > { %2442 = vmatprep.mubr.bf16.mxu0 %v6870_v54 }
  0xed   : > { %2596 = vmatmul.mubr.bf16.gmra.mrb[92].mxu1 %v6875_v22 }
  0xee   : > { %2603 = vmatprep.mubr.bf16.mxu1 %v6881_v8 }
  0xf3   : > { %2443 = vmatmul.mubr.bf16.gmra.mrb[96].mxu0 %v6893_v25 }
  0xf4   : > { %2450 = vmatprep.mubr.bf16.mxu0 %v6898_v17  ;;  %v1187_v17 = vrot.slane %v1185_v43, 7 }
  0xf5   : > { %2604 = vmatmul.mubr.bf16.gmra.mrb[96].mxu1 %v6904_v53 }
  0xf6   : > { %2611 = vmatprep.mubr.bf16.mxu1 %v6910_v6  ;;  %v8123_v6 = vld [vmem:[#allocation58_spill] sm:$0xff] }
  0xfd   : > { %2612 = vmatmul.mubr.bf16.gmra.mrb[100].mxu1 %v6935_v46 }
  0xfe   : > { %2619 = vmatprep.mubr.bf16.mxu1 %v6941_v36 }
 0x102   : > { %v4744_v56 = vpop.f32.mrb[0].mxu0 }
 0x103   : > { %v4856_v58 = vpop.f32.mrb[0].mxu1  ;;  %v4745_v30 = vpop.f32.mrb[1].mxu0 }
 0x104   : > { %v4746_v28 = vadd.f32 %v4745_v30, %v4744_v56  ;;  %v4857_v52 = vpop.f32.mrb[1].mxu1  ;;  %v4747_v48 = vpop.f32.mrb[2].mxu0  ;;  %v1197_v56 = vor.u32 %v1195_v33, %v1194_v50 }
 0x105   : > { %v4858_v8 = vadd.f32 %v4857_v52, %v4856_v58  ;;  %v4859_v22 = vpop.f32.mrb[2].mxu1  ;;  %v4748_v54 = vpop.f32.mrb[3].mxu0  ;;  %v1188_v52 = vshll.u32 %v8106_v0, 16  ;;  %v8108_v58 = vld [vmem:[#allocation49_spill] sm:$0xff] }
 0x106   : > { %v4749_v27 = vadd.f32 %v4748_v54, %v4747_v48  ;;  %v4860_v63 = vpop.f32.mrb[3].mxu1  ;;  %v1199_v34 = vshrl.u32 %v8108_v58, 16  ;;  %v8110_v48 = vld [vmem:[#allocation51_spill] sm:$0xff] }
 0x107   : > { %v6915_v30 = vadd.f32 %v4858_v8, %v4746_v28  ;;  %v4861_v25 = vadd.f32 %v4860_v63, %v4859_v22  ;;  %v1234_v54 = vshrl.u32 %v8110_v48, 16  ;;  %v6926_v8 = vsel %vm6573_vm2, 0, %v1162_v16 }
 0x108   : > { %8111 = vst [vmem:[#allocation80_spill] sm:$0xff] %v6926_v8  ;;  %v6930_v63 = vsel %vm6573_vm2, 0, %v1197_v56  ;;  %v1222_v22 = vrot.slane %v1220_v62, 7  ;;  %v1223_v28 = vshll.u32 %v6425_v3, 16  ;;  %v1201_v43 = vrot.slane %v1199_v34, 7  ;;  %2451 = vmatmul.mubr.bf16.gmra.mrb[100].mxu0 %v6926_v8  ;;  %v8116_v34 = vld [vmem:[#allocation53_spill] sm:$0xff] }
 0x109   : > { %8107 = vst [vmem:[#allocation78_spill] sm:$0xff] %v6915_v30  ;;  %v6921_v35 = vadd.f32 %v4861_v25, %v4749_v27  ;;  %8112 = vst [vmem:[#allocation81_spill] sm:$0xff] %v6930_v63  ;;  %v1202_v25 = vshll.u32 %v8108_v58, 16  ;;  %v1190_v50 = vor.u32 %v1188_v52, %v1187_v17  ;;  %v1236_v33 = vrot.slane %v1234_v54, 7  ;;  %2458 = vmatprep.mubr.bf16.mxu0 %v6930_v63  ;;  %v8117_v56 = vld [vmem:[#allocation54_spill] sm:$0xff]  ;;  %v8119_v54 = vld [vmem:[#allocation55_spill] sm:$0xff] }
 0x10a   : > { %v1237_v18 = vshll.u32 %v8110_v48, 16  ;;  %v1225_v16 = vor.u32 %v1223_v28, %v1222_v22  ;;  %v1227_v27 = vshrl.u32 %v8116_v34, 16  ;;  %v1248_v62 = vshrl.u32 %v8117_v56, 16  ;;  %v4750_v52 = vpop.f32.mrb[4].mxu0 }
 0x10b   : > { %8109 = vst [vmem:[#allocation79_spill] sm:$0xff] %v6921_v35  ;;  %v1204_v55 = vor.u32 %v1202_v25, %v1201_v43  ;;  %v6952_v5 = vsel %vm6573_vm2, 0, %v1190_v50  ;;  %v1262_v48 = vshrl.u32 %v8119_v54, 16  ;;  %v1215_v58 = vrot.slane %v1213_v19, 7  ;;  %v4751_v28 = vpop.f32.mrb[5].mxu0 }
 0x10c   : > { %8118 = vst [vmem:[#allocation84_spill] sm:$0xff] %v6952_v5  ;;  %v1239_v17 = vor.u32 %v1237_v18, %v1236_v33  ;;  %v1216_v3 = vshll.u32 %v8115_v41, 16  ;;  %v1230_v22 = vshll.u32 %v8116_v34, 16  ;;  %v1251_v0 = vshll.u32 %v8117_v56, 16  ;;  %v4753_v50 = vpop.f32.mrb[6].mxu0  ;;  %v4862_v18 = vpop.f32.mrb[4].mxu1 }
 0x10d   : > { %v6960_v35 = vsel %vm6573_vm2, 0, %v1225_v16  ;;  %v1229_v43 = vrot.slane %v1227_v27, 7  ;;  %v4752_v25 = vadd.f32 %v4751_v28, %v4750_v52  ;;  %v1250_v30 = vrot.slane %v1248_v62, 7  ;;  %v4754_v19 = vpop.f32.mrb[7].mxu0  ;;  %v8121_v41 = vld [vmem:[#allocation56_spill] sm:$0xff]  ;;  %v4863_v16 = vpop.f32.mrb[5].mxu1 }
 0x10e   : > { %8120 = vst [vmem:[#allocation85_spill] sm:$0xff] %v6960_v35  ;;  %v6964_v33 = vsel %vm6573_vm2, 0, %v1204_v55  ;;  %v1241_v36 = vshrl.u32 %v8121_v41, 16  ;;  %v6970_v34 = vsel %vm6573_vm2, 0, %v1239_v17  ;;  %v4755_v56 = vadd.f32 %v4754_v19, %v4753_v50  ;;  %v4865_v28 = vpop.f32.mrb[6].mxu1 }
 0x10f   : > { %8122 = vst [vmem:[#allocation86_spill] sm:$0xff] %v6970_v34  ;;  %v1264_v27 = vrot.slane %v1262_v48, 7  ;;  %v1265_v52 = vshll.u32 %v8119_v54, 16  ;;  %v1218_v62 = vor.u32 %v1216_v3, %v1215_v58  ;;  %v4864_v55 = vadd.f32 %v4863_v16, %v4862_v18  ;;  %2620 = vmatmul.mubr.bf16.gmra.mrb[104].mxu1 %v6964_v33  ;;  %v4866_v63 = vpop.f32.mrb[7].mxu1  ;;  %v8125_v54 = vld [vmem:[#allocation57_spill] sm:$0xff]  ;;  %v8126_v58 = vld [vmem:[#allocation59_spill] sm:$0xff] }
 0x110   : > { %2459 = vmatmul.mubr.bf16.gmra.mrb[104].mxu0 %v6952_v5  ;;  %v1232_v46 = vor.u32 %v1230_v22, %v1229_v43  ;;  %v1253_v8 = vor.u32 %v1251_v0, %v1250_v30  ;;  %v1244_v5 = vshll.u32 %v8121_v41, 16  ;;  %v1276_v17 = vshrl.u32 %v8123_v6, 16  ;;  %2627 = vmatprep.mubr.bf16.mxu1 %v6970_v34  ;;  %v8132_v41 = vld [vmem:[#allocation62_spill] sm:$0xff] }
 0x111   : > { %2466 = vmatprep.mubr.bf16.mxu0 %v6960_v35  ;;  %v6978_v50 = vadd.f32 %v4864_v55, %v4752_v25  ;;  %v4867_v48 = vadd.f32 %v4866_v63, %v4865_v28  ;;  %v1243_v19 = vrot.slane %v1241_v36, 7  ;;  %v1255_v35 = vshrl.u32 %v8125_v54, 16 }
 0x112   : > { %v1267_v3 = vor.u32 %v1265_v52, %v1264_v27  ;;  %v1290_v18 = vshrl.u32 %v8126_v58, 16  ;;  %v6984_v22 = vsel %vm6573_vm2, 0, %v1218_v62  ;;  %v6990_v30 = vsel %vm6573_vm2, 0, %v1253_v8  ;;  %v4756_v43 = vpop.f32.mrb[8].mxu0 }
 0x113   : > { %8124 = vst [vmem:[#allocation87_spill] sm:$0xff] %v6978_v50  ;;  %8127 = vst [vmem:[#allocation88_spill] sm:$0xff] %v6984_v22  ;;  %v6986_v0 = vadd.f32 %v4867_v48, %v4755_v56  ;;  %v1278_v25 = vrot.slane %v1276_v17, 7  ;;  %v1279_v63 = vshll.u32 %v8123_v6, 16  ;;  %v6995_v36 = vsel %vm6573_vm2, 0, %v1232_v46  ;;  %v4757_v62 = vpop.f32.mrb[9].mxu0 }
 0x114   : > { %8129 = vst [vmem:[#allocation90_spill] sm:$0xff] %v6990_v30  ;;  %8130 = vst [vmem:[#allocation91_spill] sm:$0xff] %v6995_v36  ;;  %v1246_v16 = vor.u32 %v1244_v5, %v1243_v19  ;;  %v1257_v27 = vrot.slane %v1255_v35, 7  ;;  %v1258_v52 = vshll.u32 %v8125_v54, 16  ;;  %v7001_v56 = vsel %vm6573_vm2, 0, %v1267_v3  ;;  %v4759_v55 = vpop.f32.mrb[10].mxu0 }
 0x115   : > { %8128 = vst [vmem:[#allocation89_spill] sm:$0xff] %v6986_v0  ;;  %v4758_v8 = vadd.f32 %v4757_v62, %v4756_v43  ;;  %v1292_v28 = vrot.slane %v1290_v18, 7  ;;  %v1293_v17 = vshll.u32 %v8126_v58, 16  ;;  %v4868_v46 = vpop.f32.mrb[8].mxu1  ;;  %v4760_v48 = vpop.f32.mrb[11].mxu0  ;;  %v8131_v5 = vld [vmem:[#allocation60_spill] sm:$0xff]  ;;  %v1281_v6 = vor.u32 %v1279_v63, %v1278_v25 }
 0x116   : > { %v1269_v35 = vshrl.u32 %v8131_v5, 16  ;;  %v4869_v19 = vpop.f32.mrb[9].mxu1  ;;  %v4761_v54 = vadd.f32 %v4760_v48, %v4759_v55  ;;  %v1304_v0 = vshrl.u32 %v8132_v41, 16  ;;  %v1260_v3 = vor.u32 %v1258_v52, %v1257_v27  ;;  %v8133_v62 = vld [vmem:[#allocation61_spill] sm:$0xff] }
 0x117   : > { %2628 = vmatmul.mubr.bf16.gmra.mrb[108].mxu1 %v6995_v36  ;;  %v4870_v43 = vadd.f32 %v4869_v19, %v4868_v46  ;;  %v4871_v18 = vpop.f32.mrb[10].mxu1  ;;  %v1283_v58 = vshrl.u32 %v8133_v62, 16  ;;  %v7012_v50 = vsel %vm6573_vm2, 0, %v1246_v16  ;;  %v1318_v36 = vshrl.u32 %v6528_v32, 16 }
 0x118   : > { %2467 = vmatmul.mubr.bf16.gmra.mrb[108].mxu0 %v6984_v22  ;;  %2635 = vmatprep.mubr.bf16.mxu1 %v7001_v56  ;;  %v1295_v22 = vor.u32 %v1293_v17, %v1292_v28  ;;  %v1271_v63 = vrot.slane %v1269_v35, 7  ;;  %v1272_v55 = vshll.u32 %v8131_v5, 16  ;;  %v7020_v27 = vsel %vm6573_vm2, 0, %v1281_v6 }
 0x119   : > { %2474 = vmatprep.mubr.bf16.mxu0 %v6990_v30  ;;  %v4872_v30 = vpop.f32.mrb[11].mxu1  ;;  %v7015_v34 = vadd.f32 %v4870_v43, %v4758_v8  ;;  %v1306_v52 = vrot.slane %v1304_v0, 7  ;;  %v1307_v46 = vshll.u32 %v8132_v41, 16  ;;  %v7025_v16 = vsel %vm6573_vm2, 0, %v1260_v3 }
 0x11a   : > { %v4873_v25 = vadd.f32 %v4872_v30, %v4871_v18  ;;  %v1285_v17 = vrot.slane %v1283_v58, 7  ;;  %v1286_v8 = vshll.u32 %v8133_v62, 16  ;;  %v4762_v30 = vpop.f32.mrb[12].mxu0  ;;  %v7033_v48 = vsel %vm6573_vm2, 0, %v1295_v22 }
 0x11b   : > { %8134 = vst [vmem:[#allocation92_spill] sm:$0xff] %v7015_v34  ;;  %8136 = vst [vmem:[#allocation94_spill] sm:$0xff] %v7033_v48  ;;  %v4763_v6 = vpop.f32.mrb[13].mxu0  ;;  %v1320_v0 = vrot.slane %v1318_v36, 7  ;;  %v1321_v35 = vshll.u32 %v6528_v32, 16  ;;  %v1274_v19 = vor.u32 %v1272_v55, %v1271_v63  ;;  %v4874_v3 = vpop.f32.mrb[12].mxu1  ;;  %v1309_v62 = vor.u32 %v1307_v46, %v1306_v52 }
 0x11c   : > { %v7027_v28 = vadd.f32 %v4873_v25, %v4761_v54  ;;  %v4764_v54 = vadd.f32 %v4763_v6, %v4762_v30  ;;  %v4765_v43 = vpop.f32.mrb[14].mxu0  ;;  %v1297_v58 = vshrl.u32 %v6534_v61, 16  ;;  %v4875_v18 = vpop.f32.mrb[13].mxu1  ;;  %v1332_v22 = vshrl.u32 %v6549_v2, 16 }
 0x11d   : > { %v4766_v25 = vpop.f32.mrb[15].mxu0  ;;  %v1288_v36 = vor.u32 %v1286_v8, %v1285_v17  ;;  %v4876_v41 = vadd.f32 %v4875_v18, %v4874_v3  ;;  %v4877_v32 = vpop.f32.mrb[14].mxu1  ;;  %v1311_v63 = vshrl.u32 %v6543_v44, 16  ;;  %v1323_v30 = vor.u32 %v1321_v35, %v1320_v0 }
 0x11e   : > { %8135 = vst [vmem:[#allocation93_spill] sm:$0xff] %v7027_v28  ;;  %v4767_v5 = vadd.f32 %v4766_v25, %v4765_v43  ;;  %v4878_v55 = vpop.f32.mrb[15].mxu1  ;;  %v1300_v6 = vshll.u32 %v6534_v61, 16  ;;  %v1346_v28 = vshrl.u32 %v6554_v47, 16  ;;  %v7046_v34 = vsel %vm6573_vm2, 0, %v1274_v19 }
 0x11f   : > { %2636 = vmatmul.mubr.bf16.gmra.mrb[112].mxu1 %v7025_v16  ;;  %v7048_v52 = vadd.f32 %v4876_v41, %v4764_v54  ;;  %v4879_v46 = vadd.f32 %v4878_v55, %v4877_v32  ;;  %v7052_v17 = vsel %vm6573_vm2, 0, %v1309_v62  ;;  %v1334_v8 = vrot.slane %v1332_v22, 7 }
 0x120   : > { %2475 = vmatmul.mubr.bf16.gmra.mrb[112].mxu0 %v7012_v50  ;;  %2643 = vmatprep.mubr.bf16.mxu1 %v7033_v48  ;;  %v1299_v48 = vrot.slane %v1297_v58, 7  ;;  %v1335_v3 = vshll.u32 %v6549_v2, 16  ;;  %v7057_v0 = vsel %vm6573_vm2, 0, %v1288_v36  ;;  %v1313_v43 = vrot.slane %v1311_v63, 7 }
 0x121   : > { %2482 = vmatprep.mubr.bf16.mxu0 %v7020_v27  ;;  %v7059_v35 = vadd.f32 %v4879_v46, %v4767_v5  ;;  %v1314_v19 = vshll.u32 %v6543_v44, 16  ;;  %v7065_v32 = vsel %vm6573_vm2, 0, %v1323_v30  ;;  %v1348_v62 = vrot.slane %v1346_v28, 7 }
 0x122   : > { %v4768_v41 = vpop.f32.mrb[16].mxu0  ;;  %v1349_v54 = vshll.u32 %v6554_v47, 16  ;;  %v1302_v58 = vor.u32 %v1300_v6, %v1299_v48  ;;  %v1325_v5 = vshrl.u32 %v6561_v31, 16  ;;  %v1337_v36 = vor.u32 %v1335_v3, %v1334_v8 }
 0x123   : > { %v4769_v18 = vpop.f32.mrb[17].mxu0  ;;  %v1316_v63 = vor.u32 %v1314_v19, %v1313_v43  ;;  %v4880_v55 = vpop.f32.mrb[16].mxu1  ;;  %v1339_v28 = vshrl.u32 %v6565_v57, 16  ;;  %v1342_v43 = vshll.u32 %v6565_v57, 16 }
 0x124   : > { %v4770_v25 = vadd.f32 %v4769_v18, %v4768_v41  ;;  %v4771_v22 = vpop.f32.mrb[18].mxu0  ;;  %v4881_v46 = vpop.f32.mrb[17].mxu1  ;;  %v1351_v44 = vor.u32 %v1349_v54, %v1348_v62  ;;  %v7075_v48 = vsel %vm6573_vm2, 0, %v1302_v58  ;;  %v1327_v61 = vrot.slane %v1325_v5, 7 }
 0x125   : > { %v4772_v30 = vpop.f32.mrb[19].mxu0  ;;  %v4882_v6 = vadd.f32 %v4881_v46, %v4880_v55  ;;  %v4883_v2 = vpop.f32.mrb[18].mxu1  ;;  %v1328_v41 = vshll.u32 %v6561_v31, 16  ;;  %v7080_v3 = vsel %vm6573_vm2, 0, %v1337_v36  ;;  %v7085_v19 = vsel %vm6573_vm2, 0, %v1316_v63 }
 0x126   : > { %v4773_v47 = vadd.f32 %v4772_v30, %v4771_v22  ;;  %v4884_v8 = vpop.f32.mrb[19].mxu1  ;;  %v1341_v58 = vrot.slane %v1339_v28, 7  ;;  %v7092_v18 = vsel %vm6573_vm2, 0, %v1351_v44 }
 0x127   : > { %2644 = vmatmul.mubr.bf16.gmra.mrb[116].mxu1 %v7057_v0  ;;  %v7087_v62 = vadd.f32 %v4882_v6, %v4770_v25  ;;  %v4885_v54 = vadd.f32 %v4884_v8, %v4883_v2  ;;  %v1330_v22 = vor.u32 %v1328_v41, %v1327_v61 }
 0x128   : > { %2483 = vmatmul.mubr.bf16.gmra.mrb[116].mxu0 %v7046_v34  ;;  %2651 = vmatprep.mubr.bf16.mxu1 %v7065_v32  ;;  %v1344_v25 = vor.u32 %v1342_v43, %v1341_v58 }
 0x129   : > { %2490 = vmatprep.mubr.bf16.mxu0 %v7052_v17  ;;  %v7094_v5 = vadd.f32 %v4885_v54, %v4773_v47  ;;  %v7101_v44 = vsel %vm6573_vm2, 0, %v1330_v22 }
 0x12a   : > { %v4774_v36 = vpop.f32.mrb[20].mxu0  ;;  %v7105_v41 = vsel %vm6573_vm2, 0, %v1344_v25  ;;  %v5732_v25 = vld [vmem:[%s7874_s3 + $0x300] sm:$0xff]  }
 0x12b   : > { %v4775_v63 = vpop.f32.mrb[21].mxu0  ;;  %v4886_v2 = vpop.f32.mrb[20].mxu1 }
 0x12c   : > { %v4776_v55 = vadd.f32 %v4775_v63, %v4774_v36  ;;  %v4777_v30 = vpop.f32.mrb[22].mxu0  ;;  %v4887_v28 = vpop.f32.mrb[21].mxu1 }
 0x12d   : > { %v4778_v46 = vpop.f32.mrb[23].mxu0  ;;  %v4888_v47 = vadd.f32 %v4887_v28, %v4886_v2  ;;  %v4889_v6 = vpop.f32.mrb[22].mxu1 }
 0x12e   : > { %v4779_v8 = vadd.f32 %v4778_v46, %v4777_v30  ;;  %v4890_v61 = vpop.f32.mrb[23].mxu1 }
 0x12f   : > { %2652 = vmatmul.mubr.bf16.gmra.mrb[120].mxu1 %v7085_v19  ;;  %v7107_v54 = vadd.f32 %v4888_v47, %v4776_v55  ;;  %v4891_v43 = vadd.f32 %v4890_v61, %v4889_v6  ;;  %v5733_v47 = vld [vmem:[%s7874_s3 + $0x380] sm:$0xff]   ;;  %v5735_v61 = vld [vmem:[%s7874_s3 + $0x3c8] sm:$0xff]  }
 0x130   : > { %2491 = vmatmul.mubr.bf16.gmra.mrb[120].mxu0 %v7075_v48  ;;  %2659 = vmatprep.mubr.bf16.mxu1 %v7092_v18 }
 0x131   : > { %2498 = vmatprep.mubr.bf16.mxu0 %v7080_v3  ;;  %v7110_v58 = vadd.f32 %v4891_v43, %v4779_v8 }
 0x132   : > { %v4780_v22 = vpop.f32.mrb[24].mxu0 }
 0x133   : > { %v4781_v36 = vpop.f32.mrb[25].mxu0  ;;  %v4892_v55 = vpop.f32.mrb[24].mxu1 }
 0x134   : > { %v4782_v63 = vadd.f32 %v4781_v36, %v4780_v22  ;;  %v4783_v2 = vpop.f32.mrb[26].mxu0  ;;  %v4893_v28 = vpop.f32.mrb[25].mxu1  ;;  %v5736_v36 = vld [vmem:[%s7874_s3 + $0x308] sm:$0xff]  }
 0x135   : > { %v4784_v30 = vpop.f32.mrb[27].mxu0  ;;  %v4895_v6 = vpop.f32.mrb[26].mxu1 }
 0x136   : > { %v4785_v46 = vadd.f32 %v4784_v30, %v4783_v2  ;;  %v4896_v8 = vpop.f32.mrb[27].mxu1 }
 0x137   : > { %2660 = vmatmul.mubr.bf16.gmra.mrb[124].mxu1 %v7105_v41  ;;  %v4897_v22 = vadd.f32 %v4896_v8, %v4895_v6 }
 0x138   : > { %2499 = vmatmul.mubr.bf16.gmra.mrb[124].mxu0 %v7101_v44  ;;  %3118 = vmatprep.mubr.bf16.mxu1 %v6598_v23  ;;  %v4894_v23 = vadd.f32 %v4893_v28, %v4892_v55 }
 0x139   : > { %2957 = vmatprep.mubr.bf16.mxu0 %v6585_v29  ;;  %v5734_v29 = vld [vmem:[%s7874_s3 + $0x348] sm:$0xff]   ;;  %v7138_v2 = vadd.f32 %v4897_v22, %v4785_v46  ;;  %v5740_v46 = vld [vmem:[%s7874_s3 + $0x310] sm:$0xff]  }
 0x13a   : > { %v7128_v43 = vadd.f32 %v4894_v23, %v4782_v63  ;;  %v4786_v63 = vpop.f32.mrb[28].mxu0 }
 0x13b   : > { %v4898_v55 = vpop.f32.mrb[28].mxu1 }
 0x13f   : > { %3119 = vmatmul.mubr.bf16.vlgmr.msra.gmra.mrb[128].mxu1 %v6641_v40  ;;  %v5739_v40 = vld [vmem:[%s7874_s3 + $0x3d0] sm:$0xff]  }
 0x140   : > { %2958 = vmatmul.mubr.bf16.vlgmr.msra.gmra.mrb[128].mxu0 %v6625_v42  ;;  %v5738_v42 = vld [vmem:[%s7874_s3 + $0x350] sm:$0xff]   ;;  %5513 = vmatpush3.bf16.msra.mxu1 %v5733_v47  ;;  %v5742_v47 = vld [vmem:[%s7874_s3 + $0x358] sm:$0xff]  }
 0x141   : > { %5401 = vmatpush3.bf16.msra.mxu0 %v5732_v25  ;;  %2965 = vmatprep.mubr.bf16.mxu0 %v6633_v14  ;;  %v5737_v14 = vld [vmem:[%s7874_s3 + $0x388] sm:$0xff]   ;;  %v4787_v25 = vpop.f32.mrb[29].mxu0 }
 0x142   : > { %5402 = vmatprep.subr.bf16.mxu0 %v5734_v29  ;;  %3126 = vmatprep.mubr.bf16.mxu1 %v6650_v26  ;;  %v4788_v30 = vadd.f32 %v4787_v25, %v4786_v63  ;;  %v4789_v28 = vpop.f32.mrb[30].mxu0  ;;  %v4899_v26 = vpop.f32.mrb[29].mxu1 }
 0x143   : > { %5514 = vmatprep.subr.bf16.mxu1 %v5735_v61  ;;  %v4790_v29 = vpop.f32.mrb[31].mxu0  ;;  %v4900_v23 = vadd.f32 %v4899_v26, %v4898_v55  ;;  %v4901_v6 = vpop.f32.mrb[30].mxu1  ;;  %v5741_v61 = vld [vmem:[%s7874_s3 + $0x390] sm:$0xff]  }
 0x144   : > { %v4791_v8 = vadd.f32 %v4790_v29, %v4789_v28  ;;  %5515 = vmatpush3.bf16.msra.mxu1 %v5737_v14  ;;  %v4902_v22 = vpop.f32.mrb[31].mxu1  ;;  %v5744_v14 = vld [vmem:[%s7874_s3 + $0x318] sm:$0xff]  }
 0x145   : > { %5403 = vmatpush3.bf16.msra.mxu0 %v5736_v36  ;;  %5516 = vmatprep.subr.bf16.mxu1 %v5739_v40  ;;  %v5743_v36 = vld [vmem:[%s7874_s3 + $0x3d8] sm:$0xff]   ;;  %v4903_v63 = vadd.f32 %v4902_v22, %v4901_v6  ;;  %v4792_v40 = vpop.f32.mrb[32].mxu0  ;;  %v4904_v26 = vpop.f32.mrb[32].mxu1 }
 0x146   : > { %5404 = vmatprep.subr.bf16.mxu0 %v5738_v42  ;;  %v7160_v42 = vadd.f32 %v4900_v23, %v4788_v30  ;;  %v4793_v55 = vpop.f32.mrb[33].mxu0  ;;  %v5748_v30 = vld [vmem:[%s7874_s3 + $0x320] sm:$0xff]   ;;  %v4905_v23 = vpop.f32.mrb[33].mxu1 }
 0x147   : > { %3127 = vmatmul.mubr.bf16.gmra.mrb[132].mxu1 %v6693_v38  ;;  %v7170_v25 = vadd.f32 %v4903_v63, %v4791_v8  ;;  %v5747_v38 = vld [vmem:[%s7874_s3 + $0x3e0] sm:$0xff]   ;;  %v4794_v28 = vadd.f32 %v4793_v55, %v4792_v40  ;;  %v5751_v8 = vld [vmem:[%s7874_s3 + $0x3e8] sm:$0xff]   ;;  %v4907_v22 = vpop.f32.mrb[34].mxu1 }
 0x148   : > { %2966 = vmatmul.mubr.bf16.gmra.mrb[132].mxu0 %v6677_v39  ;;  %v5746_v39 = vld [vmem:[%s7874_s3 + $0x360] sm:$0xff]   ;;  %3134 = vmatprep.mubr.bf16.mxu1 %v6702_v11  ;;  %v5750_v11 = vld [vmem:[%s7874_s3 + $0x368] sm:$0xff]   ;;  %v4908_v63 = vpop.f32.mrb[35].mxu1 }
 0x149   : > { %2973 = vmatprep.mubr.bf16.mxu0 %v6685_v9  ;;  %5405 = vmatpush3.bf16.msra.mxu0 %v5740_v46  ;;  %v5745_v9 = vld [vmem:[%s7874_s3 + $0x398] sm:$0xff]   ;;  %v4795_v46 = vpop.f32.mrb[34].mxu0 }
 0x14a   : > { %5406 = vmatprep.subr.bf16.mxu0 %v5742_v47  ;;  %5517 = vmatpush3.bf16.msra.mxu1 %v5741_v61  ;;  %v4796_v29 = vpop.f32.mrb[35].mxu0  ;;  %v5749_v47 = vld [vmem:[%s7874_s3 + $0x3a0] sm:$0xff]   ;;  %v4906_v61 = vadd.f32 %v4905_v23, %v4904_v26 }
 0x14b   : > { %5518 = vmatprep.subr.bf16.mxu1 %v5743_v36  ;;  %v4797_v6 = vadd.f32 %v4796_v29, %v4795_v46  ;;  %v5752_v36 = vld [vmem:[%s7874_s3 + $0x328] sm:$0xff]   ;;  %v4798_v40 = vpop.f32.mrb[36].mxu0 }
 0x14c   : > { %v4799_v55 = vpop.f32.mrb[37].mxu0 }
 0x14d   : > { %5407 = vmatpush3.bf16.msra.mxu0 %v5744_v14  ;;  %v7200_v14 = vadd.f32 %v4906_v61, %v4794_v28  ;;  %v4800_v28 = vadd.f32 %v4799_v55, %v4798_v40  ;;  %v4801_v46 = vpop.f32.mrb[38].mxu0  ;;  %v5760_v61 = vld [vmem:[%s7874_s3 + $0x338] sm:$0xff]  }
 0x14e   : > { %5408 = vmatprep.subr.bf16.mxu0 %v5746_v39  ;;  %5519 = vmatpush3.bf16.msra.mxu1 %v5745_v9  ;;  %v4909_v39 = vadd.f32 %v4908_v63, %v4907_v22  ;;  %v4802_v29 = vpop.f32.mrb[39].mxu0  ;;  %v5761_v63 = vld [vmem:[%s7874_s3 + $0x3b8] sm:$0xff]  }
 0x14f   : > { %5520 = vmatprep.subr.bf16.mxu1 %v5747_v38  ;;  %3135 = vmatmul.mubr.bf16.gmra.mrb[136].mxu1 %v6745_v45  ;;  %v5755_v45 = vld [vmem:[%s7874_s3 + $0x3f0] sm:$0xff]  }
 0x150   : > { %2974 = vmatmul.mubr.bf16.gmra.mrb[136].mxu0 %v6729_v51  ;;  %v5754_v51 = vld [vmem:[%s7874_s3 + $0x370] sm:$0xff]   ;;  %3142 = vmatprep.mubr.bf16.mxu1 %v6754_v21  ;;  %v7209_v9 = vadd.f32 %v4909_v39, %v4797_v6  ;;  %v5758_v21 = vld [vmem:[%s7874_s3 + $0x378] sm:$0xff]  }
 0x151   : > { %2981 = vmatprep.mubr.bf16.mxu0 %v6737_v10  ;;  %5409 = vmatpush3.bf16.msra.mxu0 %v5748_v30  ;;  %v5753_v10 = vld [vmem:[%s7874_s3 + $0x3a8] sm:$0xff]   ;;  %v5756_v38 = vld [vmem:[%s7874_s3 + $0x330] sm:$0xff]   ;;  %v4910_v30 = vpop.f32.mrb[36].mxu1 }
 0x152   : > { %5410 = vmatprep.subr.bf16.mxu0 %v5750_v11  ;;  %5521 = vmatpush3.bf16.msra.mxu1 %v5749_v47  ;;  %v5757_v11 = vld [vmem:[%s7874_s3 + $0x3b0] sm:$0xff]   ;;  %v4911_v26 = vpop.f32.mrb[37].mxu1  ;;  %v5759_v47 = vld [vmem:[%s7874_s3 + $0x3f8] sm:$0xff]  }
 0x153   : > { %5522 = vmatprep.subr.bf16.mxu1 %v5751_v8  ;;  %v4912_v23 = vadd.f32 %v4911_v26, %v4910_v30  ;;  %v4913_v6 = vpop.f32.mrb[38].mxu1  ;;  %v4803_v8 = vadd.f32 %v4802_v29, %v4801_v46 }
 0x155   : > { %5411 = vmatpush3.bf16.msra.mxu0 %v5752_v36  ;;  %v7229_v22 = vadd.f32 %v4912_v23, %v4800_v28 }
 0x156   : > { %5412 = vmatprep.subr.bf16.mxu0 %v5754_v51  ;;  %5523 = vmatpush3.bf16.msra.mxu1 %v5753_v10  ;;  %v4804_v51 = vpop.f32.mrb[40].mxu0 }
 0x157   : > { %5524 = vmatprep.subr.bf16.mxu1 %v5755_v45  ;;  %3143 = vmatmul.mubr.bf16.gmra.mrb[140].mxu1 %v6791_v59  ;;  %v4805_v39 = vpop.f32.mrb[41].mxu0 }
 0x158   : > { %2982 = vmatmul.mubr.bf16.gmra.mrb[140].mxu0 %v6781_v24  ;;  %v4914_v24 = vpop.f32.mrb[39].mxu1  ;;  %3150 = vmatprep.mubr.bf16.mxu1 %v6797_v60  ;;  %v4806_v59 = vadd.f32 %v4805_v39, %v4804_v51  ;;  %v4807_v10 = vpop.f32.mrb[42].mxu0  ;;  %v8138_v51 = vld [vmem:[#allocation71_spill] sm:$0xff] }
 0x159   : > { %2989 = vmatprep.mubr.bf16.mxu0 %v6786_v13  ;;  %5413 = vmatpush3.bf16.msra.mxu0 %v5756_v38  ;;  %v4915_v36 = vadd.f32 %v4914_v24, %v4913_v6  ;;  %v4916_v45 = vpop.f32.mrb[40].mxu1  ;;  %v4808_v40 = vpop.f32.mrb[43].mxu0 }
 0x15a   : > { %5414 = vmatprep.subr.bf16.mxu0 %v5758_v21  ;;  %5525 = vmatpush3.bf16.msra.mxu1 %v5757_v11  ;;  %v4917_v60 = vpop.f32.mrb[41].mxu1  ;;  %v4809_v38 = vadd.f32 %v4808_v40, %v4807_v10 }
 0x15b   : > { %5526 = vmatprep.subr.bf16.mxu1 %v5759_v47  ;;  %v7235_v13 = vadd.f32 %v4915_v36, %v4803_v8  ;;  %v4918_v55 = vadd.f32 %v4917_v60, %v4916_v45  ;;  %v4919_v21 = vpop.f32.mrb[42].mxu1 }
 0x15c   : > { %v4920_v30 = vpop.f32.mrb[43].mxu1 }
 0x15d   : > { %5415 = vmatpush3.bf16.msra.mxu0 %v5760_v61  ;;  %v7241_v28 = vadd.f32 %v4918_v55, %v4806_v59  ;;  %v4921_v46 = vadd.f32 %v4920_v30, %v4919_v21  ;;  %v4922_v29 = vpop.f32.mrb[44].mxu1  ;;  %v8137_v61 = vld [vmem:[#allocation70_spill] sm:$0xff] }
 0x15e   : > { %5527 = vmatpush3.bf16.msra.mxu1 %v5761_v63 }
 0x15f   : > { %3151 = vmatmul.mubr.bf16.gmra.mrb[144].mxu1 %v6819_v37  ;;  %v7243_v11 = vadd.f32 %v4921_v46, %v4809_v38  ;;  %v4923_v37 = vpop.f32.mrb[45].mxu1  ;;  %v8141_v38 = vld [vmem:[#allocation74_spill] sm:$0xff] }
 0x160   : > { %2990 = vmatmul.mubr.bf16.gmra.mrb[144].mxu0 %v6809_v1  ;;  %3158 = vmatprep.mubr.bf16.mxu1 %v6825_v20  ;;  %v4810_v1 = vpop.f32.mrb[44].mxu0  ;;  %v4924_v20 = vadd.f32 %v4923_v37, %v4922_v29  ;;  %v4925_v6 = vpop.f32.mrb[46].mxu1 }
 0x161   : > { %2997 = vmatprep.mubr.bf16.mxu0 %v6814_v15  ;;  %v4811_v26 = vpop.f32.mrb[45].mxu0  ;;  %v4926_v24 = vpop.f32.mrb[47].mxu1 }
 0x162   : > { %v4812_v15 = vadd.f32 %v4811_v26, %v4810_v1  ;;  %v4813_v47 = vpop.f32.mrb[46].mxu0  ;;  %v4927_v63 = vadd.f32 %v4926_v24, %v4925_v6  ;;  %v8144_v24 = vld [vmem:[#allocation77_spill] sm:$0xff] }
 0x163   : > { %v4814_v23 = vpop.f32.mrb[47].mxu0 }
 0x164   : > { %v4815_v8 = vadd.f32 %v4814_v23, %v4813_v47  ;;  %v7249_v36 = vadd.f32 %v4924_v20, %v4812_v15  ;;  %v4816_v39 = vpop.f32.mrb[48].mxu0  ;;  %v8142_v15 = vld [vmem:[#allocation75_spill] sm:$0xff]  ;;  %v8143_v23 = vld [vmem:[#allocation76_spill] sm:$0xff] }
 0x165   : > { %v4817_v59 = vpop.f32.mrb[49].mxu0 }
 0x166   : > { %v4818_v10 = vadd.f32 %v4817_v59, %v4816_v39  ;;  %v4819_v45 = vpop.f32.mrb[50].mxu0  ;;  %v4928_v40 = vpop.f32.mrb[48].mxu1 }
 0x167   : > { %3159 = vmatmul.mubr.bf16.gmra.mrb[148].mxu1 %v6847_v7  ;;  %v8140_v7 = vld [vmem:[#allocation73_spill] sm:$0xff]  ;;  %v4820_v60 = vpop.f32.mrb[51].mxu0  ;;  %v4929_v55 = vpop.f32.mrb[49].mxu1 }
 0x168   : > { %2998 = vmatmul.mubr.bf16.gmra.mrb[148].mxu0 %v6837_v49  ;;  %3166 = vmatprep.mubr.bf16.mxu1 %v8137_v61  ;;  %v7251_v49 = vadd.f32 %v4927_v63, %v4815_v8  ;;  %v4821_v21 = vadd.f32 %v4820_v60, %v4819_v45  ;;  %v4930_v30 = vadd.f32 %v4929_v55, %v4928_v40  ;;  %v4931_v46 = vpop.f32.mrb[50].mxu1  ;;  %v8146_v40 = vld [vmem:[#allocation80_spill] sm:$0xff] }
 0x169   : > { %3005 = vmatprep.mubr.bf16.mxu0 %v6842_v12  ;;  %v8139_v12 = vld [vmem:[#allocation72_spill] sm:$0xff]  ;;  %v4932_v1 = vpop.f32.mrb[51].mxu1 }
 0x16a   : > { %v7257_v26 = vadd.f32 %v4930_v30, %v4818_v10  ;;  %v4933_v29 = vadd.f32 %v4932_v1, %v4931_v46  ;;  %v8150_v30 = vld [vmem:[#allocation83_spill] sm:$0xff] }
 0x16c   : > { %v7260_v47 = vadd.f32 %v4933_v29, %v4821_v21  ;;  %v4822_v37 = vpop.f32.mrb[52].mxu0 }
 0x16d   : > { %v4823_v20 = vpop.f32.mrb[53].mxu0 }
 0x16e   : > { %v4934_v6 = vpop.f32.mrb[52].mxu1  ;;  %v4824_v8 = vadd.f32 %v4823_v20, %v4822_v37  ;;  %v4825_v61 = vpop.f32.mrb[54].mxu0 }
 0x16f   : > { %3167 = vmatmul.mubr.bf16.gmra.mrb[152].mxu1 %v8140_v7  ;;  %v4935_v63 = vpop.f32.mrb[53].mxu1 }
 0x170   : > { %3006 = vmatmul.mubr.bf16.gmra.mrb[152].mxu0 %v8138_v51  ;;  %3174 = vmatprep.mubr.bf16.mxu1 %v8141_v38  ;;  %v4826_v51 = vpop.f32.mrb[55].mxu0  ;;  %v4936_v39 = vadd.f32 %v4935_v63, %v4934_v6  ;;  %v4937_v59 = vpop.f32.mrb[54].mxu1  ;;  %v8149_v38 = vld [vmem:[#allocation82_spill] sm:$0xff] }
 0x171   : > { %3013 = vmatprep.mubr.bf16.mxu0 %v8139_v12  ;;  %v4827_v12 = vadd.f32 %v4826_v51, %v4825_v61  ;;  %v4938_v7 = vpop.f32.mrb[55].mxu1  ;;  %v8151_v61 = vld [vmem:[#allocation84_spill] sm:$0xff]  ;;  %v8153_v51 = vld [vmem:[#allocation85_spill] sm:$0xff] }
 0x172   : > { %v7265_v10 = vadd.f32 %v4936_v39, %v4824_v8  ;;  %v4939_v45 = vadd.f32 %v4938_v7, %v4937_v59  ;;  %v308_v7 = vld [vmem:[%s5932_s29 + $0x1e0] sm:$0xff] }
 0x174   : > { %8145 = vst [vmem:[#allocation70_spill] sm:$0xff] %v7265_v10  ;;  %v7268_v60 = vadd.f32 %v4939_v45, %v4827_v12  ;;  %v8155_v12 = vld [vmem:[#allocation86_spill] sm:$0xff]  ;;  %v310_v45 = vld [vmem:[%s5932_s29 + $0x1f0] sm:$0xff] }
 0x175   : > { %v4828_v55 = vpop.f32.mrb[56].mxu0 }
 0x176   : > { %8147 = vst [vmem:[#allocation71_spill] sm:$0xff] %v7268_v60  ;;  %v4829_v21 = vpop.f32.mrb[57].mxu0 }
 0x177   : > { %3175 = vmatmul.mubr.bf16.gmra.mrb[156].mxu1 %v6904_v53  ;;  %v8148_v53 = vld [vmem:[#allocation81_spill] sm:$0xff]  ;;  %v4830_v46 = vadd.f32 %v4829_v21, %v4828_v55  ;;  %v4831_v1 = vpop.f32.mrb[58].mxu0  ;;  %v309_v21 = vld [vmem:[%s5932_s29 + $0x1e8] sm:$0xff] }
 0x178   : > { %3014 = vmatmul.mubr.bf16.gmra.mrb[156].mxu0 %v8142_v15  ;;  %3182 = vmatprep.mubr.bf16.mxu1 %v8144_v24  ;;  %v4940_v29 = vpop.f32.mrb[56].mxu1  ;;  %v4832_v15 = vpop.f32.mrb[59].mxu0 }
 0x179   : > { %3021 = vmatprep.mubr.bf16.mxu0 %v8143_v23  ;;  %v4941_v37 = vpop.f32.mrb[57].mxu1  ;;  %v4833_v23 = vadd.f32 %v4832_v15, %v4831_v1  ;;  %v437_v15 = vunpack.c.h.bf16 %v310_v45 }
 0x17a   : > { %v4942_v20 = vadd.f32 %v4941_v37, %v4940_v29  ;;  %v4943_v6 = vpop.f32.mrb[58].mxu1  ;;  %v433_v29 = vunpack.c.h.bf16 %v308_v7 }
 0x17b   : > { %v4944_v8 = vpop.f32.mrb[59].mxu1 }
 0x17c   : > { %v7274_v24 = vadd.f32 %v4942_v20, %v4830_v46  ;;  %v4945_v63 = vadd.f32 %v4944_v8, %v4943_v6  ;;  %v8156_v6 = vld [vmem:[#allocation88_spill] sm:$0xff]  ;;  %v435_v8 = vunpack.c.h.bf16 %v309_v21 }
 0x17e   : > { %8152 = vst [vmem:[#allocation72_spill] sm:$0xff] %v7274_v24  ;;  %v7278_v39 = vadd.f32 %v4945_v63, %v4833_v23  ;;  %v4834_v59 = vpop.f32.mrb[60].mxu0 }
 0x17f   : > { %3183 = vmatmul.mubr.bf16.gmra.mrb[160].mxu1 %v8149_v38 }
 0x180   : > { %3022 = vmatmul.mubr.bf16.gmra.mrb[160].mxu0 %v8146_v40  ;;  %3190 = vmatprep.mubr.bf16.mxu1 %v8150_v30  ;;  %8154 = vst [vmem:[#allocation73_spill] sm:$0xff] %v7278_v39  ;;  %v4835_v40 = vpop.f32.mrb[61].mxu0  ;;  %v311_v30 = vld [vmem:[%s5932_s29 + $0x1f8] sm:$0xff]  ;;  %s4600_s29 = sshll.u32 %s5902_s9, 7 }
 0x181   : > { %3029 = vmatprep.mubr.bf16.mxu0 %v8148_v53  ;;  %v4946_v53 = vpop.f32.mrb[60].mxu1  ;;  %v4836_v38 = vadd.f32 %v4835_v40, %v4834_v59  ;;  %v4837_v55 = vpop.f32.mrb[62].mxu0  ;;  %v8159_v59 = vld [vmem:[#allocation91_spill] sm:$0xff]  ;;  %v8160_v40 = vld [vmem:[#allocation2_spill] sm:$0xff]  ;;  %s7613_s23 = scalar_lea.vmem %s7875_s4, %s4600_s29 }
 0x182   : > { %v4947_v46 = vpop.f32.mrb[61].mxu1  ;;  %v4838_v1 = vpop.f32.mrb[63].mxu0  ;;  %v583_v57 = vmul.f32 %v8160_v40, %v433_v29  ;;  %v587_v31 = vmul.f32 %v8160_v40, %v437_v15  ;;  %v8163_v29 = vld [vmem:[#allocation4_spill] sm:$0xff] }
 0x183   : > { %v4948_v37 = vadd.f32 %v4947_v46, %v4946_v53  ;;  %v4949_v20 = vpop.f32.mrb[62].mxu1  ;;  %v8162_v46 = vld [vmem:[#allocation3_spill] sm:$0xff] }
 0x184   : > { %v4950_v23 = vpop.f32.mrb[63].mxu1  ;;  %v733_v24 = vadd.f32 %v8163_v29, %v583_v57  ;;  %v737_v15 = vadd.f32 %v8163_v29, %v587_v31  ;;  %v8167_v57 = vld [vmem:[#allocation79_spill] sm:$0xff] }
 0x185   : > { %v7286_v63 = vadd.f32 %v4948_v37, %v4836_v38  ;;  %v432_v37 = vunpack.c.l.bf16 %v308_v7  ;;  %v8165_v7 = vld [vmem:[#allocation5_spill] sm:$0xff] }
 0x186   : > { %v4968_v53 = vpop.f32.mrb[64].mxu0 }
 0x187   : > { %3191 = vmatmul.mubr.bf16.gmra.mrb[164].mxu1 %v6964_v33  ;;  %v4839_v33 = vadd.f32 %v4838_v1, %v4837_v55  ;;  %8157 = vst [vmem:[#allocation74_spill] sm:$0xff] %v7286_v63  ;;  %v4969_v55 = vpop.f32.mrb[65].mxu0  ;;  %v585_v1 = vmul.f32 %v8162_v46, %v435_v8  ;;  %v438_v8 = vunpack.c.l.bf16 %v311_v30 }
 0x188   : > { %3030 = vmatmul.mubr.bf16.gmra.mrb[164].mxu0 %v8151_v61  ;;  %3198 = vmatprep.mubr.bf16.mxu1 %v8155_v12  ;;  %v439_v61 = vunpack.c.h.bf16 %v311_v30  ;;  %v8158_v12 = vld [vmem:[#allocation90_spill] sm:$0xff]  ;;  %v861_v30 = vmax.f32 %v733_v24, 0.0 }
 0x189   : > { %3037 = vmatprep.mubr.bf16.mxu0 %v8153_v51  ;;  %v4951_v51 = vadd.f32 %v4950_v23, %v4949_v20  ;;  %v5080_v20 = vpop.f32.mrb[64].mxu1  ;;  %v4970_v23 = vadd.f32 %v4969_v55, %v4968_v53  ;;  %v8166_v53 = vld [vmem:[#allocation6_spill] sm:$0xff] }
 0x18a   : > { %v589_v38 = vmul.f32 %v8162_v46, %v439_v61  ;;  %v735_v61 = vadd.f32 %v8165_v7, %v585_v1  ;;  %v582_v55 = vmul.f32 %v8166_v53, %v432_v37 }
 0x18b   : > { %v7292_v39 = vadd.f32 %v4951_v51, %v4839_v33  ;;  %v434_v33 = vunpack.c.l.bf16 %v309_v21  ;;  %v8164_v51 = vld [vmem:[#allocation78_spill] sm:$0xff] }
 0x18c   : > { %v2381_v40 = vadd.f32 %v4970_v23, %v8164_v51 }
 0x18d   : > { %8161 = vst [vmem:[#allocation75_spill] sm:$0xff] %v7292_v39 }
 0x18f   : > { %3199 = vmatmul.mubr.bf16.gmra.mrb[168].mxu1 %v8159_v59  ;;  %v5081_v59 = vpop.f32.mrb[65].mxu1 }
 0x190   : > { %3038 = vmatmul.mubr.bf16.gmra.mrb[168].mxu0 %v8156_v6  ;;  %3206 = vmatprep.mubr.bf16.mxu1 %v7001_v56  ;;  %v4971_v6 = vpop.f32.mrb[66].mxu0  ;;  %v5082_v56 = vadd.f32 %v5081_v59, %v5080_v20  ;;  %v5083_v39 = vpop.f32.mrb[66].mxu1 }
 0x191   : > { %3045 = vmatprep.mubr.bf16.mxu0 %v8158_v12  ;;  %v436_v12 = vunpack.c.l.bf16 %v310_v45  ;;  %v4972_v63 = vpop.f32.mrb[67].mxu0  ;;  %v5084_v10 = vpop.f32.mrb[67].mxu1  ;;  %v739_v45 = vadd.f32 %v8165_v7, %v589_v38  ;;  %v8172_v7 = vld [vmem:[#allocation87_spill] sm:$0xff] }
 0x192   : > { %v4973_v60 = vadd.f32 %v4972_v63, %v4971_v6  ;;  %v7304_v46 = vadd.f32 %v5082_v56, %v2381_v40  ;;  %v5085_v21 = vadd.f32 %v5084_v10, %v5083_v39  ;;  %v865_v63 = vmax.f32 %v737_v15, 0.0  ;;  %v4974_v38 = vpop.f32.mrb[68].mxu0  ;;  %v8169_v6 = vld [vmem:[#allocation94_spill] sm:$0xff]  ;;  %v8170_v39 = vld [vmem:[#allocation7_spill] sm:$0xff]  ;;  %v5086_v29 = vpop.f32.mrb[68].mxu1  ;;  %v8171_v40 = vld [vmem:[#allocation9_spill] sm:$0xff] }
 0x193   : > { %v586_v20 = vmul.f32 %v8166_v53, %v436_v12  ;;  %v4975_v59 = vpop.f32.mrb[69].mxu0  ;;  %v867_v10 = vmax.f32 %v739_v45, 0.0  ;;  %v5087_v24 = vpop.f32.mrb[69].mxu1 }
 0x194   : > { %v2384_v31 = vadd.f32 %v4973_v60, %v8167_v57  ;;  %v863_v60 = vmax.f32 %v735_v61, 0.0  ;;  %v4976_v12 = vadd.f32 %v4975_v59, %v4974_v38  ;;  %v4977_v51 = vpop.f32.mrb[70].mxu0  ;;  %v5088_v57 = vadd.f32 %v5087_v24, %v5086_v29  ;;  %v8174_v24 = vld [vmem:[#allocation92_spill] sm:$0xff] }
 0x195   : > { %v4978_v15 = vpop.f32.mrb[71].mxu0 }
 0x196   : > { %v7311_v1 = vadd.f32 %v5085_v21, %v2384_v31  ;;  %v2389_v53 = vadd.f32 %v4976_v12, %v8172_v7  ;;  %v4979_v31 = vadd.f32 %v4978_v15, %v4977_v51 }
 0x197   : > { %3207 = vmatmul.mubr.bf16.gmra.mrb[172].mxu1 %v7025_v16  ;;  %v736_v16 = vadd.f32 %v8170_v39, %v586_v20 }
 0x198   : > { %3046 = vmatmul.mubr.bf16.gmra.mrb[172].mxu0 %v7012_v50  ;;  %v8168_v50 = vld [vmem:[#allocation8_spill] sm:$0xff]  ;;  %3214 = vmatprep.mubr.bf16.mxu1 %v8169_v6  ;;  %v7325_v20 = vadd.f32 %v5088_v57, %v2389_v53 }
 0x199   : > { %3053 = vmatprep.mubr.bf16.mxu0 %v7020_v27  ;;  %v584_v23 = vmul.f32 %v8168_v50, %v434_v33  ;;  %v588_v37 = vmul.f32 %v8168_v50, %v438_v8  ;;  %v732_v27 = vadd.f32 %v8170_v39, %v582_v55  ;;  %v7317_v33 = vpack.c.bf16 %v865_v63, %v861_v30  ;;  %v5089_v8 = vpop.f32.mrb[70].mxu1  ;;  %v8173_v50 = vld [vmem:[#allocation89_spill] sm:$0xff] }
 0x19a   : > { %v5090_v45 = vpop.f32.mrb[71].mxu1  ;;  %v7323_v55 = vpack.c.bf16 %v867_v10, %v863_v60  ;;  %v2392_v30 = vadd.f32 %v4979_v31, %v8173_v50 }
 0x19b   : > { %v734_v56 = vadd.f32 %v8171_v40, %v584_v23  ;;  %v738_v61 = vadd.f32 %v8171_v40, %v588_v37  ;;  %v860_v21 = vmax.f32 %v732_v27, 0.0  ;;  %v5091_v63 = vadd.f32 %v5090_v45, %v5089_v8  ;;  %v4980_v37 = vpop.f32.mrb[72].mxu0  ;;  %v5092_v39 = vpop.f32.mrb[72].mxu1 }
 0x19c   : > { %v864_v23 = vmax.f32 %v736_v16, 0.0  ;;  %v1360_v38 = vshrl.u32 %v7317_v33, 16  ;;  %v4981_v60 = vpop.f32.mrb[73].mxu0  ;;  %v1374_v10 = vshrl.u32 %v7323_v55, 16  ;;  %v1363_v16 = vshll.u32 %v7317_v33, 16 }
 0x19d   : > { %v7331_v6 = vadd.f32 %v5091_v63, %v2392_v30  ;;  %v866_v59 = vmax.f32 %v738_v61, 0.0  ;;  %v4982_v27 = vadd.f32 %v4981_v60, %v4980_v37  ;;  %v4983_v29 = vpop.f32.mrb[74].mxu0  ;;  %v1377_v8 = vshll.u32 %v7323_v55, 16  ;;  %v8175_v61 = vld [vmem:[#allocation93_spill] sm:$0xff] }
 0x19e   : > { %v7335_v12 = vpack.c.bf16 %v864_v23, %v860_v21  ;;  %v4984_v51 = vpop.f32.mrb[75].mxu0  ;;  %v1376_v57 = vrot.slane %v1374_v10, 7 }
 0x19f   : > { %3215 = vmatmul.mubr.bf16.gmra.mrb[176].mxu1 %v7057_v0  ;;  %v1362_v0 = vrot.slane %v1360_v38, 7  ;;  %v2397_v15 = vadd.f32 %v4982_v27, %v8174_v24  ;;  %v4986_v23 = vpop.f32.mrb[76].mxu0 }
 0x1a0   : > { %3054 = vmatmul.mubr.bf16.gmra.mrb[176].mxu0 %v7046_v34  ;;  %3222 = vmatprep.mubr.bf16.mxu1 %v7065_v32  ;;  %v862_v34 = vmax.f32 %v734_v56, 0.0  ;;  %v4985_v32 = vadd.f32 %v4984_v51, %v4983_v29  ;;  %v1353_v50 = vshrl.u32 %v7335_v12, 16  ;;  %v4987_v38 = vpop.f32.mrb[77].mxu0  ;;  %v1379_v37 = vor.u32 %v1377_v8, %v1376_v57 }
 0x1a1   : > { %3061 = vmatprep.mubr.bf16.mxu0 %v7052_v17  ;;  %v5093_v17 = vpop.f32.mrb[73].mxu1  ;;  %v1365_v30 = vor.u32 %v1363_v16, %v1362_v0  ;;  %v4989_v60 = vpop.f32.mrb[78].mxu0 }
 0x1a2   : > { %v5094_v40 = vadd.f32 %v5093_v17, %v5092_v39  ;;  %v5095_v7 = vpop.f32.mrb[74].mxu1  ;;  %v7339_v56 = vpack.c.bf16 %v866_v59, %v862_v34  ;;  %v2400_v45 = vadd.f32 %v4985_v32, %v8175_v61  ;;  %v4988_v59 = vadd.f32 %v4987_v38, %v4986_v23  ;;  %v4990_v27 = vpop.f32.mrb[79].mxu0 }
 0x1a3   : > { %v5096_v53 = vpop.f32.mrb[75].mxu1  ;;  %v1355_v10 = vrot.slane %v1353_v50, 7  ;;  %v4991_v0 = vadd.f32 %v4990_v27, %v4989_v60 }
 0x1a4   : > { %v7343_v31 = vadd.f32 %v5094_v40, %v2397_v15  ;;  %v5097_v21 = vadd.f32 %v5096_v53, %v5095_v7  ;;  %v5098_v34 = vpop.f32.mrb[76].mxu1  ;;  %v1370_v29 = vshll.u32 %v7339_v56, 16  ;;  %v2405_v17 = vadd.f32 %v4988_v59, %v7048_v52 }
 0x1a5   : > { %v5099_v39 = vpop.f32.mrb[77].mxu1  ;;  %v1510_v15 = vsel %vm6573_vm2, 0, %v1379_v37  ;;  %v2408_v7 = vadd.f32 %v4991_v0, %v7059_v35 }
 0x1a6   : > { %v7349_v63 = vadd.f32 %v5097_v21, %v2400_v45  ;;  %v5101_v51 = vpop.f32.mrb[78].mxu1  ;;  %v4992_v57 = vpop.f32.mrb[80].mxu0 }
 0x1a7   : > { %3223 = vmatmul.mubr.bf16.gmra.mrb[180].mxu1 %v7085_v19  ;;  %v1508_v19 = vsel %vm6573_vm2, 0, %v1365_v30  ;;  %v5102_v24 = vpop.f32.mrb[79].mxu1  ;;  %v4993_v61 = vpop.f32.mrb[81].mxu0 }
 0x1a8   : > { %3062 = vmatmul.mubr.bf16.gmra.mrb[180].mxu0 %v7075_v48  ;;  %3230 = vmatprep.mubr.bf16.mxu1 %v7092_v18  ;;  %v1367_v48 = vshrl.u32 %v7339_v56, 16  ;;  %v5100_v18 = vadd.f32 %v5099_v39, %v5098_v34  ;;  %v5103_v32 = vadd.f32 %v5102_v24, %v5101_v51  ;;  %v5104_v45 = vpop.f32.mrb[80].mxu1  ;;  %v4995_v21 = vpop.f32.mrb[82].mxu0 }
 0x1a9   : > { %3069 = vmatprep.mubr.bf16.mxu0 %v7080_v3  ;;  %v1356_v3 = vshll.u32 %v7335_v12, 16  ;;  %v5105_v30 = vpop.f32.mrb[81].mxu1  ;;  %v4996_v23 = vpop.f32.mrb[83].mxu0 }
 0x1aa   : > { %v1369_v16 = vrot.slane %v1367_v48, 7  ;;  %v7361_v40 = vadd.f32 %v5100_v18, %v2405_v17  ;;  %v7365_v52 = vadd.f32 %v5103_v32, %v2408_v7  ;;  %v5106_v48 = vadd.f32 %v5105_v30, %v5104_v45  ;;  %v5107_v38 = vpop.f32.mrb[82].mxu1  ;;  %v8178_v7 = vld [vmem:[#allocation12_spill] sm:$0xff] }
 0x1ab   : > { %v1358_v53 = vor.u32 %v1356_v3, %v1355_v10  ;;  %v4997_v37 = vadd.f32 %v4996_v23, %v4995_v21  ;;  %v5108_v34 = vpop.f32.mrb[83].mxu1  ;;  %v8176_v3 = vld [vmem:[#allocation10_spill] sm:$0xff]  ;;  %v8181_v21 = vld [vmem:[#allocation15_spill] sm:$0xff] }
 0x1ac   : > { %v1372_v8 = vor.u32 %v1370_v29, %v1369_v16  ;;  %v5109_v10 = vadd.f32 %v5108_v34, %v5107_v38 }
 0x1ad   : > { %v1507_v50 = vsel %vm6573_vm2, 0, %v1358_v53  ;;  %v2416_v60 = vadd.f32 %v4997_v37, %v7094_v5 }
 0x1ae   : > { %v4998_v27 = vpop.f32.mrb[84].mxu0 }
 0x1af   : > { %3231 = vmatmul.mubr.bf16.gmra.mrb[184].mxu1 %v7105_v41  ;;  %v1509_v41 = vsel %vm6573_vm2, 0, %v1372_v8  ;;  %v7376_v39 = vadd.f32 %v5109_v10, %v2416_v60  ;;  %v8179_v8 = vld [vmem:[#allocation14_spill] sm:$0xff]  ;;  %v8182_v60 = vld [vmem:[#allocation16_spill] sm:$0xff] }
 0x1b0   : > { %3070 = vmatmul.mubr.bf16.gmra.mrb[184].mxu0 %v7101_v44  ;;  %3238 = vmatprep.mubr.bf16.mxu1 %v1510_v15  ;;  %v4994_v44 = vadd.f32 %v4993_v61, %v4992_v57  ;;  %v5110_v29 = vpop.f32.mrb[84].mxu1  ;;  %v8180_v61 = vld [vmem:[#allocation13_spill] sm:$0xff] }
 0x1b1   : > { %3077 = vmatprep.mubr.bf16.mxu0 %v1508_v19  ;;  %v4999_v19 = vpop.f32.mrb[85].mxu0  ;;  %v5111_v18 = vpop.f32.mrb[85].mxu1 }
 0x1b2   : > { %v2413_v35 = vadd.f32 %v4994_v44, %v7087_v62  ;;  %v8177_v62 = vld [vmem:[#allocation11_spill] sm:$0xff]  ;;  %v5000_v17 = vadd.f32 %v4999_v19, %v4998_v27  ;;  %v5001_v4 = vpop.f32.mrb[86].mxu0  ;;  %v5112_v16 = vadd.f32 %v5111_v18, %v5110_v29  ;;  %v5113_v24 = vpop.f32.mrb[86].mxu1  ;;  %v8184_v19 = vld [vmem:[#allocation17_spill] sm:$0xff] }
 0x1b3   : > { %v5002_v51 = vpop.f32.mrb[87].mxu0  ;;  %v5114_v15 = vpop.f32.mrb[87].mxu1 }
 0x1b4   : > { %v7372_v59 = vadd.f32 %v5106_v48, %v2413_v35  ;;  %v2421_v0 = vadd.f32 %v5000_v17, %v7107_v54  ;;  %v5003_v5 = vadd.f32 %v5002_v51, %v5001_v4  ;;  %v5115_v57 = vadd.f32 %v5114_v15, %v5113_v24  ;;  %v8185_v4 = vld [vmem:[#allocation19_spill] sm:$0xff] }
 0x1b6   : > { %v7381_v32 = vadd.f32 %v5112_v16, %v2421_v0  ;;  %v2424_v53 = vadd.f32 %v5003_v5, %v7110_v58  ;;  %v5004_v44 = vpop.f32.mrb[88].mxu0 }
 0x1b7   : > { %3239 = vmatmul.mubr.bf16.gmra.mrb[188].mxu1 %v1509_v41  ;;  %v5005_v54 = vpop.f32.mrb[89].mxu0 }
 0x1b8   : > { %3078 = vmatmul.mubr.bf16.gmra.mrb[188].mxu0 %v1507_v50  ;;  %3729 = vmatprep.mubr.bf16.mxu1 %v8177_v62  ;;  %v7386_v45 = vadd.f32 %v5115_v57, %v2424_v53  ;;  %v5116_v50 = vpop.f32.mrb[88].mxu1  ;;  %v5006_v30 = vadd.f32 %v5005_v54, %v5004_v44  ;;  %v5007_v23 = vpop.f32.mrb[90].mxu0  ;;  %v8183_v62 = vld [vmem:[#allocation18_spill] sm:$0xff]  ;;  %v8186_v57 = vld [vmem:[#allocation20_spill] sm:$0xff]  ;;  %v8188_v54 = vld [vmem:[#allocation21_spill] sm:$0xff] }
 0x1b9   : > { %3568 = vmatprep.mubr.bf16.mxu0 %v8176_v3  ;;  %v5117_v35 = vpop.f32.mrb[89].mxu1  ;;  %v5008_v48 = vpop.f32.mrb[91].mxu0 }
 0x1ba   : > { %v2429_v38 = vadd.f32 %v5006_v30, %v7128_v43  ;;  %v5118_v37 = vadd.f32 %v5117_v35, %v5116_v50  ;;  %v5119_v58 = vpop.f32.mrb[90].mxu1  ;;  %v5009_v41 = vadd.f32 %v5008_v48, %v5007_v23  ;;  %v8189_v23 = vld [vmem:[#allocation23_spill] sm:$0xff] }
 0x1bb   : > { %v5120_v34 = vpop.f32.mrb[91].mxu1 }
 0x1bc   : > { %v7391_v10 = vadd.f32 %v5118_v37, %v2429_v38  ;;  %v2432_v3 = vadd.f32 %v5009_v41, %v7138_v2  ;;  %v5121_v27 = vadd.f32 %v5120_v34, %v5119_v58 }
 0x1be   : > { %v7396_v29 = vadd.f32 %v5121_v27, %v2432_v3  ;;  %v5010_v17 = vpop.f32.mrb[92].mxu0  ;;  %v8190_v27 = vld [vmem:[#allocation24_spill] sm:$0xff] }
 0x1bf   : > { %3730 = vmatmul.mubr.bf16.vlgmr.msra.gmra.mrb[192].mxu1 %v8180_v61  ;;  %v5011_v43 = vpop.f32.mrb[93].mxu0 }
 0x1c0   : > { %3569 = vmatmul.mubr.bf16.vlgmr.msra.gmra.mrb[192].mxu0 %v8178_v7  ;;  %3737 = vmatprep.mubr.bf16.mxu1 %v8181_v21  ;;  %v5122_v18 = vpop.f32.mrb[92].mxu1  ;;  %v5012_v51 = vadd.f32 %v5011_v43, %v5010_v17  ;;  %v5013_v0 = vpop.f32.mrb[94].mxu0  ;;  %v8187_v21 = vld [vmem:[#allocation22_spill] sm:$0xff]  ;;  %v8192_v43 = vld [vmem:[#allocation25_spill] sm:$0xff] }
 0x1c1   : > { %3576 = vmatprep.mubr.bf16.mxu0 %v8179_v8  ;;  %v5123_v16 = vpop.f32.mrb[93].mxu1  ;;  %v5014_v24 = vpop.f32.mrb[95].mxu0 }
 0x1c2   : > { %v2437_v5 = vadd.f32 %v5012_v51, %v7160_v42  ;;  %v5124_v15 = vadd.f32 %v5123_v16, %v5122_v18  ;;  %v5125_v2 = vpop.f32.mrb[94].mxu1  ;;  %v5015_v7 = vadd.f32 %v5014_v24, %v5013_v0  ;;  %v8193_v0 = vld [vmem:[#allocation27_spill] sm:$0xff] }
 0x1c3   : > { %v5126_v53 = vpop.f32.mrb[95].mxu1 }
 0x1c4   : > { %v7401_v8 = vadd.f32 %v5124_v15, %v2437_v5  ;;  %v2440_v61 = vadd.f32 %v5015_v7, %v7170_v25  ;;  %v5127_v44 = vadd.f32 %v5126_v53, %v5125_v2 }
 0x1c6   : > { %v7406_v50 = vadd.f32 %v5127_v44, %v2440_v61  ;;  %v5016_v30 = vpop.f32.mrb[96].mxu0  ;;  %v8194_v44 = vld [vmem:[#allocation28_spill] sm:$0xff] }
 0x1c7   : > { %3738 = vmatmul.mubr.bf16.gmra.mrb[196].mxu1 %v8184_v19  ;;  %v5017_v42 = vpop.f32.mrb[97].mxu0 }
 0x1c8   : > { %3577 = vmatmul.mubr.bf16.gmra.mrb[196].mxu0 %v8182_v60  ;;  %3745 = vmatprep.mubr.bf16.mxu1 %v8185_v4  ;;  %v5128_v35 = vpop.f32.mrb[96].mxu1  ;;  %v5018_v48 = vadd.f32 %v5017_v42, %v5016_v30  ;;  %v5019_v38 = vpop.f32.mrb[98].mxu0  ;;  %v8191_v4 = vld [vmem:[#allocation26_spill] sm:$0xff]  ;;  %v8196_v42 = vld [vmem:[#allocation29_spill] sm:$0xff] }
 0x1c9   : > { %3584 = vmatprep.mubr.bf16.mxu0 %v8183_v62  ;;  %v5129_v37 = vpop.f32.mrb[97].mxu1  ;;  %v5020_v58 = vpop.f32.mrb[99].mxu0 }
 0x1ca   : > { %v2445_v41 = vadd.f32 %v5018_v48, %v7200_v14  ;;  %v5130_v34 = vadd.f32 %v5129_v37, %v5128_v35  ;;  %v5131_v25 = vpop.f32.mrb[98].mxu1  ;;  %v5021_v60 = vadd.f32 %v5020_v58, %v5019_v38  ;;  %v8197_v38 = vld [vmem:[#allocation31_spill] sm:$0xff] }
 0x1cb   : > { %v5132_v3 = vpop.f32.mrb[99].mxu1 }
 0x1cc   : > { %v7411_v62 = vadd.f32 %v5130_v34, %v2445_v41  ;;  %v2448_v19 = vadd.f32 %v5021_v60, %v7209_v9  ;;  %v5133_v17 = vadd.f32 %v5132_v3, %v5131_v25 }
 0x1ce   : > { %v7416_v18 = vadd.f32 %v5133_v17, %v2448_v19  ;;  %v8198_v17 = vld [vmem:[#allocation32_spill] sm:$0xff] }
 0x1cf   : > { %3746 = vmatmul.mubr.bf16.gmra.mrb[200].mxu1 %v8188_v54 }
 0x1d0   : > { %3585 = vmatmul.mubr.bf16.gmra.mrb[200].mxu0 %v8186_v57  ;;  %3753 = vmatprep.mubr.bf16.mxu1 %v8189_v23  ;;  %v5134_v16 = vpop.f32.mrb[100].mxu1  ;;  %v8195_v23 = vld [vmem:[#allocation30_spill] sm:$0xff] }
 0x1d1   : > { %3592 = vmatprep.mubr.bf16.mxu0 %v8187_v21  ;;  %v5135_v15 = vpop.f32.mrb[101].mxu1 }
 0x1d2   : > { %v5136_v53 = vadd.f32 %v5135_v15, %v5134_v16  ;;  %v5137_v9 = vpop.f32.mrb[102].mxu1 }
 0x1d3   : > { %v5138_v61 = vpop.f32.mrb[103].mxu1 }
 0x1d4   : > { %v5139_v30 = vadd.f32 %v5138_v61, %v5137_v9 }
 0x1d7   : > { %3754 = vmatmul.mubr.bf16.gmra.mrb[204].mxu1 %v8192_v43 }
 0x1d8   : > { %3593 = vmatmul.mubr.bf16.gmra.mrb[204].mxu0 %v8190_v27  ;;  %3761 = vmatprep.mubr.bf16.mxu1 %v8193_v0  ;;  %v8199_v0 = vld [vmem:[#allocation34_spill] sm:$0xff] }
 0x1d9   : > { %3600 = vmatprep.mubr.bf16.mxu0 %v8191_v4 }
 0x1db   : > { %v5022_v51 = vpop.f32.mrb[100].mxu0 }
 0x1dc   : > { %v5023_v14 = vpop.f32.mrb[101].mxu0 }
 0x1dd   : > { %v5024_v24 = vadd.f32 %v5023_v14, %v5022_v51  ;;  %v5025_v5 = vpop.f32.mrb[102].mxu0  ;;  %v8200_v14 = vld [vmem:[#allocation33_spill] sm:$0xff] }
 0x1de   : > { %v5026_v2 = vpop.f32.mrb[103].mxu0 }
 0x1df   : > { %v2453_v7 = vadd.f32 %v5024_v24, %v7229_v22  ;;  %v5027_v57 = vadd.f32 %v5026_v2, %v5025_v5  ;;  %3762 = vmatmul.mubr.bf16.gmra.mrb[208].mxu1 %v8196_v42  ;;  %v8201_v5 = vld [vmem:[#allocation35_spill] sm:$0xff] }
 0x1e0   : > { %3601 = vmatmul.mubr.bf16.gmra.mrb[208].mxu0 %v8194_v44  ;;  %3769 = vmatprep.mubr.bf16.mxu1 %v8197_v38  ;;  %v8203_v38 = vld [vmem:[#allocation38_spill] sm:$0xff] }
 0x1e1   : > { %v7421_v21 = vadd.f32 %v5136_v53, %v2453_v7  ;;  %v2456_v54 = vadd.f32 %v5027_v57, %v7235_v13  ;;  %3608 = vmatprep.mubr.bf16.mxu0 %v8195_v23 }
 0x1e2   : > { %v5140_v37 = vpop.f32.mrb[104].mxu1 }
 0x1e3   : > { %v7426_v35 = vadd.f32 %v5139_v30, %v2456_v54  ;;  %v5028_v48 = vpop.f32.mrb[104].mxu0  ;;  %v5141_v34 = vpop.f32.mrb[105].mxu1  ;;  %v8202_v30 = vld [vmem:[#allocation36_spill] sm:$0xff] }
 0x1e4   : > { %v5029_v22 = vpop.f32.mrb[105].mxu0  ;;  %v5142_v3 = vadd.f32 %v5141_v34, %v5140_v37  ;;  %v5143_v13 = vpop.f32.mrb[106].mxu1 }
 0x1e5   : > { %v5030_v58 = vadd.f32 %v5029_v22, %v5028_v48  ;;  %v5031_v41 = vpop.f32.mrb[106].mxu0  ;;  %v5144_v19 = vpop.f32.mrb[107].mxu1  ;;  %v8204_v22 = vld [vmem:[#allocation37_spill] sm:$0xff] }
 0x1e6   : > { %v5032_v25 = vpop.f32.mrb[107].mxu0  ;;  %v5145_v51 = vadd.f32 %v5144_v19, %v5143_v13 }
 0x1e7   : > { %v2461_v60 = vadd.f32 %v5030_v58, %v7241_v28  ;;  %v5033_v27 = vadd.f32 %v5032_v25, %v5031_v41  ;;  %3770 = vmatmul.mubr.bf16.gmra.mrb[212].mxu1 %v8200_v14  ;;  %v8205_v41 = vld [vmem:[#allocation39_spill] sm:$0xff] }
 0x1e8   : > { %3609 = vmatmul.mubr.bf16.gmra.mrb[212].mxu0 %v8198_v17  ;;  %3777 = vmatprep.mubr.bf16.mxu1 %v8201_v5  ;;  %v8207_v5 = vld [vmem:[#allocation42_spill] sm:$0xff] }
 0x1e9   : > { %v7431_v4 = vadd.f32 %v5142_v3, %v2461_v60  ;;  %v2464_v43 = vadd.f32 %v5033_v27, %v7243_v11  ;;  %3616 = vmatprep.mubr.bf16.mxu0 %v8199_v0 }
 0x1ea   : > { %v5146_v15 = vpop.f32.mrb[108].mxu1 }
 0x1eb   : > { %v7436_v16 = vadd.f32 %v5145_v51, %v2464_v43  ;;  %v5034_v24 = vpop.f32.mrb[108].mxu0  ;;  %v5147_v53 = vpop.f32.mrb[109].mxu1  ;;  %v8206_v51 = vld [vmem:[#allocation40_spill] sm:$0xff] }
 0x1ec   : > { %v5035_v28 = vpop.f32.mrb[109].mxu0  ;;  %v5148_v61 = vadd.f32 %v5147_v53, %v5146_v15  ;;  %v5149_v11 = vpop.f32.mrb[110].mxu1 }
 0x1ed   : > { %v5036_v2 = vadd.f32 %v5035_v28, %v5034_v24  ;;  %v5037_v7 = vpop.f32.mrb[110].mxu0  ;;  %v5150_v54 = vpop.f32.mrb[111].mxu1  ;;  %v8208_v28 = vld [vmem:[#allocation41_spill] sm:$0xff] }
 0x1ee   : > { %v5038_v9 = vpop.f32.mrb[111].mxu0  ;;  %v5151_v48 = vadd.f32 %v5150_v54, %v5149_v11 }
 0x1ef   : > { %v2469_v57 = vadd.f32 %v5036_v2, %v7249_v36  ;;  %v5039_v44 = vadd.f32 %v5038_v9, %v5037_v7  ;;  %3778 = vmatmul.mubr.bf16.gmra.mrb[216].mxu1 %v8204_v22  ;;  %v8209_v7 = vld [vmem:[#allocation43_spill] sm:$0xff] }
 0x1f0   : > { %3617 = vmatmul.mubr.bf16.gmra.mrb[216].mxu0 %v8202_v30  ;;  %3785 = vmatprep.mubr.bf16.mxu1 %v8205_v41 }
 0x1f1   : > { %v7441_v23 = vadd.f32 %v5148_v61, %v2469_v57  ;;  %v2472_v42 = vadd.f32 %v5039_v44, %v7251_v49  ;;  %3624 = vmatprep.mubr.bf16.mxu0 %v8203_v38  ;;  %v8210_v44 = vld [vmem:[#allocation70_spill] sm:$0xff]  ;;  %v8211_v38 = vld [vmem:[#allocation44_spill] sm:$0xff] }
 0x1f2   : > { %v5152_v34 = vpop.f32.mrb[112].mxu1 }
 0x1f3   : > { %v7446_v37 = vadd.f32 %v5151_v48, %v2472_v42  ;;  %v5040_v58 = vpop.f32.mrb[112].mxu0  ;;  %v5153_v3 = vpop.f32.mrb[113].mxu1 }
 0x1f4   : > { %v5041_v36 = vpop.f32.mrb[113].mxu0  ;;  %v5154_v19 = vadd.f32 %v5153_v3, %v5152_v34  ;;  %v5155_v49 = vpop.f32.mrb[114].mxu1  ;;  %v8213_v34 = vld [vmem:[#allocation46_spill] sm:$0xff] }
 0x1f5   : > { %v5042_v25 = vadd.f32 %v5041_v36, %v5040_v58  ;;  %v5043_v60 = vpop.f32.mrb[114].mxu0  ;;  %v5156_v43 = vpop.f32.mrb[115].mxu1  ;;  %v8212_v58 = vld [vmem:[#allocation71_spill] sm:$0xff] }
 0x1f6   : > { %v5044_v13 = vpop.f32.mrb[115].mxu0  ;;  %v5157_v24 = vadd.f32 %v5156_v43, %v5155_v49 }
 0x1f7   : > { %v2477_v27 = vadd.f32 %v5042_v25, %v7257_v26  ;;  %v5045_v17 = vadd.f32 %v5044_v13, %v5043_v60  ;;  %3786 = vmatmul.mubr.bf16.gmra.mrb[220].mxu1 %v8208_v28  ;;  %v8214_v25 = vld [vmem:[#allocation45_spill] sm:$0xff]  ;;  %v8215_v13 = vld [vmem:[#allocation47_spill] sm:$0xff] }
 0x1f8   : > { %3625 = vmatmul.mubr.bf16.gmra.mrb[220].mxu0 %v8206_v51  ;;  %3793 = vmatprep.mubr.bf16.mxu1 %v8209_v7 }
 0x1f9   : > { %v7451_v0 = vadd.f32 %v5154_v19, %v2477_v27  ;;  %v2480_v14 = vadd.f32 %v5045_v17, %v7260_v47  ;;  %3632 = vmatprep.mubr.bf16.mxu0 %v8207_v5 }
 0x1fa   : > { %v5158_v53 = vpop.f32.mrb[116].mxu1 }
 0x1fb   : > { %v7456_v15 = vadd.f32 %v5157_v24, %v2480_v14  ;;  %v5046_v2 = vpop.f32.mrb[116].mxu0  ;;  %v5159_v61 = vpop.f32.mrb[117].mxu1  ;;  %v8216_v14 = vld [vmem:[#allocation72_spill] sm:$0xff] }
 0x1fc   : > { %v5047_v26 = vpop.f32.mrb[117].mxu0  ;;  %v5160_v30 = vadd.f32 %v5159_v61, %v5158_v53  ;;  %v5161_v47 = vpop.f32.mrb[118].mxu1 }
 0x1fd   : > { %v5048_v9 = vadd.f32 %v5047_v26, %v5046_v2  ;;  %v5049_v57 = vpop.f32.mrb[118].mxu0  ;;  %v5162_v48 = vpop.f32.mrb[119].mxu1  ;;  %v8217_v26 = vld [vmem:[#allocation48_spill] sm:$0xff] }
 0x1fe   : > { %v5050_v11 = vpop.f32.mrb[119].mxu0  ;;  %v5163_v36 = vadd.f32 %v5162_v48, %v5161_v47  ;;  %v8221_v47 = vld [vmem:[#allocation51_spill] sm:$0xff] }
 0x1ff   : > { %v2485_v54 = vadd.f32 %v5048_v9, %v8210_v44  ;;  %v5051_v42 = vadd.f32 %v5050_v11, %v5049_v57  ;;  %3794 = vmatmul.mubr.bf16.gmra.mrb[224].mxu1 %v8214_v25  ;;  %v8218_v9 = vld [vmem:[#allocation73_spill] sm:$0xff]  ;;  %v8219_v11 = vld [vmem:[#allocation50_spill] sm:$0xff] }
 0x200   : > { %3633 = vmatmul.mubr.bf16.gmra.mrb[224].mxu0 %v8211_v38  ;;  %3801 = vmatprep.mubr.bf16.mxu1 %v8215_v13  ;;  %v8220_v44 = vld [vmem:[#allocation49_spill] sm:$0xff] }
 0x201   : > { %v7461_v22 = vadd.f32 %v5160_v30, %v2485_v54  ;;  %v2488_v41 = vadd.f32 %v5051_v42, %v8212_v58  ;;  %3640 = vmatprep.mubr.bf16.mxu0 %v8213_v34  ;;  %v8222_v34 = vld [vmem:[#allocation74_spill] sm:$0xff] }
 0x202   : > { %v5164_v19 = vpop.f32.mrb[120].mxu1 }
 0x203   : > { %v7466_v60 = vadd.f32 %v5163_v36, %v2488_v41  ;;  %v5052_v3 = vpop.f32.mrb[120].mxu0  ;;  %v5165_v43 = vpop.f32.mrb[121].mxu1 }
 0x204   : > { %v5053_v27 = vpop.f32.mrb[121].mxu0  ;;  %v5166_v5 = vadd.f32 %v5165_v43, %v5164_v19  ;;  %v5167_v28 = vpop.f32.mrb[122].mxu1  ;;  %v8224_v43 = vld [vmem:[#allocation75_spill] sm:$0xff] }
 0x205   : > { %v5054_v49 = vadd.f32 %v5053_v27, %v5052_v3  ;;  %v5055_v17 = vpop.f32.mrb[122].mxu0  ;;  %v5168_v7 = vpop.f32.mrb[123].mxu1 }
 0x206   : > { %v5056_v51 = vpop.f32.mrb[123].mxu0  ;;  %v5169_v61 = vadd.f32 %v5168_v7, %v5167_v28  ;;  %v8227_v7 = vld [vmem:[#allocation55_spill] sm:$0xff] }
 0x207   : > { %v2493_v24 = vadd.f32 %v5054_v49, %v8216_v14  ;;  %v5057_v2 = vadd.f32 %v5056_v51, %v5055_v17  ;;  %3802 = vmatmul.mubr.bf16.gmra.mrb[228].mxu1 %v8220_v44  ;;  %v8223_v49 = vld [vmem:[#allocation52_spill] sm:$0xff] }
 0x208   : > { %3641 = vmatmul.mubr.bf16.gmra.mrb[228].mxu0 %v8217_v26  ;;  %3809 = vmatprep.mubr.bf16.mxu1 %v8221_v47 }
 0x209   : > { %v7471_v53 = vadd.f32 %v5166_v5, %v2493_v24  ;;  %v2496_v57 = vadd.f32 %v5057_v2, %v8218_v9  ;;  %3648 = vmatprep.mubr.bf16.mxu0 %v8219_v11  ;;  %v8225_v24 = vld [vmem:[#allocation54_spill] sm:$0xff]  ;;  %v8226_v5 = vld [vmem:[#allocation53_spill] sm:$0xff] }
 0x20a   : > { %v5170_v48 = vpop.f32.mrb[124].mxu1 }
 0x20b   : > { %v7476_v54 = vadd.f32 %v5169_v61, %v2496_v57  ;;  %v5058_v30 = vpop.f32.mrb[124].mxu0  ;;  %v5171_v41 = vpop.f32.mrb[125].mxu1 }
 0x20c   : > { %v5059_v42 = vpop.f32.mrb[125].mxu0  ;;  %v5172_v3 = vadd.f32 %v5171_v41, %v5170_v48  ;;  %v5173_v13 = vpop.f32.mrb[126].mxu1 }
 0x20d   : > { %v5060_v38 = vadd.f32 %v5059_v42, %v5058_v30  ;;  %v5061_v58 = vpop.f32.mrb[126].mxu0  ;;  %v5174_v19 = vpop.f32.mrb[127].mxu1 }
 0x20e   : > { %v5062_v36 = vpop.f32.mrb[127].mxu0  ;;  %v5175_v14 = vadd.f32 %v5174_v19, %v5173_v13 }
 0x20f   : > { %v2501_v25 = vadd.f32 %v5060_v38, %v8222_v34  ;;  %v5063_v27 = vadd.f32 %v5062_v36, %v5061_v58  ;;  %3810 = vmatmul.mubr.bf16.gmra.mrb[232].mxu1 %v8226_v5  ;;  %v8228_v38 = vld [vmem:[#allocation56_spill] sm:$0xff]  ;;  %v8229_v36 = vld [vmem:[#allocation58_spill] sm:$0xff]  ;;  %v8230_v34 = vld [vmem:[#allocation57_spill] sm:$0xff] }
 0x210   : > { %3649 = vmatmul.mubr.bf16.gmra.mrb[232].mxu0 %v8223_v49  ;;  %3817 = vmatprep.mubr.bf16.mxu1 %v8227_v7 }
 0x211   : > { %v7481_v17 = vadd.f32 %v5172_v3, %v2501_v25  ;;  %v2504_v51 = vadd.f32 %v5063_v27, %v8224_v43  ;;  %3656 = vmatprep.mubr.bf16.mxu0 %v8225_v24  ;;  %v8231_v27 = vld [vmem:[#allocation59_spill] sm:$0xff] }
 0x212   : > { %v5304_v9 = vpop.f32.mrb[128].mxu1 }
 0x213   : > { %v7486_v28 = vadd.f32 %v5175_v14, %v2504_v51  ;;  %v5192_v2 = vpop.f32.mrb[128].mxu0  ;;  %v5305_v11 = vpop.f32.mrb[129].mxu1 }
 0x214   : > { %v5193_v26 = vpop.f32.mrb[129].mxu0  ;;  %v5306_v30 = vadd.f32 %v5305_v11, %v5304_v9  ;;  %v5307_v47 = vpop.f32.mrb[130].mxu1  ;;  %v8233_v11 = vld [vmem:[#allocation62_spill] sm:$0xff] }
 0x215   : > { %v5194_v57 = vadd.f32 %v5193_v26, %v5192_v2  ;;  %v5195_v61 = vpop.f32.mrb[130].mxu0  ;;  %v5308_v48 = vpop.f32.mrb[131].mxu1 }
 0x216   : > { %v5196_v44 = vpop.f32.mrb[131].mxu0  ;;  %v5309_v41 = vadd.f32 %v5308_v48, %v5307_v47 }
 0x217   : > { %v5197_v42 = vadd.f32 %v5196_v44, %v5195_v61  ;;  %v3121_v58 = vadd.f32 %v5306_v30, %v5194_v57  ;;  %3818 = vmatmul.mubr.bf16.gmra.mrb[236].mxu1 %v8230_v34  ;;  %v8232_v57 = vld [vmem:[#allocation60_spill] sm:$0xff]  ;;  %v8234_v44 = vld [vmem:[#allocation61_spill] sm:$0xff] }
 0x218   : > { %3657 = vmatmul.mubr.bf16.gmra.mrb[236].mxu0 %v8228_v38  ;;  %3825 = vmatprep.mubr.bf16.mxu1 %v8231_v27 }
 0x219   : > { %3664 = vmatprep.mubr.bf16.mxu0 %v8229_v36  ;;  %v7493_v25 = vadd.f32 %v3121_v58, %v7304_v46  ;;  %v3124_v3 = vadd.f32 %v5309_v41, %v5197_v42  ;;  %v8235_v42 = vld [vmem:[#allocation63_spill] sm:$0xff] }
 0x21a   : > { %v5310_v43 = vpop.f32.mrb[132].mxu1 }
 0x21b   : > { %v5198_v13 = vpop.f32.mrb[132].mxu0  ;;  %v7497_v49 = vadd.f32 %v3124_v3, %v7311_v1  ;;  %v5311_v24 = vpop.f32.mrb[133].mxu1 }
 0x21c   : > { %v5199_v19 = vpop.f32.mrb[133].mxu0  ;;  %v5312_v2 = vadd.f32 %v5311_v24, %v5310_v43  ;;  %v5313_v7 = vpop.f32.mrb[134].mxu1  ;;  %v8237_v24 = vld [vmem:[#allocation66_spill] sm:$0xff] }
 0x21d   : > { %v5200_v51 = vadd.f32 %v5199_v19, %v5198_v13  ;;  %v5201_v14 = vpop.f32.mrb[134].mxu0  ;;  %v5314_v9 = vpop.f32.mrb[135].mxu1 }
 0x21e   : > { %v5202_v5 = vpop.f32.mrb[135].mxu0  ;;  %v5315_v61 = vadd.f32 %v5314_v9, %v5313_v7 }
 0x21f   : > { %v5203_v26 = vadd.f32 %v5202_v5, %v5201_v14  ;;  %v3129_v46 = vadd.f32 %v5312_v2, %v5200_v51  ;;  %3826 = vmatmul.mubr.bf16.gmra.mrb[240].mxu1 %v8234_v44  ;;  %v8236_v51 = vld [vmem:[#allocation64_spill] sm:$0xff]  ;;  %v8238_v5 = vld [vmem:[#allocation65_spill] sm:$0xff] }
 0x220   : > { %3665 = vmatmul.mubr.bf16.gmra.mrb[240].mxu0 %v8232_v57  ;;  %3833 = vmatprep.mubr.bf16.mxu1 %v8235_v42 }
 0x221   : > { %3672 = vmatprep.mubr.bf16.mxu0 %v8233_v11  ;;  %v7503_v1 = vadd.f32 %v3129_v46, %v7325_v20  ;;  %v3132_v30 = vadd.f32 %v5315_v61, %v5203_v26  ;;  %v8239_v26 = vld [vmem:[#allocation67_spill] sm:$0xff] }
 0x222   : > { %v5316_v58 = vpop.f32.mrb[136].mxu1 }
 0x223   : > { %v5204_v47 = vpop.f32.mrb[136].mxu0  ;;  %v7507_v38 = vadd.f32 %v3132_v30, %v7331_v6  ;;  %v5317_v34 = vpop.f32.mrb[137].mxu1 }
 0x224   : > { %v5205_v48 = vpop.f32.mrb[137].mxu0  ;;  %v5318_v13 = vadd.f32 %v5317_v34, %v5316_v58  ;;  %v5319_v27 = vpop.f32.mrb[138].mxu1  ;;  %v8241_v34 = vld [vmem:[#allocation69_spill] sm:$0xff] }
 0x225   : > { %v5206_v41 = vadd.f32 %v5205_v48, %v5204_v47  ;;  %v5207_v36 = vpop.f32.mrb[138].mxu0  ;;  %v5320_v43 = vpop.f32.mrb[139].mxu1 }
 0x226   : > { %v5208_v3 = vpop.f32.mrb[139].mxu0  ;;  %v5321_v14 = vadd.f32 %v5320_v43, %v5319_v27 }
 0x227   : > { %v5209_v19 = vadd.f32 %v5208_v3, %v5207_v36  ;;  %v3137_v20 = vadd.f32 %v5318_v13, %v5206_v41  ;;  %3834 = vmatmul.mubr.bf16.gmra.mrb[244].mxu1 %v8238_v5  ;;  %v8240_v41 = vld [vmem:[#allocation68_spill] sm:$0xff] }
 0x228   : > { %3673 = vmatmul.mubr.bf16.gmra.mrb[244].mxu0 %v8236_v51  ;;  %3841 = vmatprep.mubr.bf16.mxu1 %v8239_v26 }
 0x229   : > { %3680 = vmatprep.mubr.bf16.mxu0 %v8237_v24  ;;  %v7513_v6 = vadd.f32 %v3137_v20, %v7343_v31  ;;  %v3140_v2 = vadd.f32 %v5321_v14, %v5209_v19 }
 0x22a   : > { %v5322_v46 = vpop.f32.mrb[140].mxu1 }
 0x22b   : > { %v5210_v7 = vpop.f32.mrb[140].mxu0  ;;  %v7517_v57 = vadd.f32 %v3140_v2, %v7349_v63  ;;  %v5323_v44 = vpop.f32.mrb[141].mxu1 }
 0x22c   : > { %v5211_v9 = vpop.f32.mrb[141].mxu0  ;;  %v5324_v47 = vadd.f32 %v5323_v44, %v5322_v46  ;;  %v5325_v42 = vpop.f32.mrb[142].mxu1 }
 0x22d   : > { %v5212_v61 = vadd.f32 %v5211_v9, %v5210_v7  ;;  %v5213_v11 = vpop.f32.mrb[142].mxu0  ;;  %v5326_v58 = vpop.f32.mrb[143].mxu1 }
 0x22e   : > { %v5214_v30 = vpop.f32.mrb[143].mxu0  ;;  %v5327_v36 = vadd.f32 %v5326_v58, %v5325_v42 }
 0x22f   : > { %v5215_v48 = vadd.f32 %v5214_v30, %v5213_v11  ;;  %v3145_v31 = vadd.f32 %v5324_v47, %v5212_v61  ;;  %3842 = vmatmul.mubr.bf16.gmra.mrb[248].mxu1 %v8241_v34 }
 0x230   : > { %3681 = vmatmul.mubr.bf16.gmra.mrb[248].mxu0 %v8240_v41  ;;  %3849 = vmatprep.mubr.bf16.mxu1 %v7323_v55 }
 0x231   : > { %3688 = vmatprep.mubr.bf16.mxu0 %v7317_v33  ;;  %v7523_v63 = vadd.f32 %v3145_v31, %v7361_v40  ;;  %v3148_v3 = vadd.f32 %v5327_v36, %v5215_v48 }
 0x232   : > { %v5328_v43 = vpop.f32.mrb[144].mxu1 }
 0x233   : > { %v5216_v13 = vpop.f32.mrb[144].mxu0  ;;  %v7527_v19 = vadd.f32 %v3148_v3, %v7365_v52  ;;  %v5329_v14 = vpop.f32.mrb[145].mxu1 }
 0x234   : > { %v5217_v27 = vpop.f32.mrb[145].mxu0  ;;  %v5330_v5 = vadd.f32 %v5329_v14, %v5328_v43  ;;  %v5331_v33 = vpop.f32.mrb[146].mxu1 }
 0x235   : > { %v5218_v51 = vadd.f32 %v5217_v27, %v5216_v13  ;;  %v5219_v20 = vpop.f32.mrb[146].mxu0  ;;  %v5332_v7 = vpop.f32.mrb[147].mxu1 }
 0x236   : > { %v5220_v24 = vpop.f32.mrb[147].mxu0  ;;  %v5333_v26 = vadd.f32 %v5332_v7, %v5331_v33 }
 0x237   : > { %v5221_v2 = vadd.f32 %v5220_v24, %v5219_v20  ;;  %v3153_v40 = vadd.f32 %v5330_v5, %v5218_v51  ;;  %3850 = vmatmul.mubr.bf16.gmra.mrb[252].mxu1 %v7339_v56 }
 0x238   : > { %3689 = vmatmul.mubr.bf16.gmra.mrb[252].mxu0 %v7335_v12 }
 0x239   : > { %v7532_v55 = vadd.f32 %v3153_v40, %v7372_v59  ;;  %v3156_v52 = vadd.f32 %v5333_v26, %v5221_v2 }
 0x23a   : > { %v5334_v11 = vpop.f32.mrb[148].mxu1 }
 0x23b   : > { %v5222_v9 = vpop.f32.mrb[148].mxu0  ;;  %v7535_v61 = vadd.f32 %v3156_v52, %v7376_v39  ;;  %v5335_v47 = vpop.f32.mrb[149].mxu1 }
 0x23c   : > { %v5223_v46 = vpop.f32.mrb[149].mxu0  ;;  %v5336_v48 = vadd.f32 %v5335_v47, %v5334_v11  ;;  %v5337_v12 = vpop.f32.mrb[150].mxu1 }
 0x23d   : > { %v5224_v44 = vadd.f32 %v5223_v46, %v5222_v9  ;;  %v5225_v30 = vpop.f32.mrb[150].mxu0  ;;  %v5338_v41 = vpop.f32.mrb[151].mxu1 }
 0x23e   : > { %v5226_v42 = vpop.f32.mrb[151].mxu0  ;;  %v5339_v56 = vadd.f32 %v5338_v41, %v5337_v12 }
 0x23f   : > { %v5227_v58 = vadd.f32 %v5226_v42, %v5225_v30  ;;  %v3161_v31 = vadd.f32 %v5336_v48, %v5224_v44 }
 0x241   : > { %v7538_v59 = vadd.f32 %v3161_v31, %v7381_v32  ;;  %v3164_v36 = vadd.f32 %v5339_v56, %v5227_v58 }
 0x242   : > { %v5340_v13 = vpop.f32.mrb[152].mxu1 }
 0x243   : > { %v5228_v34 = vpop.f32.mrb[152].mxu0  ;;  %v7541_v39 = vadd.f32 %v3164_v36, %v7386_v45  ;;  %v5341_v51 = vpop.f32.mrb[153].mxu1 }
 0x244   : > { %v5229_v3 = vpop.f32.mrb[153].mxu0  ;;  %v5342_v14 = vadd.f32 %v5341_v51, %v5340_v13  ;;  %v5343_v24 = vpop.f32.mrb[154].mxu1 }
 0x245   : > { %v5230_v27 = vadd.f32 %v5229_v3, %v5228_v34  ;;  %v5231_v43 = vpop.f32.mrb[154].mxu0  ;;  %v5344_v33 = vpop.f32.mrb[155].mxu1 }
 0x246   : > { %v5232_v20 = vpop.f32.mrb[155].mxu0  ;;  %v5345_v7 = vadd.f32 %v5344_v33, %v5343_v24 }
 0x247   : > { %v5233_v5 = vadd.f32 %v5232_v20, %v5231_v43  ;;  %v3169_v2 = vadd.f32 %v5342_v14, %v5230_v27 }
 0x249   : > { %v7544_v32 = vadd.f32 %v3169_v2, %v7391_v10  ;;  %v3172_v40 = vadd.f32 %v5345_v7, %v5233_v5 }
 0x24a   : > { %v5346_v9 = vpop.f32.mrb[156].mxu1 }
 0x24b   : > { %v5234_v26 = vpop.f32.mrb[156].mxu0  ;;  %v7547_v45 = vadd.f32 %v3172_v40, %v7396_v29  ;;  %v5347_v44 = vpop.f32.mrb[157].mxu1 }
 0x24c   : > { %v5235_v52 = vpop.f32.mrb[157].mxu0  ;;  %v5348_v47 = vadd.f32 %v5347_v44, %v5346_v9  ;;  %v5349_v42 = vpop.f32.mrb[158].mxu1 }
 0x24d   : > { %v5236_v46 = vadd.f32 %v5235_v52, %v5234_v26  ;;  %v5237_v11 = vpop.f32.mrb[158].mxu0  ;;  %v5350_v12 = vpop.f32.mrb[159].mxu1 }
 0x24e   : > { %v5238_v30 = vpop.f32.mrb[159].mxu0  ;;  %v5351_v41 = vadd.f32 %v5350_v12, %v5349_v42 }
 0x24f   : > { %v5239_v48 = vadd.f32 %v5238_v30, %v5237_v11  ;;  %v3177_v58 = vadd.f32 %v5348_v47, %v5236_v46 }
 0x251   : > { %v7550_v10 = vadd.f32 %v3177_v58, %v7401_v8  ;;  %v3180_v31 = vadd.f32 %v5351_v41, %v5239_v48 }
 0x252   : > { %v5352_v34 = vpop.f32.mrb[160].mxu1 }
 0x253   : > { %v5240_v56 = vpop.f32.mrb[160].mxu0  ;;  %v7553_v29 = vadd.f32 %v3180_v31, %v7406_v50  ;;  %v5353_v27 = vpop.f32.mrb[161].mxu1 }
 0x254   : > { %v5241_v36 = vpop.f32.mrb[161].mxu0  ;;  %v5354_v51 = vadd.f32 %v5353_v27, %v5352_v34  ;;  %v5355_v20 = vpop.f32.mrb[162].mxu1 }
 0x255   : > { %v5242_v3 = vadd.f32 %v5241_v36, %v5240_v56  ;;  %v5243_v13 = vpop.f32.mrb[162].mxu0  ;;  %v5356_v24 = vpop.f32.mrb[163].mxu1 }
 0x256   : > { %v5244_v43 = vpop.f32.mrb[163].mxu0  ;;  %v5357_v33 = vadd.f32 %v5356_v24, %v5355_v20 }
 0x257   : > { %v5245_v14 = vadd.f32 %v5244_v43, %v5243_v13  ;;  %v3185_v5 = vadd.f32 %v5354_v51, %v5242_v3 }
 0x259   : > { %v7556_v8 = vadd.f32 %v3185_v5, %v7411_v62  ;;  %v3188_v2 = vadd.f32 %v5357_v33, %v5245_v14 }
 0x25a   : > { %v5358_v26 = vpop.f32.mrb[164].mxu1 }
 0x25b   : > { %v5246_v7 = vpop.f32.mrb[164].mxu0  ;;  %v7559_v50 = vadd.f32 %v3188_v2, %v7416_v18  ;;  %v5359_v46 = vpop.f32.mrb[165].mxu1 }
 0x25c   : > { %v5247_v40 = vpop.f32.mrb[165].mxu0  ;;  %v5360_v44 = vadd.f32 %v5359_v46, %v5358_v26  ;;  %v5361_v30 = vpop.f32.mrb[166].mxu1 }
 0x25d   : > { %v5248_v52 = vadd.f32 %v5247_v40, %v5246_v7  ;;  %v5249_v9 = vpop.f32.mrb[166].mxu0  ;;  %v5362_v42 = vpop.f32.mrb[167].mxu1 }
 0x25e   : > { %v5250_v11 = vpop.f32.mrb[167].mxu0  ;;  %v5363_v12 = vadd.f32 %v5362_v42, %v5361_v30 }
 0x25f   : > { %v5251_v47 = vadd.f32 %v5250_v11, %v5249_v9  ;;  %v3193_v48 = vadd.f32 %v5360_v44, %v5248_v52 }
 0x261   : > { %v7562_v62 = vadd.f32 %v3193_v48, %v7421_v21  ;;  %v3196_v58 = vadd.f32 %v5363_v12, %v5251_v47 }
 0x262   : > { %v5364_v56 = vpop.f32.mrb[168].mxu1 }
 0x263   : > { %v5252_v41 = vpop.f32.mrb[168].mxu0  ;;  %v7565_v18 = vadd.f32 %v3196_v58, %v7426_v35  ;;  %v5365_v3 = vpop.f32.mrb[169].mxu1 }
 0x264   : > { %v5253_v31 = vpop.f32.mrb[169].mxu0  ;;  %v5366_v27 = vadd.f32 %v5365_v3, %v5364_v56  ;;  %v5367_v43 = vpop.f32.mrb[170].mxu1 }
 0x265   : > { %v5254_v36 = vadd.f32 %v5253_v31, %v5252_v41  ;;  %v5255_v34 = vpop.f32.mrb[170].mxu0  ;;  %v5368_v20 = vpop.f32.mrb[171].mxu1 }
 0x266   : > { %v5256_v13 = vpop.f32.mrb[171].mxu0  ;;  %v5369_v24 = vadd.f32 %v5368_v20, %v5367_v43 }
 0x267   : > { %v5257_v51 = vadd.f32 %v5256_v13, %v5255_v34  ;;  %v3201_v14 = vadd.f32 %v5366_v27, %v5254_v36 }
 0x269   : > { %v7568_v21 = vadd.f32 %v3201_v14, %v7431_v4  ;;  %v3204_v5 = vadd.f32 %v5369_v24, %v5257_v51 }
 0x26a   : > { %v5370_v7 = vpop.f32.mrb[172].mxu1 }
 0x26b   : > { %v5258_v33 = vpop.f32.mrb[172].mxu0  ;;  %v7571_v35 = vadd.f32 %v3204_v5, %v7436_v16  ;;  %v5371_v52 = vpop.f32.mrb[173].mxu1 }
 0x26c   : > { %v5259_v2 = vpop.f32.mrb[173].mxu0  ;;  %v5372_v46 = vadd.f32 %v5371_v52, %v5370_v7  ;;  %v5373_v11 = vpop.f32.mrb[174].mxu1 }
 0x26d   : > { %v5260_v40 = vadd.f32 %v5259_v2, %v5258_v33  ;;  %v5261_v26 = vpop.f32.mrb[174].mxu0  ;;  %v5374_v30 = vpop.f32.mrb[175].mxu1 }
 0x26e   : > { %v5262_v9 = vpop.f32.mrb[175].mxu0  ;;  %v5375_v42 = vadd.f32 %v5374_v30, %v5373_v11 }
 0x26f   : > { %v5263_v44 = vadd.f32 %v5262_v9, %v5261_v26  ;;  %v3209_v47 = vadd.f32 %v5372_v46, %v5260_v40 }
 0x271   : > { %v7574_v4 = vadd.f32 %v3209_v47, %v7441_v23  ;;  %v3212_v48 = vadd.f32 %v5375_v42, %v5263_v44 }
 0x272   : > { %v5376_v41 = vpop.f32.mrb[176].mxu1 }
 0x273   : > { %v5264_v12 = vpop.f32.mrb[176].mxu0  ;;  %v7577_v16 = vadd.f32 %v3212_v48, %v7446_v37  ;;  %v5377_v36 = vpop.f32.mrb[177].mxu1 }
 0x274   : > { %v5265_v58 = vpop.f32.mrb[177].mxu0  ;;  %v5378_v3 = vadd.f32 %v5377_v36, %v5376_v41  ;;  %v5379_v13 = vpop.f32.mrb[178].mxu1 }
 0x275   : > { %v5266_v31 = vadd.f32 %v5265_v58, %v5264_v12  ;;  %v5267_v56 = vpop.f32.mrb[178].mxu0  ;;  %v5380_v43 = vpop.f32.mrb[179].mxu1 }
 0x276   : > { %v5268_v34 = vpop.f32.mrb[179].mxu0  ;;  %v5381_v20 = vadd.f32 %v5380_v43, %v5379_v13 }
 0x277   : > { %v5269_v27 = vadd.f32 %v5268_v34, %v5267_v56  ;;  %v3217_v51 = vadd.f32 %v5378_v3, %v5266_v31 }
 0x279   : > { %v7580_v23 = vadd.f32 %v3217_v51, %v7451_v0  ;;  %v3220_v14 = vadd.f32 %v5381_v20, %v5269_v27 }
 0x27a   : > { %v5382_v33 = vpop.f32.mrb[180].mxu1 }
 0x27b   : > { %v5270_v24 = vpop.f32.mrb[180].mxu0  ;;  %v7583_v37 = vadd.f32 %v3220_v14, %v7456_v15  ;;  %v5383_v40 = vpop.f32.mrb[181].mxu1 }
 0x27c   : > { %v5271_v5 = vpop.f32.mrb[181].mxu0  ;;  %v5384_v52 = vadd.f32 %v5383_v40, %v5382_v33  ;;  %v5385_v9 = vpop.f32.mrb[182].mxu1 }
 0x27d   : > { %v5272_v2 = vadd.f32 %v5271_v5, %v5270_v24  ;;  %v5273_v7 = vpop.f32.mrb[182].mxu0  ;;  %v5386_v11 = vpop.f32.mrb[183].mxu1 }
 0x27e   : > { %v5274_v26 = vpop.f32.mrb[183].mxu0  ;;  %v5387_v30 = vadd.f32 %v5386_v11, %v5385_v9 }
 0x27f   : > { %v5275_v46 = vadd.f32 %v5274_v26, %v5273_v7  ;;  %v3225_v44 = vadd.f32 %v5384_v52, %v5272_v2 }
 0x281   : > { %v7586_v0 = vadd.f32 %v3225_v44, %v7461_v22  ;;  %v3228_v47 = vadd.f32 %v5387_v30, %v5275_v46 }
 0x282   : > { %v5388_v12 = vpop.f32.mrb[184].mxu1 }
 0x283   : > { %v5276_v42 = vpop.f32.mrb[184].mxu0  ;;  %v7589_v15 = vadd.f32 %v3228_v47, %v7466_v60  ;;  %v5389_v31 = vpop.f32.mrb[185].mxu1 }
 0x284   : > { %v5277_v48 = vpop.f32.mrb[185].mxu0  ;;  %v5390_v36 = vadd.f32 %v5389_v31, %v5388_v12  ;;  %v5391_v34 = vpop.f32.mrb[186].mxu1 }
 0x285   : > { %v5278_v58 = vadd.f32 %v5277_v48, %v5276_v42  ;;  %v5279_v41 = vpop.f32.mrb[186].mxu0  ;;  %v5392_v13 = vpop.f32.mrb[187].mxu1 }
 0x286   : > { %v5280_v56 = vpop.f32.mrb[187].mxu0  ;;  %v5393_v43 = vadd.f32 %v5392_v13, %v5391_v34 }
 0x287   : > { %v5281_v3 = vadd.f32 %v5280_v56, %v5279_v41  ;;  %v3233_v27 = vadd.f32 %v5390_v36, %v5278_v58 }
 0x289   : > { %v7592_v22 = vadd.f32 %v3233_v27, %v7471_v53  ;;  %v3236_v51 = vadd.f32 %v5393_v43, %v5281_v3 }
 0x28a   : > { %v5394_v24 = vpop.f32.mrb[188].mxu1 }
 0x28b   : > { %v5282_v20 = vpop.f32.mrb[188].mxu0  ;;  %v7595_v60 = vadd.f32 %v3236_v51, %v7476_v54  ;;  %v5395_v2 = vpop.f32.mrb[189].mxu1 }
 0x28c   : > { %v5283_v14 = vpop.f32.mrb[189].mxu0  ;;  %v5396_v40 = vadd.f32 %v5395_v2, %v5394_v24  ;;  %v5397_v26 = vpop.f32.mrb[190].mxu1 }
 0x28d   : > { %v5284_v5 = vadd.f32 %v5283_v14, %v5282_v20  ;;  %v5285_v33 = vpop.f32.mrb[190].mxu0  ;;  %v5398_v9 = vpop.f32.mrb[191].mxu1 }
 0x28e   : > { %v5286_v7 = vpop.f32.mrb[191].mxu0  ;;  %v5399_v11 = vadd.f32 %v5398_v9, %v5397_v26 }
 0x28f   : > { %v5287_v52 = vadd.f32 %v5286_v7, %v5285_v33  ;;  %v3241_v46 = vadd.f32 %v5396_v40, %v5284_v5 }
 0x291   : > { %v7598_v53 = vadd.f32 %v3241_v46, %v7481_v17  ;;  %v3244_v44 = vadd.f32 %v5399_v11, %v5287_v52 }
 0x292   : > { %v5528_v42 = vpop.f32.mrb[192].mxu1 }
 0x293   : > { %v5416_v30 = vpop.f32.mrb[192].mxu0  ;;  %v7601_v54 = vadd.f32 %v3244_v44, %v7486_v28  ;;  %v5529_v58 = vpop.f32.mrb[193].mxu1 }
 0x294   : > { %v5417_v47 = vpop.f32.mrb[193].mxu0  ;;  %v5530_v31 = vadd.f32 %v5529_v58, %v5528_v42  ;;  %v5531_v56 = vpop.f32.mrb[194].mxu1 }
 0x295   : > { %v5418_v48 = vadd.f32 %v5417_v47, %v5416_v30  ;;  %v5419_v12 = vpop.f32.mrb[194].mxu0  ;;  %v5532_v34 = vpop.f32.mrb[195].mxu1 }
 0x296   : > { %v5420_v41 = vpop.f32.mrb[195].mxu0  ;;  %v5533_v13 = vadd.f32 %v5532_v34, %v5531_v56 }
 0x297   : > { %v5421_v36 = vadd.f32 %v5420_v41, %v5419_v12  ;;  %v3732_v3 = vadd.f32 %v5530_v31, %v5418_v48 }
 0x299   : > { %v7604_v17 = vadd.f32 %v3732_v3, %v7493_v25  ;;  %v3735_v27 = vadd.f32 %v5533_v13, %v5421_v36 }
 0x29a   : > { %v5534_v20 = vpop.f32.mrb[196].mxu1 }
 0x29b   : > { %v5422_v43 = vpop.f32.mrb[196].mxu0  ;;  %v7608_v28 = vadd.f32 %v3735_v27, %v7497_v49  ;;  %v5535_v5 = vpop.f32.mrb[197].mxu1 }
 0x29c   : > { %v5423_v51 = vpop.f32.mrb[197].mxu0  ;;  %v5536_v2 = vadd.f32 %v5535_v5, %v5534_v20  ;;  %v5537_v7 = vpop.f32.mrb[198].mxu1 }
 0x29d   : > { %v5424_v14 = vadd.f32 %v5423_v51, %v5422_v43  ;;  %v5425_v24 = vpop.f32.mrb[198].mxu0  ;;  %v4636_v25 = vpack.c.bf16 %v7608_v28, %v7604_v17  ;;  %v5538_v26 = vpop.f32.mrb[199].mxu1 }
 0x29e   : > { %v5426_v33 = vpop.f32.mrb[199].mxu0  ;;  %v5539_v52 = vadd.f32 %v5538_v26, %v5537_v7 }
 0x29f   : > { %v5427_v40 = vadd.f32 %v5426_v33, %v5425_v24  ;;  %4637 = vst [vmem:[%s7613_s23] sm:$0xff] %v4636_v25   ;;  %v3740_v49 = vadd.f32 %v5536_v2, %v5424_v14 }
 0x2a1   : > { %v7619_v9 = vadd.f32 %v3740_v49, %v7503_v1  ;;  %v3743_v46 = vadd.f32 %v5539_v52, %v5427_v40 }
 0x2a2   : > { %v5540_v47 = vpop.f32.mrb[200].mxu1 }
 0x2a3   : > { %v5428_v11 = vpop.f32.mrb[200].mxu0  ;;  %v7622_v30 = vadd.f32 %v3743_v46, %v7507_v38  ;;  %v5541_v12 = vpop.f32.mrb[201].mxu1 }
 0x2a4   : > { %v5429_v44 = vpop.f32.mrb[201].mxu0  ;;  %v5542_v31 = vadd.f32 %v5541_v12, %v5540_v47  ;;  %v5543_v56 = vpop.f32.mrb[202].mxu1 }
 0x2a5   : > { %v5430_v42 = vadd.f32 %v5429_v44, %v5428_v11  ;;  %v5431_v48 = vpop.f32.mrb[202].mxu0  ;;  %v4641_v41 = vpack.c.bf16 %v7622_v30, %v7619_v9  ;;  %v5544_v34 = vpop.f32.mrb[203].mxu1 }
 0x2a6   : > { %v5432_v58 = vpop.f32.mrb[203].mxu0  ;;  %v5545_v3 = vadd.f32 %v5544_v34, %v5543_v56 }
 0x2a7   : > { %v5433_v36 = vadd.f32 %v5432_v58, %v5431_v48  ;;  %4713 = vst [vmem:[%s7613_s23 + $0x8] sm:$0xff] %v4641_v41   ;;  %v3748_v1 = vadd.f32 %v5542_v31, %v5430_v42 }
 0x2a9   : > { %v7628_v13 = vadd.f32 %v3748_v1, %v7513_v6  ;;  %v3751_v38 = vadd.f32 %v5545_v3, %v5433_v36 }
 0x2aa   : > { %v5546_v20 = vpop.f32.mrb[204].mxu1 }
 0x2ab   : > { %v5434_v27 = vpop.f32.mrb[204].mxu0  ;;  %v7631_v51 = vadd.f32 %v3751_v38, %v7517_v57  ;;  %v5547_v5 = vpop.f32.mrb[205].mxu1 }
 0x2ac   : > { %v5435_v43 = vpop.f32.mrb[205].mxu0  ;;  %v5548_v2 = vadd.f32 %v5547_v5, %v5546_v20  ;;  %v5549_v7 = vpop.f32.mrb[206].mxu1 }
 0x2ad   : > { %v5436_v14 = vadd.f32 %v5435_v43, %v5434_v27  ;;  %v5437_v24 = vpop.f32.mrb[206].mxu0  ;;  %v4646_v25 = vpack.c.bf16 %v7631_v51, %v7628_v13  ;;  %v5550_v26 = vpop.f32.mrb[207].mxu1 }
 0x2ae   : > { %v5438_v33 = vpop.f32.mrb[207].mxu0  ;;  %v5551_v49 = vadd.f32 %v5550_v26, %v5549_v7 }
 0x2af   : > { %v5439_v40 = vadd.f32 %v5438_v33, %v5437_v24  ;;  %4714 = vst [vmem:[%s7613_s23 + $0x10] sm:$0xff] %v4646_v25   ;;  %v3756_v6 = vadd.f32 %v5548_v2, %v5436_v14 }
 0x2b1   : > { %v7637_v52 = vadd.f32 %v3756_v6, %v7523_v63  ;;  %v3759_v57 = vadd.f32 %v5551_v49, %v5439_v40 }
 0x2b2   : > { %v5552_v47 = vpop.f32.mrb[208].mxu1 }
 0x2b3   : > { %v5440_v46 = vpop.f32.mrb[208].mxu0  ;;  %v7640_v44 = vadd.f32 %v3759_v57, %v7527_v19  ;;  %v5553_v12 = vpop.f32.mrb[209].mxu1 }
 0x2b4   : > { %v5441_v11 = vpop.f32.mrb[209].mxu0  ;;  %v5554_v31 = vadd.f32 %v5553_v12, %v5552_v47  ;;  %v5555_v56 = vpop.f32.mrb[210].mxu1 }
 0x2b5   : > { %v5442_v42 = vadd.f32 %v5441_v11, %v5440_v46  ;;  %v5443_v48 = vpop.f32.mrb[210].mxu0  ;;  %v4651_v41 = vpack.c.bf16 %v7640_v44, %v7637_v52  ;;  %v5556_v34 = vpop.f32.mrb[211].mxu1 }
 0x2b6   : > { %v5444_v58 = vpop.f32.mrb[211].mxu0  ;;  %v5557_v1 = vadd.f32 %v5556_v34, %v5555_v56 }
 0x2b7   : > { %v5445_v36 = vadd.f32 %v5444_v58, %v5443_v48  ;;  %4715 = vst [vmem:[%s7613_s23 + $0x18] sm:$0xff] %v4651_v41   ;;  %v3764_v63 = vadd.f32 %v5554_v31, %v5442_v42 }
 0x2b9   : > { %v7646_v3 = vadd.f32 %v3764_v63, %v7532_v55  ;;  %v3767_v19 = vadd.f32 %v5557_v1, %v5445_v36 }
 0x2ba   : > { %v5558_v20 = vpop.f32.mrb[212].mxu1 }
 0x2bb   : > { %v5446_v38 = vpop.f32.mrb[212].mxu0  ;;  %v7649_v43 = vadd.f32 %v3767_v19, %v7535_v61  ;;  %v5559_v5 = vpop.f32.mrb[213].mxu1 }
 0x2bc   : > { %v5447_v27 = vpop.f32.mrb[213].mxu0  ;;  %v5560_v2 = vadd.f32 %v5559_v5, %v5558_v20  ;;  %v5561_v7 = vpop.f32.mrb[214].mxu1 }
 0x2bd   : > { %v5448_v14 = vadd.f32 %v5447_v27, %v5446_v38  ;;  %v5449_v24 = vpop.f32.mrb[214].mxu0  ;;  %v4656_v25 = vpack.c.bf16 %v7649_v43, %v7646_v3  ;;  %v5562_v26 = vpop.f32.mrb[215].mxu1 }
 0x2be   : > { %v5450_v33 = vpop.f32.mrb[215].mxu0  ;;  %v5563_v6 = vadd.f32 %v5562_v26, %v5561_v7 }
 0x2bf   : > { %v5451_v40 = vadd.f32 %v5450_v33, %v5449_v24  ;;  %4716 = vst [vmem:[%s7613_s23 + $0x20] sm:$0xff] %v4656_v25   ;;  %v3772_v55 = vadd.f32 %v5560_v2, %v5448_v14 }
 0x2c1   : > { %v7655_v49 = vadd.f32 %v3772_v55, %v7538_v59  ;;  %v3775_v61 = vadd.f32 %v5563_v6, %v5451_v40 }
 0x2c2   : > { %v5564_v47 = vpop.f32.mrb[216].mxu1 }
 0x2c3   : > { %v5452_v57 = vpop.f32.mrb[216].mxu0  ;;  %v7658_v11 = vadd.f32 %v3775_v61, %v7541_v39  ;;  %v5565_v12 = vpop.f32.mrb[217].mxu1 }
 0x2c4   : > { %v5453_v46 = vpop.f32.mrb[217].mxu0  ;;  %v5566_v31 = vadd.f32 %v5565_v12, %v5564_v47  ;;  %v5567_v56 = vpop.f32.mrb[218].mxu1 }
 0x2c5   : > { %v5454_v42 = vadd.f32 %v5453_v46, %v5452_v57  ;;  %v5455_v48 = vpop.f32.mrb[218].mxu0  ;;  %v4661_v41 = vpack.c.bf16 %v7658_v11, %v7655_v49  ;;  %v5568_v34 = vpop.f32.mrb[219].mxu1 }
 0x2c6   : > { %v5456_v58 = vpop.f32.mrb[219].mxu0  ;;  %v5569_v63 = vadd.f32 %v5568_v34, %v5567_v56 }
 0x2c7   : > { %v5457_v36 = vadd.f32 %v5456_v58, %v5455_v48  ;;  %4717 = vst [vmem:[%s7613_s23 + $0x28] sm:$0xff] %v4661_v41   ;;  %v3780_v59 = vadd.f32 %v5566_v31, %v5454_v42 }
 0x2c9   : > { %v7664_v1 = vadd.f32 %v3780_v59, %v7544_v32  ;;  %v3783_v39 = vadd.f32 %v5569_v63, %v5457_v36 }
 0x2ca   : > { %v5570_v20 = vpop.f32.mrb[220].mxu1 }
 0x2cb   : > { %v5458_v19 = vpop.f32.mrb[220].mxu0  ;;  %v7667_v27 = vadd.f32 %v3783_v39, %v7547_v45  ;;  %v5571_v5 = vpop.f32.mrb[221].mxu1 }
 0x2cc   : > { %v5459_v38 = vpop.f32.mrb[221].mxu0  ;;  %v5572_v2 = vadd.f32 %v5571_v5, %v5570_v20  ;;  %v5573_v7 = vpop.f32.mrb[222].mxu1 }
 0x2cd   : > { %v5460_v14 = vadd.f32 %v5459_v38, %v5458_v19  ;;  %v5461_v24 = vpop.f32.mrb[222].mxu0  ;;  %v4666_v25 = vpack.c.bf16 %v7667_v27, %v7664_v1  ;;  %v5574_v26 = vpop.f32.mrb[223].mxu1 }
 0x2ce   : > { %v5462_v33 = vpop.f32.mrb[223].mxu0  ;;  %v5575_v55 = vadd.f32 %v5574_v26, %v5573_v7 }
 0x2cf   : > { %v5463_v40 = vadd.f32 %v5462_v33, %v5461_v24  ;;  %4718 = vst [vmem:[%s7613_s23 + $0x30] sm:$0xff] %v4666_v25   ;;  %v3788_v32 = vadd.f32 %v5572_v2, %v5460_v14 }
 0x2d1   : > { %v7673_v6 = vadd.f32 %v3788_v32, %v7550_v10  ;;  %v3791_v45 = vadd.f32 %v5575_v55, %v5463_v40 }
 0x2d2   : > { %v5576_v47 = vpop.f32.mrb[224].mxu1 }
 0x2d3   : > { %v5464_v61 = vpop.f32.mrb[224].mxu0  ;;  %v7676_v46 = vadd.f32 %v3791_v45, %v7553_v29  ;;  %v5577_v12 = vpop.f32.mrb[225].mxu1 }
 0x2d4   : > { %v5465_v57 = vpop.f32.mrb[225].mxu0  ;;  %v5578_v31 = vadd.f32 %v5577_v12, %v5576_v47  ;;  %v5579_v56 = vpop.f32.mrb[226].mxu1 }
 0x2d5   : > { %v5466_v42 = vadd.f32 %v5465_v57, %v5464_v61  ;;  %v5467_v48 = vpop.f32.mrb[226].mxu0  ;;  %v4671_v41 = vpack.c.bf16 %v7676_v46, %v7673_v6  ;;  %v5580_v34 = vpop.f32.mrb[227].mxu1 }
 0x2d6   : > { %v5468_v58 = vpop.f32.mrb[227].mxu0  ;;  %v5581_v59 = vadd.f32 %v5580_v34, %v5579_v56 }
 0x2d7   : > { %v5469_v36 = vadd.f32 %v5468_v58, %v5467_v48  ;;  %4719 = vst [vmem:[%s7613_s23 + $0x38] sm:$0xff] %v4671_v41   ;;  %v3796_v10 = vadd.f32 %v5578_v31, %v5466_v42 }
 0x2d9   : > { %v7682_v63 = vadd.f32 %v3796_v10, %v7556_v8  ;;  %v3799_v29 = vadd.f32 %v5581_v59, %v5469_v36 }
 0x2da   : > { %v5582_v20 = vpop.f32.mrb[228].mxu1 }
 0x2db   : > { %v5470_v39 = vpop.f32.mrb[228].mxu0  ;;  %v7685_v38 = vadd.f32 %v3799_v29, %v7559_v50  ;;  %v5583_v5 = vpop.f32.mrb[229].mxu1 }
 0x2dc   : > { %v5471_v19 = vpop.f32.mrb[229].mxu0  ;;  %v5584_v2 = vadd.f32 %v5583_v5, %v5582_v20  ;;  %v5585_v7 = vpop.f32.mrb[230].mxu1 }
 0x2dd   : > { %v5472_v14 = vadd.f32 %v5471_v19, %v5470_v39  ;;  %v5473_v24 = vpop.f32.mrb[230].mxu0  ;;  %v4676_v25 = vpack.c.bf16 %v7685_v38, %v7682_v63  ;;  %v5586_v26 = vpop.f32.mrb[231].mxu1 }
 0x2de   : > { %v5474_v33 = vpop.f32.mrb[231].mxu0  ;;  %v5587_v32 = vadd.f32 %v5586_v26, %v5585_v7 }
 0x2df   : > { %v5475_v40 = vadd.f32 %v5474_v33, %v5473_v24  ;;  %4720 = vst [vmem:[%s7613_s23 + $0x40] sm:$0xff] %v4676_v25   ;;  %v3804_v8 = vadd.f32 %v5584_v2, %v5472_v14 }
 0x2e1   : > { %v7691_v55 = vadd.f32 %v3804_v8, %v7562_v62  ;;  %v3807_v50 = vadd.f32 %v5587_v32, %v5475_v40 }
 0x2e2   : > { %v5588_v47 = vpop.f32.mrb[232].mxu1 }
 0x2e3   : > { %v5476_v45 = vpop.f32.mrb[232].mxu0  ;;  %v7694_v57 = vadd.f32 %v3807_v50, %v7565_v18  ;;  %v5589_v12 = vpop.f32.mrb[233].mxu1 }
 0x2e4   : > { %v5477_v61 = vpop.f32.mrb[233].mxu0  ;;  %v5590_v31 = vadd.f32 %v5589_v12, %v5588_v47  ;;  %v5591_v56 = vpop.f32.mrb[234].mxu1 }
 0x2e5   : > { %v5478_v42 = vadd.f32 %v5477_v61, %v5476_v45  ;;  %v5479_v48 = vpop.f32.mrb[234].mxu0  ;;  %v4681_v41 = vpack.c.bf16 %v7694_v57, %v7691_v55  ;;  %v5592_v34 = vpop.f32.mrb[235].mxu1 }
 0x2e6   : > { %v5480_v58 = vpop.f32.mrb[235].mxu0  ;;  %v5593_v10 = vadd.f32 %v5592_v34, %v5591_v56 }
 0x2e7   : > { %v5481_v36 = vadd.f32 %v5480_v58, %v5479_v48  ;;  %4721 = vst [vmem:[%s7613_s23 + $0x48] sm:$0xff] %v4681_v41   ;;  %v3812_v62 = vadd.f32 %v5590_v31, %v5478_v42 }
 0x2e9   : > { %v7700_v59 = vadd.f32 %v3812_v62, %v7568_v21  ;;  %v3815_v18 = vadd.f32 %v5593_v10, %v5481_v36 }
 0x2ea   : > { %v5594_v20 = vpop.f32.mrb[236].mxu1 }
 0x2eb   : > { %v5482_v29 = vpop.f32.mrb[236].mxu0  ;;  %v7703_v19 = vadd.f32 %v3815_v18, %v7571_v35  ;;  %v5595_v5 = vpop.f32.mrb[237].mxu1 }
 0x2ec   : > { %v5483_v39 = vpop.f32.mrb[237].mxu0  ;;  %v5596_v2 = vadd.f32 %v5595_v5, %v5594_v20  ;;  %v5597_v7 = vpop.f32.mrb[238].mxu1 }
 0x2ed   : > { %v5484_v14 = vadd.f32 %v5483_v39, %v5482_v29  ;;  %v5485_v24 = vpop.f32.mrb[238].mxu0  ;;  %v4686_v25 = vpack.c.bf16 %v7703_v19, %v7700_v59  ;;  %v5598_v26 = vpop.f32.mrb[239].mxu1 }
 0x2ee   : > { %v5486_v33 = vpop.f32.mrb[239].mxu0  ;;  %v5599_v8 = vadd.f32 %v5598_v26, %v5597_v7 }
 0x2ef   : > { %v5487_v40 = vadd.f32 %v5486_v33, %v5485_v24  ;;  %4722 = vst [vmem:[%s7613_s23 + $0x50] sm:$0xff] %v4686_v25   ;;  %v3820_v21 = vadd.f32 %v5596_v2, %v5484_v14 }
 0x2f1   : > { %v7709_v32 = vadd.f32 %v3820_v21, %v7574_v4  ;;  %v3823_v35 = vadd.f32 %v5599_v8, %v5487_v40 }
 0x2f2   : > { %v5600_v47 = vpop.f32.mrb[240].mxu1 }
 0x2f3   : > { %v5488_v50 = vpop.f32.mrb[240].mxu0  ;;  %v7712_v61 = vadd.f32 %v3823_v35, %v7577_v16  ;;  %v5601_v12 = vpop.f32.mrb[241].mxu1 }
 0x2f4   : > { %v5489_v45 = vpop.f32.mrb[241].mxu0  ;;  %v5602_v31 = vadd.f32 %v5601_v12, %v5600_v47  ;;  %v5603_v56 = vpop.f32.mrb[242].mxu1 }
 0x2f5   : > { %v5490_v42 = vadd.f32 %v5489_v45, %v5488_v50  ;;  %v5491_v48 = vpop.f32.mrb[242].mxu0  ;;  %v4691_v41 = vpack.c.bf16 %v7712_v61, %v7709_v32  ;;  %v5604_v34 = vpop.f32.mrb[243].mxu1 }
 0x2f6   : > { %v5492_v58 = vpop.f32.mrb[243].mxu0  ;;  %v5605_v62 = vadd.f32 %v5604_v34, %v5603_v56 }
 0x2f7   : > { %v5493_v36 = vadd.f32 %v5492_v58, %v5491_v48  ;;  %4723 = vst [vmem:[%s7613_s23 + $0x58] sm:$0xff] %v4691_v41   ;;  %v3828_v4 = vadd.f32 %v5602_v31, %v5490_v42 }
 0x2f9   : > { %v7718_v10 = vadd.f32 %v3828_v4, %v7580_v23  ;;  %v3831_v16 = vadd.f32 %v5605_v62, %v5493_v36 }
 0x2fa   : > { %v5606_v20 = vpop.f32.mrb[244].mxu1 }
 0x2fb   : > { %v5494_v18 = vpop.f32.mrb[244].mxu0  ;;  %v7721_v39 = vadd.f32 %v3831_v16, %v7583_v37  ;;  %v5607_v5 = vpop.f32.mrb[245].mxu1 }
 0x2fc   : > { %v5495_v29 = vpop.f32.mrb[245].mxu0  ;;  %v5608_v2 = vadd.f32 %v5607_v5, %v5606_v20  ;;  %v5609_v7 = vpop.f32.mrb[246].mxu1 }
 0x2fd   : > { %v5496_v14 = vadd.f32 %v5495_v29, %v5494_v18  ;;  %v5497_v24 = vpop.f32.mrb[246].mxu0  ;;  %v4696_v25 = vpack.c.bf16 %v7721_v39, %v7718_v10  ;;  %v5610_v26 = vpop.f32.mrb[247].mxu1 }
 0x2fe   : > { %v5498_v33 = vpop.f32.mrb[247].mxu0  ;;  %v5611_v21 = vadd.f32 %v5610_v26, %v5609_v7 }
 0x2ff   : > { %v5499_v40 = vadd.f32 %v5498_v33, %v5497_v24  ;;  %4724 = vst [vmem:[%s7613_s23 + $0x60] sm:$0xff] %v4696_v25   ;;  %v3836_v23 = vadd.f32 %v5608_v2, %v5496_v14 }
 0x301   : > { %v7727_v8 = vadd.f32 %v3836_v23, %v7586_v0  ;;  %v3839_v37 = vadd.f32 %v5611_v21, %v5499_v40 }
 0x302   : > { %v5612_v47 = vpop.f32.mrb[248].mxu1 }
 0x303   : > { %v5500_v35 = vpop.f32.mrb[248].mxu0  ;;  %v7730_v45 = vadd.f32 %v3839_v37, %v7589_v15  ;;  %v5613_v12 = vpop.f32.mrb[249].mxu1 }
 0x304   : > { %v5501_v50 = vpop.f32.mrb[249].mxu0  ;;  %v5614_v31 = vadd.f32 %v5613_v12, %v5612_v47  ;;  %v5615_v56 = vpop.f32.mrb[250].mxu1 }
 0x305   : > { %v5502_v42 = vadd.f32 %v5501_v50, %v5500_v35  ;;  %v5503_v48 = vpop.f32.mrb[250].mxu0  ;;  %v4701_v41 = vpack.c.bf16 %v7730_v45, %v7727_v8  ;;  %v5616_v34 = vpop.f32.mrb[251].mxu1  ;;  %v5771_v50 = vmov (!%p4596_p4), 0.0  }
 0x306   : > { %v5504_v58 = vpop.f32.mrb[251].mxu0  ;;  %v5617_v4 = vadd.f32 %v5616_v34, %v5615_v56  ;;  %4054 = vst [vmem:[%s7876_s5] sm:$0x1] (!%p4596_p4), %v5771_v50  ;;  %4055 = vst [vmem:[%s7877_s6] sm:$0x1] (!%p4596_p4), %v5771_v50 }
 0x307   : > { %v5505_v36 = vadd.f32 %v5504_v58, %v5503_v48  ;;  %4725 = vst [vmem:[%s7613_s23 + $0x68] sm:$0xff] %v4701_v41   ;;  %v3844_v0 = vadd.f32 %v5614_v31, %v5502_v42 }
 0x309   : > { %v7736_v62 = vadd.f32 %v3844_v0, %v7592_v22  ;;  %v3847_v15 = vadd.f32 %v5617_v4, %v5505_v36 }
 0x30a   : > { %v5618_v20 = vpop.f32.mrb[252].mxu1 }
 0x30b   : > { %v5506_v16 = vpop.f32.mrb[252].mxu0  ;;  %v7739_v29 = vadd.f32 %v3847_v15, %v7595_v60  ;;  %v5619_v5 = vpop.f32.mrb[253].mxu1 }
 0x30c   : > { %v5507_v18 = vpop.f32.mrb[253].mxu0  ;;  %v5620_v2 = vadd.f32 %v5619_v5, %v5618_v20  ;;  %v5621_v7 = vpop.f32.mrb[254].mxu1 }
 0x30d   : > { %v5508_v14 = vadd.f32 %v5507_v18, %v5506_v16  ;;  %v5509_v24 = vpop.f32.mrb[254].mxu0  ;;  %v4706_v25 = vpack.c.bf16 %v7739_v29, %v7736_v62  ;;  %v5622_v22 = vpop.f32.mrb[255].mxu1 }
 0x30e   : > { %v5510_v33 = vpop.f32.mrb[255].mxu0  ;;  %v5623_v23 = vadd.f32 %v5622_v22, %v5621_v7 }
 0x30f   : > { %v5511_v40 = vadd.f32 %v5510_v33, %v5509_v24  ;;  %4726 = vst [vmem:[%s7613_s23 + $0x70] sm:$0xff] %v4706_v25   ;;  %v3852_v26 = vadd.f32 %v5620_v2, %v5508_v14 }
 0x311   : > { %v7745_v21 = vadd.f32 %v3852_v26, %v7598_v53  ;;  %v3855_v60 = vadd.f32 %v5623_v23, %v5511_v40  ;;  %4053 = sbr.rel (%p4596_p4) target bundleno = 792 (0x318), region = 40 }
 0x313   : > { %v7748_v37 = vadd.f32 %v3855_v60, %v7601_v54 }
 0x315   : > { %v4711_v35 = vpack.c.bf16 %v7748_v37, %v7745_v21 }
 0x317   : > { %4727 = vst [vmem:[%s7613_s23 + $0x78] sm:$0xff] %v4711_v35  }
 0x318 PF: > { %v4057_v53 = vadd.f32 %v7608_v28, %v7604_v17  ;;  %v4097_v42 = vmul.f32 %v7604_v17, %v7604_v17  ;;  %v4098_v48 = vmul.f32 %v7608_v28, %v7608_v28  ;;  %v4099_v58 = vmul.f32 %v7619_v9, %v7619_v9 }
 0x319   : > { %v4100_v31 = vmul.f32 %v7622_v30, %v7622_v30  ;;  %v4101_v34 = vmul.f32 %v7628_v13, %v7628_v13  ;;  %v4102_v28 = vmul.f32 %v7631_v51, %v7631_v51  ;;  %v4103_v15 = vmul.f32 %v7637_v52, %v7637_v52 }
 0x31a   : > { %v4058_v54 = vadd.f32 %v4057_v53, %v7619_v9  ;;  %v4129_v56 = vadd.f32 %v4098_v48, %v4097_v42  ;;  %v4104_v18 = vmul.f32 %v7640_v44, %v7640_v44  ;;  %v4105_v14 = vmul.f32 %v7646_v3, %v7646_v3 }
 0x31b   : > { %v4106_v5 = vmul.f32 %v7649_v43, %v7649_v43  ;;  %v4107_v25 = vmul.f32 %v7655_v49, %v7655_v49  ;;  %v4108_v7 = vmul.f32 %v7658_v11, %v7658_v11  ;;  %v4109_v22 = vmul.f32 %v7664_v1, %v7664_v1 }
 0x31c   : > { %v4059_v47 = vadd.f32 %v4058_v54, %v7622_v30  ;;  %v4130_v17 = vadd.f32 %v4129_v56, %v4099_v58  ;;  %v4110_v23 = vmul.f32 %v7667_v27, %v7667_v27  ;;  %v4111_v35 = vmul.f32 %v7673_v6, %v7673_v6 }
 0x31d   : > { %v4112_v53 = vmul.f32 %v7676_v46, %v7676_v46  ;;  %v4114_v48 = vmul.f32 %v7685_v38, %v7685_v38  ;;  %v4115_v58 = vmul.f32 %v7691_v55, %v7691_v55 }
 0x31e   : > { %v4060_v12 = vadd.f32 %v4059_v47, %v7628_v13  ;;  %v4131_v4 = vadd.f32 %v4130_v17, %v4100_v31  ;;  %v4113_v47 = vmul.f32 %v7682_v63, %v7682_v63  ;;  %v4116_v31 = vmul.f32 %v7694_v57, %v7694_v57 }
 0x31f   : > { %v4118_v17 = vmul.f32 %v7703_v19, %v7703_v19 }
 0x320   : > { %v4061_v41 = vadd.f32 %v4060_v12, %v7631_v51  ;;  %v4132_v16 = vadd.f32 %v4131_v4, %v4101_v34 }
 0x322   : > { %v4062_v36 = vadd.f32 %v4061_v41, %v7637_v52  ;;  %v4133_v20 = vadd.f32 %v4132_v16, %v4102_v28  ;;  %v4119_v28 = vmul.f32 %v7709_v32, %v7709_v32  ;;  %v4121_v16 = vmul.f32 %v7718_v10, %v7718_v10 }
 0x324   : > { %v4063_v0 = vadd.f32 %v4062_v36, %v7640_v44  ;;  %v4134_v24 = vadd.f32 %v4133_v20, %v4103_v15  ;;  %v4117_v36 = vmul.f32 %v7700_v59, %v7700_v59 }
 0x326   : > { %v4064_v9 = vadd.f32 %v4063_v0, %v7646_v3  ;;  %v4135_v33 = vadd.f32 %v4134_v24, %v4104_v18  ;;  %v4122_v18 = vmul.f32 %v7721_v39, %v7721_v39  ;;  %v4124_v24 = vmul.f32 %v7730_v45, %v7730_v45 }
 0x328   : > { %v4065_v30 = vadd.f32 %v4064_v9, %v7649_v43  ;;  %v4136_v2 = vadd.f32 %v4135_v33, %v4105_v14  ;;  %v4120_v9 = vmul.f32 %v7712_v61, %v7712_v61 }
 0x32a   : > { %v4066_v13 = vadd.f32 %v4065_v30, %v7655_v49  ;;  %v4137_v40 = vadd.f32 %v4136_v2, %v4106_v5  ;;  %v4125_v5 = vmul.f32 %v7736_v62, %v7736_v62  ;;  %v4127_v2 = vmul.f32 %v7745_v21, %v7745_v21 }
 0x32c   : > { %v4067_v51 = vadd.f32 %v4066_v13, %v7658_v11  ;;  %v4138_v26 = vadd.f32 %v4137_v40, %v4107_v25  ;;  %v4123_v13 = vmul.f32 %v7727_v8, %v7727_v8 }
 0x32e   : > { %v4068_v52 = vadd.f32 %v4067_v51, %v7664_v1  ;;  %v4139_v60 = vadd.f32 %v4138_v26, %v4108_v7 }
 0x330   : > { %v4069_v44 = vadd.f32 %v4068_v52, %v7667_v27  ;;  %v4140_v50 = vadd.f32 %v4139_v60, %v4109_v22  ;;  %v4126_v52 = vmul.f32 %v7739_v29, %v7739_v29 }
 0x332   : > { %v4070_v3 = vadd.f32 %v4069_v44, %v7673_v6  ;;  %v4141_v54 = vadd.f32 %v4140_v50, %v4110_v23 }
 0x334   : > { %v4071_v43 = vadd.f32 %v4070_v3, %v7676_v46  ;;  %v4142_v42 = vadd.f32 %v4141_v54, %v4111_v35 }
 0x336   : > { %v4072_v49 = vadd.f32 %v4071_v43, %v7682_v63  ;;  %v4143_v12 = vadd.f32 %v4142_v42, %v4112_v53 }
 0x338   : > { %v4073_v11 = vadd.f32 %v4072_v49, %v7685_v38  ;;  %v4144_v41 = vadd.f32 %v4143_v12, %v4113_v47 }
 0x33a   : > { %v4074_v1 = vadd.f32 %v4073_v11, %v7691_v55  ;;  %v4145_v56 = vadd.f32 %v4144_v41, %v4114_v48  ;;  %v4096_v11 = vld [vmem:[%s7877_s6] sm:$0x1] }
 0x33c   : > { %v4075_v27 = vadd.f32 %v4074_v1, %v7694_v57  ;;  %v4146_v34 = vadd.f32 %v4145_v56, %v4115_v58 }
 0x33e   : > { %v4076_v6 = vadd.f32 %v4075_v27, %v7700_v59  ;;  %v4147_v0 = vadd.f32 %v4146_v34, %v4116_v31 }
 0x340   : > { %v4077_v46 = vadd.f32 %v4076_v6, %v7703_v19  ;;  %v4148_v4 = vadd.f32 %v4147_v0, %v4117_v36 }
 0x342   : > { %v4078_v63 = vadd.f32 %v4077_v46, %v7709_v32  ;;  %v4149_v15 = vadd.f32 %v4148_v4, %v4118_v17 }
 0x344   : > { %v4079_v38 = vadd.f32 %v4078_v63, %v7712_v61  ;;  %v4150_v30 = vadd.f32 %v4149_v15, %v4119_v28 }
 0x346   : > { %v4080_v55 = vadd.f32 %v4079_v38, %v7718_v10  ;;  %v4151_v20 = vadd.f32 %v4150_v30, %v4120_v9 }
 0x348   : > { %v4081_v57 = vadd.f32 %v4080_v55, %v7721_v39  ;;  %v4152_v14 = vadd.f32 %v4151_v20, %v4121_v16 }
 0x34a   : > { %v4082_v59 = vadd.f32 %v4081_v57, %v7727_v8  ;;  %v4153_v51 = vadd.f32 %v4152_v14, %v4122_v18 }
 0x34c   : > { %v4083_v19 = vadd.f32 %v4082_v59, %v7730_v45  ;;  %v4154_v33 = vadd.f32 %v4153_v51, %v4123_v13  ;;  %v4128_v45 = vmul.f32 %v7748_v37, %v7748_v37 }
 0x34e   : > { %v4084_v32 = vadd.f32 %v4083_v19, %v7736_v62  ;;  %v4155_v25 = vadd.f32 %v4154_v33, %v4124_v24 }
 0x350   : > { %v4085_v61 = vadd.f32 %v4084_v32, %v7739_v29  ;;  %v4156_v44 = vadd.f32 %v4155_v25, %v4125_v5  ;;  %v4056_v29 = vld [vmem:[%s7876_s5] sm:$0x1] }
 0x352   : > { %v4086_v10 = vadd.f32 %v4085_v61, %v7745_v21  ;;  %v4157_v40 = vadd.f32 %v4156_v44, %v4126_v52 }
 0x354   : > { %v4087_v39 = vadd.f32 %v4086_v10, %v7748_v37  ;;  %v4158_v22 = vadd.f32 %v4157_v40, %v4127_v2 }
 0x356   : > { %v4088_v8 = vrot.slane %v4087_v39, 4  ;;  %v4159_v26 = vadd.f32 %v4158_v22, %v4128_v45 }
 0x358   : > { %v4089_v7 = vadd.f32 %v4088_v8, %v4087_v39  ;;  %v4160_v23 = vrot.slane %v4159_v26, 4 }
 0x35a   : > { %v4090_v3 = vrot.slane %v4089_v7, 2  ;;  %v4161_v49 = vadd.f32 %v4160_v23, %v4159_v26 }
 0x35c   : > { %v4091_v62 = vadd.f32 %v4090_v3, %v4089_v7  ;;  %v4162_v21 = vrot.slane %v4161_v49, 2 }
 0x35e   : > { %v4092_v43 = vrot.slane %v4091_v62, 1  ;;  %v4163_v37 = vadd.f32 %v4162_v21, %v4161_v49 }
 0x360   : > { %v4093_v60 = vadd.f32 %v4092_v43, %v4091_v62  ;;  %v4164_v50 = vrot.slane %v4163_v37, 1 }
 0x362   : > { %v4094_v35 = vadd.f32 %v4093_v60, %v4056_v29  ;;  %v4165_v53 = vadd.f32 %v4164_v50, %v4163_v37 }
 0x364   : > { %4095 = vst [vmem:[%s7876_s5] sm:$0x1] %v4094_v35  ;;  %v4166_v54 = vadd.f32 %v4165_v53, %v4096_v11 }
 0x366   : > { %4167 = vst [vmem:[%s7877_s6] sm:$0x1] %v4166_v54 }
 0x367 PF: > { %s17_s21 = sadd.s32 1, %s5768_s21  }
 0x368   : > { %p14_p5 = scmp.ge.s32.totalorder %s17_s21, 4  }
 0x36a   :  { %16 = sbr.rel (!%p14_p5) target bundleno = 1 (0x1), region = 89 }

// kernel: bottleneck_forward.6
= control target key start
LH: loop header
LB: loop body
LE: loop exit
PB: predicated region body
PF: predicated region fallthrough
CT: control target
= control target key end

     0   :  { %s4121_s3 = inlined_call_operand.vmem [shape: bf16[128,128], index: 3, kind: input, shape index: {}]   ;;  %s4122_s5 = inlined_call_operand.vmem [shape: bf16[128,128], index: 5, kind: input, shape index: {}]   ;;  %s4123_s0 = inlined_call_operand.vmem [shape: bf16[512,128], index: 0, kind: input, shape index: {}]   ;;  %s4124_s1 = inlined_call_operand.vmem [shape: f32[1,128], index: 1, kind: input, shape index: {}]   ;;  %s4125_s4 = inlined_call_operand.vmem [shape: f32[512,128], index: 4, kind: input, shape index: {}]   ;;  %s4126_s2 = inlined_call_operand.vmem [shape: f32[1,128], index: 2, kind: input, shape index: {}]   ;;  %s4127_s7 = inlined_call_operand.vmem [shape: f32[1,128], index: 7, kind: output, shape index: {1}]   ;;  %s4128_s8 = inlined_call_operand.vmem [shape: f32[1,128], index: 8, kind: output, shape index: {2}]   ;;  %s4129_s6 = inlined_call_operand.vmem [shape: bf16[512,128], index: 6, kind: output, shape index: {0}]   ;;  %s4130_s9 = inlined_call_operand.vmem [shape: bf16[512,128], index: 9, kind: output, shape index: {3}]   ;;  %s4131_s10 = inlined_call_operand.vmem [shape: f32[1,128], index: 10, kind: output, shape index: {4}]   ;;  %s4132_s11 = inlined_call_operand.vmem [shape: f32[1,128], index: 11, kind: output, shape index: {5}]  }
   0x1   :  { %v3342_v0 = vld [vmem:[%s4121_s3] sm:$0xff]   ;;  %v3344_v2 = vld [vmem:[%s4121_s3 + $0x8] sm:$0xff]   ;;  %v3346_v4 = vld [vmem:[%s4121_s3 + $0x10] sm:$0xff]  }
   0x2   :  { %v3343_v1 = vld [vmem:[%s4122_s5] sm:$0xff]   ;;  %3181 = vmatprep.subr.bf16.mxu0 %v3342_v0  ;;  %v3345_v3 = vld [vmem:[%s4122_s5 + $0x8] sm:$0xff]   ;;  %v3347_v5 = vld [vmem:[%s4122_s5 + $0x10] sm:$0xff]  }
   0x3   :  { %3261 = vmatprep.subr.bf16.mxu1 %v3343_v1  ;;  %3182 = vmatpush3.bf16.msra.mxu0 %v3342_v0  ;;  %v3348_v6 = vld [vmem:[%s4121_s3 + $0x18] sm:$0xff]   ;;  %v3350_v8 = vld [vmem:[%s4121_s3 + $0x20] sm:$0xff]   ;;  %v3352_v10 = vld [vmem:[%s4121_s3 + $0x28] sm:$0xff]  }
   0x4   :  { %3262 = vmatpush3.bf16.msra.mxu1 %v3343_v1  ;;  %3183 = vmatprep.subr.bf16.mxu0 %v3344_v2  ;;  %v3349_v7 = vld [vmem:[%s4122_s5 + $0x18] sm:$0xff]   ;;  %v3351_v9 = vld [vmem:[%s4122_s5 + $0x20] sm:$0xff]   ;;  %v3353_v11 = vld [vmem:[%s4122_s5 + $0x28] sm:$0xff]  }
   0x5   :  { %3263 = vmatprep.subr.bf16.mxu1 %v3345_v3  ;;  %v2561_v12 = vld [vmem:[%s4123_s0] sm:$0xff]   ;;  %v1070_v17 = vld [vmem:[%s4125_s4 + $0x8] sm:$0xff]  ;;  %v3009_v23 = vld [vmem:[%s4123_s0 + $0x10] sm:$0xff]  }
   0x6   :  { %v3461_v13 = vld [vmem:[%s4124_s1] ss:$0 sm:$0xff]  ;;  %v2562_v14 = vunpack.c.l.bf16 %v2561_v12  ;;  %v2563_v15 = vunpack.c.h.bf16 %v2561_v12  ;;  %v3008_v18 = vld [vmem:[%s4123_s0 + $0x8] sm:$0xff]   ;;  %v2570_v26 = vunpack.c.l.bf16 %v3009_v23  ;;  %v3010_v27 = vld [vmem:[%s4123_s0 + $0x18] sm:$0xff]   ;;  %v2571_v31 = vunpack.c.h.bf16 %v3009_v23 }
   0x7   :  { %3184 = vmatpush3.bf16.msra.mxu0 %v3344_v2  ;;  %v1069_v16 = vld [vmem:[%s4125_s4] sm:$0xff]  ;;  %v2566_v21 = vunpack.c.l.bf16 %v3008_v18  ;;  %v2567_v22 = vunpack.c.h.bf16 %v3008_v18  ;;  %v3354_v28 = vld [vmem:[%s4121_s3 + $0x30] sm:$0xff]   ;;  %v2574_v36 = vunpack.c.l.bf16 %v3010_v27  ;;  %v2575_v40 = vunpack.c.h.bf16 %v3010_v27  ;;  %v3356_v45 = vld [vmem:[%s4121_s3 + $0x38] sm:$0xff]  }
   0x8   :  { %3264 = vmatpush3.bf16.msra.mxu1 %v3345_v3  ;;  %3185 = vmatprep.subr.bf16.mxu0 %v3346_v4  ;;  %v3475_v19 = vld [vmem:[%s4126_s2] ss:$0 sm:$0xff]  ;;  %v1133_v20 = vpack.c.bf16 %v1070_v17, %v1069_v16  ;;  %v165_v24 = vmul.f32 %v2562_v14, %v3461_v13  ;;  %v166_v25 = vmul.f32 %v2563_v15, %v3461_v13  ;;  %v3355_v32 = vld [vmem:[%s4122_s5 + $0x30] sm:$0xff]   ;;  %v3357_v48 = vld [vmem:[%s4122_s5 + $0x38] sm:$0xff]  }
   0x9   :  { %3265 = vmatprep.subr.bf16.mxu1 %v3347_v5  ;;  %v167_v29 = vmul.f32 %v2566_v21, %v3461_v13  ;;  %v168_v30 = vmul.f32 %v2567_v22, %v3461_v13  ;;  %v169_v35 = vmul.f32 %v2570_v26, %v3461_v13  ;;  %v170_v39 = vmul.f32 %v2571_v31, %v3461_v13  ;;  %v3011_v44 = vld [vmem:[%s4123_s0 + $0x20] sm:$0xff]   ;;  %v3012_v56 = vld [vmem:[%s4123_s0 + $0x28] sm:$0xff]   ;;  %v1071_v57 = vld [vmem:[%s4125_s4 + $0x10] sm:$0xff] }
   0xa   :  { %v236_v33 = vadd.f32 %v3475_v19, %v165_v24  ;;  %v237_v34 = vadd.f32 %v3475_v19, %v166_v25  ;;  %3277 = vmatprep.mubr.bf16.mxu1 %v1133_v20  ;;  %v171_v47 = vmul.f32 %v2574_v36, %v3461_v13  ;;  %v172_v51 = vmul.f32 %v2575_v40, %v3461_v13  ;;  %v1072_v58 = vld [vmem:[%s4125_s4 + $0x18] sm:$0xff]  ;;  %v3013_v62 = vld [vmem:[%s4123_s0 + $0x30] sm:$0xff]   ;;  %v1073_v63 = vld [vmem:[%s4125_s4 + $0x20] sm:$0xff] }
   0xb   :  { %3186 = vmatpush3.bf16.msra.mxu0 %v3346_v4  ;;  %v238_v37 = vadd.f32 %v3475_v19, %v167_v29  ;;  %v239_v38 = vadd.f32 %v3475_v19, %v168_v30  ;;  %v240_v43 = vadd.f32 %v3475_v19, %v169_v35  ;;  %v241_v46 = vadd.f32 %v3475_v19, %v170_v39  ;;  %v1074_v0 = vld [vmem:[%s4125_s4 + $0x28] sm:$0xff]  ;;  %v3014_v23 = vld [vmem:[%s4123_s0 + $0x38] sm:$0xff]   ;;  %v3015_v24 = vld [vmem:[%s4123_s0 + $0x40] sm:$0xff]  }
   0xc   :  { %3266 = vmatpush3.bf16.msra.mxu1 %v3347_v5  ;;  %3187 = vmatprep.subr.bf16.mxu0 %v3348_v6  ;;  %v300_v41 = vmax.f32 %v236_v33, 0.0  ;;  %v301_v42 = vmax.f32 %v237_v34, 0.0  ;;  %v2578_v55 = vunpack.c.l.bf16 %v3011_v44  ;;  %v2579_v59 = vunpack.c.h.bf16 %v3011_v44  ;;  %v1075_v25 = vld [vmem:[%s4125_s4 + $0x30] sm:$0xff]  ;;  %v1076_v26 = vld [vmem:[%s4125_s4 + $0x38] sm:$0xff]  ;;  %v1078_v29 = vld [vmem:[%s4125_s4 + $0x48] sm:$0xff] }
   0xd   :  { %3267 = vmatprep.subr.bf16.mxu1 %v3349_v7  ;;  %v302_v50 = vmax.f32 %v238_v37, 0.0  ;;  %v303_v52 = vmax.f32 %v239_v38, 0.0  ;;  %v304_v53 = vmax.f32 %v240_v43, 0.0  ;;  %v305_v54 = vmax.f32 %v241_v46, 0.0 }
   0xe   :  { %v364_v49 = vpack.c.bf16 %v301_v42, %v300_v41  ;;  %v242_v60 = vadd.f32 %v3475_v19, %v171_v47  ;;  %v173_v61 = vmul.f32 %v2578_v55, %v3461_v13  ;;  %v243_v1 = vadd.f32 %v3475_v19, %v172_v51  ;;  %v3016_v47 = vld [vmem:[%s4123_s0 + $0x48] sm:$0xff]   ;;  %v1080_v51 = vld [vmem:[%s4125_s4 + $0x58] sm:$0xff] }
   0xf   :  { %3188 = vmatpush3.bf16.msra.mxu0 %v3348_v6  ;;  %v174_v2 = vmul.f32 %v2579_v59, %v3461_v13  ;;  %v2582_v3 = vunpack.c.l.bf16 %v3012_v56  ;;  %v2583_v4 = vunpack.c.h.bf16 %v3012_v56  ;;  %v365_v5 = vpack.c.bf16 %v303_v52, %v302_v50  ;;  %v1079_v50 = vld [vmem:[%s4125_s4 + $0x50] sm:$0xff]  ;;  %v1082_v55 = vld [vmem:[%s4125_s4 + $0x68] sm:$0xff] }
  0x10   :  { %3268 = vmatpush3.bf16.msra.mxu1 %v3349_v7  ;;  %3189 = vmatprep.subr.bf16.mxu0 %v3350_v8  ;;  %v1134_v6 = vpack.c.bf16 %v1072_v58, %v1071_v57  ;;  %v366_v7 = vpack.c.bf16 %v305_v54, %v304_v53  ;;  %v1135_v12 = vpack.c.bf16 %v1074_v0, %v1073_v63  ;;  %v306_v14 = vmax.f32 %v242_v60, 0.0  ;;  %v3017_v52 = vld [vmem:[%s4123_s0 + $0x50] sm:$0xff]   ;;  %v1081_v54 = vld [vmem:[%s4125_s4 + $0x60] sm:$0xff] }
  0x11   :  { %3269 = vmatprep.subr.bf16.mxu1 %v3351_v9  ;;  %3197 = vmatprep.mubr.bf16.mxu0 %v364_v49  ;;  %v307_v15 = vmax.f32 %v243_v1, 0.0  ;;  %v175_v16 = vmul.f32 %v2582_v3, %v3461_v13  ;;  %v176_v17 = vmul.f32 %v2583_v4, %v3461_v13  ;;  %v2591_v33 = vunpack.c.h.bf16 %v3014_v23 }
  0x12   :  { %v2594_v34 = vunpack.c.l.bf16 %v3015_v24  ;;  %v2595_v35 = vunpack.c.h.bf16 %v3015_v24  ;;  %v1136_v36 = vpack.c.bf16 %v1076_v26, %v1075_v25  ;;  %v2598_v56 = vunpack.c.l.bf16 %v3016_v47 }
  0x13   :  { %3190 = vmatpush3.bf16.msra.mxu0 %v3350_v8  ;;  %v244_v8 = vadd.f32 %v3475_v19, %v173_v61  ;;  %v367_v27 = vpack.c.bf16 %v307_v15, %v306_v14  ;;  %v246_v30 = vadd.f32 %v3475_v19, %v175_v16  ;;  %v247_v31 = vadd.f32 %v3475_v19, %v176_v17  ;;  %v3019_v15 = vld [vmem:[%s4123_s0 + $0x60] sm:$0xff]   ;;  %v1086_v17 = vld [vmem:[%s4125_s4 + $0x88] sm:$0xff] }
  0x14   :  { %3270 = vmatpush3.bf16.msra.mxu1 %v3351_v9  ;;  %3191 = vmatprep.subr.bf16.mxu0 %v3352_v10  ;;  %v245_v9 = vadd.f32 %v3475_v19, %v174_v2  ;;  %v180_v44 = vmul.f32 %v2591_v33, %v3461_v13  ;;  %v182_v46 = vmul.f32 %v2595_v35, %v3461_v13  ;;  %v2599_v57 = vunpack.c.h.bf16 %v3016_v47  ;;  %v1085_v16 = vld [vmem:[%s4125_s4 + $0x80] sm:$0xff] }
  0x15   :  { %3271 = vmatprep.subr.bf16.mxu1 %v3353_v11  ;;  %v308_v18 = vmax.f32 %v244_v8, 0.0  ;;  %v310_v41 = vmax.f32 %v246_v30, 0.0  ;;  %v311_v42 = vmax.f32 %v247_v31, 0.0  ;;  %v2602_v0 = vunpack.c.l.bf16 %v3017_v52 }
  0x16   :  { %v309_v20 = vmax.f32 %v245_v9, 0.0  ;;  %v251_v59 = vadd.f32 %v3475_v19, %v180_v44  ;;  %v253_v61 = vadd.f32 %v3475_v19, %v182_v46  ;;  %v2603_v1 = vunpack.c.h.bf16 %v3017_v52  ;;  %v3018_v9 = vld [vmem:[%s4123_s0 + $0x58] sm:$0xff]   ;;  %v1089_v44 = vld [vmem:[%s4125_s4 + $0xa0] sm:$0xff] }
  0x17   :  { %3192 = vmatpush3.bf16.msra.mxu0 %v3352_v10  ;;  %v2586_v10 = vunpack.c.l.bf16 %v3013_v62  ;;  %v369_v53 = vpack.c.bf16 %v311_v42, %v310_v41  ;;  %v1139_v2 = vpack.c.bf16 %v1082_v55, %v1081_v54  ;;  %v183_v3 = vmul.f32 %v2598_v56, %v3461_v13  ;;  %v1087_v41 = vld [vmem:[%s4125_s4 + $0x90] sm:$0xff]  ;;  %v1088_v42 = vld [vmem:[%s4125_s4 + $0x98] sm:$0xff] }
  0x18   :  { %3272 = vmatpush3.bf16.msra.mxu1 %v3353_v11  ;;  %3193 = vmatprep.subr.bf16.mxu0 %v3354_v28  ;;  %v2587_v11 = vunpack.c.h.bf16 %v3013_v62  ;;  %v368_v37 = vpack.c.bf16 %v309_v20, %v308_v18  ;;  %v1138_v62 = vpack.c.bf16 %v1080_v51, %v1079_v50  ;;  %v184_v4 = vmul.f32 %v2599_v57, %v3461_v13 }
  0x19   :  { %3273 = vmatprep.subr.bf16.mxu1 %v3355_v32  ;;  %v177_v21 = vmul.f32 %v2586_v10, %v3461_v13  ;;  %v317_v8 = vmax.f32 %v253_v61, 0.0  ;;  %v1083_v10 = vld [vmem:[%s4125_s4 + $0x70] sm:$0xff]  ;;  %v186_v14 = vmul.f32 %v2603_v1, %v3461_v13  ;;  %v254_v18 = vadd.f32 %v3475_v19, %v183_v3  ;;  %v1092_v3 = vld [vmem:[%s4125_s4 + $0xb8] sm:$0xff] }
  0x1a   :  { %v178_v22 = vmul.f32 %v2587_v11, %v3461_v13  ;;  %v1084_v11 = vld [vmem:[%s4125_s4 + $0x78] sm:$0xff]  ;;  %v255_v20 = vadd.f32 %v3475_v19, %v184_v4  ;;  %v1141_v30 = vpack.c.bf16 %v1086_v17, %v1085_v16  ;;  %v1142_v52 = vpack.c.bf16 %v1088_v42, %v1087_v41  ;;  %v3023_v4 = vld [vmem:[%s4123_s0 + $0x80] sm:$0xff]  }
  0x1b   :  { %3194 = vmatpush3.bf16.msra.mxu0 %v3354_v28  ;;  %v1077_v28 = vld [vmem:[%s4125_s4 + $0x40] sm:$0xff]  ;;  %v248_v38 = vadd.f32 %v3475_v19, %v177_v21  ;;  %v2606_v21 = vunpack.c.l.bf16 %v3018_v9  ;;  %v1140_v24 = vpack.c.bf16 %v1084_v11, %v1083_v10  ;;  %v318_v31 = vmax.f32 %v254_v18, 0.0 }
  0x1c   :  { %3274 = vmatpush3.bf16.msra.mxu1 %v3355_v32  ;;  %3195 = vmatprep.subr.bf16.mxu0 %v3356_v45  ;;  %v2590_v32 = vunpack.c.l.bf16 %v3014_v23  ;;  %v249_v39 = vadd.f32 %v3475_v19, %v178_v22  ;;  %v1137_v40 = vpack.c.bf16 %v1078_v29, %v1077_v28  ;;  %v2607_v22 = vunpack.c.h.bf16 %v3018_v9 }
  0x1d   :  { %3275 = vmatprep.subr.bf16.mxu1 %v3357_v48  ;;  %v2610_v28 = vunpack.c.l.bf16 %v3019_v15  ;;  %v2611_v29 = vunpack.c.h.bf16 %v3019_v15  ;;  %v187_v33 = vmul.f32 %v2606_v21, %v3461_v13  ;;  %v2626_v17 = vunpack.c.l.bf16 %v3023_v4 }
  0x1e   :  { %v179_v43 = vmul.f32 %v2590_v32, %v3461_v13  ;;  %v313_v49 = vmax.f32 %v249_v39, 0.0  ;;  %v319_v32 = vmax.f32 %v255_v20, 0.0  ;;  %v3020_v39 = vld [vmem:[%s4123_s0 + $0x68] sm:$0xff]   ;;  %v2627_v18 = vunpack.c.h.bf16 %v3023_v4 }
  0x1f   :  { %3196 = vmatpush3.bf16.msra.mxu0 %v3356_v45  ;;  %v181_v45 = vmul.f32 %v2594_v34, %v3461_v13  ;;  %v188_v34 = vmul.f32 %v2607_v22, %v3461_v13  ;;  %v258_v46 = vadd.f32 %v3475_v19, %v187_v33  ;;  %v1097_v33 = vld [vmem:[%s4125_s4 + $0xe0] sm:$0xff] }
  0x20   :  { %3276 = vmatpush3.bf16.msra.mxu1 %v3357_v48  ;;  %v312_v48 = vmax.f32 %v248_v38, 0.0  ;;  %v250_v58 = vadd.f32 %v3475_v19, %v179_v43  ;;  %v190_v38 = vmul.f32 %v2611_v29, %v3461_v13  ;;  %v373_v43 = vpack.c.bf16 %v319_v32, %v318_v31  ;;  %v1096_v29 = vld [vmem:[%s4125_s4 + $0xd8] sm:$0xff]  ;;  %v3025_v32 = vld [vmem:[%s4123_s0 + $0x90] sm:$0xff]  }
  0x21   :  { %v252_v60 = vadd.f32 %v3475_v19, %v181_v45  ;;  %v1090_v45 = vld [vmem:[%s4125_s4 + $0xa8] sm:$0xff]  ;;  %v259_v47 = vadd.f32 %v3475_v19, %v188_v34  ;;  %v322_v57 = vmax.f32 %v258_v46, 0.0  ;;  %v198_v31 = vmul.f32 %v2627_v18, %v3461_v13 }
  0x22   :  { %3198 = vmatmul.mubr.bf16.vlgmr.msra.gmra.mrb[0].mxu0 %v365_v5  ;;  %v370_v63 = vpack.c.bf16 %v313_v49, %v312_v48  ;;  %v314_v5 = vmax.f32 %v250_v58, 0.0  ;;  %v2614_v48 = vunpack.c.l.bf16 %v3020_v39  ;;  %v2615_v49 = vunpack.c.h.bf16 %v3020_v39  ;;  %v1098_v34 = vld [vmem:[%s4125_s4 + $0xe8] sm:$0xff] }
  0x23   :  { %3278 = vmatmul.mubr.bf16.vlgmr.msra.gmra.mrb[0].mxu1 %v1134_v6  ;;  %3201 = vmatprep.mubr.bf16.mxu0 %v366_v7  ;;  %v315_v6 = vmax.f32 %v251_v59, 0.0  ;;  %v316_v7 = vmax.f32 %v252_v60, 0.0  ;;  %v261_v55 = vadd.f32 %v3475_v19, %v190_v38  ;;  %v1143_v56 = vpack.c.bf16 %v1090_v45, %v1089_v44 }
  0x24   :  { %3281 = vmatprep.mubr.bf16.mxu1 %v1135_v12  ;;  %v185_v12 = vmul.f32 %v2602_v0, %v3461_v13  ;;  %v323_v58 = vmax.f32 %v259_v47, 0.0  ;;  %v191_v59 = vmul.f32 %v2614_v48, %v3461_v13  ;;  %v192_v60 = vmul.f32 %v2615_v49, %v3461_v13 }
  0x25   :  { %v371_v23 = vpack.c.bf16 %v315_v6, %v314_v5  ;;  %v372_v25 = vpack.c.bf16 %v317_v8, %v316_v7  ;;  %v325_v1 = vmax.f32 %v261_v55, 0.0  ;;  %v1093_v6 = vld [vmem:[%s4125_s4 + $0xc0] sm:$0xff]  ;;  %v1094_v7 = vld [vmem:[%s4125_s4 + $0xc8] sm:$0xff]  ;;  %v2634_v44 = vunpack.c.l.bf16 %v3025_v32  ;;  %v3026_v55 = vld [vmem:[%s4123_s0 + $0x98] sm:$0xff]  }
  0x26   :  { %v256_v26 = vadd.f32 %v3475_v19, %v185_v12  ;;  %v375_v5 = vpack.c.bf16 %v323_v58, %v322_v57  ;;  %v262_v10 = vadd.f32 %v3475_v19, %v191_v59  ;;  %v263_v11 = vadd.f32 %v3475_v19, %v192_v60  ;;  %v1099_v57 = vld [vmem:[%s4125_s4 + $0xf0] sm:$0xff]  ;;  %v1100_v58 = vld [vmem:[%s4125_s4 + $0xf8] sm:$0xff]  ;;  %v1101_v60 = vld [vmem:[%s4125_s4 + $0x100] sm:$0xff] }
  0x27   :  { %v1145_v20 = vpack.c.bf16 %v1094_v7, %v1093_v6  ;;  %v2635_v45 = vunpack.c.h.bf16 %v3025_v32  ;;  %v1147_v46 = vpack.c.bf16 %v1098_v34, %v1097_v33  ;;  %v1148_v4 = vpack.c.bf16 %v1100_v58, %v1099_v57 }
  0x28   :  { %v320_v35 = vmax.f32 %v256_v26, 0.0 }
  0x2a   :  { %3202 = vmatmul.mubr.bf16.gmra.mrb[4].mxu0 %v367_v27  ;;  %v257_v27 = vadd.f32 %v3475_v19, %v186_v14 }
  0x2b   :  { %3282 = vmatmul.mubr.bf16.gmra.mrb[4].mxu1 %v1136_v36  ;;  %3205 = vmatprep.mubr.bf16.mxu0 %v368_v37  ;;  %v189_v37 = vmul.f32 %v2610_v28, %v3461_v13  ;;  %v1095_v28 = vld [vmem:[%s4125_s4 + $0xd0] sm:$0xff] }
  0x2c   :  { %3285 = vmatprep.mubr.bf16.mxu1 %v1137_v40  ;;  %v321_v36 = vmax.f32 %v257_v27, 0.0  ;;  %v3021_v40 = vld [vmem:[%s4123_s0 + $0x70] sm:$0xff]   ;;  %v3024_v27 = vld [vmem:[%s4123_s0 + $0x88] sm:$0xff]  }
  0x2d   :  { %v2618_v50 = vunpack.c.l.bf16 %v3021_v40  ;;  %v2619_v51 = vunpack.c.h.bf16 %v3021_v40  ;;  %v260_v54 = vadd.f32 %v3475_v19, %v189_v37  ;;  %v2630_v37 = vunpack.c.l.bf16 %v3024_v27 }
  0x2e   :  { %v2631_v38 = vunpack.c.h.bf16 %v3024_v27  ;;  %v1146_v40 = vpack.c.bf16 %v1096_v29, %v1095_v28 }
  0x2f   :  { %v193_v61 = vmul.f32 %v2618_v50, %v3461_v13  ;;  %v324_v0 = vmax.f32 %v260_v54, 0.0  ;;  %v199_v49 = vmul.f32 %v2630_v37, %v3461_v13  ;;  %v202_v54 = vmul.f32 %v2635_v45, %v3461_v13  ;;  %v1108_v45 = vld [vmem:[%s4125_s4 + $0x138] sm:$0xff] }
  0x30   :  { %v200_v50 = vmul.f32 %v2631_v38, %v3461_v13 }
  0x31   :  { %v264_v12 = vadd.f32 %v3475_v19, %v193_v61  ;;  %v376_v16 = vpack.c.bf16 %v325_v1, %v324_v0  ;;  %v1102_v61 = vld [vmem:[%s4125_s4 + $0x108] sm:$0xff]  ;;  %v2638_v0 = vunpack.c.l.bf16 %v3026_v55  ;;  %v2639_v1 = vunpack.c.h.bf16 %v3026_v55 }
  0x32   :  { %3206 = vmatmul.mubr.bf16.gmra.mrb[8].mxu0 %v369_v53  ;;  %v374_v53 = vpack.c.bf16 %v321_v36, %v320_v35  ;;  %v273_v7 = vadd.f32 %v3475_v19, %v202_v54 }
  0x33   :  { %3286 = vmatmul.mubr.bf16.gmra.mrb[8].mxu1 %v1138_v62  ;;  %3209 = vmatprep.mubr.bf16.mxu0 %v370_v63  ;;  %v194_v62 = vmul.f32 %v2619_v51, %v3461_v13  ;;  %v3022_v63 = vld [vmem:[%s4123_s0 + $0x78] sm:$0xff]  }
  0x34   :  { %3289 = vmatprep.mubr.bf16.mxu1 %v1139_v2  ;;  %v1091_v2 = vld [vmem:[%s4125_s4 + $0xb0] sm:$0xff]  ;;  %v2622_v8 = vunpack.c.l.bf16 %v3022_v63  ;;  %v2623_v9 = vunpack.c.h.bf16 %v3022_v63  ;;  %v271_v63 = vadd.f32 %v3475_v19, %v200_v50  ;;  %v337_v18 = vmax.f32 %v273_v7, 0.0  ;;  %v1110_v50 = vld [vmem:[%s4125_s4 + $0x148] sm:$0xff] }
  0x35   :  { %v265_v14 = vadd.f32 %v3475_v19, %v194_v62  ;;  %v1144_v15 = vpack.c.bf16 %v1092_v3, %v1091_v2  ;;  %v270_v62 = vadd.f32 %v3475_v19, %v199_v49  ;;  %v1109_v49 = vld [vmem:[%s4125_s4 + $0x140] sm:$0xff]  ;;  %v3032_v7 = vld [vmem:[%s4123_s0 + $0xc8] sm:$0xff]  }
  0x36   :  { %v195_v21 = vmul.f32 %v2622_v8, %v3461_v13  ;;  %v196_v22 = vmul.f32 %v2623_v9, %v3461_v13  ;;  %v1149_v8 = vpack.c.bf16 %v1102_v61, %v1101_v60 }
  0x37   :  { %v329_v26 = vmax.f32 %v265_v14, 0.0  ;;  %v334_v9 = vmax.f32 %v270_v62, 0.0  ;;  %v1153_v62 = vpack.c.bf16 %v1110_v50, %v1109_v49 }
  0x38   :  { %v266_v35 = vadd.f32 %v3475_v19, %v195_v21  ;;  %v267_v36 = vadd.f32 %v3475_v19, %v196_v22  ;;  %v1104_v21 = vld [vmem:[%s4125_s4 + $0x118] sm:$0xff]  ;;  %v3029_v22 = vld [vmem:[%s4123_s0 + $0xb0] sm:$0xff]  }
  0x39   :  { %v2650_v34 = vunpack.c.l.bf16 %v3029_v22 }
  0x3a   :  { %3210 = vmatmul.mubr.bf16.gmra.mrb[12].mxu0 %v371_v23  ;;  %v326_v23 = vmax.f32 %v262_v10, 0.0  ;;  %v330_v47 = vmax.f32 %v266_v35, 0.0  ;;  %v331_v48 = vmax.f32 %v267_v36, 0.0  ;;  %v335_v10 = vmax.f32 %v271_v63, 0.0 }
  0x3b   :  { %3290 = vmatmul.mubr.bf16.gmra.mrb[12].mxu1 %v1140_v24  ;;  %3213 = vmatprep.mubr.bf16.mxu0 %v372_v25  ;;  %v327_v24 = vmax.f32 %v263_v11, 0.0  ;;  %v328_v25 = vmax.f32 %v264_v12, 0.0  ;;  %v203_v11 = vmul.f32 %v2638_v0, %v3461_v13  ;;  %v204_v12 = vmul.f32 %v2639_v1, %v3461_v13 }
  0x3c   :  { %3293 = vmatprep.mubr.bf16.mxu1 %v1141_v30  ;;  %v197_v30 = vmul.f32 %v2626_v17, %v3461_v13  ;;  %v379_v59 = vpack.c.bf16 %v331_v48, %v330_v47  ;;  %v2651_v35 = vunpack.c.h.bf16 %v3029_v22  ;;  %v3031_v48 = vld [vmem:[%s4123_s0 + $0xc0] sm:$0xff]  }
  0x3d   :  { %v377_v39 = vpack.c.bf16 %v327_v24, %v326_v23  ;;  %v378_v41 = vpack.c.bf16 %v329_v26, %v328_v25  ;;  %v381_v23 = vpack.c.bf16 %v335_v10, %v334_v9  ;;  %v1105_v24 = vld [vmem:[%s4125_s4 + $0x120] sm:$0xff]  ;;  %v1106_v25 = vld [vmem:[%s4125_s4 + $0x128] sm:$0xff]  ;;  %v274_v28 = vadd.f32 %v3475_v19, %v203_v11  ;;  %v1111_v9 = vld [vmem:[%s4125_s4 + $0x150] sm:$0xff] }
  0x3e   :  { %v268_v42 = vadd.f32 %v3475_v19, %v197_v30  ;;  %v275_v29 = vadd.f32 %v3475_v19, %v204_v12  ;;  %v1151_v36 = vpack.c.bf16 %v1106_v25, %v1105_v24  ;;  %v210_v47 = vmul.f32 %v2651_v35, %v3461_v13  ;;  %v1112_v10 = vld [vmem:[%s4125_s4 + $0x158] sm:$0xff]  ;;  %v1113_v12 = vld [vmem:[%s4125_s4 + $0x160] sm:$0xff] }
  0x3f   :  { %v2658_v60 = vunpack.c.l.bf16 %v3031_v48  ;;  %v2659_v61 = vunpack.c.h.bf16 %v3031_v48  ;;  %v1154_v22 = vpack.c.bf16 %v1112_v10, %v1111_v9 }
  0x40   :  { %v332_v51 = vmax.f32 %v268_v42, 0.0 }
  0x42   :  { %3214 = vmatmul.mubr.bf16.gmra.mrb[16].mxu0 %v373_v43  ;;  %v269_v43 = vadd.f32 %v3475_v19, %v198_v31 }
  0x43   :  { %3294 = vmatmul.mubr.bf16.gmra.mrb[16].mxu1 %v1142_v52  ;;  %3217 = vmatprep.mubr.bf16.mxu0 %v374_v53  ;;  %v201_v53 = vmul.f32 %v2634_v44, %v3461_v13  ;;  %v1107_v44 = vld [vmem:[%s4125_s4 + $0x130] sm:$0xff] }
  0x44   :  { %3297 = vmatprep.mubr.bf16.mxu1 %v1143_v56  ;;  %v333_v52 = vmax.f32 %v269_v43, 0.0  ;;  %v3027_v56 = vld [vmem:[%s4123_s0 + $0xa0] sm:$0xff]   ;;  %v3030_v43 = vld [vmem:[%s4123_s0 + $0xb8] sm:$0xff]  }
  0x45   :  { %v2642_v2 = vunpack.c.l.bf16 %v3027_v56  ;;  %v2643_v3 = vunpack.c.h.bf16 %v3027_v56  ;;  %v272_v6 = vadd.f32 %v3475_v19, %v201_v53  ;;  %v2654_v53 = vunpack.c.l.bf16 %v3030_v43 }
  0x46   :  { %v2655_v54 = vunpack.c.h.bf16 %v3030_v43  ;;  %v1152_v56 = vpack.c.bf16 %v1108_v45, %v1107_v44 }
  0x47   :  { %v205_v14 = vmul.f32 %v2642_v2, %v3461_v13  ;;  %v336_v17 = vmax.f32 %v272_v6, 0.0  ;;  %v211_v1 = vmul.f32 %v2654_v53, %v3461_v13  ;;  %v214_v6 = vmul.f32 %v2659_v61, %v3461_v13 }
  0x48   :  { %v212_v2 = vmul.f32 %v2655_v54, %v3461_v13 }
  0x49   :  { %v276_v30 = vadd.f32 %v3475_v19, %v205_v14  ;;  %v382_v33 = vpack.c.bf16 %v337_v18, %v336_v17  ;;  %v1114_v14 = vld [vmem:[%s4125_s4 + $0x168] sm:$0xff]  ;;  %v2662_v17 = vunpack.c.l.bf16 %v3032_v7  ;;  %v2663_v18 = vunpack.c.h.bf16 %v3032_v7 }
  0x4a   :  { %3218 = vmatmul.mubr.bf16.gmra.mrb[20].mxu0 %v375_v5  ;;  %v380_v5 = vpack.c.bf16 %v333_v52, %v332_v51  ;;  %v285_v25 = vadd.f32 %v3475_v19, %v214_v6 }
  0x4b   :  { %3298 = vmatmul.mubr.bf16.gmra.mrb[20].mxu1 %v1144_v15  ;;  %3221 = vmatprep.mubr.bf16.mxu0 %v376_v16  ;;  %v206_v15 = vmul.f32 %v2643_v3, %v3461_v13  ;;  %v3028_v16 = vld [vmem:[%s4123_s0 + $0xa8] sm:$0xff]  }
  0x4c   :  { %3301 = vmatprep.mubr.bf16.mxu1 %v1145_v20  ;;  %v1103_v20 = vld [vmem:[%s4125_s4 + $0x110] sm:$0xff]  ;;  %v2646_v26 = vunpack.c.l.bf16 %v3028_v16  ;;  %v2647_v27 = vunpack.c.h.bf16 %v3028_v16  ;;  %v283_v16 = vadd.f32 %v3475_v19, %v212_v2  ;;  %v349_v35 = vmax.f32 %v285_v25, 0.0  ;;  %v1121_v2 = vld [vmem:[%s4125_s4 + $0x1a0] sm:$0xff]  ;;  %v3038_v25 = vld [vmem:[%s4123_s0 + $0xf8] sm:$0xff]  }
  0x4d   :  { %v277_v31 = vadd.f32 %v3475_v19, %v206_v15  ;;  %v1150_v32 = vpack.c.bf16 %v1104_v21, %v1103_v20  ;;  %v282_v15 = vadd.f32 %v3475_v19, %v211_v1 }
  0x4e   :  { %v207_v37 = vmul.f32 %v2646_v26, %v3461_v13  ;;  %v208_v38 = vmul.f32 %v2647_v27, %v3461_v13  ;;  %v1155_v26 = vpack.c.bf16 %v1114_v14, %v1113_v12 }
  0x4f   :  { %v341_v42 = vmax.f32 %v277_v31, 0.0  ;;  %v346_v27 = vmax.f32 %v282_v15, 0.0 }
  0x50   :  { %v278_v51 = vadd.f32 %v3475_v19, %v207_v37  ;;  %v279_v52 = vadd.f32 %v3475_v19, %v208_v38  ;;  %v1116_v37 = vld [vmem:[%s4125_s4 + $0x178] sm:$0xff]  ;;  %v3035_v38 = vld [vmem:[%s4123_s0 + $0xe0] sm:$0xff]  }
  0x51   :  { %v2674_v50 = vunpack.c.l.bf16 %v3035_v38 }
  0x52   :  { %3222 = vmatmul.mubr.bf16.gmra.mrb[24].mxu0 %v377_v39  ;;  %v338_v39 = vmax.f32 %v274_v28, 0.0  ;;  %v342_v63 = vmax.f32 %v278_v51, 0.0  ;;  %v343_v0 = vmax.f32 %v279_v52, 0.0  ;;  %v347_v28 = vmax.f32 %v283_v16, 0.0 }
  0x53   :  { %3302 = vmatmul.mubr.bf16.gmra.mrb[24].mxu1 %v1146_v40  ;;  %3225 = vmatprep.mubr.bf16.mxu0 %v378_v41  ;;  %v339_v40 = vmax.f32 %v275_v29, 0.0  ;;  %v340_v41 = vmax.f32 %v276_v30, 0.0  ;;  %v215_v29 = vmul.f32 %v2662_v17, %v3461_v13  ;;  %v216_v30 = vmul.f32 %v2663_v18, %v3461_v13 }
  0x54   :  { %3305 = vmatprep.mubr.bf16.mxu1 %v1147_v46  ;;  %v209_v46 = vmul.f32 %v2650_v34, %v3461_v13  ;;  %v385_v11 = vpack.c.bf16 %v343_v0, %v342_v63  ;;  %v2675_v51 = vunpack.c.h.bf16 %v3035_v38  ;;  %v221_v61 = vmul.f32 %v2674_v50, %v3461_v13  ;;  %v3036_v63 = vld [vmem:[%s4123_s0 + $0xe8] sm:$0xff]   ;;  %v3037_v0 = vld [vmem:[%s4123_s0 + $0xf0] sm:$0xff]  }
  0x55   :  { %v383_v55 = vpack.c.bf16 %v339_v40, %v338_v39  ;;  %v384_v57 = vpack.c.bf16 %v341_v42, %v340_v41  ;;  %v387_v39 = vpack.c.bf16 %v347_v28, %v346_v27  ;;  %v1117_v40 = vld [vmem:[%s4125_s4 + $0x180] sm:$0xff]  ;;  %v1118_v41 = vld [vmem:[%s4125_s4 + $0x188] sm:$0xff]  ;;  %v286_v44 = vadd.f32 %v3475_v19, %v215_v29  ;;  %v1124_v27 = vld [vmem:[%s4125_s4 + $0x1b8] sm:$0xff] }
  0x56   :  { %v280_v58 = vadd.f32 %v3475_v19, %v209_v46  ;;  %v287_v45 = vadd.f32 %v3475_v19, %v216_v30  ;;  %v1157_v52 = vpack.c.bf16 %v1118_v41, %v1117_v40  ;;  %v2679_v9 = vunpack.c.h.bf16 %v3036_v63  ;;  %v1125_v29 = vld [vmem:[%s4125_s4 + $0x1c0] sm:$0xff]  ;;  %v1126_v30 = vld [vmem:[%s4125_s4 + $0x1c8] sm:$0xff] }
  0x57   :  { %v292_v10 = vadd.f32 %v3475_v19, %v221_v61  ;;  %v2682_v12 = vunpack.c.l.bf16 %v3037_v0  ;;  %v2683_v14 = vunpack.c.h.bf16 %v3037_v0  ;;  %v3358_v61 = vmov 0.0  }
  0x58   :  { %v344_v3 = vmax.f32 %v280_v58, 0.0  ;;  %v1120_v58 = vld [vmem:[%s4125_s4 + $0x198] sm:$0xff]  ;;  %1842 = vst [vmem:[%s4127_s7] sm:$0x1] %v3358_v61  ;;  %1843 = vst [vmem:[%s4128_s8] sm:$0x1] %v3358_v61 }
  0x59   :  { %1844 = vst [vmem:[%s4131_s10] sm:$0x1] %v3358_v61  ;;  %1845 = vst [vmem:[%s4132_s11] sm:$0x1] %v3358_v61 }
  0x5a   :  { %3226 = vmatmul.mubr.bf16.gmra.mrb[28].mxu0 %v379_v59  ;;  %v281_v59 = vadd.f32 %v3475_v19, %v210_v47 }
  0x5b   :  { %3306 = vmatmul.mubr.bf16.gmra.mrb[28].mxu1 %v1148_v4  ;;  %3229 = vmatprep.mubr.bf16.mxu0 %v380_v5  ;;  %v213_v5 = vmul.f32 %v2658_v60, %v3461_v13 }
  0x5c   :  { %3309 = vmatprep.mubr.bf16.mxu1 %v1149_v8  ;;  %v345_v4 = vmax.f32 %v281_v59, 0.0  ;;  %v3033_v8 = vld [vmem:[%s4123_s0 + $0xd0] sm:$0xff]  }
  0x5d   :  { %v2666_v20 = vunpack.c.l.bf16 %v3033_v8  ;;  %v2667_v21 = vunpack.c.h.bf16 %v3033_v8  ;;  %v284_v24 = vadd.f32 %v3475_v19, %v213_v5  ;;  %v2678_v8 = vunpack.c.l.bf16 %v3036_v63 }
  0x5f   :  { %v217_v31 = vmul.f32 %v2666_v20, %v3461_v13  ;;  %v348_v34 = vmax.f32 %v284_v24, 0.0  ;;  %v223_v18 = vmul.f32 %v2678_v8, %v3461_v13  ;;  %v224_v20 = vmul.f32 %v2679_v9, %v3461_v13 }
  0x60   :  { %v226_v24 = vmul.f32 %v2683_v14, %v3461_v13 }
  0x61   :  { %v288_v46 = vadd.f32 %v3475_v19, %v217_v31  ;;  %v388_v49 = vpack.c.bf16 %v349_v35, %v348_v34  ;;  %v294_v31 = vadd.f32 %v3475_v19, %v223_v18  ;;  %v2687_v34 = vunpack.c.h.bf16 %v3038_v25 }
  0x62   :  { %3230 = vmatmul.mubr.bf16.gmra.mrb[32].mxu0 %v381_v23  ;;  %v386_v23 = vpack.c.bf16 %v345_v4, %v344_v3  ;;  %v1122_v3 = vld [vmem:[%s4125_s4 + $0x1a8] sm:$0xff]  ;;  %v297_v38 = vadd.f32 %v3475_v19, %v226_v24 }
  0x63   :  { %3310 = vmatmul.mubr.bf16.gmra.mrb[32].mxu1 %v1150_v32  ;;  %3233 = vmatprep.mubr.bf16.mxu0 %v382_v33  ;;  %v218_v32 = vmul.f32 %v2667_v21, %v3461_v13  ;;  %v3034_v33 = vld [vmem:[%s4123_s0 + $0xd8] sm:$0xff]   ;;  %v352_v59 = vmax.f32 %v288_v46, 0.0  ;;  %v1159_v15 = vpack.c.bf16 %v1122_v3, %v1121_v2  ;;  %v356_v21 = vmax.f32 %v292_v10, 0.0  ;;  %v1127_v46 = vld [vmem:[%s4125_s4 + $0x1d0] sm:$0xff] }
  0x64   :  { %3313 = vmatprep.mubr.bf16.mxu1 %v1151_v36  ;;  %v1115_v36 = vld [vmem:[%s4125_s4 + $0x170] sm:$0xff]  ;;  %v2670_v42 = vunpack.c.l.bf16 %v3034_v33  ;;  %v2671_v43 = vunpack.c.h.bf16 %v3034_v33  ;;  %v2686_v33 = vunpack.c.l.bf16 %v3038_v25  ;;  %v358_v40 = vmax.f32 %v294_v31, 0.0 }
  0x65   :  { %v289_v47 = vadd.f32 %v3475_v19, %v218_v32  ;;  %v1156_v48 = vpack.c.bf16 %v1116_v37, %v1115_v36  ;;  %v295_v32 = vadd.f32 %v3475_v19, %v224_v20 }
  0x66   :  { %v219_v53 = vmul.f32 %v2670_v42, %v3461_v13  ;;  %v220_v54 = vmul.f32 %v2671_v43, %v3461_v13  ;;  %v227_v42 = vmul.f32 %v2686_v33, %v3461_v13  ;;  %v228_v43 = vmul.f32 %v2687_v34, %v3461_v13 }
  0x67   :  { %v353_v60 = vmax.f32 %v289_v47, 0.0  ;;  %v359_v41 = vmax.f32 %v295_v32, 0.0  ;;  %v1128_v47 = vld [vmem:[%s4125_s4 + $0x1d8] sm:$0xff] }
  0x68   :  { %v290_v4 = vadd.f32 %v3475_v19, %v219_v53  ;;  %v291_v5 = vadd.f32 %v3475_v19, %v220_v54  ;;  %v298_v50 = vadd.f32 %v3475_v19, %v227_v42 }
  0x69   :  { %v390_v7 = vpack.c.bf16 %v353_v60, %v352_v59 }
  0x6a   :  { %3234 = vmatmul.mubr.bf16.gmra.mrb[36].mxu0 %v383_v55  ;;  %v350_v55 = vmax.f32 %v286_v44, 0.0  ;;  %v354_v16 = vmax.f32 %v290_v4, 0.0  ;;  %v355_v17 = vmax.f32 %v291_v5, 0.0 }
  0x6b   :  { %3314 = vmatmul.mubr.bf16.gmra.mrb[36].mxu1 %v1152_v56  ;;  %3237 = vmatprep.mubr.bf16.mxu0 %v384_v57  ;;  %v351_v56 = vmax.f32 %v287_v45, 0.0  ;;  %v1119_v57 = vld [vmem:[%s4125_s4 + $0x190] sm:$0xff]  ;;  %v361_v45 = vmax.f32 %v297_v38, 0.0 }
  0x6c   :  { %3317 = vmatprep.mubr.bf16.mxu1 %v1153_v62  ;;  %v222_v62 = vmul.f32 %v2675_v51, %v3461_v13  ;;  %v1158_v1 = vpack.c.bf16 %v1120_v58, %v1119_v57  ;;  %v391_v28 = vpack.c.bf16 %v355_v17, %v354_v16  ;;  %v299_v51 = vadd.f32 %v3475_v19, %v228_v43  ;;  %v1131_v57 = vld [vmem:[%s4125_s4 + $0x1f0] sm:$0xff]  ;;  %v1132_v58 = vld [vmem:[%s4125_s4 + $0x1f8] sm:$0xff] }
  0x6d   :  { %v389_v6 = vpack.c.bf16 %v351_v56, %v350_v55  ;;  %v362_v55 = vmax.f32 %v298_v50, 0.0  ;;  %v1164_v60 = vpack.c.bf16 %v1132_v58, %v1131_v57 }
  0x6e   :  { %v363_v56 = vmax.f32 %v299_v51, 0.0 }
  0x70   :  { %v395_v59 = vpack.c.bf16 %v363_v56, %v362_v55 }
  0x72   :  { %3238 = vmatmul.mubr.bf16.gmra.mrb[40].mxu0 %v385_v11  ;;  %v293_v11 = vadd.f32 %v3475_v19, %v222_v62 }
  0x73   :  { %3318 = vmatmul.mubr.bf16.gmra.mrb[40].mxu1 %v1154_v22  ;;  %3241 = vmatprep.mubr.bf16.mxu0 %v386_v23  ;;  %v225_v23 = vmul.f32 %v2682_v12, %v3461_v13  ;;  %v1130_v13 = vld [vmem:[%s4125_s4 + $0x1e8] sm:$0xff] }
  0x74   :  { %3321 = vmatprep.mubr.bf16.mxu1 %v1155_v26  ;;  %v357_v22 = vmax.f32 %v293_v11, 0.0  ;;  %v1123_v26 = vld [vmem:[%s4125_s4 + $0x1b0] sm:$0xff] }
  0x75   :  { %v1160_v35 = vpack.c.bf16 %v1124_v27, %v1123_v26  ;;  %v296_v37 = vadd.f32 %v3475_v19, %v225_v23 }
  0x76   :  { %v392_v36 = vpack.c.bf16 %v357_v22, %v356_v21 }
  0x77   :  { %v360_v44 = vmax.f32 %v296_v37, 0.0 }
  0x79   :  { %v394_v53 = vpack.c.bf16 %v361_v45, %v360_v44 }
  0x7a   :  { %3242 = vmatmul.mubr.bf16.gmra.mrb[44].mxu0 %v387_v39  ;;  %v1161_v39 = vpack.c.bf16 %v1126_v30, %v1125_v29 }
  0x7b   :  { %3322 = vmatmul.mubr.bf16.gmra.mrb[44].mxu1 %v1156_v48  ;;  %3245 = vmatprep.mubr.bf16.mxu0 %v388_v49  ;;  %v1129_v48 = vld [vmem:[%s4125_s4 + $0x1e0] sm:$0xff]  ;;  %v393_v49 = vpack.c.bf16 %v359_v41, %v358_v40 }
  0x7c   :  { %3325 = vmatprep.mubr.bf16.mxu1 %v1157_v52  ;;  %v1162_v52 = vpack.c.bf16 %v1128_v47, %v1127_v46  ;;  %v1163_v54 = vpack.c.bf16 %v1130_v13, %v1129_v48 }
  0x82   :  { %3246 = vmatmul.mubr.bf16.gmra.mrb[48].mxu0 %v389_v6 }
  0x83   :  { %3326 = vmatmul.mubr.bf16.gmra.mrb[48].mxu1 %v1158_v1  ;;  %3249 = vmatprep.mubr.bf16.mxu0 %v390_v7 }
  0x84   :  { %3329 = vmatprep.mubr.bf16.mxu1 %v1159_v15 }
  0x8a   :  { %3250 = vmatmul.mubr.bf16.gmra.mrb[52].mxu0 %v391_v28 }
  0x8b   :  { %3330 = vmatmul.mubr.bf16.gmra.mrb[52].mxu1 %v1160_v35  ;;  %3253 = vmatprep.mubr.bf16.mxu0 %v392_v36 }
  0x8c   :  { %3333 = vmatprep.mubr.bf16.mxu1 %v1161_v39 }
  0x92   :  { %3254 = vmatmul.mubr.bf16.gmra.mrb[56].mxu0 %v393_v49 }
  0x93   :  { %3334 = vmatmul.mubr.bf16.gmra.mrb[56].mxu1 %v1162_v52  ;;  %3257 = vmatprep.mubr.bf16.mxu0 %v394_v53 }
  0x94   :  { %3337 = vmatprep.mubr.bf16.mxu1 %v1163_v54 }
  0x9a   :  { %3258 = vmatmul.mubr.bf16.gmra.mrb[60].mxu0 %v395_v59 }
  0x9b   :  { %3338 = vmatmul.mubr.bf16.gmra.mrb[60].mxu1 %v1164_v60 }
  0xf5   :  { %v3199_v19 = vpop.f32.mrb[0].mxu0 }
  0xf6   :  { %v3279_v62 = vpop.f32.mrb[0].mxu1  ;;  %v494_v63 = vpop.f32.mrb[1].mxu0  ;;  %v1921_v16 = vmul.f32 %v3199_v19, %v3199_v19 }
  0xf7   :  { %v1263_v0 = vpop.f32.mrb[1].mxu1  ;;  %v3200_v1 = vpop.f32.mrb[2].mxu0  ;;  %v1919_v2 = vmul.f32 %v494_v63, %v494_v63  ;;  %v2129_v18 = vmul.f32 %v3279_v62, %v3279_v62 }
  0xf8   :  { %v2696_v3 = vpack.c.bf16 %v3200_v1, %v3199_v19  ;;  %v3280_v4 = vpop.f32.mrb[2].mxu1  ;;  %v497_v5 = vpop.f32.mrb[3].mxu0  ;;  %v2127_v6 = vmul.f32 %v1263_v0, %v1263_v0  ;;  %v1922_v23 = vmul.f32 %v3200_v1, %v3200_v1 }
  0xf9   :  { %v2856_v7 = vpack.c.bf16 %v3280_v4, %v3279_v62  ;;  %v2691_v8 = vpack.c.bf16 %v497_v5, %v494_v63  ;;  %v1847_v9 = vadd.f32 %v497_v5, %v494_v63  ;;  %v1266_v10 = vpop.f32.mrb[3].mxu1  ;;  %v1920_v11 = vmul.f32 %v497_v5, %v497_v5 }
  0xfa   :  { %3039 = vst [vmem:[%s4129_s6 + $0x8] sm:$0xff] %v2696_v3   ;;  %v2851_v12 = vpack.c.bf16 %v1266_v10, %v1263_v0  ;;  %v2055_v14 = vadd.f32 %v1266_v10, %v1263_v0  ;;  %v2128_v15 = vmul.f32 %v1266_v10, %v1266_v10  ;;  %v2130_v26 = vmul.f32 %v3280_v4, %v3280_v4 }
  0xfb   :  { %3070 = vst [vmem:[%s4130_s9 + $0x8] sm:$0xff] %v2856_v7   ;;  %2692 = vst [vmem:[%s4129_s6] sm:$0xff] %v2691_v8   ;;  %v1848_v17 = vadd.f32 %v3199_v19, %v1847_v9  ;;  %v1983_v20 = vadd.f32 %v1920_v11, %v1919_v2 }
  0xfc   :  { %2852 = vst [vmem:[%s4130_s9] sm:$0xff] %v2851_v12   ;;  %v2056_v21 = vadd.f32 %v3279_v62, %v2055_v14  ;;  %v2191_v22 = vadd.f32 %v2128_v15, %v2127_v6 }
  0xfd   :  { %v3203_v24 = vpop.f32.mrb[4].mxu0  ;;  %v1849_v25 = vadd.f32 %v3200_v1, %v1848_v17  ;;  %v1984_v27 = vadd.f32 %v1983_v20, %v1921_v16 }
  0xfe   :  { %v2192_v28 = vadd.f32 %v2191_v22, %v2129_v18  ;;  %v3283_v29 = vpop.f32.mrb[4].mxu1  ;;  %v510_v30 = vpop.f32.mrb[5].mxu0  ;;  %v2057_v31 = vadd.f32 %v3280_v4, %v2056_v21  ;;  %v1925_v52 = vmul.f32 %v3203_v24, %v3203_v24 }
  0xff   :  { %v1850_v32 = vadd.f32 %v1849_v25, %v510_v30  ;;  %v1923_v33 = vmul.f32 %v510_v30, %v510_v30  ;;  %v1279_v34 = vpop.f32.mrb[5].mxu1  ;;  %v3204_v35 = vpop.f32.mrb[6].mxu0  ;;  %v1985_v36 = vadd.f32 %v1984_v27, %v1922_v23  ;;  %v2133_v54 = vmul.f32 %v3283_v29, %v3283_v29 }
 0x100   :  { %v2058_v37 = vadd.f32 %v2057_v31, %v1279_v34  ;;  %v2131_v38 = vmul.f32 %v1279_v34, %v1279_v34  ;;  %v2193_v39 = vadd.f32 %v2192_v28, %v2130_v26  ;;  %v3284_v40 = vpop.f32.mrb[6].mxu1  ;;  %v513_v41 = vpop.f32.mrb[7].mxu0  ;;  %v2706_v42 = vpack.c.bf16 %v3204_v35, %v3203_v24 }
 0x101   :  { %v2866_v43 = vpack.c.bf16 %v3284_v40, %v3283_v29  ;;  %v1282_v44 = vpop.f32.mrb[7].mxu1  ;;  %v1986_v45 = vadd.f32 %v1985_v36, %v1923_v33  ;;  %v2701_v47 = vpack.c.bf16 %v513_v41, %v510_v30  ;;  %v1851_v48 = vadd.f32 %v1850_v32, %v513_v41 }
 0x102   :  { %v2194_v46 = vadd.f32 %v2193_v39, %v2131_v38  ;;  %3041 = vst [vmem:[%s4129_s6 + $0x18] sm:$0xff] %v2706_v42   ;;  %v1924_v13 = vmul.f32 %v513_v41, %v513_v41  ;;  %v2861_v49 = vpack.c.bf16 %v1282_v44, %v1279_v34  ;;  %v2059_v50 = vadd.f32 %v2058_v37, %v1282_v44 }
 0x103   :  { %3072 = vst [vmem:[%s4130_s9 + $0x18] sm:$0xff] %v2866_v43   ;;  %v2132_v51 = vmul.f32 %v1282_v44, %v1282_v44  ;;  %3040 = vst [vmem:[%s4129_s6 + $0x10] sm:$0xff] %v2701_v47   ;;  %v1852_v53 = vadd.f32 %v3203_v24, %v1851_v48  ;;  %v1926_v59 = vmul.f32 %v3204_v35, %v3204_v35 }
 0x104   :  { %v1987_v55 = vadd.f32 %v1986_v45, %v1924_v13  ;;  %3071 = vst [vmem:[%s4130_s9 + $0x10] sm:$0xff] %v2861_v49   ;;  %v2060_v56 = vadd.f32 %v3283_v29, %v2059_v50  ;;  %v2134_v62 = vmul.f32 %v3284_v40, %v3284_v40 }
 0x105   :  { %v2195_v57 = vadd.f32 %v2194_v46, %v2132_v51  ;;  %v3207_v58 = vpop.f32.mrb[8].mxu0  ;;  %v1853_v61 = vadd.f32 %v3204_v35, %v1852_v53 }
 0x106   :  { %v3287_v60 = vpop.f32.mrb[8].mxu1  ;;  %v526_v19 = vpop.f32.mrb[9].mxu0  ;;  %v1988_v63 = vadd.f32 %v1987_v55, %v1925_v52  ;;  %v2061_v5 = vadd.f32 %v3284_v40, %v2060_v56  ;;  %v1929_v26 = vmul.f32 %v3207_v58, %v3207_v58 }
 0x107   :  { %v2196_v0 = vadd.f32 %v2195_v57, %v2133_v54  ;;  %v1927_v1 = vmul.f32 %v526_v19, %v526_v19  ;;  %v1295_v2 = vpop.f32.mrb[9].mxu1  ;;  %v3208_v3 = vpop.f32.mrb[10].mxu0  ;;  %v1854_v4 = vadd.f32 %v1853_v61, %v526_v19  ;;  %v2137_v29 = vmul.f32 %v3287_v60, %v3287_v60 }
 0x108   :  { %v2135_v6 = vmul.f32 %v1295_v2, %v1295_v2  ;;  %v2716_v7 = vpack.c.bf16 %v3208_v3, %v3207_v58  ;;  %v3288_v8 = vpop.f32.mrb[10].mxu1  ;;  %v529_v9 = vpop.f32.mrb[11].mxu0  ;;  %v1989_v10 = vadd.f32 %v1988_v63, %v1926_v59  ;;  %v2062_v15 = vadd.f32 %v2061_v5, %v1295_v2 }
 0x109   :  { %v2197_v11 = vadd.f32 %v2196_v0, %v2134_v62  ;;  %v2876_v12 = vpack.c.bf16 %v3288_v8, %v3287_v60  ;;  %v1298_v14 = vpop.f32.mrb[11].mxu1  ;;  %v2711_v16 = vpack.c.bf16 %v529_v9, %v526_v19  ;;  %v1855_v17 = vadd.f32 %v1854_v4, %v529_v9 }
 0x10a   :  { %3043 = vst [vmem:[%s4129_s6 + $0x28] sm:$0xff] %v2716_v7   ;;  %v1990_v18 = vadd.f32 %v1989_v10, %v1927_v1  ;;  %v1928_v21 = vmul.f32 %v529_v9, %v529_v9  ;;  %v2871_v22 = vpack.c.bf16 %v1298_v14, %v1295_v2  ;;  %v2063_v24 = vadd.f32 %v2062_v15, %v1298_v14 }
 0x10b   :  { %v2198_v20 = vadd.f32 %v2197_v11, %v2135_v6  ;;  %3074 = vst [vmem:[%s4130_s9 + $0x28] sm:$0xff] %v2876_v12   ;;  %3042 = vst [vmem:[%s4129_s6 + $0x20] sm:$0xff] %v2711_v16   ;;  %v1856_v23 = vadd.f32 %v3207_v58, %v1855_v17  ;;  %v2136_v25 = vmul.f32 %v1298_v14, %v1298_v14 }
 0x10c   :  { %v1991_v27 = vadd.f32 %v1990_v18, %v1928_v21  ;;  %3073 = vst [vmem:[%s4130_s9 + $0x20] sm:$0xff] %v2871_v22   ;;  %v2064_v30 = vadd.f32 %v3287_v60, %v2063_v24  ;;  %v1930_v35 = vmul.f32 %v3208_v3, %v3208_v3  ;;  %v2138_v36 = vmul.f32 %v3288_v8, %v3288_v8 }
 0x10d   :  { %v3211_v28 = vpop.f32.mrb[12].mxu0  ;;  %v2199_v31 = vadd.f32 %v2198_v20, %v2136_v25  ;;  %v1857_v34 = vadd.f32 %v3208_v3, %v1856_v23 }
 0x10e   :  { %v3291_v32 = vpop.f32.mrb[12].mxu1  ;;  %v542_v33 = vpop.f32.mrb[13].mxu0  ;;  %v1992_v37 = vadd.f32 %v1991_v27, %v1929_v26  ;;  %v2065_v43 = vadd.f32 %v3288_v8, %v2064_v30  ;;  %v1933_v60 = vmul.f32 %v3211_v28, %v3211_v28 }
 0x10f   :  { %v1931_v38 = vmul.f32 %v542_v33, %v542_v33  ;;  %v1311_v39 = vpop.f32.mrb[13].mxu1  ;;  %v3212_v40 = vpop.f32.mrb[14].mxu0  ;;  %v2200_v41 = vadd.f32 %v2199_v31, %v2137_v29  ;;  %v1858_v42 = vadd.f32 %v1857_v34, %v542_v33  ;;  %v2141_v63 = vmul.f32 %v3291_v32, %v3291_v32 }
 0x110   :  { %v2139_v44 = vmul.f32 %v1311_v39, %v1311_v39  ;;  %v3292_v45 = vpop.f32.mrb[14].mxu1  ;;  %v545_v46 = vpop.f32.mrb[15].mxu0  ;;  %v1993_v47 = vadd.f32 %v1992_v37, %v1930_v35  ;;  %v2726_v48 = vpack.c.bf16 %v3212_v40, %v3211_v28  ;;  %v2066_v50 = vadd.f32 %v2065_v43, %v1311_v39 }
 0x111   :  { %v2886_v13 = vpack.c.bf16 %v3292_v45, %v3291_v32  ;;  %v1314_v49 = vpop.f32.mrb[15].mxu1  ;;  %v2201_v51 = vadd.f32 %v2200_v41, %v2138_v36  ;;  %v2721_v52 = vpack.c.bf16 %v545_v46, %v542_v33  ;;  %v1859_v54 = vadd.f32 %v1858_v42, %v545_v46 }
 0x112   :  { %v1994_v53 = vadd.f32 %v1993_v47, %v1931_v38  ;;  %3045 = vst [vmem:[%s4129_s6 + $0x38] sm:$0xff] %v2726_v48   ;;  %v1932_v55 = vmul.f32 %v545_v46, %v545_v46  ;;  %v2881_v56 = vpack.c.bf16 %v1314_v49, %v1311_v39  ;;  %v2067_v58 = vadd.f32 %v2066_v50, %v1314_v49 }
 0x113   :  { %3076 = vst [vmem:[%s4130_s9 + $0x38] sm:$0xff] %v2886_v13   ;;  %v2202_v57 = vadd.f32 %v2201_v51, %v2139_v44  ;;  %3044 = vst [vmem:[%s4129_s6 + $0x30] sm:$0xff] %v2721_v52   ;;  %v2140_v59 = vmul.f32 %v1314_v49, %v1314_v49  ;;  %v1860_v19 = vadd.f32 %v3211_v28, %v1859_v54 }
 0x114   :  { %v1995_v61 = vadd.f32 %v1994_v53, %v1932_v55  ;;  %3075 = vst [vmem:[%s4130_s9 + $0x30] sm:$0xff] %v2881_v56   ;;  %v1934_v0 = vmul.f32 %v3212_v40, %v3212_v40  ;;  %v2068_v1 = vadd.f32 %v3291_v32, %v2067_v58  ;;  %v2142_v5 = vmul.f32 %v3292_v45, %v3292_v45 }
 0x115   :  { %v3215_v62 = vpop.f32.mrb[16].mxu0  ;;  %v2203_v2 = vadd.f32 %v2202_v57, %v2140_v59  ;;  %v1861_v7 = vadd.f32 %v3212_v40, %v1860_v19 }
 0x116   :  { %v3295_v3 = vpop.f32.mrb[16].mxu1  ;;  %v558_v4 = vpop.f32.mrb[17].mxu0  ;;  %v1996_v6 = vadd.f32 %v1995_v61, %v1933_v60  ;;  %v2069_v12 = vadd.f32 %v3292_v45, %v2068_v1  ;;  %v1937_v33 = vmul.f32 %v3215_v62, %v3215_v62 }
 0x117   :  { %v1935_v8 = vmul.f32 %v558_v4, %v558_v4  ;;  %v1327_v9 = vpop.f32.mrb[17].mxu1  ;;  %v3216_v10 = vpop.f32.mrb[18].mxu0  ;;  %v2204_v11 = vadd.f32 %v2203_v2, %v2141_v63  ;;  %v1862_v18 = vadd.f32 %v1861_v7, %v558_v4  ;;  %v2145_v37 = vmul.f32 %v3295_v3, %v3295_v3 }
 0x118   :  { %v2143_v14 = vmul.f32 %v1327_v9, %v1327_v9  ;;  %v2736_v15 = vpack.c.bf16 %v3216_v10, %v3215_v62  ;;  %v3296_v16 = vpop.f32.mrb[18].mxu1  ;;  %v561_v17 = vpop.f32.mrb[19].mxu0  ;;  %v1997_v20 = vadd.f32 %v1996_v6, %v1934_v0  ;;  %v2070_v23 = vadd.f32 %v2069_v12, %v1327_v9 }
 0x119   :  { %v2896_v21 = vpack.c.bf16 %v3296_v16, %v3295_v3  ;;  %v1330_v22 = vpop.f32.mrb[19].mxu1  ;;  %v2205_v24 = vadd.f32 %v2204_v11, %v2142_v5  ;;  %v2731_v25 = vpack.c.bf16 %v561_v17, %v558_v4  ;;  %v1863_v27 = vadd.f32 %v1862_v18, %v561_v17 }
 0x11a   :  { %3047 = vst [vmem:[%s4129_s6 + $0x48] sm:$0xff] %v2736_v15   ;;  %v1998_v26 = vadd.f32 %v1997_v20, %v1935_v8  ;;  %v1936_v28 = vmul.f32 %v561_v17, %v561_v17  ;;  %v2891_v29 = vpack.c.bf16 %v1330_v22, %v1327_v9  ;;  %v2071_v31 = vadd.f32 %v2070_v23, %v1330_v22 }
 0x11b   :  { %3078 = vst [vmem:[%s4130_s9 + $0x48] sm:$0xff] %v2896_v21   ;;  %v2206_v30 = vadd.f32 %v2205_v24, %v2143_v14  ;;  %3046 = vst [vmem:[%s4129_s6 + $0x40] sm:$0xff] %v2731_v25   ;;  %v2144_v32 = vmul.f32 %v1330_v22, %v1330_v22  ;;  %v1864_v34 = vadd.f32 %v3215_v62, %v1863_v27 }
 0x11c   :  { %v1999_v35 = vadd.f32 %v1998_v26, %v1936_v28  ;;  %3077 = vst [vmem:[%s4130_s9 + $0x40] sm:$0xff] %v2891_v29   ;;  %v1938_v38 = vmul.f32 %v3216_v10, %v3216_v10  ;;  %v2072_v39 = vadd.f32 %v3295_v3, %v2071_v31  ;;  %v2146_v43 = vmul.f32 %v3296_v16, %v3296_v16 }
 0x11d   :  { %v3219_v36 = vpop.f32.mrb[20].mxu0  ;;  %v2207_v40 = vadd.f32 %v2206_v30, %v2144_v32  ;;  %v1865_v45 = vadd.f32 %v3216_v10, %v1864_v34 }
 0x11e   :  { %v3299_v41 = vpop.f32.mrb[20].mxu1  ;;  %v574_v42 = vpop.f32.mrb[21].mxu0  ;;  %v2000_v44 = vadd.f32 %v1999_v35, %v1937_v33  ;;  %v2073_v49 = vadd.f32 %v3296_v16, %v2072_v39  ;;  %v1941_v3 = vmul.f32 %v3219_v36, %v3219_v36 }
 0x11f   :  { %v1939_v46 = vmul.f32 %v574_v42, %v574_v42  ;;  %v1343_v47 = vpop.f32.mrb[21].mxu1  ;;  %v3220_v48 = vpop.f32.mrb[22].mxu0  ;;  %v2208_v13 = vadd.f32 %v2207_v40, %v2145_v37  ;;  %v1866_v54 = vadd.f32 %v1865_v45, %v574_v42  ;;  %v2149_v7 = vmul.f32 %v3299_v41, %v3299_v41 }
 0x120   :  { %v2147_v50 = vmul.f32 %v1343_v47, %v1343_v47  ;;  %v2746_v51 = vpack.c.bf16 %v3220_v48, %v3219_v36  ;;  %v3300_v52 = vpop.f32.mrb[22].mxu1  ;;  %v577_v53 = vpop.f32.mrb[23].mxu0  ;;  %v2001_v55 = vadd.f32 %v2000_v44, %v1938_v38  ;;  %v2074_v58 = vadd.f32 %v2073_v49, %v1343_v47 }
 0x121   :  { %v2906_v56 = vpack.c.bf16 %v3300_v52, %v3299_v41  ;;  %v1346_v57 = vpop.f32.mrb[23].mxu1  ;;  %v2209_v59 = vadd.f32 %v2208_v13, %v2146_v43  ;;  %v2741_v60 = vpack.c.bf16 %v577_v53, %v574_v42  ;;  %v1867_v61 = vadd.f32 %v1866_v54, %v577_v53 }
 0x122   :  { %3049 = vst [vmem:[%s4129_s6 + $0x58] sm:$0xff] %v2746_v51   ;;  %v2002_v19 = vadd.f32 %v2001_v55, %v1939_v46  ;;  %v1940_v62 = vmul.f32 %v577_v53, %v577_v53  ;;  %v2901_v63 = vpack.c.bf16 %v1346_v57, %v1343_v47  ;;  %v2075_v1 = vadd.f32 %v2074_v58, %v1346_v57 }
 0x123   :  { %3080 = vst [vmem:[%s4130_s9 + $0x58] sm:$0xff] %v2906_v56   ;;  %v2210_v0 = vadd.f32 %v2209_v59, %v2147_v50  ;;  %3048 = vst [vmem:[%s4129_s6 + $0x50] sm:$0xff] %v2741_v60   ;;  %v2148_v2 = vmul.f32 %v1346_v57, %v1346_v57  ;;  %v1868_v4 = vadd.f32 %v3219_v36, %v1867_v61 }
 0x124   :  { %v2003_v5 = vadd.f32 %v2002_v19, %v1940_v62  ;;  %3079 = vst [vmem:[%s4130_s9 + $0x50] sm:$0xff] %v2901_v63   ;;  %v1942_v8 = vmul.f32 %v3220_v48, %v3220_v48  ;;  %v2076_v9 = vadd.f32 %v3299_v41, %v2075_v1  ;;  %v2150_v14 = vmul.f32 %v3300_v52, %v3300_v52 }
 0x125   :  { %v3223_v6 = vpop.f32.mrb[24].mxu0  ;;  %v2211_v10 = vadd.f32 %v2210_v0, %v2148_v2  ;;  %v1869_v16 = vadd.f32 %v3220_v48, %v1868_v4 }
 0x126   :  { %v3303_v11 = vpop.f32.mrb[24].mxu1  ;;  %v590_v12 = vpop.f32.mrb[25].mxu0  ;;  %v2004_v15 = vadd.f32 %v2003_v5, %v1941_v3  ;;  %v2077_v22 = vadd.f32 %v3300_v52, %v2076_v9  ;;  %v1945_v41 = vmul.f32 %v3223_v6, %v3223_v6 }
 0x127   :  { %v1943_v17 = vmul.f32 %v590_v12, %v590_v12  ;;  %v1359_v18 = vpop.f32.mrb[25].mxu1  ;;  %v3224_v20 = vpop.f32.mrb[26].mxu0  ;;  %v2212_v21 = vadd.f32 %v2211_v10, %v2149_v7  ;;  %v1870_v27 = vadd.f32 %v1869_v16, %v590_v12  ;;  %v2153_v45 = vmul.f32 %v3303_v11, %v3303_v11 }
 0x128   :  { %v2151_v23 = vmul.f32 %v1359_v18, %v1359_v18  ;;  %v2756_v24 = vpack.c.bf16 %v3224_v20, %v3223_v6  ;;  %v3304_v25 = vpop.f32.mrb[26].mxu1  ;;  %v593_v26 = vpop.f32.mrb[27].mxu0  ;;  %v2005_v28 = vadd.f32 %v2004_v15, %v1942_v8  ;;  %v2078_v31 = vadd.f32 %v2077_v22, %v1359_v18 }
 0x129   :  { %v2916_v29 = vpack.c.bf16 %v3304_v25, %v3303_v11  ;;  %v1362_v30 = vpop.f32.mrb[27].mxu1  ;;  %v2213_v32 = vadd.f32 %v2212_v21, %v2150_v14  ;;  %v2751_v33 = vpack.c.bf16 %v593_v26, %v590_v12  ;;  %v1871_v35 = vadd.f32 %v1870_v27, %v593_v26 }
 0x12a   :  { %3051 = vst [vmem:[%s4129_s6 + $0x68] sm:$0xff] %v2756_v24   ;;  %v2006_v34 = vadd.f32 %v2005_v28, %v1943_v17  ;;  %v1944_v36 = vmul.f32 %v593_v26, %v593_v26  ;;  %v2911_v37 = vpack.c.bf16 %v1362_v30, %v1359_v18  ;;  %v2079_v39 = vadd.f32 %v2078_v31, %v1362_v30 }
 0x12b   :  { %3082 = vst [vmem:[%s4130_s9 + $0x68] sm:$0xff] %v2916_v29   ;;  %v2214_v38 = vadd.f32 %v2213_v32, %v2151_v23  ;;  %3050 = vst [vmem:[%s4129_s6 + $0x60] sm:$0xff] %v2751_v33   ;;  %v2152_v40 = vmul.f32 %v1362_v30, %v1362_v30  ;;  %v1872_v42 = vadd.f32 %v3223_v6, %v1871_v35 }
 0x12c   :  { %v2007_v43 = vadd.f32 %v2006_v34, %v1944_v36  ;;  %3081 = vst [vmem:[%s4130_s9 + $0x60] sm:$0xff] %v2911_v37   ;;  %v1946_v46 = vmul.f32 %v3224_v20, %v3224_v20  ;;  %v2080_v47 = vadd.f32 %v3303_v11, %v2079_v39  ;;  %v2154_v50 = vmul.f32 %v3304_v25, %v3304_v25 }
 0x12d   :  { %v3227_v44 = vpop.f32.mrb[28].mxu0  ;;  %v2215_v48 = vadd.f32 %v2214_v38, %v2152_v40  ;;  %v1873_v52 = vadd.f32 %v3224_v20, %v1872_v42 }
 0x12e   :  { %v3307_v13 = vpop.f32.mrb[28].mxu1  ;;  %v606_v49 = vpop.f32.mrb[29].mxu0  ;;  %v2008_v51 = vadd.f32 %v2007_v43, %v1945_v41  ;;  %v2081_v57 = vadd.f32 %v3304_v25, %v2080_v47  ;;  %v1949_v11 = vmul.f32 %v3227_v44, %v3227_v44 }
 0x12f   :  { %v1947_v53 = vmul.f32 %v606_v49, %v606_v49  ;;  %v1375_v54 = vpop.f32.mrb[29].mxu1  ;;  %v3228_v55 = vpop.f32.mrb[30].mxu0  ;;  %v2216_v56 = vadd.f32 %v2215_v48, %v2153_v45  ;;  %v1874_v61 = vadd.f32 %v1873_v52, %v606_v49  ;;  %v2157_v16 = vmul.f32 %v3307_v13, %v3307_v13 }
 0x130   :  { %v2155_v58 = vmul.f32 %v1375_v54, %v1375_v54  ;;  %v2766_v59 = vpack.c.bf16 %v3228_v55, %v3227_v44  ;;  %v3308_v60 = vpop.f32.mrb[30].mxu1  ;;  %v609_v19 = vpop.f32.mrb[31].mxu0  ;;  %v2009_v62 = vadd.f32 %v2008_v51, %v1946_v46  ;;  %v2082_v1 = vadd.f32 %v2081_v57, %v1375_v54 }
 0x131   :  { %v2926_v63 = vpack.c.bf16 %v3308_v60, %v3307_v13  ;;  %v1378_v0 = vpop.f32.mrb[31].mxu1  ;;  %v2217_v2 = vadd.f32 %v2216_v56, %v2154_v50  ;;  %v2761_v3 = vpack.c.bf16 %v609_v19, %v606_v49  ;;  %v1875_v5 = vadd.f32 %v1874_v61, %v609_v19 }
 0x132   :  { %3053 = vst [vmem:[%s4129_s6 + $0x78] sm:$0xff] %v2766_v59   ;;  %v2010_v4 = vadd.f32 %v2009_v62, %v1947_v53  ;;  %v1948_v6 = vmul.f32 %v609_v19, %v609_v19  ;;  %v2921_v7 = vpack.c.bf16 %v1378_v0, %v1375_v54  ;;  %v2083_v9 = vadd.f32 %v2082_v1, %v1378_v0 }
 0x133   :  { %3084 = vst [vmem:[%s4130_s9 + $0x78] sm:$0xff] %v2926_v63   ;;  %v2218_v8 = vadd.f32 %v2217_v2, %v2155_v58  ;;  %3052 = vst [vmem:[%s4129_s6 + $0x70] sm:$0xff] %v2761_v3   ;;  %v2156_v10 = vmul.f32 %v1378_v0, %v1378_v0  ;;  %v1876_v12 = vadd.f32 %v3227_v44, %v1875_v5 }
 0x134   :  { %v2011_v14 = vadd.f32 %v2010_v4, %v1948_v6  ;;  %3083 = vst [vmem:[%s4130_s9 + $0x70] sm:$0xff] %v2921_v7   ;;  %v1950_v17 = vmul.f32 %v3228_v55, %v3228_v55  ;;  %v2084_v18 = vadd.f32 %v3307_v13, %v2083_v9  ;;  %v2158_v23 = vmul.f32 %v3308_v60, %v3308_v60 }
 0x135   :  { %v3231_v15 = vpop.f32.mrb[32].mxu0  ;;  %v2219_v20 = vadd.f32 %v2218_v8, %v2156_v10  ;;  %v1877_v25 = vadd.f32 %v3228_v55, %v1876_v12 }
 0x136   :  { %v3311_v21 = vpop.f32.mrb[32].mxu1  ;;  %v622_v22 = vpop.f32.mrb[33].mxu0  ;;  %v2012_v24 = vadd.f32 %v2011_v14, %v1949_v11  ;;  %v2085_v30 = vadd.f32 %v3308_v60, %v2084_v18  ;;  %v1953_v13 = vmul.f32 %v3231_v15, %v3231_v15 }
 0x137   :  { %v1951_v26 = vmul.f32 %v622_v22, %v622_v22  ;;  %v1391_v27 = vpop.f32.mrb[33].mxu1  ;;  %v3232_v28 = vpop.f32.mrb[34].mxu0  ;;  %v2220_v29 = vadd.f32 %v2219_v20, %v2157_v16  ;;  %v1878_v35 = vadd.f32 %v1877_v25, %v622_v22  ;;  %v2161_v52 = vmul.f32 %v3311_v21, %v3311_v21 }
 0x138   :  { %v2159_v31 = vmul.f32 %v1391_v27, %v1391_v27  ;;  %v2776_v32 = vpack.c.bf16 %v3232_v28, %v3231_v15  ;;  %v3312_v33 = vpop.f32.mrb[34].mxu1  ;;  %v625_v34 = vpop.f32.mrb[35].mxu0  ;;  %v2013_v36 = vadd.f32 %v2012_v24, %v1950_v17  ;;  %v2086_v39 = vadd.f32 %v2085_v30, %v1391_v27 }
 0x139   :  { %v2936_v37 = vpack.c.bf16 %v3312_v33, %v3311_v21  ;;  %v1394_v38 = vpop.f32.mrb[35].mxu1  ;;  %v2221_v40 = vadd.f32 %v2220_v29, %v2158_v23  ;;  %v2771_v41 = vpack.c.bf16 %v625_v34, %v622_v22  ;;  %v1879_v43 = vadd.f32 %v1878_v35, %v625_v34 }
 0x13a   :  { %3055 = vst [vmem:[%s4129_s6 + $0x88] sm:$0xff] %v2776_v32   ;;  %v2014_v42 = vadd.f32 %v2013_v36, %v1951_v26  ;;  %v1952_v44 = vmul.f32 %v625_v34, %v625_v34  ;;  %v2931_v45 = vpack.c.bf16 %v1394_v38, %v1391_v27  ;;  %v2087_v47 = vadd.f32 %v2086_v39, %v1394_v38 }
 0x13b   :  { %3086 = vst [vmem:[%s4130_s9 + $0x88] sm:$0xff] %v2936_v37   ;;  %v2222_v46 = vadd.f32 %v2221_v40, %v2159_v31  ;;  %3054 = vst [vmem:[%s4129_s6 + $0x80] sm:$0xff] %v2771_v41   ;;  %v2160_v48 = vmul.f32 %v1394_v38, %v1394_v38  ;;  %v1880_v49 = vadd.f32 %v3231_v15, %v1879_v43 }
 0x13c   :  { %v2015_v50 = vadd.f32 %v2014_v42, %v1952_v44  ;;  %3085 = vst [vmem:[%s4130_s9 + $0x80] sm:$0xff] %v2931_v45   ;;  %v1954_v53 = vmul.f32 %v3232_v28, %v3232_v28  ;;  %v2088_v54 = vadd.f32 %v3311_v21, %v2087_v47  ;;  %v2162_v58 = vmul.f32 %v3312_v33, %v3312_v33 }
 0x13d   :  { %v3235_v51 = vpop.f32.mrb[36].mxu0  ;;  %v2223_v55 = vadd.f32 %v2222_v46, %v2160_v48  ;;  %v1881_v60 = vadd.f32 %v3232_v28, %v1880_v49 }
 0x13e   :  { %v3315_v56 = vpop.f32.mrb[36].mxu1  ;;  %v638_v57 = vpop.f32.mrb[37].mxu0  ;;  %v2016_v59 = vadd.f32 %v2015_v50, %v1953_v13  ;;  %v2089_v0 = vadd.f32 %v3312_v33, %v2088_v54  ;;  %v1957_v21 = vmul.f32 %v3235_v51, %v3235_v51 }
 0x13f   :  { %v1955_v19 = vmul.f32 %v638_v57, %v638_v57  ;;  %v1407_v61 = vpop.f32.mrb[37].mxu1  ;;  %v3236_v62 = vpop.f32.mrb[38].mxu0  ;;  %v2224_v63 = vadd.f32 %v2223_v55, %v2161_v52  ;;  %v1882_v5 = vadd.f32 %v1881_v60, %v638_v57  ;;  %v2165_v25 = vmul.f32 %v3315_v56, %v3315_v56 }
 0x140   :  { %v2163_v1 = vmul.f32 %v1407_v61, %v1407_v61  ;;  %v2786_v2 = vpack.c.bf16 %v3236_v62, %v3235_v51  ;;  %v3316_v3 = vpop.f32.mrb[38].mxu1  ;;  %v641_v4 = vpop.f32.mrb[39].mxu0  ;;  %v2017_v6 = vadd.f32 %v2016_v59, %v1954_v53  ;;  %v2090_v9 = vadd.f32 %v2089_v0, %v1407_v61 }
 0x141   :  { %v2946_v7 = vpack.c.bf16 %v3316_v3, %v3315_v56  ;;  %v1410_v8 = vpop.f32.mrb[39].mxu1  ;;  %v2225_v10 = vadd.f32 %v2224_v63, %v2162_v58  ;;  %v2781_v11 = vpack.c.bf16 %v641_v4, %v638_v57  ;;  %v1883_v14 = vadd.f32 %v1882_v5, %v641_v4 }
 0x142   :  { %3057 = vst [vmem:[%s4129_s6 + $0x98] sm:$0xff] %v2786_v2   ;;  %v2018_v12 = vadd.f32 %v2017_v6, %v1955_v19  ;;  %v1956_v15 = vmul.f32 %v641_v4, %v641_v4  ;;  %v2941_v16 = vpack.c.bf16 %v1410_v8, %v1407_v61  ;;  %v2091_v18 = vadd.f32 %v2090_v9, %v1410_v8 }
 0x143   :  { %3088 = vst [vmem:[%s4130_s9 + $0x98] sm:$0xff] %v2946_v7   ;;  %v2226_v17 = vadd.f32 %v2225_v10, %v2163_v1  ;;  %3056 = vst [vmem:[%s4129_s6 + $0x90] sm:$0xff] %v2781_v11   ;;  %v2164_v20 = vmul.f32 %v1410_v8, %v1410_v8  ;;  %v1884_v22 = vadd.f32 %v3235_v51, %v1883_v14 }
 0x144   :  { %v2019_v23 = vadd.f32 %v2018_v12, %v1956_v15  ;;  %3087 = vst [vmem:[%s4130_s9 + $0x90] sm:$0xff] %v2941_v16   ;;  %v1958_v26 = vmul.f32 %v3236_v62, %v3236_v62  ;;  %v2092_v27 = vadd.f32 %v3315_v56, %v2091_v18  ;;  %v2166_v31 = vmul.f32 %v3316_v3, %v3316_v3 }
 0x145   :  { %v3239_v24 = vpop.f32.mrb[40].mxu0  ;;  %v2227_v28 = vadd.f32 %v2226_v17, %v2164_v20  ;;  %v1885_v33 = vadd.f32 %v3236_v62, %v1884_v22 }
 0x146   :  { %v3319_v29 = vpop.f32.mrb[40].mxu1  ;;  %v654_v30 = vpop.f32.mrb[41].mxu0  ;;  %v2020_v32 = vadd.f32 %v2019_v23, %v1957_v21  ;;  %v2093_v38 = vadd.f32 %v3316_v3, %v2092_v27  ;;  %v1961_v56 = vmul.f32 %v3239_v24, %v3239_v24 }
 0x147   :  { %v1959_v34 = vmul.f32 %v654_v30, %v654_v30  ;;  %v1423_v35 = vpop.f32.mrb[41].mxu1  ;;  %v3240_v36 = vpop.f32.mrb[42].mxu0  ;;  %v2228_v37 = vadd.f32 %v2227_v28, %v2165_v25  ;;  %v1886_v43 = vadd.f32 %v1885_v33, %v654_v30  ;;  %v2169_v60 = vmul.f32 %v3319_v29, %v3319_v29 }
 0x148   :  { %v2167_v39 = vmul.f32 %v1423_v35, %v1423_v35  ;;  %v2796_v40 = vpack.c.bf16 %v3240_v36, %v3239_v24  ;;  %v3320_v41 = vpop.f32.mrb[42].mxu1  ;;  %v657_v42 = vpop.f32.mrb[43].mxu0  ;;  %v2021_v44 = vadd.f32 %v2020_v32, %v1958_v26  ;;  %v2094_v47 = vadd.f32 %v2093_v38, %v1423_v35 }
 0x149   :  { %v2956_v45 = vpack.c.bf16 %v3320_v41, %v3319_v29  ;;  %v1426_v46 = vpop.f32.mrb[43].mxu1  ;;  %v2229_v48 = vadd.f32 %v2228_v37, %v2166_v31  ;;  %v2791_v13 = vpack.c.bf16 %v657_v42, %v654_v30  ;;  %v1887_v50 = vadd.f32 %v1886_v43, %v657_v42 }
 0x14a   :  { %3059 = vst [vmem:[%s4129_s6 + $0xa8] sm:$0xff] %v2796_v40   ;;  %v2022_v49 = vadd.f32 %v2021_v44, %v1959_v34  ;;  %v1960_v51 = vmul.f32 %v657_v42, %v657_v42  ;;  %v2951_v52 = vpack.c.bf16 %v1426_v46, %v1423_v35  ;;  %v2095_v54 = vadd.f32 %v2094_v47, %v1426_v46 }
 0x14b   :  { %3090 = vst [vmem:[%s4130_s9 + $0xa8] sm:$0xff] %v2956_v45   ;;  %v2230_v53 = vadd.f32 %v2229_v48, %v2167_v39  ;;  %3058 = vst [vmem:[%s4129_s6 + $0xa0] sm:$0xff] %v2791_v13   ;;  %v2168_v55 = vmul.f32 %v1426_v46, %v1426_v46  ;;  %v1888_v57 = vadd.f32 %v3239_v24, %v1887_v50 }
 0x14c   :  { %v2023_v58 = vadd.f32 %v2022_v49, %v1960_v51  ;;  %3089 = vst [vmem:[%s4130_s9 + $0xa0] sm:$0xff] %v2951_v52   ;;  %v1962_v19 = vmul.f32 %v3240_v36, %v3240_v36  ;;  %v2096_v61 = vadd.f32 %v3319_v29, %v2095_v54  ;;  %v2170_v1 = vmul.f32 %v3320_v41, %v3320_v41 }
 0x14d   :  { %v3243_v59 = vpop.f32.mrb[44].mxu0  ;;  %v2231_v62 = vadd.f32 %v2230_v53, %v2168_v55  ;;  %v1889_v3 = vadd.f32 %v3240_v36, %v1888_v57 }
 0x14e   :  { %v3323_v63 = vpop.f32.mrb[44].mxu1  ;;  %v670_v0 = vpop.f32.mrb[45].mxu0  ;;  %v2024_v2 = vadd.f32 %v2023_v58, %v1961_v56  ;;  %v2097_v8 = vadd.f32 %v3320_v41, %v2096_v61  ;;  %v1965_v29 = vmul.f32 %v3243_v59, %v3243_v59 }
 0x14f   :  { %v1963_v4 = vmul.f32 %v670_v0, %v670_v0  ;;  %v1439_v5 = vpop.f32.mrb[45].mxu1  ;;  %v3244_v6 = vpop.f32.mrb[46].mxu0  ;;  %v2232_v7 = vadd.f32 %v2231_v62, %v2169_v60  ;;  %v1890_v14 = vadd.f32 %v1889_v3, %v670_v0  ;;  %v2173_v33 = vmul.f32 %v3323_v63, %v3323_v63 }
 0x150   :  { %v2171_v9 = vmul.f32 %v1439_v5, %v1439_v5  ;;  %v2806_v10 = vpack.c.bf16 %v3244_v6, %v3243_v59  ;;  %v3324_v11 = vpop.f32.mrb[46].mxu1  ;;  %v673_v12 = vpop.f32.mrb[47].mxu0  ;;  %v2025_v15 = vadd.f32 %v2024_v2, %v1962_v19  ;;  %v2098_v18 = vadd.f32 %v2097_v8, %v1439_v5 }
 0x151   :  { %v2966_v16 = vpack.c.bf16 %v3324_v11, %v3323_v63  ;;  %v1442_v17 = vpop.f32.mrb[47].mxu1  ;;  %v2233_v20 = vadd.f32 %v2232_v7, %v2170_v1  ;;  %v2801_v21 = vpack.c.bf16 %v673_v12, %v670_v0  ;;  %v1891_v23 = vadd.f32 %v1890_v14, %v673_v12 }
 0x152   :  { %3061 = vst [vmem:[%s4129_s6 + $0xb8] sm:$0xff] %v2806_v10   ;;  %v2026_v22 = vadd.f32 %v2025_v15, %v1963_v4  ;;  %v1964_v24 = vmul.f32 %v673_v12, %v673_v12  ;;  %v2961_v25 = vpack.c.bf16 %v1442_v17, %v1439_v5  ;;  %v2099_v27 = vadd.f32 %v2098_v18, %v1442_v17 }
 0x153   :  { %3092 = vst [vmem:[%s4130_s9 + $0xb8] sm:$0xff] %v2966_v16   ;;  %v2234_v26 = vadd.f32 %v2233_v20, %v2171_v9  ;;  %3060 = vst [vmem:[%s4129_s6 + $0xb0] sm:$0xff] %v2801_v21   ;;  %v2172_v28 = vmul.f32 %v1442_v17, %v1442_v17  ;;  %v1892_v30 = vadd.f32 %v3243_v59, %v1891_v23 }
 0x154   :  { %v2027_v31 = vadd.f32 %v2026_v22, %v1964_v24  ;;  %3091 = vst [vmem:[%s4130_s9 + $0xb0] sm:$0xff] %v2961_v25   ;;  %v1966_v34 = vmul.f32 %v3244_v6, %v3244_v6  ;;  %v2100_v35 = vadd.f32 %v3323_v63, %v2099_v27  ;;  %v2174_v39 = vmul.f32 %v3324_v11, %v3324_v11 }
 0x155   :  { %v3247_v32 = vpop.f32.mrb[48].mxu0  ;;  %v2235_v36 = vadd.f32 %v2234_v26, %v2172_v28  ;;  %v1893_v41 = vadd.f32 %v3244_v6, %v1892_v30 }
 0x156   :  { %v3327_v37 = vpop.f32.mrb[48].mxu1  ;;  %v686_v38 = vpop.f32.mrb[49].mxu0  ;;  %v2028_v40 = vadd.f32 %v2027_v31, %v1965_v29  ;;  %v2101_v46 = vadd.f32 %v3324_v11, %v2100_v35  ;;  %v1969_v63 = vmul.f32 %v3247_v32, %v3247_v32 }
 0x157   :  { %v1967_v42 = vmul.f32 %v686_v38, %v686_v38  ;;  %v1455_v43 = vpop.f32.mrb[49].mxu1  ;;  %v3248_v44 = vpop.f32.mrb[50].mxu0  ;;  %v2236_v45 = vadd.f32 %v2235_v36, %v2173_v33  ;;  %v1894_v50 = vadd.f32 %v1893_v41, %v686_v38  ;;  %v2177_v3 = vmul.f32 %v3327_v37, %v3327_v37 }
 0x158   :  { %v2175_v47 = vmul.f32 %v1455_v43, %v1455_v43  ;;  %v2816_v48 = vpack.c.bf16 %v3248_v44, %v3247_v32  ;;  %v3328_v13 = vpop.f32.mrb[50].mxu1  ;;  %v689_v49 = vpop.f32.mrb[51].mxu0  ;;  %v2029_v51 = vadd.f32 %v2028_v40, %v1966_v34  ;;  %v2102_v54 = vadd.f32 %v2101_v46, %v1455_v43 }
 0x159   :  { %v2976_v52 = vpack.c.bf16 %v3328_v13, %v3327_v37  ;;  %v1458_v53 = vpop.f32.mrb[51].mxu1  ;;  %v2237_v55 = vadd.f32 %v2236_v45, %v2174_v39  ;;  %v2811_v56 = vpack.c.bf16 %v689_v49, %v686_v38  ;;  %v1895_v58 = vadd.f32 %v1894_v50, %v689_v49 }
 0x15a   :  { %3063 = vst [vmem:[%s4129_s6 + $0xc8] sm:$0xff] %v2816_v48   ;;  %v2030_v57 = vadd.f32 %v2029_v51, %v1967_v42  ;;  %v1968_v59 = vmul.f32 %v689_v49, %v689_v49  ;;  %v2971_v60 = vpack.c.bf16 %v1458_v53, %v1455_v43  ;;  %v2103_v61 = vadd.f32 %v2102_v54, %v1458_v53 }
 0x15b   :  { %3094 = vst [vmem:[%s4130_s9 + $0xc8] sm:$0xff] %v2976_v52   ;;  %v2238_v19 = vadd.f32 %v2237_v55, %v2175_v47  ;;  %3062 = vst [vmem:[%s4129_s6 + $0xc0] sm:$0xff] %v2811_v56   ;;  %v2176_v62 = vmul.f32 %v1458_v53, %v1458_v53  ;;  %v1896_v0 = vadd.f32 %v3247_v32, %v1895_v58 }
 0x15c   :  { %v2031_v1 = vadd.f32 %v2030_v57, %v1968_v59  ;;  %3093 = vst [vmem:[%s4130_s9 + $0xc0] sm:$0xff] %v2971_v60   ;;  %v1970_v4 = vmul.f32 %v3248_v44, %v3248_v44  ;;  %v2104_v5 = vadd.f32 %v3327_v37, %v2103_v61  ;;  %v2178_v9 = vmul.f32 %v3328_v13, %v3328_v13 }
 0x15d   :  { %v3251_v2 = vpop.f32.mrb[52].mxu0  ;;  %v2239_v6 = vadd.f32 %v2238_v19, %v2176_v62  ;;  %v1897_v11 = vadd.f32 %v3248_v44, %v1896_v0 }
 0x15e   :  { %v3331_v7 = vpop.f32.mrb[52].mxu1  ;;  %v702_v8 = vpop.f32.mrb[53].mxu0  ;;  %v2032_v10 = vadd.f32 %v2031_v1, %v1969_v63  ;;  %v2105_v17 = vadd.f32 %v3328_v13, %v2104_v5  ;;  %v1973_v37 = vmul.f32 %v3251_v2, %v3251_v2 }
 0x15f   :  { %v1971_v12 = vmul.f32 %v702_v8, %v702_v8  ;;  %v1471_v14 = vpop.f32.mrb[53].mxu1  ;;  %v3252_v15 = vpop.f32.mrb[54].mxu0  ;;  %v2240_v16 = vadd.f32 %v2239_v6, %v2177_v3  ;;  %v1898_v23 = vadd.f32 %v1897_v11, %v702_v8  ;;  %v2181_v41 = vmul.f32 %v3331_v7, %v3331_v7 }
 0x160   :  { %v2179_v18 = vmul.f32 %v1471_v14, %v1471_v14  ;;  %v2826_v20 = vpack.c.bf16 %v3252_v15, %v3251_v2  ;;  %v3332_v21 = vpop.f32.mrb[54].mxu1  ;;  %v705_v22 = vpop.f32.mrb[55].mxu0  ;;  %v2033_v24 = vadd.f32 %v2032_v10, %v1970_v4  ;;  %v2106_v27 = vadd.f32 %v2105_v17, %v1471_v14 }
 0x161   :  { %v2986_v25 = vpack.c.bf16 %v3332_v21, %v3331_v7  ;;  %v1474_v26 = vpop.f32.mrb[55].mxu1  ;;  %v2241_v28 = vadd.f32 %v2240_v16, %v2178_v9  ;;  %v2821_v29 = vpack.c.bf16 %v705_v22, %v702_v8  ;;  %v1899_v31 = vadd.f32 %v1898_v23, %v705_v22 }
 0x162   :  { %3065 = vst [vmem:[%s4129_s6 + $0xd8] sm:$0xff] %v2826_v20   ;;  %v2034_v30 = vadd.f32 %v2033_v24, %v1971_v12  ;;  %v1972_v32 = vmul.f32 %v705_v22, %v705_v22  ;;  %v2981_v33 = vpack.c.bf16 %v1474_v26, %v1471_v14  ;;  %v2107_v35 = vadd.f32 %v2106_v27, %v1474_v26 }
 0x163   :  { %3096 = vst [vmem:[%s4130_s9 + $0xd8] sm:$0xff] %v2986_v25   ;;  %v2242_v34 = vadd.f32 %v2241_v28, %v2179_v18  ;;  %3064 = vst [vmem:[%s4129_s6 + $0xd0] sm:$0xff] %v2821_v29   ;;  %v2180_v36 = vmul.f32 %v1474_v26, %v1474_v26  ;;  %v1900_v38 = vadd.f32 %v3251_v2, %v1899_v31 }
 0x164   :  { %v2035_v39 = vadd.f32 %v2034_v30, %v1972_v32  ;;  %3095 = vst [vmem:[%s4130_s9 + $0xd0] sm:$0xff] %v2981_v33   ;;  %v1974_v42 = vmul.f32 %v3252_v15, %v3252_v15  ;;  %v2108_v43 = vadd.f32 %v3331_v7, %v2107_v35  ;;  %v2182_v47 = vmul.f32 %v3332_v21, %v3332_v21 }
 0x165   :  { %v3255_v40 = vpop.f32.mrb[56].mxu0  ;;  %v2243_v44 = vadd.f32 %v2242_v34, %v2180_v36  ;;  %v1901_v13 = vadd.f32 %v3252_v15, %v1900_v38 }
 0x166   :  { %v3335_v45 = vpop.f32.mrb[56].mxu1  ;;  %v718_v46 = vpop.f32.mrb[57].mxu0  ;;  %v2036_v48 = vadd.f32 %v2035_v39, %v1973_v37  ;;  %v2109_v53 = vadd.f32 %v3332_v21, %v2108_v43  ;;  %v1977_v7 = vmul.f32 %v3255_v40, %v3255_v40 }
 0x167   :  { %v1975_v49 = vmul.f32 %v718_v46, %v718_v46  ;;  %v1487_v50 = vpop.f32.mrb[57].mxu1  ;;  %v3256_v51 = vpop.f32.mrb[58].mxu0  ;;  %v2244_v52 = vadd.f32 %v2243_v44, %v2181_v41  ;;  %v1902_v58 = vadd.f32 %v1901_v13, %v718_v46  ;;  %v2185_v11 = vmul.f32 %v3335_v45, %v3335_v45 }
 0x168   :  { %v2183_v54 = vmul.f32 %v1487_v50, %v1487_v50  ;;  %v2836_v55 = vpack.c.bf16 %v3256_v51, %v3255_v40  ;;  %v3336_v56 = vpop.f32.mrb[58].mxu1  ;;  %v721_v57 = vpop.f32.mrb[59].mxu0  ;;  %v2037_v59 = vadd.f32 %v2036_v48, %v1974_v42  ;;  %v2110_v61 = vadd.f32 %v2109_v53, %v1487_v50 }
 0x169   :  { %v2996_v60 = vpack.c.bf16 %v3336_v56, %v3335_v45  ;;  %v1490_v19 = vpop.f32.mrb[59].mxu1  ;;  %v2245_v62 = vadd.f32 %v2244_v52, %v2182_v47  ;;  %v2831_v63 = vpack.c.bf16 %v721_v57, %v718_v46  ;;  %v1903_v1 = vadd.f32 %v1902_v58, %v721_v57 }
 0x16a   :  { %3067 = vst [vmem:[%s4129_s6 + $0xe8] sm:$0xff] %v2836_v55   ;;  %v2038_v0 = vadd.f32 %v2037_v59, %v1975_v49  ;;  %v1976_v2 = vmul.f32 %v721_v57, %v721_v57  ;;  %v2991_v3 = vpack.c.bf16 %v1490_v19, %v1487_v50  ;;  %v2111_v5 = vadd.f32 %v2110_v61, %v1490_v19 }
 0x16b   :  { %3098 = vst [vmem:[%s4130_s9 + $0xe8] sm:$0xff] %v2996_v60   ;;  %v2246_v4 = vadd.f32 %v2245_v62, %v2183_v54  ;;  %3066 = vst [vmem:[%s4129_s6 + $0xe0] sm:$0xff] %v2831_v63   ;;  %v2184_v6 = vmul.f32 %v1490_v19, %v1490_v19  ;;  %v1904_v8 = vadd.f32 %v3255_v40, %v1903_v1 }
 0x16c   :  { %v2039_v9 = vadd.f32 %v2038_v0, %v1976_v2  ;;  %3097 = vst [vmem:[%s4130_s9 + $0xe0] sm:$0xff] %v2991_v3   ;;  %v1978_v12 = vmul.f32 %v3256_v51, %v3256_v51  ;;  %v2112_v14 = vadd.f32 %v3335_v45, %v2111_v5  ;;  %v2186_v18 = vmul.f32 %v3336_v56, %v3336_v56 }
 0x16d   :  { %v3259_v10 = vpop.f32.mrb[60].mxu0  ;;  %v2247_v15 = vadd.f32 %v2246_v4, %v2184_v6  ;;  %v1905_v21 = vadd.f32 %v3256_v51, %v1904_v8 }
 0x16e   :  { %v3339_v16 = vpop.f32.mrb[60].mxu1  ;;  %v734_v17 = vpop.f32.mrb[61].mxu0  ;;  %v2040_v20 = vadd.f32 %v2039_v9, %v1977_v7  ;;  %v2113_v26 = vadd.f32 %v3336_v56, %v2112_v14  ;;  %v1981_v45 = vmul.f32 %v3259_v10, %v3259_v10  ;;  %v1846_v9 = vld [vmem:[%s4127_s7] sm:$0x1] }
 0x16f   :  { %v1979_v22 = vmul.f32 %v734_v17, %v734_v17  ;;  %v1503_v23 = vpop.f32.mrb[61].mxu1  ;;  %v3260_v24 = vpop.f32.mrb[62].mxu0  ;;  %v2248_v25 = vadd.f32 %v2247_v15, %v2185_v11  ;;  %v1906_v31 = vadd.f32 %v1905_v21, %v734_v17  ;;  %v2189_v48 = vmul.f32 %v3339_v16, %v3339_v16  ;;  %v2054_v15 = vld [vmem:[%s4131_s10] sm:$0x1] }
 0x170   :  { %v2187_v27 = vmul.f32 %v1503_v23, %v1503_v23  ;;  %v2846_v28 = vpack.c.bf16 %v3260_v24, %v3259_v10  ;;  %v3340_v29 = vpop.f32.mrb[62].mxu1  ;;  %v737_v30 = vpop.f32.mrb[63].mxu0  ;;  %v2041_v32 = vadd.f32 %v2040_v20, %v1978_v12  ;;  %v2114_v35 = vadd.f32 %v2113_v26, %v1503_v23 }
 0x171   :  { %v3006_v33 = vpack.c.bf16 %v3340_v29, %v3339_v16  ;;  %v1506_v34 = vpop.f32.mrb[63].mxu1  ;;  %v2249_v36 = vadd.f32 %v2248_v25, %v2186_v18  ;;  %v2841_v37 = vpack.c.bf16 %v737_v30, %v734_v17  ;;  %v1907_v39 = vadd.f32 %v1906_v31, %v737_v30 }
 0x172   :  { %3069 = vst [vmem:[%s4129_s6 + $0xf8] sm:$0xff] %v2846_v28   ;;  %v2042_v38 = vadd.f32 %v2041_v32, %v1979_v22  ;;  %v1980_v40 = vmul.f32 %v737_v30, %v737_v30  ;;  %v3001_v41 = vpack.c.bf16 %v1506_v34, %v1503_v23  ;;  %v2115_v43 = vadd.f32 %v2114_v35, %v1506_v34  ;;  %v2126_v22 = vld [vmem:[%s4132_s11] sm:$0x1] }
 0x173   :  { %3100 = vst [vmem:[%s4130_s9 + $0xf8] sm:$0xff] %v3006_v33   ;;  %v2250_v42 = vadd.f32 %v2249_v36, %v2187_v27  ;;  %3068 = vst [vmem:[%s4129_s6 + $0xf0] sm:$0xff] %v2841_v37   ;;  %v2188_v44 = vmul.f32 %v1506_v34, %v1506_v34  ;;  %v1908_v46 = vadd.f32 %v3259_v10, %v1907_v39 }
 0x174   :  { %v2043_v47 = vadd.f32 %v2042_v38, %v1980_v40  ;;  %3099 = vst [vmem:[%s4130_s9 + $0xf0] sm:$0xff] %v3001_v41   ;;  %v2116_v13 = vadd.f32 %v3339_v16, %v2115_v43  ;;  %v1982_v50 = vmul.f32 %v3260_v24, %v3260_v24  ;;  %v2190_v53 = vmul.f32 %v3340_v29, %v3340_v29  ;;  %v1918_v16 = vld [vmem:[%s4128_s8] sm:$0x1] }
 0x175   :  { %v2251_v49 = vadd.f32 %v2250_v42, %v2188_v44  ;;  %v1909_v51 = vadd.f32 %v3260_v24, %v1908_v46 }
 0x176   :  { %v2044_v52 = vadd.f32 %v2043_v47, %v1981_v45  ;;  %v2117_v54 = vadd.f32 %v3340_v29, %v2116_v13 }
 0x177   :  { %v2252_v55 = vadd.f32 %v2251_v49, %v2189_v48  ;;  %v1910_v56 = vrot.slane %v1909_v51, 4 }
 0x178   :  { %v2045_v57 = vadd.f32 %v2044_v52, %v1982_v50  ;;  %v2118_v58 = vrot.slane %v2117_v54, 4 }
 0x179   :  { %v2253_v59 = vadd.f32 %v2252_v55, %v2190_v53  ;;  %v1911_v60 = vadd.f32 %v1910_v56, %v1909_v51 }
 0x17a   :  { %v2046_v19 = vrot.slane %v2045_v57, 4  ;;  %v2119_v61 = vadd.f32 %v2118_v58, %v2117_v54 }
 0x17b   :  { %v2254_v62 = vrot.slane %v2253_v59, 4  ;;  %v1912_v63 = vrot.slane %v1911_v60, 2 }
 0x17c   :  { %v2047_v0 = vadd.f32 %v2046_v19, %v2045_v57  ;;  %v2120_v1 = vrot.slane %v2119_v61, 2 }
 0x17d   :  { %v2255_v2 = vadd.f32 %v2254_v62, %v2253_v59  ;;  %v1913_v3 = vadd.f32 %v1912_v63, %v1911_v60 }
 0x17e   :  { %v2048_v4 = vrot.slane %v2047_v0, 2  ;;  %v2121_v5 = vadd.f32 %v2120_v1, %v2119_v61 }
 0x17f   :  { %v2256_v6 = vrot.slane %v2255_v2, 2  ;;  %v1914_v7 = vrot.slane %v1913_v3, 1 }
 0x180   :  { %v2049_v8 = vadd.f32 %v2048_v4, %v2047_v0  ;;  %v2122_v10 = vrot.slane %v2121_v5, 1 }
 0x181   :  { %v2257_v11 = vadd.f32 %v2256_v6, %v2255_v2  ;;  %v1915_v12 = vadd.f32 %v1914_v7, %v1913_v3 }
 0x182   :  { %v2050_v14 = vrot.slane %v2049_v8, 1  ;;  %v2123_v17 = vadd.f32 %v2122_v10, %v2121_v5 }
 0x183   :  { %v2258_v18 = vrot.slane %v2257_v11, 1  ;;  %v1916_v20 = vadd.f32 %v1915_v12, %v1846_v9 }
 0x184   :  { %v2051_v21 = vadd.f32 %v2050_v14, %v2049_v8  ;;  %v2124_v23 = vadd.f32 %v2123_v17, %v2054_v15 }
 0x185   :  { %v2259_v24 = vadd.f32 %v2258_v18, %v2257_v11  ;;  %1917 = vst [vmem:[%s4127_s7] sm:$0x1] %v1916_v20 }
 0x186   :  { %v2052_v25 = vadd.f32 %v2051_v21, %v1918_v16  ;;  %2125 = vst [vmem:[%s4131_s10] sm:$0x1] %v2124_v23 }
 0x187   :  { %v2260_v26 = vadd.f32 %v2259_v24, %v2126_v22 }
 0x188   :  { %2053 = vst [vmem:[%s4128_s8] sm:$0x1] %v2052_v25 }
 0x189   :  { %2261 = vst [vmem:[%s4132_s11] sm:$0x1] %v2260_v26 }

// kernel: bottleneck_forward.7
= control target key start
LH: loop header
LB: loop body
LE: loop exit
PB: predicated region body
PF: predicated region fallthrough
CT: control target
= control target key end

     0   :  { %s1800_s0 = inlined_call_operand.vmem [shape: bf16[512,128], index: 0, kind: input, shape index: {}]   ;;  %s1801_s1 = inlined_call_operand.vmem [shape: f32[1,128], index: 1, kind: input, shape index: {}]   ;;  %s1802_s2 = inlined_call_operand.vmem [shape: f32[1,128], index: 2, kind: input, shape index: {}]   ;;  %s1803_s3 = inlined_call_operand.vmem [shape: bf16[512,128], index: 3, kind: input, shape index: {}]   ;;  %s1804_s4 = inlined_call_operand.vmem [shape: f32[1,128], index: 4, kind: input, shape index: {}]   ;;  %s1805_s5 = inlined_call_operand.vmem [shape: f32[1,128], index: 5, kind: input, shape index: {}]   ;;  %s1806_s6 = inlined_call_operand.vmem [shape: f32[512,128], index: 6, kind: output, shape index: {}]  }
   0x1   :  { %v764_v0 = vld [vmem:[%s1800_s0] sm:$0xff]   ;;  %v1019_v9 = vld [vmem:[%s1800_s0 + $0x8] sm:$0xff]   ;;  %v1020_v20 = vld [vmem:[%s1800_s0 + $0x10] sm:$0xff]  }
   0x2   :  { %v1126_v1 = vld [vmem:[%s1801_s1] ss:$0 sm:$0xff]  ;;  %v765_v2 = vunpack.c.l.bf16 %v764_v0  ;;  %v766_v5 = vunpack.c.h.bf16 %v764_v0  ;;  %v1050_v10 = vld [vmem:[%s1803_s3 + $0x8] sm:$0xff]   ;;  %v769_v14 = vunpack.c.l.bf16 %v1019_v9  ;;  %v770_v18 = vunpack.c.h.bf16 %v1019_v9  ;;  %v1051_v21 = vld [vmem:[%s1803_s3 + $0x10] sm:$0xff]  }
   0x3   :  { %v892_v3 = vld [vmem:[%s1803_s3] sm:$0xff]   ;;  %v897_v15 = vunpack.c.l.bf16 %v1050_v10  ;;  %v898_v19 = vunpack.c.h.bf16 %v1050_v10  ;;  %v773_v32 = vunpack.c.l.bf16 %v1020_v20  ;;  %v901_v33 = vunpack.c.l.bf16 %v1051_v21  ;;  %v1021_v42 = vld [vmem:[%s1800_s0 + $0x18] sm:$0xff]  }
   0x4   :  { %v1134_v4 = vld [vmem:[%s1804_s4] ss:$0 sm:$0xff]  ;;  %v893_v7 = vunpack.c.l.bf16 %v892_v3  ;;  %v894_v8 = vunpack.c.h.bf16 %v892_v3  ;;  %v158_v11 = vmul.f32 %v765_v2, %v1126_v1  ;;  %v159_v13 = vmul.f32 %v766_v5, %v1126_v1  ;;  %v1052_v43 = vld [vmem:[%s1803_s3 + $0x18] sm:$0xff]  }
   0x5   :  { %v1139_v6 = vld [vmem:[%s1802_s2] ss:$0 sm:$0xff]  ;;  %v160_v24 = vmul.f32 %v769_v14, %v1126_v1  ;;  %v430_v25 = vmul.f32 %v897_v15, %v1134_v4  ;;  %v161_v28 = vmul.f32 %v770_v18, %v1126_v1  ;;  %v431_v29 = vmul.f32 %v898_v19, %v1134_v4  ;;  %v1023_v14 = vld [vmem:[%s1800_s0 + $0x28] sm:$0xff]  }
   0x6   :  { %v1151_v12 = vld [vmem:[%s1805_s5] ss:$0 sm:$0xff]  ;;  %v428_v16 = vmul.f32 %v893_v7, %v1134_v4  ;;  %v429_v17 = vmul.f32 %v894_v8, %v1134_v4  ;;  %v229_v22 = vadd.f32 %v1139_v6, %v158_v11  ;;  %v230_v23 = vadd.f32 %v1139_v6, %v159_v13  ;;  %v1054_v19 = vld [vmem:[%s1803_s3 + $0x28] sm:$0xff]  }
   0x7   :  { %v231_v30 = vadd.f32 %v1139_v6, %v160_v24  ;;  %v501_v31 = vadd.f32 %v1151_v12, %v430_v25  ;;  %v232_v36 = vadd.f32 %v1139_v6, %v161_v28  ;;  %v502_v37 = vadd.f32 %v1151_v12, %v431_v29  ;;  %v1022_v52 = vld [vmem:[%s1800_s0 + $0x20] sm:$0xff]  }
   0x8   :  { %v499_v26 = vadd.f32 %v1151_v12, %v428_v16  ;;  %v500_v27 = vadd.f32 %v1151_v12, %v429_v17  ;;  %v162_v39 = vmul.f32 %v773_v32, %v1126_v1  ;;  %v432_v40 = vmul.f32 %v901_v33, %v1134_v4  ;;  %v1053_v57 = vld [vmem:[%s1803_s3 + $0x20] sm:$0xff]   ;;  %v1024_v32 = vld [vmem:[%s1800_s0 + $0x30] sm:$0xff]  }
   0x9   :  { %v565_v38 = vadd.f32 %v501_v31, %v231_v30  ;;  %v774_v41 = vunpack.c.h.bf16 %v1020_v20  ;;  %v566_v46 = vadd.f32 %v502_v37, %v232_v36  ;;  %v902_v47 = vunpack.c.h.bf16 %v1051_v21  ;;  %v1055_v33 = vld [vmem:[%s1803_s3 + $0x30] sm:$0xff]  }
   0xa   :  { %v563_v34 = vadd.f32 %v499_v26, %v229_v22  ;;  %v564_v35 = vadd.f32 %v500_v27, %v230_v23  ;;  %v233_v49 = vadd.f32 %v1139_v6, %v162_v39  ;;  %v503_v50 = vadd.f32 %v1151_v12, %v432_v40 }
   0xb   :  { %v629_v48 = vmax.f32 %v565_v38, 0.0  ;;  %v163_v51 = vmul.f32 %v774_v41, %v1126_v1  ;;  %v630_v53 = vmax.f32 %v566_v46, 0.0  ;;  %v433_v54 = vmul.f32 %v902_v47, %v1134_v4  ;;  %v1025_v46 = vld [vmem:[%s1800_s0 + $0x38] sm:$0xff]  }
   0xc   :  { %v627_v44 = vmax.f32 %v563_v34, 0.0  ;;  %v628_v45 = vmax.f32 %v564_v35, 0.0  ;;  %v777_v55 = vunpack.c.l.bf16 %v1021_v42  ;;  %v905_v56 = vunpack.c.l.bf16 %v1052_v43 }
   0xd   :  { %693 = vst [vmem:[%s1806_s6 + $0x10] sm:$0xff] %v629_v48  ;;  %v567_v58 = vadd.f32 %v503_v50, %v233_v49  ;;  %v234_v59 = vadd.f32 %v1139_v6, %v163_v51  ;;  %v778_v60 = vunpack.c.h.bf16 %v1021_v42  ;;  %v906_v61 = vunpack.c.h.bf16 %v1052_v43  ;;  %694 = vst [vmem:[%s1806_s6 + $0x18] sm:$0xff] %v630_v53 }
   0xe   :  { %691 = vst [vmem:[%s1806_s6] sm:$0xff] %v627_v44  ;;  %692 = vst [vmem:[%s1806_s6 + $0x8] sm:$0xff] %v628_v45  ;;  %v504_v62 = vadd.f32 %v1151_v12, %v433_v54  ;;  %v164_v63 = vmul.f32 %v777_v55, %v1126_v1  ;;  %v434_v0 = vmul.f32 %v905_v56, %v1134_v4  ;;  %v781_v2 = vunpack.c.l.bf16 %v1022_v52  ;;  %v1056_v55 = vld [vmem:[%s1803_s3 + $0x38] sm:$0xff]  }
   0xf   :  { %v631_v3 = vmax.f32 %v567_v58, 0.0  ;;  %v165_v5 = vmul.f32 %v778_v60, %v1126_v1  ;;  %v435_v7 = vmul.f32 %v906_v61, %v1134_v4  ;;  %v909_v8 = vunpack.c.l.bf16 %v1053_v57 }
  0x10   :  { %v568_v9 = vadd.f32 %v504_v62, %v234_v59  ;;  %v235_v10 = vadd.f32 %v1139_v6, %v164_v63  ;;  %v505_v11 = vadd.f32 %v1151_v12, %v434_v0  ;;  %v166_v13 = vmul.f32 %v781_v2, %v1126_v1 }
  0x11   :  { %695 = vst [vmem:[%s1806_s6 + $0x20] sm:$0xff] %v631_v3  ;;  %v236_v15 = vadd.f32 %v1139_v6, %v165_v5  ;;  %v506_v16 = vadd.f32 %v1151_v12, %v435_v7  ;;  %v436_v17 = vmul.f32 %v909_v8, %v1134_v4  ;;  %v782_v18 = vunpack.c.h.bf16 %v1022_v52  ;;  %v1026_v7 = vld [vmem:[%s1800_s0 + $0x40] sm:$0xff]  }
  0x12   :  { %v632_v20 = vmax.f32 %v568_v9, 0.0  ;;  %v569_v21 = vadd.f32 %v505_v11, %v235_v10  ;;  %v237_v22 = vadd.f32 %v1139_v6, %v166_v13  ;;  %v910_v23 = vunpack.c.h.bf16 %v1053_v57  ;;  %v1057_v13 = vld [vmem:[%s1803_s3 + $0x40] sm:$0xff]  }
  0x13   :  { %v570_v24 = vadd.f32 %v506_v16, %v236_v15  ;;  %v507_v25 = vadd.f32 %v1151_v12, %v436_v17  ;;  %v167_v26 = vmul.f32 %v782_v18, %v1126_v1  ;;  %v785_v27 = vunpack.c.l.bf16 %v1023_v14 }
  0x14   :  { %696 = vst [vmem:[%s1806_s6 + $0x28] sm:$0xff] %v632_v20  ;;  %v633_v28 = vmax.f32 %v569_v21, 0.0  ;;  %v437_v29 = vmul.f32 %v910_v23, %v1134_v4  ;;  %v913_v30 = vunpack.c.l.bf16 %v1054_v19  ;;  %v786_v31 = vunpack.c.h.bf16 %v1023_v14 }
  0x15   :  { %v634_v34 = vmax.f32 %v570_v24, 0.0  ;;  %v571_v35 = vadd.f32 %v507_v25, %v237_v22  ;;  %v238_v36 = vadd.f32 %v1139_v6, %v167_v26  ;;  %v168_v37 = vmul.f32 %v785_v27, %v1126_v1  ;;  %v1027_v26 = vld [vmem:[%s1800_s0 + $0x48] sm:$0xff]  }
  0x16   :  { %697 = vst [vmem:[%s1806_s6 + $0x30] sm:$0xff] %v633_v28  ;;  %v508_v38 = vadd.f32 %v1151_v12, %v437_v29  ;;  %v438_v39 = vmul.f32 %v913_v30, %v1134_v4  ;;  %v169_v40 = vmul.f32 %v786_v31, %v1126_v1  ;;  %v914_v41 = vunpack.c.h.bf16 %v1054_v19  ;;  %v1058_v27 = vld [vmem:[%s1803_s3 + $0x48] sm:$0xff]  }
  0x17   :  { %698 = vst [vmem:[%s1806_s6 + $0x38] sm:$0xff] %v634_v34  ;;  %v635_v42 = vmax.f32 %v571_v35, 0.0  ;;  %v239_v43 = vadd.f32 %v1139_v6, %v168_v37  ;;  %v789_v44 = vunpack.c.l.bf16 %v1024_v32  ;;  %v917_v45 = vunpack.c.l.bf16 %v1055_v33 }
  0x18   :  { %v572_v47 = vadd.f32 %v508_v38, %v238_v36  ;;  %v509_v48 = vadd.f32 %v1151_v12, %v438_v39  ;;  %v240_v49 = vadd.f32 %v1139_v6, %v169_v40  ;;  %v439_v50 = vmul.f32 %v914_v41, %v1134_v4  ;;  %v1028_v40 = vld [vmem:[%s1800_s0 + $0x50] sm:$0xff]  }
  0x19   :  { %699 = vst [vmem:[%s1806_s6 + $0x40] sm:$0xff] %v635_v42  ;;  %v170_v51 = vmul.f32 %v789_v44, %v1126_v1  ;;  %v440_v52 = vmul.f32 %v917_v45, %v1134_v4  ;;  %v790_v53 = vunpack.c.h.bf16 %v1024_v32  ;;  %v918_v54 = vunpack.c.h.bf16 %v1055_v33 }
  0x1a   :  { %v636_v56 = vmax.f32 %v572_v47, 0.0  ;;  %v573_v57 = vadd.f32 %v509_v48, %v239_v43  ;;  %v510_v58 = vadd.f32 %v1151_v12, %v439_v50  ;;  %v793_v59 = vunpack.c.l.bf16 %v1025_v46 }
  0x1b   :  { %v241_v60 = vadd.f32 %v1139_v6, %v170_v51  ;;  %v511_v61 = vadd.f32 %v1151_v12, %v440_v52  ;;  %v171_v62 = vmul.f32 %v790_v53, %v1126_v1  ;;  %v441_v63 = vmul.f32 %v918_v54, %v1134_v4 }
  0x1c   :  { %700 = vst [vmem:[%s1806_s6 + $0x48] sm:$0xff] %v636_v56  ;;  %v637_v0 = vmax.f32 %v573_v57, 0.0  ;;  %v574_v2 = vadd.f32 %v510_v58, %v240_v49  ;;  %v172_v3 = vmul.f32 %v793_v59, %v1126_v1  ;;  %v921_v5 = vunpack.c.l.bf16 %v1056_v55  ;;  %v1059_v49 = vld [vmem:[%s1803_s3 + $0x50] sm:$0xff]  }
  0x1d   :  { %v575_v8 = vadd.f32 %v511_v61, %v241_v60  ;;  %v242_v9 = vadd.f32 %v1139_v6, %v171_v62  ;;  %v512_v10 = vadd.f32 %v1151_v12, %v441_v63  ;;  %v794_v11 = vunpack.c.h.bf16 %v1025_v46  ;;  %v1029_v62 = vld [vmem:[%s1800_s0 + $0x58] sm:$0xff]  }
  0x1e   :  { %701 = vst [vmem:[%s1806_s6 + $0x50] sm:$0xff] %v637_v0  ;;  %v638_v14 = vmax.f32 %v574_v2, 0.0  ;;  %v243_v15 = vadd.f32 %v1139_v6, %v172_v3  ;;  %v442_v16 = vmul.f32 %v921_v5, %v1134_v4  ;;  %v922_v17 = vunpack.c.h.bf16 %v1056_v55  ;;  %v1060_v63 = vld [vmem:[%s1803_s3 + $0x58] sm:$0xff]  }
  0x1f   :  { %v639_v18 = vmax.f32 %v575_v8, 0.0  ;;  %v576_v19 = vadd.f32 %v512_v10, %v242_v9  ;;  %v173_v20 = vmul.f32 %v794_v11, %v1126_v1  ;;  %v797_v21 = vunpack.c.l.bf16 %v1026_v7 }
  0x20   :  { %702 = vst [vmem:[%s1806_s6 + $0x58] sm:$0xff] %v638_v14  ;;  %v513_v22 = vadd.f32 %v1151_v12, %v442_v16  ;;  %v443_v23 = vmul.f32 %v922_v17, %v1134_v4  ;;  %v925_v24 = vunpack.c.l.bf16 %v1057_v13  ;;  %v798_v25 = vunpack.c.h.bf16 %v1026_v7 }
  0x21   :  { %703 = vst [vmem:[%s1806_s6 + $0x60] sm:$0xff] %v639_v18  ;;  %v640_v28 = vmax.f32 %v576_v19, 0.0  ;;  %v244_v29 = vadd.f32 %v1139_v6, %v173_v20  ;;  %v174_v30 = vmul.f32 %v797_v21, %v1126_v1  ;;  %v926_v31 = vunpack.c.h.bf16 %v1057_v13  ;;  %v1030_v20 = vld [vmem:[%s1800_s0 + $0x60] sm:$0xff]  }
  0x22   :  { %v577_v32 = vadd.f32 %v513_v22, %v243_v15  ;;  %v514_v33 = vadd.f32 %v1151_v12, %v443_v23  ;;  %v444_v34 = vmul.f32 %v925_v24, %v1134_v4  ;;  %v175_v35 = vmul.f32 %v798_v25, %v1126_v1  ;;  %v1061_v25 = vld [vmem:[%s1803_s3 + $0x60] sm:$0xff]  }
  0x23   :  { %704 = vst [vmem:[%s1806_s6 + $0x68] sm:$0xff] %v640_v28  ;;  %v245_v36 = vadd.f32 %v1139_v6, %v174_v30  ;;  %v445_v37 = vmul.f32 %v926_v31, %v1134_v4  ;;  %v801_v38 = vunpack.c.l.bf16 %v1027_v26  ;;  %v929_v39 = vunpack.c.l.bf16 %v1058_v27 }
  0x24   :  { %v641_v41 = vmax.f32 %v577_v32, 0.0  ;;  %v578_v42 = vadd.f32 %v514_v33, %v244_v29  ;;  %v515_v43 = vadd.f32 %v1151_v12, %v444_v34  ;;  %v246_v44 = vadd.f32 %v1139_v6, %v175_v35  ;;  %v1031_v34 = vld [vmem:[%s1800_s0 + $0x68] sm:$0xff]  }
  0x25   :  { %v516_v45 = vadd.f32 %v1151_v12, %v445_v37  ;;  %v176_v46 = vmul.f32 %v801_v38, %v1126_v1  ;;  %v446_v47 = vmul.f32 %v929_v39, %v1134_v4  ;;  %v802_v48 = vunpack.c.h.bf16 %v1027_v26 }
  0x26   :  { %705 = vst [vmem:[%s1806_s6 + $0x70] sm:$0xff] %v641_v41  ;;  %v642_v50 = vmax.f32 %v578_v42, 0.0  ;;  %v579_v51 = vadd.f32 %v515_v43, %v245_v36  ;;  %v930_v52 = vunpack.c.h.bf16 %v1058_v27  ;;  %v805_v53 = vunpack.c.l.bf16 %v1028_v40  ;;  %v1062_v43 = vld [vmem:[%s1803_s3 + $0x68] sm:$0xff]  }
  0x27   :  { %v580_v54 = vadd.f32 %v516_v45, %v246_v44  ;;  %v247_v55 = vadd.f32 %v1139_v6, %v176_v46  ;;  %v517_v56 = vadd.f32 %v1151_v12, %v446_v47  ;;  %v177_v57 = vmul.f32 %v802_v48, %v1126_v1 }
  0x28   :  { %706 = vst [vmem:[%s1806_s6 + $0x78] sm:$0xff] %v642_v50  ;;  %v643_v58 = vmax.f32 %v579_v51, 0.0  ;;  %v447_v59 = vmul.f32 %v930_v52, %v1134_v4  ;;  %v178_v60 = vmul.f32 %v805_v53, %v1126_v1  ;;  %v933_v61 = vunpack.c.l.bf16 %v1059_v49 }
  0x29   :  { %v644_v0 = vmax.f32 %v580_v54, 0.0  ;;  %v581_v2 = vadd.f32 %v517_v56, %v247_v55  ;;  %v248_v3 = vadd.f32 %v1139_v6, %v177_v57  ;;  %v806_v5 = vunpack.c.h.bf16 %v1028_v40  ;;  %v1032_v56 = vld [vmem:[%s1800_s0 + $0x70] sm:$0xff]  }
  0x2a   :  { %707 = vst [vmem:[%s1806_s6 + $0x80] sm:$0xff] %v643_v58  ;;  %v518_v7 = vadd.f32 %v1151_v12, %v447_v59  ;;  %v249_v8 = vadd.f32 %v1139_v6, %v178_v60  ;;  %v448_v9 = vmul.f32 %v933_v61, %v1134_v4  ;;  %v934_v10 = vunpack.c.h.bf16 %v1059_v49  ;;  %v1063_v57 = vld [vmem:[%s1803_s3 + $0x70] sm:$0xff]  }
  0x2b   :  { %708 = vst [vmem:[%s1806_s6 + $0x88] sm:$0xff] %v644_v0  ;;  %v645_v11 = vmax.f32 %v581_v2, 0.0  ;;  %v179_v13 = vmul.f32 %v806_v5, %v1126_v1  ;;  %v809_v14 = vunpack.c.l.bf16 %v1029_v62  ;;  %v937_v15 = vunpack.c.l.bf16 %v1060_v63 }
  0x2c   :  { %v582_v16 = vadd.f32 %v518_v7, %v248_v3  ;;  %v519_v17 = vadd.f32 %v1151_v12, %v448_v9  ;;  %v449_v18 = vmul.f32 %v934_v10, %v1134_v4  ;;  %v810_v19 = vunpack.c.h.bf16 %v1029_v62 }
  0x2d   :  { %709 = vst [vmem:[%s1806_s6 + $0x90] sm:$0xff] %v645_v11  ;;  %v250_v21 = vadd.f32 %v1139_v6, %v179_v13  ;;  %v180_v22 = vmul.f32 %v809_v14, %v1126_v1  ;;  %v450_v23 = vmul.f32 %v937_v15, %v1134_v4  ;;  %v938_v24 = vunpack.c.h.bf16 %v1060_v63  ;;  %v1033_v14 = vld [vmem:[%s1800_s0 + $0x78] sm:$0xff]  }
  0x2e   :  { %v646_v26 = vmax.f32 %v582_v16, 0.0  ;;  %v583_v27 = vadd.f32 %v519_v17, %v249_v8  ;;  %v520_v28 = vadd.f32 %v1151_v12, %v449_v18  ;;  %v181_v29 = vmul.f32 %v810_v19, %v1126_v1  ;;  %v1064_v19 = vld [vmem:[%s1803_s3 + $0x78] sm:$0xff]  }
  0x2f   :  { %v251_v30 = vadd.f32 %v1139_v6, %v180_v22  ;;  %v521_v31 = vadd.f32 %v1151_v12, %v450_v23  ;;  %v451_v32 = vmul.f32 %v938_v24, %v1134_v4  ;;  %v813_v33 = vunpack.c.l.bf16 %v1030_v20 }
  0x30   :  { %710 = vst [vmem:[%s1806_s6 + $0x98] sm:$0xff] %v646_v26  ;;  %v647_v35 = vmax.f32 %v583_v27, 0.0  ;;  %v584_v36 = vadd.f32 %v520_v28, %v250_v21  ;;  %v252_v37 = vadd.f32 %v1139_v6, %v181_v29  ;;  %v941_v38 = vunpack.c.l.bf16 %v1061_v25  ;;  %v1034_v28 = vld [vmem:[%s1800_s0 + $0x80] sm:$0xff]  }
  0x31   :  { %v585_v39 = vadd.f32 %v521_v31, %v251_v30  ;;  %v522_v40 = vadd.f32 %v1151_v12, %v451_v32  ;;  %v182_v41 = vmul.f32 %v813_v33, %v1126_v1  ;;  %v814_v42 = vunpack.c.h.bf16 %v1030_v20  ;;  %v1065_v33 = vld [vmem:[%s1803_s3 + $0x80] sm:$0xff]  }
  0x32   :  { %711 = vst [vmem:[%s1806_s6 + $0xa0] sm:$0xff] %v647_v35  ;;  %v648_v44 = vmax.f32 %v584_v36, 0.0  ;;  %v452_v45 = vmul.f32 %v941_v38, %v1134_v4  ;;  %v942_v46 = vunpack.c.h.bf16 %v1061_v25  ;;  %v817_v47 = vunpack.c.l.bf16 %v1031_v34 }
  0x33   :  { %v649_v48 = vmax.f32 %v585_v39, 0.0  ;;  %v586_v49 = vadd.f32 %v522_v40, %v252_v37  ;;  %v253_v50 = vadd.f32 %v1139_v6, %v182_v41  ;;  %v183_v51 = vmul.f32 %v814_v42, %v1126_v1 }
  0x34   :  { %712 = vst [vmem:[%s1806_s6 + $0xa8] sm:$0xff] %v648_v44  ;;  %v523_v52 = vadd.f32 %v1151_v12, %v452_v45  ;;  %v453_v53 = vmul.f32 %v942_v46, %v1134_v4  ;;  %v184_v54 = vmul.f32 %v817_v47, %v1126_v1  ;;  %v945_v55 = vunpack.c.l.bf16 %v1062_v43 }
  0x35   :  { %713 = vst [vmem:[%s1806_s6 + $0xb0] sm:$0xff] %v649_v48  ;;  %v650_v58 = vmax.f32 %v586_v49, 0.0  ;;  %v254_v59 = vadd.f32 %v1139_v6, %v183_v51  ;;  %v818_v60 = vunpack.c.h.bf16 %v1031_v34  ;;  %v946_v61 = vunpack.c.h.bf16 %v1062_v43 }
  0x36   :  { %v587_v62 = vadd.f32 %v523_v52, %v253_v50  ;;  %v524_v63 = vadd.f32 %v1151_v12, %v453_v53  ;;  %v255_v0 = vadd.f32 %v1139_v6, %v184_v54  ;;  %v454_v2 = vmul.f32 %v945_v55, %v1134_v4  ;;  %v1035_v50 = vld [vmem:[%s1800_s0 + $0x88] sm:$0xff]  }
  0x37   :  { %714 = vst [vmem:[%s1806_s6 + $0xb8] sm:$0xff] %v650_v58  ;;  %v185_v3 = vmul.f32 %v818_v60, %v1126_v1  ;;  %v455_v5 = vmul.f32 %v946_v61, %v1134_v4  ;;  %v821_v7 = vunpack.c.l.bf16 %v1032_v56  ;;  %v949_v8 = vunpack.c.l.bf16 %v1063_v57  ;;  %v1066_v55 = vld [vmem:[%s1803_s3 + $0x88] sm:$0xff]  }
  0x38   :  { %v651_v9 = vmax.f32 %v587_v62, 0.0  ;;  %v588_v10 = vadd.f32 %v524_v63, %v254_v59  ;;  %v525_v11 = vadd.f32 %v1151_v12, %v454_v2  ;;  %v822_v13 = vunpack.c.h.bf16 %v1032_v56 }
  0x39   :  { %v256_v15 = vadd.f32 %v1139_v6, %v185_v3  ;;  %v526_v16 = vadd.f32 %v1151_v12, %v455_v5  ;;  %v186_v17 = vmul.f32 %v821_v7, %v1126_v1  ;;  %v456_v18 = vmul.f32 %v949_v8, %v1134_v4  ;;  %v1036_v7 = vld [vmem:[%s1800_s0 + $0x90] sm:$0xff]  }
  0x3a   :  { %715 = vst [vmem:[%s1806_s6 + $0xc0] sm:$0xff] %v651_v9  ;;  %v652_v20 = vmax.f32 %v588_v10, 0.0  ;;  %v589_v21 = vadd.f32 %v525_v11, %v255_v0  ;;  %v187_v22 = vmul.f32 %v822_v13, %v1126_v1  ;;  %v950_v23 = vunpack.c.h.bf16 %v1063_v57  ;;  %v1067_v13 = vld [vmem:[%s1803_s3 + $0x90] sm:$0xff]  }
  0x3b   :  { %v590_v24 = vadd.f32 %v526_v16, %v256_v15  ;;  %v257_v25 = vadd.f32 %v1139_v6, %v186_v17  ;;  %v527_v26 = vadd.f32 %v1151_v12, %v456_v18  ;;  %v825_v27 = vunpack.c.l.bf16 %v1033_v14 }
  0x3c   :  { %716 = vst [vmem:[%s1806_s6 + $0xc8] sm:$0xff] %v652_v20  ;;  %v653_v29 = vmax.f32 %v589_v21, 0.0  ;;  %v258_v30 = vadd.f32 %v1139_v6, %v187_v22  ;;  %v457_v31 = vmul.f32 %v950_v23, %v1134_v4  ;;  %v953_v32 = vunpack.c.l.bf16 %v1064_v19  ;;  %v1037_v22 = vld [vmem:[%s1800_s0 + $0x98] sm:$0xff]  }
  0x3d   :  { %v654_v34 = vmax.f32 %v590_v24, 0.0  ;;  %v591_v35 = vadd.f32 %v527_v26, %v257_v25  ;;  %v188_v36 = vmul.f32 %v825_v27, %v1126_v1  ;;  %v826_v37 = vunpack.c.h.bf16 %v1033_v14  ;;  %v1068_v27 = vld [vmem:[%s1803_s3 + $0x98] sm:$0xff]  }
  0x3e   :  { %717 = vst [vmem:[%s1806_s6 + $0xd0] sm:$0xff] %v653_v29  ;;  %v528_v38 = vadd.f32 %v1151_v12, %v457_v31  ;;  %v458_v39 = vmul.f32 %v953_v32, %v1134_v4  ;;  %v954_v40 = vunpack.c.h.bf16 %v1064_v19  ;;  %v829_v41 = vunpack.c.l.bf16 %v1034_v28 }
  0x3f   :  { %718 = vst [vmem:[%s1806_s6 + $0xd8] sm:$0xff] %v654_v34  ;;  %v655_v42 = vmax.f32 %v591_v35, 0.0  ;;  %v259_v43 = vadd.f32 %v1139_v6, %v188_v36  ;;  %v189_v44 = vmul.f32 %v826_v37, %v1126_v1  ;;  %v957_v45 = vunpack.c.l.bf16 %v1065_v33 }
  0x40   :  { %v592_v46 = vadd.f32 %v528_v38, %v258_v30  ;;  %v529_v47 = vadd.f32 %v1151_v12, %v458_v39  ;;  %v459_v48 = vmul.f32 %v954_v40, %v1134_v4  ;;  %v190_v49 = vmul.f32 %v829_v41, %v1126_v1 }
  0x41   :  { %719 = vst [vmem:[%s1806_s6 + $0xe0] sm:$0xff] %v655_v42  ;;  %v260_v51 = vadd.f32 %v1139_v6, %v189_v44  ;;  %v460_v52 = vmul.f32 %v957_v45, %v1134_v4  ;;  %v830_v53 = vunpack.c.h.bf16 %v1034_v28  ;;  %v958_v54 = vunpack.c.h.bf16 %v1065_v33  ;;  %v1038_v44 = vld [vmem:[%s1800_s0 + $0xa0] sm:$0xff]  }
  0x42   :  { %v656_v56 = vmax.f32 %v592_v46, 0.0  ;;  %v593_v57 = vadd.f32 %v529_v47, %v259_v43  ;;  %v530_v58 = vadd.f32 %v1151_v12, %v459_v48  ;;  %v261_v59 = vadd.f32 %v1139_v6, %v190_v49  ;;  %v1069_v49 = vld [vmem:[%s1803_s3 + $0xa0] sm:$0xff]  }
  0x43   :  { %v531_v60 = vadd.f32 %v1151_v12, %v460_v52  ;;  %v191_v61 = vmul.f32 %v830_v53, %v1126_v1  ;;  %v461_v62 = vmul.f32 %v958_v54, %v1134_v4  ;;  %v833_v63 = vunpack.c.l.bf16 %v1035_v50 }
  0x44   :  { %720 = vst [vmem:[%s1806_s6 + $0xe8] sm:$0xff] %v656_v56  ;;  %v657_v0 = vmax.f32 %v593_v57, 0.0  ;;  %v594_v2 = vadd.f32 %v530_v58, %v260_v51  ;;  %v961_v3 = vunpack.c.l.bf16 %v1066_v55  ;;  %v834_v5 = vunpack.c.h.bf16 %v1035_v50 }
  0x45   :  { %v595_v8 = vadd.f32 %v531_v60, %v261_v59  ;;  %v262_v9 = vadd.f32 %v1139_v6, %v191_v61  ;;  %v532_v10 = vadd.f32 %v1151_v12, %v461_v62  ;;  %v192_v11 = vmul.f32 %v833_v63, %v1126_v1  ;;  %v1039_v62 = vld [vmem:[%s1800_s0 + $0xa8] sm:$0xff]  }
  0x46   :  { %721 = vst [vmem:[%s1806_s6 + $0xf0] sm:$0xff] %v657_v0  ;;  %v658_v14 = vmax.f32 %v594_v2, 0.0  ;;  %v462_v15 = vmul.f32 %v961_v3, %v1134_v4  ;;  %v193_v16 = vmul.f32 %v834_v5, %v1126_v1  ;;  %v962_v17 = vunpack.c.h.bf16 %v1066_v55  ;;  %v1070_v63 = vld [vmem:[%s1803_s3 + $0xa8] sm:$0xff]  }
  0x47   :  { %v659_v18 = vmax.f32 %v595_v8, 0.0  ;;  %v596_v19 = vadd.f32 %v532_v10, %v262_v9  ;;  %v263_v20 = vadd.f32 %v1139_v6, %v192_v11  ;;  %v837_v21 = vunpack.c.l.bf16 %v1036_v7 }
  0x48   :  { %722 = vst [vmem:[%s1806_s6 + $0xf8] sm:$0xff] %v658_v14  ;;  %v533_v23 = vadd.f32 %v1151_v12, %v462_v15  ;;  %v264_v24 = vadd.f32 %v1139_v6, %v193_v16  ;;  %v463_v25 = vmul.f32 %v962_v17, %v1134_v4  ;;  %v965_v26 = vunpack.c.l.bf16 %v1067_v13  ;;  %v1040_v16 = vld [vmem:[%s1800_s0 + $0xb0] sm:$0xff]  }
  0x49   :  { %723 = vst [vmem:[%s1806_s6 + $0x100] sm:$0xff] %v659_v18  ;;  %v660_v28 = vmax.f32 %v596_v19, 0.0  ;;  %v194_v29 = vmul.f32 %v837_v21, %v1126_v1  ;;  %v838_v30 = vunpack.c.h.bf16 %v1036_v7  ;;  %v966_v31 = vunpack.c.h.bf16 %v1067_v13 }
  0x4a   :  { %v597_v32 = vadd.f32 %v533_v23, %v263_v20  ;;  %v534_v33 = vadd.f32 %v1151_v12, %v463_v25  ;;  %v464_v34 = vmul.f32 %v965_v26, %v1134_v4  ;;  %v841_v35 = vunpack.c.l.bf16 %v1037_v22  ;;  %v1071_v25 = vld [vmem:[%s1803_s3 + $0xb0] sm:$0xff]  }
  0x4b   :  { %724 = vst [vmem:[%s1806_s6 + $0x108] sm:$0xff] %v660_v28  ;;  %v265_v36 = vadd.f32 %v1139_v6, %v194_v29  ;;  %v195_v37 = vmul.f32 %v838_v30, %v1126_v1  ;;  %v465_v38 = vmul.f32 %v966_v31, %v1134_v4  ;;  %v969_v39 = vunpack.c.l.bf16 %v1068_v27 }
  0x4c   :  { %v661_v40 = vmax.f32 %v597_v32, 0.0  ;;  %v598_v41 = vadd.f32 %v534_v33, %v264_v24  ;;  %v535_v42 = vadd.f32 %v1151_v12, %v464_v34  ;;  %v196_v43 = vmul.f32 %v841_v35, %v1126_v1 }
  0x4d   :  { %v266_v45 = vadd.f32 %v1139_v6, %v195_v37  ;;  %v536_v46 = vadd.f32 %v1151_v12, %v465_v38  ;;  %v466_v47 = vmul.f32 %v969_v39, %v1134_v4  ;;  %v842_v48 = vunpack.c.h.bf16 %v1037_v22  ;;  %v1041_v38 = vld [vmem:[%s1800_s0 + $0xb8] sm:$0xff]  }
  0x4e   :  { %725 = vst [vmem:[%s1806_s6 + $0x110] sm:$0xff] %v661_v40  ;;  %v662_v50 = vmax.f32 %v598_v41, 0.0  ;;  %v599_v51 = vadd.f32 %v535_v42, %v265_v36  ;;  %v267_v52 = vadd.f32 %v1139_v6, %v196_v43  ;;  %v970_v53 = vunpack.c.h.bf16 %v1068_v27  ;;  %v1072_v43 = vld [vmem:[%s1803_s3 + $0xb8] sm:$0xff]  }
  0x4f   :  { %v600_v54 = vadd.f32 %v536_v46, %v266_v45  ;;  %v537_v55 = vadd.f32 %v1151_v12, %v466_v47  ;;  %v197_v56 = vmul.f32 %v842_v48, %v1126_v1  ;;  %v845_v57 = vunpack.c.l.bf16 %v1038_v44 }
  0x50   :  { %726 = vst [vmem:[%s1806_s6 + $0x118] sm:$0xff] %v662_v50  ;;  %v663_v58 = vmax.f32 %v599_v51, 0.0  ;;  %v467_v59 = vmul.f32 %v970_v53, %v1134_v4  ;;  %v973_v60 = vunpack.c.l.bf16 %v1069_v49  ;;  %v846_v61 = vunpack.c.h.bf16 %v1038_v44 }
  0x51   :  { %v664_v0 = vmax.f32 %v600_v54, 0.0  ;;  %v601_v2 = vadd.f32 %v537_v55, %v267_v52  ;;  %v268_v3 = vadd.f32 %v1139_v6, %v197_v56  ;;  %v198_v5 = vmul.f32 %v845_v57, %v1126_v1  ;;  %v1042_v56 = vld [vmem:[%s1800_s0 + $0xc0] sm:$0xff]  }
  0x52   :  { %727 = vst [vmem:[%s1806_s6 + $0x120] sm:$0xff] %v663_v58  ;;  %v538_v7 = vadd.f32 %v1151_v12, %v467_v59  ;;  %v468_v8 = vmul.f32 %v973_v60, %v1134_v4  ;;  %v199_v9 = vmul.f32 %v846_v61, %v1126_v1  ;;  %v974_v10 = vunpack.c.h.bf16 %v1069_v49  ;;  %v1073_v57 = vld [vmem:[%s1803_s3 + $0xc0] sm:$0xff]  }
  0x53   :  { %728 = vst [vmem:[%s1806_s6 + $0x128] sm:$0xff] %v664_v0  ;;  %v665_v11 = vmax.f32 %v601_v2, 0.0  ;;  %v269_v13 = vadd.f32 %v1139_v6, %v198_v5  ;;  %v849_v14 = vunpack.c.l.bf16 %v1039_v62  ;;  %v977_v15 = vunpack.c.l.bf16 %v1070_v63 }
  0x54   :  { %v602_v17 = vadd.f32 %v538_v7, %v268_v3  ;;  %v539_v18 = vadd.f32 %v1151_v12, %v468_v8  ;;  %v270_v19 = vadd.f32 %v1139_v6, %v199_v9  ;;  %v469_v20 = vmul.f32 %v974_v10, %v1134_v4  ;;  %v1043_v9 = vld [vmem:[%s1800_s0 + $0xc8] sm:$0xff]  }
  0x55   :  { %729 = vst [vmem:[%s1806_s6 + $0x130] sm:$0xff] %v665_v11  ;;  %v200_v21 = vmul.f32 %v849_v14, %v1126_v1  ;;  %v470_v22 = vmul.f32 %v977_v15, %v1134_v4  ;;  %v850_v23 = vunpack.c.h.bf16 %v1039_v62  ;;  %v978_v24 = vunpack.c.h.bf16 %v1070_v63 }
  0x56   :  { %v666_v26 = vmax.f32 %v602_v17, 0.0  ;;  %v603_v27 = vadd.f32 %v539_v18, %v269_v13  ;;  %v540_v28 = vadd.f32 %v1151_v12, %v469_v20  ;;  %v853_v29 = vunpack.c.l.bf16 %v1040_v16 }
  0x57   :  { %v271_v30 = vadd.f32 %v1139_v6, %v200_v21  ;;  %v541_v31 = vadd.f32 %v1151_v12, %v470_v22  ;;  %v201_v32 = vmul.f32 %v850_v23, %v1126_v1  ;;  %v471_v33 = vmul.f32 %v978_v24, %v1134_v4 }
  0x58   :  { %730 = vst [vmem:[%s1806_s6 + $0x138] sm:$0xff] %v666_v26  ;;  %v667_v34 = vmax.f32 %v603_v27, 0.0  ;;  %v604_v35 = vadd.f32 %v540_v28, %v270_v19  ;;  %v202_v36 = vmul.f32 %v853_v29, %v1126_v1  ;;  %v981_v37 = vunpack.c.l.bf16 %v1071_v25  ;;  %v1074_v19 = vld [vmem:[%s1803_s3 + $0xc8] sm:$0xff]  }
  0x59   :  { %v605_v39 = vadd.f32 %v541_v31, %v271_v30  ;;  %v272_v40 = vadd.f32 %v1139_v6, %v201_v32  ;;  %v542_v41 = vadd.f32 %v1151_v12, %v471_v33  ;;  %v854_v42 = vunpack.c.h.bf16 %v1040_v16  ;;  %v1044_v32 = vld [vmem:[%s1800_s0 + $0xd0] sm:$0xff]  }
  0x5a   :  { %731 = vst [vmem:[%s1806_s6 + $0x140] sm:$0xff] %v667_v34  ;;  %v668_v44 = vmax.f32 %v604_v35, 0.0  ;;  %v273_v45 = vadd.f32 %v1139_v6, %v202_v36  ;;  %v472_v46 = vmul.f32 %v981_v37, %v1134_v4  ;;  %v982_v47 = vunpack.c.h.bf16 %v1071_v25  ;;  %v1075_v33 = vld [vmem:[%s1803_s3 + $0xd0] sm:$0xff]  }
  0x5b   :  { %v669_v48 = vmax.f32 %v605_v39, 0.0  ;;  %v606_v49 = vadd.f32 %v542_v41, %v272_v40  ;;  %v203_v50 = vmul.f32 %v854_v42, %v1126_v1  ;;  %v857_v51 = vunpack.c.l.bf16 %v1041_v38 }
  0x5c   :  { %732 = vst [vmem:[%s1806_s6 + $0x148] sm:$0xff] %v668_v44  ;;  %v543_v52 = vadd.f32 %v1151_v12, %v472_v46  ;;  %v473_v53 = vmul.f32 %v982_v47, %v1134_v4  ;;  %v985_v54 = vunpack.c.l.bf16 %v1072_v43  ;;  %v858_v55 = vunpack.c.h.bf16 %v1041_v38 }
  0x5d   :  { %733 = vst [vmem:[%s1806_s6 + $0x150] sm:$0xff] %v669_v48  ;;  %v670_v58 = vmax.f32 %v606_v49, 0.0  ;;  %v274_v59 = vadd.f32 %v1139_v6, %v203_v50  ;;  %v204_v60 = vmul.f32 %v857_v51, %v1126_v1  ;;  %v986_v61 = vunpack.c.h.bf16 %v1072_v43  ;;  %v1654_v48 = vld [vmem:[%s1804_s4] ss:$0 sm:$0xff]  ;;  %v1045_v49 = vld [vmem:[%s1800_s0 + $0xd8] sm:$0xff]  }
  0x5e   :  { %v607_v62 = vadd.f32 %v543_v52, %v273_v45  ;;  %v544_v63 = vadd.f32 %v1151_v12, %v473_v53  ;;  %v474_v0 = vmul.f32 %v985_v54, %v1134_v4  ;;  %v205_v2 = vmul.f32 %v858_v55, %v1126_v1  ;;  %v1672_v50 = vld [vmem:[%s1801_s1] ss:$0 sm:$0xff]  ;;  %v1076_v54 = vld [vmem:[%s1803_s3 + $0xd8] sm:$0xff]  }
  0x5f   :  { %734 = vst [vmem:[%s1806_s6 + $0x158] sm:$0xff] %v670_v58  ;;  %v275_v3 = vadd.f32 %v1139_v6, %v204_v60  ;;  %v475_v5 = vmul.f32 %v986_v61, %v1134_v4  ;;  %v861_v7 = vunpack.c.l.bf16 %v1042_v56  ;;  %v989_v8 = vunpack.c.l.bf16 %v1073_v57 }
  0x60   :  { %v671_v10 = vmax.f32 %v607_v62, 0.0  ;;  %v608_v11 = vadd.f32 %v544_v63, %v274_v59  ;;  %v545_v13 = vadd.f32 %v1151_v12, %v474_v0  ;;  %v276_v14 = vadd.f32 %v1139_v6, %v205_v2  ;;  %v1046_v0 = vld [vmem:[%s1800_s0 + $0xe0] sm:$0xff]  }
  0x61   :  { %v546_v15 = vadd.f32 %v1151_v12, %v475_v5  ;;  %v206_v16 = vmul.f32 %v861_v7, %v1126_v1  ;;  %v476_v17 = vmul.f32 %v989_v8, %v1134_v4  ;;  %v862_v18 = vunpack.c.h.bf16 %v1042_v56 }
  0x62   :  { %735 = vst [vmem:[%s1806_s6 + $0x160] sm:$0xff] %v671_v10  ;;  %v672_v20 = vmax.f32 %v608_v11, 0.0  ;;  %v609_v21 = vadd.f32 %v545_v13, %v275_v3  ;;  %v990_v22 = vunpack.c.h.bf16 %v1073_v57  ;;  %v865_v23 = vunpack.c.l.bf16 %v1043_v9  ;;  %v1682_v57 = vld [vmem:[%s1805_s5] ss:$0 sm:$0xff] }
  0x63   :  { %v610_v24 = vadd.f32 %v546_v15, %v276_v14  ;;  %v277_v25 = vadd.f32 %v1139_v6, %v206_v16  ;;  %v547_v26 = vadd.f32 %v1151_v12, %v476_v17  ;;  %v207_v27 = vmul.f32 %v862_v18, %v1126_v1  ;;  %v1077_v13 = vld [vmem:[%s1803_s3 + $0xe0] sm:$0xff]  }
  0x64   :  { %736 = vst [vmem:[%s1806_s6 + $0x168] sm:$0xff] %v672_v20  ;;  %v673_v28 = vmax.f32 %v609_v21, 0.0  ;;  %v477_v29 = vmul.f32 %v990_v22, %v1134_v4  ;;  %v208_v30 = vmul.f32 %v865_v23, %v1126_v1  ;;  %v993_v31 = vunpack.c.l.bf16 %v1074_v19 }
  0x65   :  { %v674_v34 = vmax.f32 %v610_v24, 0.0  ;;  %v611_v35 = vadd.f32 %v547_v26, %v277_v25  ;;  %v278_v36 = vadd.f32 %v1139_v6, %v207_v27  ;;  %v866_v37 = vunpack.c.h.bf16 %v1043_v9  ;;  %v1047_v26 = vld [vmem:[%s1800_s0 + $0xe8] sm:$0xff]  }
  0x66   :  { %737 = vst [vmem:[%s1806_s6 + $0x170] sm:$0xff] %v673_v28  ;;  %v548_v38 = vadd.f32 %v1151_v12, %v477_v29  ;;  %v279_v39 = vadd.f32 %v1139_v6, %v208_v30  ;;  %v478_v40 = vmul.f32 %v993_v31, %v1134_v4  ;;  %v994_v41 = vunpack.c.h.bf16 %v1074_v19  ;;  %v1078_v27 = vld [vmem:[%s1803_s3 + $0xe8] sm:$0xff]  }
  0x67   :  { %738 = vst [vmem:[%s1806_s6 + $0x178] sm:$0xff] %v674_v34  ;;  %v675_v42 = vmax.f32 %v611_v35, 0.0  ;;  %v209_v43 = vmul.f32 %v866_v37, %v1126_v1  ;;  %v869_v44 = vunpack.c.l.bf16 %v1044_v32  ;;  %v997_v45 = vunpack.c.l.bf16 %v1075_v33  ;;  %v1666_v1 = vld [vmem:[%s1802_s2] ss:$0 sm:$0xff] }
  0x68   :  { %v612_v46 = vadd.f32 %v548_v38, %v278_v36  ;;  %v549_v47 = vadd.f32 %v1151_v12, %v478_v40  ;;  %v479_v4 = vmul.f32 %v1654_v48, %v994_v41  ;;  %v870_v6 = vunpack.c.h.bf16 %v1044_v32 }
  0x69   :  { %739 = vst [vmem:[%s1806_s6 + $0x180] sm:$0xff] %v675_v42  ;;  %v280_v12 = vadd.f32 %v1666_v1, %v209_v43  ;;  %v210_v51 = vmul.f32 %v1672_v50, %v869_v44  ;;  %v480_v52 = vmul.f32 %v1654_v48, %v997_v45  ;;  %v998_v53 = vunpack.c.h.bf16 %v1075_v33  ;;  %v1048_v44 = vld [vmem:[%s1800_s0 + $0xf0] sm:$0xff]  }
  0x6a   :  { %v676_v55 = vmax.f32 %v612_v46, 0.0  ;;  %v613_v56 = vadd.f32 %v549_v47, %v279_v39  ;;  %v550_v58 = vadd.f32 %v1682_v57, %v479_v4  ;;  %v211_v59 = vmul.f32 %v1672_v50, %v870_v6  ;;  %v1079_v6 = vld [vmem:[%s1803_s3 + $0xf0] sm:$0xff]  }
  0x6b   :  { %v281_v60 = vadd.f32 %v1666_v1, %v210_v51  ;;  %v551_v61 = vadd.f32 %v1682_v57, %v480_v52  ;;  %v481_v62 = vmul.f32 %v1654_v48, %v998_v53  ;;  %v873_v63 = vunpack.c.l.bf16 %v1045_v49 }
  0x6c   :  { %740 = vst [vmem:[%s1806_s6 + $0x188] sm:$0xff] %v676_v55  ;;  %v677_v2 = vmax.f32 %v613_v56, 0.0  ;;  %v614_v3 = vadd.f32 %v550_v58, %v280_v12  ;;  %v282_v5 = vadd.f32 %v1666_v1, %v211_v59  ;;  %v1001_v7 = vunpack.c.l.bf16 %v1076_v54  ;;  %v1049_v58 = vld [vmem:[%s1800_s0 + $0xf8] sm:$0xff]  }
  0x6d   :  { %v615_v8 = vadd.f32 %v551_v61, %v281_v60  ;;  %v552_v9 = vadd.f32 %v1682_v57, %v481_v62  ;;  %v212_v10 = vmul.f32 %v1672_v50, %v873_v63  ;;  %v874_v11 = vunpack.c.h.bf16 %v1045_v49  ;;  %v1080_v63 = vld [vmem:[%s1803_s3 + $0xf8] sm:$0xff]  }
  0x6e   :  { %741 = vst [vmem:[%s1806_s6 + $0x190] sm:$0xff] %v677_v2  ;;  %v678_v14 = vmax.f32 %v614_v3, 0.0  ;;  %v482_v15 = vmul.f32 %v1654_v48, %v1001_v7  ;;  %v1002_v16 = vunpack.c.h.bf16 %v1076_v54  ;;  %v877_v17 = vunpack.c.l.bf16 %v1046_v0 }
  0x6f   :  { %v679_v18 = vmax.f32 %v615_v8, 0.0  ;;  %v616_v19 = vadd.f32 %v552_v9, %v282_v5  ;;  %v283_v20 = vadd.f32 %v1666_v1, %v212_v10  ;;  %v213_v21 = vmul.f32 %v1672_v50, %v874_v11 }
  0x70   :  { %742 = vst [vmem:[%s1806_s6 + $0x198] sm:$0xff] %v678_v14  ;;  %v553_v22 = vadd.f32 %v1682_v57, %v482_v15  ;;  %v483_v23 = vmul.f32 %v1654_v48, %v1002_v16  ;;  %v214_v24 = vmul.f32 %v1672_v50, %v877_v17  ;;  %v1005_v25 = vunpack.c.l.bf16 %v1077_v13 }
  0x71   :  { %743 = vst [vmem:[%s1806_s6 + $0x1a0] sm:$0xff] %v679_v18  ;;  %v680_v28 = vmax.f32 %v616_v19, 0.0  ;;  %v284_v29 = vadd.f32 %v1666_v1, %v213_v21  ;;  %v878_v30 = vunpack.c.h.bf16 %v1046_v0  ;;  %v1006_v31 = vunpack.c.h.bf16 %v1077_v13 }
  0x72   :  { %v617_v32 = vadd.f32 %v553_v22, %v283_v20  ;;  %v554_v33 = vadd.f32 %v1682_v57, %v483_v23  ;;  %v285_v34 = vadd.f32 %v1666_v1, %v214_v24  ;;  %v484_v35 = vmul.f32 %v1654_v48, %v1005_v25 }
  0x73   :  { %744 = vst [vmem:[%s1806_s6 + $0x1a8] sm:$0xff] %v680_v28  ;;  %v215_v36 = vmul.f32 %v1672_v50, %v878_v30  ;;  %v485_v37 = vmul.f32 %v1654_v48, %v1006_v31  ;;  %v881_v38 = vunpack.c.l.bf16 %v1047_v26  ;;  %v1009_v39 = vunpack.c.l.bf16 %v1078_v27 }
  0x74   :  { %v681_v40 = vmax.f32 %v617_v32, 0.0  ;;  %v618_v41 = vadd.f32 %v554_v33, %v284_v29  ;;  %v555_v42 = vadd.f32 %v1682_v57, %v484_v35  ;;  %v882_v43 = vunpack.c.h.bf16 %v1047_v26 }
  0x75   :  { %v286_v45 = vadd.f32 %v1666_v1, %v215_v36  ;;  %v556_v46 = vadd.f32 %v1682_v57, %v485_v37  ;;  %v216_v47 = vmul.f32 %v1672_v50, %v881_v38  ;;  %v486_v4 = vmul.f32 %v1654_v48, %v1009_v39 }
  0x76   :  { %745 = vst [vmem:[%s1806_s6 + $0x1b0] sm:$0xff] %v681_v40  ;;  %v682_v49 = vmax.f32 %v618_v41, 0.0  ;;  %v619_v12 = vadd.f32 %v555_v42, %v285_v34  ;;  %v217_v51 = vmul.f32 %v1672_v50, %v882_v43  ;;  %v1010_v52 = vunpack.c.h.bf16 %v1078_v27 }
  0x77   :  { %v620_v53 = vadd.f32 %v556_v46, %v286_v45  ;;  %v287_v54 = vadd.f32 %v1666_v1, %v216_v47  ;;  %v557_v55 = vadd.f32 %v1682_v57, %v486_v4  ;;  %v885_v56 = vunpack.c.l.bf16 %v1048_v44 }
  0x78   :  { %746 = vst [vmem:[%s1806_s6 + $0x1b8] sm:$0xff] %v682_v49  ;;  %v683_v59 = vmax.f32 %v619_v12, 0.0  ;;  %v288_v60 = vadd.f32 %v1666_v1, %v217_v51  ;;  %v487_v61 = vmul.f32 %v1654_v48, %v1010_v52  ;;  %v1013_v62 = vunpack.c.l.bf16 %v1079_v6 }
  0x79   :  { %v684_v0 = vmax.f32 %v620_v53, 0.0  ;;  %v621_v2 = vadd.f32 %v557_v55, %v287_v54  ;;  %v218_v3 = vmul.f32 %v1672_v50, %v885_v56  ;;  %v886_v5 = vunpack.c.h.bf16 %v1048_v44 }
  0x7a   :  { %747 = vst [vmem:[%s1806_s6 + $0x1c0] sm:$0xff] %v683_v59  ;;  %v558_v7 = vadd.f32 %v1682_v57, %v487_v61  ;;  %v488_v8 = vmul.f32 %v1654_v48, %v1013_v62  ;;  %v1014_v9 = vunpack.c.h.bf16 %v1079_v6  ;;  %v889_v10 = vunpack.c.l.bf16 %v1049_v58 }
  0x7b   :  { %748 = vst [vmem:[%s1806_s6 + $0x1c8] sm:$0xff] %v684_v0  ;;  %v685_v11 = vmax.f32 %v621_v2, 0.0  ;;  %v289_v13 = vadd.f32 %v1666_v1, %v218_v3  ;;  %v219_v14 = vmul.f32 %v1672_v50, %v886_v5  ;;  %v1017_v15 = vunpack.c.l.bf16 %v1080_v63 }
  0x7c   :  { %v622_v16 = vadd.f32 %v558_v7, %v288_v60  ;;  %v559_v17 = vadd.f32 %v1682_v57, %v488_v8  ;;  %v489_v18 = vmul.f32 %v1654_v48, %v1014_v9  ;;  %v220_v19 = vmul.f32 %v1672_v50, %v889_v10 }
  0x7d   :  { %749 = vst [vmem:[%s1806_s6 + $0x1d0] sm:$0xff] %v685_v11  ;;  %v290_v20 = vadd.f32 %v1666_v1, %v219_v14  ;;  %v490_v21 = vmul.f32 %v1654_v48, %v1017_v15  ;;  %v890_v22 = vunpack.c.h.bf16 %v1049_v58  ;;  %v1018_v23 = vunpack.c.h.bf16 %v1080_v63 }
  0x7e   :  { %v686_v24 = vmax.f32 %v622_v16, 0.0  ;;  %v623_v25 = vadd.f32 %v559_v17, %v289_v13  ;;  %v560_v26 = vadd.f32 %v1682_v57, %v489_v18  ;;  %v291_v27 = vadd.f32 %v1666_v1, %v220_v19 }
  0x7f   :  { %v561_v28 = vadd.f32 %v1682_v57, %v490_v21  ;;  %v221_v29 = vmul.f32 %v1672_v50, %v890_v22  ;;  %v491_v30 = vmul.f32 %v1654_v48, %v1018_v23 }
  0x80   :  { %750 = vst [vmem:[%s1806_s6 + $0x1d8] sm:$0xff] %v686_v24  ;;  %v687_v31 = vmax.f32 %v623_v25, 0.0  ;;  %v624_v32 = vadd.f32 %v560_v26, %v290_v20 }
  0x81   :  { %v625_v33 = vadd.f32 %v561_v28, %v291_v27  ;;  %v292_v34 = vadd.f32 %v1666_v1, %v221_v29  ;;  %v562_v35 = vadd.f32 %v1682_v57, %v491_v30 }
  0x82   :  { %751 = vst [vmem:[%s1806_s6 + $0x1e0] sm:$0xff] %v687_v31  ;;  %v688_v36 = vmax.f32 %v624_v32, 0.0 }
  0x83   :  { %v689_v37 = vmax.f32 %v625_v33, 0.0  ;;  %v626_v50 = vadd.f32 %v562_v35, %v292_v34 }
  0x84   :  { %752 = vst [vmem:[%s1806_s6 + $0x1e8] sm:$0xff] %v688_v36 }
  0x85   :  { %753 = vst [vmem:[%s1806_s6 + $0x1f0] sm:$0xff] %v689_v37  ;;  %v690_v48 = vmax.f32 %v626_v50, 0.0 }
  0x87   :  { %754 = vst [vmem:[%s1806_s6 + $0x1f8] sm:$0xff] %v690_v48 }

</bundles_post_ra>
